<compile_context>
chip_gen: v6e
topology: v6e:2x2x1
jax: 0.10.0
libtpu: 0.0.40
codegen_flags: <defaults>
</compile_context>

<pallas_src>
import jax
import jax.numpy as jnp
from jax.experimental import pallas as pl
from jax.experimental.pallas import tpu as pltpu

nc = 3
ngf = 64
nz = 100
BN_EPS = 1e-5
VMEM_LIMIT = 48 * 1024 * 1024   # <= 48 MiB: safe headroom on v7x (64 MiB physical)


# ----------------------------- Pallas kernels ------------------------------

def _matmul_stats_kernel(p_ref, w_ref, out_ref, sum_ref, sq_ref):
    """conv-as-matmul tile (bf16 in, f32 acc) + per-step partial channel stats."""
    y = jnp.dot(p_ref[...], w_ref[...], preferred_element_type=jnp.float32)
    out_ref[...] = y
    sum_ref[...] = jnp.sum(y, axis=0, keepdims=True)
    sq_ref[...] = jnp.sum(y * y, axis=0, keepdims=True)


def _matmul_tanh_kernel(p_ref, w_ref, o_ref):
    y = jnp.dot(p_ref[...], w_ref[...], preferred_element_type=jnp.float32)
    o_ref[...] = jnp.tanh(y)


# ------------------------------ call wrappers -------------------------------

def _round_up(x, m):
    return (x + m - 1) // m * m


def _tile_m(m, cap=1024):
    """Largest M tile <= cap that divides m (multiple of 8), else full m."""
    if m <= cap:
        return m
    t = cap
    while t >= 8:
        if m % t == 0:
            return t
        t //= 2
    return m  # fall back to a single tile (always legal)


def matmul_stats(patches, weights):
    """patches: (P, M, K) bf16, weights: (P, K, C) bf16.

    Returns (P, M, C) f32 conv output plus per-channel sum / sum-of-squares
    (shape (C,) each) accumulated over all P*M rows.
    """
    p_, m_, k_ = patches.shape
    c_ = weights.shape[2]
    tm = _tile_m(m_)
    nm = m_ // tm

    out, psum, psq = pl.pallas_call(
        _matmul_stats_kernel,
        out_shape=(jax.ShapeDtypeStruct((p_, m_, c_), jnp.float32),
                   jax.ShapeDtypeStruct((p_, nm, 1, c_), jnp.float32),
                   jax.ShapeDtypeStruct((p_, nm, 1, c_), jnp.float32)),
        grid_spec=pltpu.PrefetchScalarGridSpec(
            num_scalar_prefetch=0, grid=(p_, nm),
            in_specs=[pl.BlockSpec((None, tm, k_), lambda ph, i: (ph, i, 0)),
                      pl.BlockSpec((None, k_, c_), lambda ph, i: (ph, 0, 0))],
            out_specs=(pl.BlockSpec((None, tm, c_), lambda ph, i: (ph, i, 0)),
                       pl.BlockSpec((None, None, 1, c_),
                                    lambda ph, i: (ph, i, 0, 0)),
                       pl.BlockSpec((None, None, 1, c_),
                                    lambda ph, i: (ph, i, 0, 0)))),
        compiler_params=pltpu.CompilerParams(
            dimension_semantics=("parallel", "parallel"),
            vmem_limit_bytes=VMEM_LIMIT),
    )(patches, weights)

    ssum = jnp.sum(psum, axis=(0, 1, 2))   # (C,)
    ssq = jnp.sum(psq, axis=(0, 1, 2))     # (C,)
    return out, ssum, ssq


def matmul_tanh(patches, weights):
    """patches: (P, M, K) bf16, weights: (P, K, C) bf16 -> tanh(P@W) f32."""
    p_, m_, k_ = patches.shape
    c_ = weights.shape[2]
    tm = _tile_m(m_)
    nm = m_ // tm

    return pl.pallas_call(
        _matmul_tanh_kernel,
        out_shape=jax.ShapeDtypeStruct((p_, m_, c_), jnp.float32),
        grid_spec=pltpu.PrefetchScalarGridSpec(
            num_scalar_prefetch=0, grid=(p_, nm),
            in_specs=[pl.BlockSpec((None, tm, k_), lambda ph, i: (ph, i, 0)),
                      pl.BlockSpec((None, k_, c_), lambda ph, i: (ph, 0, 0))],
            out_specs=pl.BlockSpec((None, tm, c_), lambda ph, i: (ph, i, 0))),
        compiler_params=pltpu.CompilerParams(
            dimension_semantics=("parallel", "parallel"),
            vmem_limit_bytes=VMEM_LIMIT),
    )(patches, weights)


# -------------------- sub-pixel (phase) deconv glue (plain JAX) --------------
#
# ConvTranspose2d(k=4, s=2, p=1): output[2m+py, 2n+px] for phase (py, px) is a
# dense 2x2 conv over the input with the kernel taps
#   kh in (3-py, 1-py), kw in (3-px, 1-px)
# and input window rows (m-1+py+dy), cols (n-1+px+dx), dy,dx in {0,1}.

def phase_patches(a):
    """a: (N,H,W,Ci) -> (4, N*H*W, 4*Ci) bf16 patches, phase-major (py, px)."""
    a = a.astype(jnp.bfloat16)
    n, h, w, ci = a.shape
    ap = jnp.pad(a, ((0, 0), (1, 1), (1, 1), (0, 0)))
    phases = []
    for py in (0, 1):
        for px in (0, 1):
            cols = [ap[:, py + dy: py + dy + h, px + dx: px + dx + w, :]
                    for dy in (0, 1) for dx in (0, 1)]
            p = jnp.stack(cols, axis=3)                 # (N,H,W,4,Ci)
            phases.append(p.reshape(n * h * w, 4 * ci))
    return jnp.stack(phases, axis=0)                    # (4, N*H*W, 4*Ci)


def phase_weights(w, co_pad):
    """w: ConvTranspose2d weight (Ci, Co, 4, 4) -> (4, 4*Ci, co_pad) bf16."""
    ci, co, k, _ = w.shape
    mats = []
    for py in (0, 1):
        for px in (0, 1):
            sub = w[:, :, [3 - py, 1 - py], :][:, :, :, [3 - px, 1 - px]]
            mats.append(sub.transpose(2, 3, 0, 1).reshape(4 * ci, co))
    wm = jnp.stack(mats, axis=0)                        # (4, 4*Ci, Co)
    if co_pad > co:
        wm = jnp.pad(wm, ((0, 0), (0, 0), (0, co_pad - co)))
    return wm.astype(jnp.bfloat16)


def interleave_phases(y_all, n, h, w, c):
    """(4, N*H*W, C) phase-major -> (N, 2H, 2W, C)."""
    y = y_all.reshape(2, 2, n, h, w, c)                 # (py, px, n, h, w, c)
    y = y.transpose(2, 3, 0, 4, 1, 5)                   # (n, h, py, w, px, c)
    return y.reshape(n, 2 * h, 2 * w, c)


def bn_relu(y, ssum, ssq, gamma, beta, count):
    """Train-mode BatchNorm (biased batch var) + ReLU, folded into scale/bias."""
    mean = ssum / count
    var = jnp.maximum(ssq / count - mean * mean, 0.0)   # guard tiny negatives
    scale = gamma * jax.lax.rsqrt(var + BN_EPS)
    bias = beta - mean * scale
    return jnp.maximum(y * scale + bias, 0.0)


# ------------------------------ layers --------------------------------------

def layer1_bn_relu(x, w, gamma, beta):
    """ConvTranspose2d(nz, 512, 4, 1, 0) on 1x1 input == pure matmul."""
    n = x.shape[0]
    co = w.shape[1]
    k_pad = _round_up(nz, 128)

    xf = jnp.pad(x.reshape(n, nz), ((0, 0), (0, k_pad - nz)))
    wm = w.transpose(0, 2, 3, 1).reshape(nz, 16 * co)   # (ci, oy*ox*co)
    wm = jnp.pad(wm, ((0, k_pad - nz), (0, 0)))

    out, ssum, ssq = matmul_stats(xf[None].astype(jnp.bfloat16),
                                  wm[None].astype(jnp.bfloat16))
    y = out[0].reshape(n, 4, 4, co)
    ssum = ssum.reshape(16, co).sum(axis=0)
    ssq = ssq.reshape(16, co).sum(axis=0)
    return bn_relu(y, ssum, ssq, gamma, beta, n * 16)


def deconv_s2_bn_relu(a, w, gamma, beta):
    """ConvTranspose2d(k=4, s=2, p=1) via 4-phase decomposition + BN + ReLU."""
    n, h, w_sp, _ = a.shape
    co = w.shape[1]
    co_p = _round_up(co, 128)

    out, ssum, ssq = matmul_stats(phase_patches(a), phase_weights(w, co_p))
    y = interleave_phases(out, n, h, w_sp, co_p)[..., :co]
    count = n * (2 * h) * (2 * w_sp)
    return bn_relu(y, ssum[:co], ssq[:co], gamma, beta, count)


def deconv_s2_tanh(a, w):
    """Final ConvTranspose2d(k=4, s=2, p=1) with fused tanh (co padded to 128)."""
    n, h, w_sp, _ = a.shape
    co = w.shape[1]
    co_p = _round_up(co, 128)

    out = matmul_tanh(phase_patches(a), phase_weights(w, co_p))
    return interleave_phases(out, n, h, w_sp, co_p)[..., :co]


# ------------------------------ Generator -----------------------------------

def init_params(key):
    ks = jax.random.split(key, 5)

    def conv_w(k_, ci, co):
        return jax.random.normal(k_, (ci, co, 4, 4), jnp.float32) * 0.02

    chans = [ngf * 8, ngf * 4, ngf * 2, ngf]
    params = {
        "w1": conv_w(ks[0], nz, ngf * 8),
        "w2": conv_w(ks[1], ngf * 8, ngf * 4),
        "w3": conv_w(ks[2], ngf * 4, ngf * 2),
        "w4": conv_w(ks[3], ngf * 2, ngf),
        "w5": conv_w(ks[4], ngf, nc),
    }
    for i, c in enumerate(chans, start=1):
        params[f"g{i}"] = jnp.ones((c,), jnp.float32)   # BN weight (PyTorch default)
        params[f"b{i}"] = jnp.zeros((c,), jnp.float32)  # BN bias   (PyTorch default)
    return params
    # TODO(synk): BN running-stat updates (a training side effect) are not emulated.


def generator_forward(x_nchw, params):
    # NCHW at the module boundary, NHWC inside.
    x = jnp.transpose(x_nchw, (0, 2, 3, 1)).astype(jnp.float32)            # (N,1,1,nz)
    a = layer1_bn_relu(x, params["w1"], params["g1"], params["b1"])        # -> 4x4x512
    a = deconv_s2_bn_relu(a, params["w2"], params["g2"], params["b2"])     # -> 8x8x256
    a = deconv_s2_bn_relu(a, params["w3"], params["g3"], params["b3"])     # -> 16x16x128
    a = deconv_s2_bn_relu(a, params["w4"], params["g4"], params["b4"])     # -> 32x32x64
    y = deconv_s2_tanh(a, params["w5"])                                    # -> 64x64x3
    return jnp.transpose(y, (0, 3, 1, 2))


if __name__ == "__main__":
    key = jax.random.PRNGKey(0)
    k_x, k_p = jax.random.split(key)
    params = init_params(k_p)
    x = jax.random.normal(k_x, (2, nz, 1, 1), jnp.float32)   # DCGAN latent input

    out = jax.jit(generator_forward)(x, params)
    out = jax.block_until_ready(out)

    assert out.shape == (2, nc, 64, 64), out.shape
    assert bool(jnp.all(jnp.isfinite(out)))
    assert bool(jnp.all(jnp.abs(out) <= 1.0 + 1e-6))          # tanh range
    print("KERNEL_OK")
</pallas_src>

<mosaic_0001>
module attributes {stable_mosaic.version = 11 : i64} {
  func.func @_matmul_stats_kernel(%arg0: i32, %arg1: i32, %arg2: memref<1x2x128xbf16, #tpu.memory_space<vmem>>, %arg3: memref<1x128x8192xbf16, #tpu.memory_space<vmem>>, %arg4: memref<1x2x8192xf32, #tpu.memory_space<vmem>>, %arg5: memref<1x1x1x8192xf32, #tpu.memory_space<vmem>>, %arg6: memref<1x1x1x8192xf32, #tpu.memory_space<vmem>>) attributes {dimension_semantics = [#tpu.dimension_semantics<parallel>, #tpu.dimension_semantics<parallel>], iteration_bounds = array<i64: 1, 1>, scalar_prefetch = 0 : i64, scratch_operands = 0 : i64, tpu.core_type = #tpu.core_type<tc>, window_params = [{transform_indices = @transform_0, window_bounds = array<i64: 1, 2, 128>}, {transform_indices = @transform_1, window_bounds = array<i64: 1, 128, 8192>}, {transform_indices = @transform_2, window_bounds = array<i64: 1, 2, 8192>}, {transform_indices = @transform_3, window_bounds = array<i64: 1, 1, 1, 8192>}, {transform_indices = @transform_4, window_bounds = array<i64: 1, 1, 1, 8192>}]} {
    %c0 = arith.constant 0 : index
    %c0_0 = arith.constant 0 : index
    %c0_1 = arith.constant 0 : index
    %0 = vector.load %arg2[%c0, %c0_0, %c0_1] : memref<1x2x128xbf16, #tpu.memory_space<vmem>>, vector<1x2x128xbf16>
    %1 = vector.shape_cast %0 : vector<1x2x128xbf16> to vector<2x128xbf16>
    %c0_2 = arith.constant 0 : index
    %c0_3 = arith.constant 0 : index
    %c0_4 = arith.constant 0 : index
    %2 = vector.load %arg3[%c0_2, %c0_3, %c0_4] : memref<1x128x8192xbf16, #tpu.memory_space<vmem>>, vector<1x128x8192xbf16>
    %3 = vector.shape_cast %2 : vector<1x128x8192xbf16> to vector<128x8192xbf16>
    %cst = arith.constant dense<0.000000e+00> : vector<2x8192xf32>
    %4 = tpu.matmul %1, %3, %cst {dimension_numbers = #tpu.dot_dimension_numbers<[1], [0], [0], [1], [0, 0, 1, 1], [], []>} : vector<2x128xbf16>, vector<128x8192xbf16>, vector<2x8192xf32> -> vector<2x8192xf32>
    %c0_5 = arith.constant 0 : index
    %c0_6 = arith.constant 0 : index
    %c0_7 = arith.constant 0 : index
    %5 = vector.load %arg4[%c0_5, %c0_6, %c0_7] : memref<1x2x8192xf32, #tpu.memory_space<vmem>>, vector<1x2x8192xf32>
    %6 = vector.shape_cast %5 : vector<1x2x8192xf32> to vector<2x8192xf32>
    %7 = vector.shape_cast %4 : vector<2x8192xf32> to vector<1x2x8192xf32>
    tpu.vector_store %arg4[%c0_5, %c0_6, %c0_7], %7 {strides = array<i32>} : memref<1x2x8192xf32, #tpu.memory_space<vmem>>, vector<1x2x8192xf32>,
    %cst_8 = arith.constant dense<0.000000e+00> : vector<8192xf32>
    %8 = vector.multi_reduction <add>, %4, %cst_8 [0] : vector<2x8192xf32> to vector<8192xf32>
    %9 = vector.shape_cast %8 : vector<8192xf32> to vector<1x8192xf32>
    %c0_9 = arith.constant 0 : index
    %c0_10 = arith.constant 0 : index
    %c0_11 = arith.constant 0 : index
    %c0_12 = arith.constant 0 : index
    %10 = vector.load %arg5[%c0_9, %c0_10, %c0_11, %c0_12] : memref<1x1x1x8192xf32, #tpu.memory_space<vmem>>, vector<1x1x1x8192xf32>
    %11 = vector.shape_cast %10 : vector<1x1x1x8192xf32> to vector<1x8192xf32>
    %12 = vector.shape_cast %9 : vector<1x8192xf32> to vector<1x1x1x8192xf32>
    tpu.vector_store %arg5[%c0_9, %c0_10, %c0_11, %c0_12], %12 {strides = array<i32>} : memref<1x1x1x8192xf32, #tpu.memory_space<vmem>>, vector<1x1x1x8192xf32>,
    %13 = arith.mulf %4, %4 : vector<2x8192xf32>
    %cst_13 = arith.constant dense<0.000000e+00> : vector<8192xf32>
    %14 = vector.multi_reduction <add>, %13, %cst_13 [0] : vector<2x8192xf32> to vector<8192xf32>
    %15 = vector.shape_cast %14 : vector<8192xf32> to vector<1x8192xf32>
    %c0_14 = arith.constant 0 : index
    %c0_15 = arith.constant 0 : index
    %c0_16 = arith.constant 0 : index
    %c0_17 = arith.constant 0 : index
    %16 = vector.load %arg6[%c0_14, %c0_15, %c0_16, %c0_17] : memref<1x1x1x8192xf32, #tpu.memory_space<vmem>>, vector<1x1x1x8192xf32>
    %17 = vector.shape_cast %16 : vector<1x1x1x8192xf32> to vector<1x8192xf32>
    %18 = vector.shape_cast %15 : vector<1x8192xf32> to vector<1x1x1x8192xf32>
    tpu.vector_store %arg6[%c0_14, %c0_15, %c0_16, %c0_17], %18 {strides = array<i32>} : memref<1x1x1x8192xf32, #tpu.memory_space<vmem>>, vector<1x1x1x8192xf32>,
    return
  }
  func.func @transform_0(%arg0: i32, %arg1: i32) -> (i32, i32, i32) {
    %c0_i32 = arith.constant 0 : i32
    %c0_i32_0 = arith.constant 0 : i32
    return %arg0, %arg1, %c0_i32 : i32, i32, i32
  }
  func.func @transform_1(%arg0: i32, %arg1: i32) -> (i32, i32, i32) {
    %c0_i32 = arith.constant 0 : i32
    %c0_i32_0 = arith.constant 0 : i32
    %c0_i32_1 = arith.constant 0 : i32
    return %arg0, %c0_i32, %c0_i32_0 : i32, i32, i32
  }
  func.func @transform_2(%arg0: i32, %arg1: i32) -> (i32, i32, i32) {
    %c0_i32 = arith.constant 0 : i32
    %c0_i32_0 = arith.constant 0 : i32
    return %arg0, %arg1, %c0_i32 : i32, i32, i32
  }
  func.func @transform_3(%arg0: i32, %arg1: i32) -> (i32, i32, i32, i32) {
    %c0_i32 = arith.constant 0 : i32
    %c0_i32_0 = arith.constant 0 : i32
    %c0_i32_1 = arith.constant 0 : i32
    return %arg0, %arg1, %c0_i32, %c0_i32_0 : i32, i32, i32, i32
  }
  func.func @transform_4(%arg0: i32, %arg1: i32) -> (i32, i32, i32, i32) {
    %c0_i32 = arith.constant 0 : i32
    %c0_i32_0 = arith.constant 0 : i32
    %c0_i32_1 = arith.constant 0 : i32
    return %arg0, %arg1, %c0_i32, %c0_i32_0 : i32, i32, i32, i32
  }
}

module attributes {stable_mosaic.version = 11 : i64} {
  func.func @_matmul_stats_kernel(%arg0: i32, %arg1: i32, %arg2: memref<1x32x2048xbf16, #tpu.memory_space<vmem>>, %arg3: memref<1x2048x256xbf16, #tpu.memory_space<vmem>>, %arg4: memref<1x32x256xf32, #tpu.memory_space<vmem>>, %arg5: memref<1x1x1x256xf32, #tpu.memory_space<vmem>>, %arg6: memref<1x1x1x256xf32, #tpu.memory_space<vmem>>) attributes {dimension_semantics = [#tpu.dimension_semantics<parallel>, #tpu.dimension_semantics<parallel>], iteration_bounds = array<i64: 4, 1>, scalar_prefetch = 0 : i64, scratch_operands = 0 : i64, tpu.core_type = #tpu.core_type<tc>, window_params = [{transform_indices = @transform_0, window_bounds = array<i64: 1, 32, 2048>}, {transform_indices = @transform_1, window_bounds = array<i64: 1, 2048, 256>}, {transform_indices = @transform_2, window_bounds = array<i64: 1, 32, 256>}, {transform_indices = @transform_3, window_bounds = array<i64: 1, 1, 1, 256>}, {transform_indices = @transform_4, window_bounds = array<i64: 1, 1, 1, 256>}]} {
    %c0 = arith.constant 0 : index
    %c0_0 = arith.constant 0 : index
    %c0_1 = arith.constant 0 : index
    %0 = vector.load %arg2[%c0, %c0_0, %c0_1] : memref<1x32x2048xbf16, #tpu.memory_space<vmem>>, vector<1x32x2048xbf16>
    %1 = vector.shape_cast %0 : vector<1x32x2048xbf16> to vector<32x2048xbf16>
    %c0_2 = arith.constant 0 : index
    %c0_3 = arith.constant 0 : index
    %c0_4 = arith.constant 0 : index
    %2 = vector.load %arg3[%c0_2, %c0_3, %c0_4] : memref<1x2048x256xbf16, #tpu.memory_space<vmem>>, vector<1x2048x256xbf16>
    %3 = vector.shape_cast %2 : vector<1x2048x256xbf16> to vector<2048x256xbf16>
    %cst = arith.constant dense<0.000000e+00> : vector<32x256xf32>
    %4 = tpu.matmul %1, %3, %cst {dimension_numbers = #tpu.dot_dimension_numbers<[1], [0], [0], [1], [0, 0, 1, 1], [], []>} : vector<32x2048xbf16>, vector<2048x256xbf16>, vector<32x256xf32> -> vector<32x256xf32>
    %c0_5 = arith.constant 0 : index
    %c0_6 = arith.constant 0 : index
    %c0_7 = arith.constant 0 : index
    %5 = vector.load %arg4[%c0_5, %c0_6, %c0_7] : memref<1x32x256xf32, #tpu.memory_space<vmem>>, vector<1x32x256xf32>
    %6 = vector.shape_cast %5 : vector<1x32x256xf32> to vector<32x256xf32>
    %7 = vector.shape_cast %4 : vector<32x256xf32> to vector<1x32x256xf32>
    tpu.vector_store %arg4[%c0_5, %c0_6, %c0_7], %7 {strides = array<i32>} : memref<1x32x256xf32, #tpu.memory_space<vmem>>, vector<1x32x256xf32>,
    %cst_8 = arith.constant dense<0.000000e+00> : vector<256xf32>
    %8 = vector.multi_reduction <add>, %4, %cst_8 [0] : vector<32x256xf32> to vector<256xf32>
    %9 = vector.shape_cast %8 : vector<256xf32> to vector<1x256xf32>
    %c0_9 = arith.constant 0 : index
    %c0_10 = arith.constant 0 : index
    %c0_11 = arith.constant 0 : index
    %c0_12 = arith.constant 0 : index
    %10 = vector.load %arg5[%c0_9, %c0_10, %c0_11, %c0_12] : memref<1x1x1x256xf32, #tpu.memory_space<vmem>>, vector<1x1x1x256xf32>
    %11 = vector.shape_cast %10 : vector<1x1x1x256xf32> to vector<1x256xf32>
    %12 = vector.shape_cast %9 : vector<1x256xf32> to vector<1x1x1x256xf32>
    tpu.vector_store %arg5[%c0_9, %c0_10, %c0_11, %c0_12], %12 {strides = array<i32>} : memref<1x1x1x256xf32, #tpu.memory_space<vmem>>, vector<1x1x1x256xf32>,
    %13 = arith.mulf %4, %4 : vector<32x256xf32>
    %cst_13 = arith.constant dense<0.000000e+00> : vector<256xf32>
    %14 = vector.multi_reduction <add>, %13, %cst_13 [0] : vector<32x256xf32> to vector<256xf32>
    %15 = vector.shape_cast %14 : vector<256xf32> to vector<1x256xf32>
    %c0_14 = arith.constant 0 : index
    %c0_15 = arith.constant 0 : index
    %c0_16 = arith.constant 0 : index
    %c0_17 = arith.constant 0 : index
    %16 = vector.load %arg6[%c0_14, %c0_15, %c0_16, %c0_17] : memref<1x1x1x256xf32, #tpu.memory_space<vmem>>, vector<1x1x1x256xf32>
    %17 = vector.shape_cast %16 : vector<1x1x1x256xf32> to vector<1x256xf32>
    %18 = vector.shape_cast %15 : vector<1x256xf32> to vector<1x1x1x256xf32>
    tpu.vector_store %arg6[%c0_14, %c0_15, %c0_16, %c0_17], %18 {strides = array<i32>} : memref<1x1x1x256xf32, #tpu.memory_space<vmem>>, vector<1x1x1x256xf32>,
    return
  }
  func.func @transform_0(%arg0: i32, %arg1: i32) -> (i32, i32, i32) {
    %c0_i32 = arith.constant 0 : i32
    %c0_i32_0 = arith.constant 0 : i32
    return %arg0, %arg1, %c0_i32 : i32, i32, i32
  }
  func.func @transform_1(%arg0: i32, %arg1: i32) -> (i32, i32, i32) {
    %c0_i32 = arith.constant 0 : i32
    %c0_i32_0 = arith.constant 0 : i32
    %c0_i32_1 = arith.constant 0 : i32
    return %arg0, %c0_i32, %c0_i32_0 : i32, i32, i32
  }
  func.func @transform_2(%arg0: i32, %arg1: i32) -> (i32, i32, i32) {
    %c0_i32 = arith.constant 0 : i32
    %c0_i32_0 = arith.constant 0 : i32
    return %arg0, %arg1, %c0_i32 : i32, i32, i32
  }
  func.func @transform_3(%arg0: i32, %arg1: i32) -> (i32, i32, i32, i32) {
    %c0_i32 = arith.constant 0 : i32
    %c0_i32_0 = arith.constant 0 : i32
    %c0_i32_1 = arith.constant 0 : i32
    return %arg0, %arg1, %c0_i32, %c0_i32_0 : i32, i32, i32, i32
  }
  func.func @transform_4(%arg0: i32, %arg1: i32) -> (i32, i32, i32, i32) {
    %c0_i32 = arith.constant 0 : i32
    %c0_i32_0 = arith.constant 0 : i32
    %c0_i32_1 = arith.constant 0 : i32
    return %arg0, %arg1, %c0_i32, %c0_i32_0 : i32, i32, i32, i32
  }
}

module attributes {stable_mosaic.version = 11 : i64} {
  func.func @_matmul_stats_kernel(%arg0: i32, %arg1: i32, %arg2: memref<1x128x1024xbf16, #tpu.memory_space<vmem>>, %arg3: memref<1x1024x128xbf16, #tpu.memory_space<vmem>>, %arg4: memref<1x128x128xf32, #tpu.memory_space<vmem>>, %arg5: memref<1x1x1x128xf32, #tpu.memory_space<vmem>>, %arg6: memref<1x1x1x128xf32, #tpu.memory_space<vmem>>) attributes {dimension_semantics = [#tpu.dimension_semantics<parallel>, #tpu.dimension_semantics<parallel>], iteration_bounds = array<i64: 4, 1>, scalar_prefetch = 0 : i64, scratch_operands = 0 : i64, tpu.core_type = #tpu.core_type<tc>, window_params = [{transform_indices = @transform_0, window_bounds = array<i64: 1, 128, 1024>}, {transform_indices = @transform_1, window_bounds = array<i64: 1, 1024, 128>}, {transform_indices = @transform_2, window_bounds = array<i64: 1, 128, 128>}, {transform_indices = @transform_3, window_bounds = array<i64: 1, 1, 1, 128>}, {transform_indices = @transform_4, window_bounds = array<i64: 1, 1, 1, 128>}]} {
    %c0 = arith.constant 0 : index
    %c0_0 = arith.constant 0 : index
    %c0_1 = arith.constant 0 : index
    %0 = vector.load %arg2[%c0, %c0_0, %c0_1] : memref<1x128x1024xbf16, #tpu.memory_space<vmem>>, vector<1x128x1024xbf16>
    %1 = vector.shape_cast %0 : vector<1x128x1024xbf16> to vector<128x1024xbf16>
    %c0_2 = arith.constant 0 : index
    %c0_3 = arith.constant 0 : index
    %c0_4 = arith.constant 0 : index
    %2 = vector.load %arg3[%c0_2, %c0_3, %c0_4] : memref<1x1024x128xbf16, #tpu.memory_space<vmem>>, vector<1x1024x128xbf16>
    %3 = vector.shape_cast %2 : vector<1x1024x128xbf16> to vector<1024x128xbf16>
    %cst = arith.constant dense<0.000000e+00> : vector<128x128xf32>
    %4 = tpu.matmul %1, %3, %cst {dimension_numbers = #tpu.dot_dimension_numbers<[1], [0], [0], [1], [0, 0, 1, 1], [], []>} : vector<128x1024xbf16>, vector<1024x128xbf16>, vector<128x128xf32> -> vector<128x128xf32>
    %c0_5 = arith.constant 0 : index
    %c0_6 = arith.constant 0 : index
    %c0_7 = arith.constant 0 : index
    %5 = vector.load %arg4[%c0_5, %c0_6, %c0_7] : memref<1x128x128xf32, #tpu.memory_space<vmem>>, vector<1x128x128xf32>
    %6 = vector.shape_cast %5 : vector<1x128x128xf32> to vector<128x128xf32>
    %7 = vector.shape_cast %4 : vector<128x128xf32> to vector<1x128x128xf32>
    tpu.vector_store %arg4[%c0_5, %c0_6, %c0_7], %7 {strides = array<i32>} : memref<1x128x128xf32, #tpu.memory_space<vmem>>, vector<1x128x128xf32>,
    %cst_8 = arith.constant dense<0.000000e+00> : vector<128xf32>
    %8 = vector.multi_reduction <add>, %4, %cst_8 [0] : vector<128x128xf32> to vector<128xf32>
    %9 = vector.shape_cast %8 : vector<128xf32> to vector<1x128xf32>
    %c0_9 = arith.constant 0 : index
    %c0_10 = arith.constant 0 : index
    %c0_11 = arith.constant 0 : index
    %c0_12 = arith.constant 0 : index
    %10 = vector.load %arg5[%c0_9, %c0_10, %c0_11, %c0_12] : memref<1x1x1x128xf32, #tpu.memory_space<vmem>>, vector<1x1x1x128xf32>
    %11 = vector.shape_cast %10 : vector<1x1x1x128xf32> to vector<1x128xf32>
    %12 = vector.shape_cast %9 : vector<1x128xf32> to vector<1x1x1x128xf32>
    tpu.vector_store %arg5[%c0_9, %c0_10, %c0_11, %c0_12], %12 {strides = array<i32>} : memref<1x1x1x128xf32, #tpu.memory_space<vmem>>, vector<1x1x1x128xf32>,
    %13 = arith.mulf %4, %4 : vector<128x128xf32>
    %cst_13 = arith.constant dense<0.000000e+00> : vector<128xf32>
    %14 = vector.multi_reduction <add>, %13, %cst_13 [0] : vector<128x128xf32> to vector<128xf32>
    %15 = vector.shape_cast %14 : vector<128xf32> to vector<1x128xf32>
    %c0_14 = arith.constant 0 : index
    %c0_15 = arith.constant 0 : index
    %c0_16 = arith.constant 0 : index
    %c0_17 = arith.constant 0 : index
    %16 = vector.load %arg6[%c0_14, %c0_15, %c0_16, %c0_17] : memref<1x1x1x128xf32, #tpu.memory_space<vmem>>, vector<1x1x1x128xf32>
    %17 = vector.shape_cast %16 : vector<1x1x1x128xf32> to vector<1x128xf32>
    %18 = vector.shape_cast %15 : vector<1x128xf32> to vector<1x1x1x128xf32>
    tpu.vector_store %arg6[%c0_14, %c0_15, %c0_16, %c0_17], %18 {strides = array<i32>} : memref<1x1x1x128xf32, #tpu.memory_space<vmem>>, vector<1x1x1x128xf32>,
    return
  }
  func.func @transform_0(%arg0: i32, %arg1: i32) -> (i32, i32, i32) {
    %c0_i32 = arith.constant 0 : i32
    %c0_i32_0 = arith.constant 0 : i32
    return %arg0, %arg1, %c0_i32 : i32, i32, i32
  }
  func.func @transform_1(%arg0: i32, %arg1: i32) -> (i32, i32, i32) {
    %c0_i32 = arith.constant 0 : i32
    %c0_i32_0 = arith.constant 0 : i32
    %c0_i32_1 = arith.constant 0 : i32
    return %arg0, %c0_i32, %c0_i32_0 : i32, i32, i32
  }
  func.func @transform_2(%arg0: i32, %arg1: i32) -> (i32, i32, i32) {
    %c0_i32 = arith.constant 0 : i32
    %c0_i32_0 = arith.constant 0 : i32
    return %arg0, %arg1, %c0_i32 : i32, i32, i32
  }
  func.func @transform_3(%arg0: i32, %arg1: i32) -> (i32, i32, i32, i32) {
    %c0_i32 = arith.constant 0 : i32
    %c0_i32_0 = arith.constant 0 : i32
    %c0_i32_1 = arith.constant 0 : i32
    return %arg0, %arg1, %c0_i32, %c0_i32_0 : i32, i32, i32, i32
  }
  func.func @transform_4(%arg0: i32, %arg1: i32) -> (i32, i32, i32, i32) {
    %c0_i32 = arith.constant 0 : i32
    %c0_i32_0 = arith.constant 0 : i32
    %c0_i32_1 = arith.constant 0 : i32
    return %arg0, %arg1, %c0_i32, %c0_i32_0 : i32, i32, i32, i32
  }
}

module attributes {stable_mosaic.version = 11 : i64} {
  func.func @_matmul_stats_kernel(%arg0: i32, %arg1: i32, %arg2: memref<1x512x512xbf16, #tpu.memory_space<vmem>>, %arg3: memref<1x512x128xbf16, #tpu.memory_space<vmem>>, %arg4: memref<1x512x128xf32, #tpu.memory_space<vmem>>, %arg5: memref<1x1x1x128xf32, #tpu.memory_space<vmem>>, %arg6: memref<1x1x1x128xf32, #tpu.memory_space<vmem>>) attributes {dimension_semantics = [#tpu.dimension_semantics<parallel>, #tpu.dimension_semantics<parallel>], iteration_bounds = array<i64: 4, 1>, scalar_prefetch = 0 : i64, scratch_operands = 0 : i64, tpu.core_type = #tpu.core_type<tc>, window_params = [{transform_indices = @transform_0, window_bounds = array<i64: 1, 512, 512>}, {transform_indices = @transform_1, window_bounds = array<i64: 1, 512, 128>}, {transform_indices = @transform_2, window_bounds = array<i64: 1, 512, 128>}, {transform_indices = @transform_3, window_bounds = array<i64: 1, 1, 1, 128>}, {transform_indices = @transform_4, window_bounds = array<i64: 1, 1, 1, 128>}]} {
    %c0 = arith.constant 0 : index
    %c0_0 = arith.constant 0 : index
    %c0_1 = arith.constant 0 : index
    %0 = vector.load %arg2[%c0, %c0_0, %c0_1] : memref<1x512x512xbf16, #tpu.memory_space<vmem>>, vector<1x512x512xbf16>
    %1 = vector.shape_cast %0 : vector<1x512x512xbf16> to vector<512x512xbf16>
    %c0_2 = arith.constant 0 : index
    %c0_3 = arith.constant 0 : index
    %c0_4 = arith.constant 0 : index
    %2 = vector.load %arg3[%c0_2, %c0_3, %c0_4] : memref<1x512x128xbf16, #tpu.memory_space<vmem>>, vector<1x512x128xbf16>
    %3 = vector.shape_cast %2 : vector<1x512x128xbf16> to vector<512x128xbf16>
    %cst = arith.constant dense<0.000000e+00> : vector<512x128xf32>
    %4 = tpu.matmul %1, %3, %cst {dimension_numbers = #tpu.dot_dimension_numbers<[1], [0], [0], [1], [0, 0, 1, 1], [], []>} : vector<512x512xbf16>, vector<512x128xbf16>, vector<512x128xf32> -> vector<512x128xf32>
    %c0_5 = arith.constant 0 : index
    %c0_6 = arith.constant 0 : index
    %c0_7 = arith.constant 0 : index
    %5 = vector.load %arg4[%c0_5, %c0_6, %c0_7] : memref<1x512x128xf32, #tpu.memory_space<vmem>>, vector<1x512x128xf32>
    %6 = vector.shape_cast %5 : vector<1x512x128xf32> to vector<512x128xf32>
    %7 = vector.shape_cast %4 : vector<512x128xf32> to vector<1x512x128xf32>
    tpu.vector_store %arg4[%c0_5, %c0_6, %c0_7], %7 {strides = array<i32>} : memref<1x512x128xf32, #tpu.memory_space<vmem>>, vector<1x512x128xf32>,
    %cst_8 = arith.constant dense<0.000000e+00> : vector<128xf32>
    %8 = vector.multi_reduction <add>, %4, %cst_8 [0] : vector<512x128xf32> to vector<128xf32>
    %9 = vector.shape_cast %8 : vector<128xf32> to vector<1x128xf32>
    %c0_9 = arith.constant 0 : index
    %c0_10 = arith.constant 0 : index
    %c0_11 = arith.constant 0 : index
    %c0_12 = arith.constant 0 : index
    %10 = vector.load %arg5[%c0_9, %c0_10, %c0_11, %c0_12] : memref<1x1x1x128xf32, #tpu.memory_space<vmem>>, vector<1x1x1x128xf32>
    %11 = vector.shape_cast %10 : vector<1x1x1x128xf32> to vector<1x128xf32>
    %12 = vector.shape_cast %9 : vector<1x128xf32> to vector<1x1x1x128xf32>
    tpu.vector_store %arg5[%c0_9, %c0_10, %c0_11, %c0_12], %12 {strides = array<i32>} : memref<1x1x1x128xf32, #tpu.memory_space<vmem>>, vector<1x1x1x128xf32>,
    %13 = arith.mulf %4, %4 : vector<512x128xf32>
    %cst_13 = arith.constant dense<0.000000e+00> : vector<128xf32>
    %14 = vector.multi_reduction <add>, %13, %cst_13 [0] : vector<512x128xf32> to vector<128xf32>
    %15 = vector.shape_cast %14 : vector<128xf32> to vector<1x128xf32>
    %c0_14 = arith.constant 0 : index
    %c0_15 = arith.constant 0 : index
    %c0_16 = arith.constant 0 : index
    %c0_17 = arith.constant 0 : index
    %16 = vector.load %arg6[%c0_14, %c0_15, %c0_16, %c0_17] : memref<1x1x1x128xf32, #tpu.memory_space<vmem>>, vector<1x1x1x128xf32>
    %17 = vector.shape_cast %16 : vector<1x1x1x128xf32> to vector<1x128xf32>
    %18 = vector.shape_cast %15 : vector<1x128xf32> to vector<1x1x1x128xf32>
    tpu.vector_store %arg6[%c0_14, %c0_15, %c0_16, %c0_17], %18 {strides = array<i32>} : memref<1x1x1x128xf32, #tpu.memory_space<vmem>>, vector<1x1x1x128xf32>,
    return
  }
  func.func @transform_0(%arg0: i32, %arg1: i32) -> (i32, i32, i32) {
    %c0_i32 = arith.constant 0 : i32
    %c0_i32_0 = arith.constant 0 : i32
    return %arg0, %arg1, %c0_i32 : i32, i32, i32
  }
  func.func @transform_1(%arg0: i32, %arg1: i32) -> (i32, i32, i32) {
    %c0_i32 = arith.constant 0 : i32
    %c0_i32_0 = arith.constant 0 : i32
    %c0_i32_1 = arith.constant 0 : i32
    return %arg0, %c0_i32, %c0_i32_0 : i32, i32, i32
  }
  func.func @transform_2(%arg0: i32, %arg1: i32) -> (i32, i32, i32) {
    %c0_i32 = arith.constant 0 : i32
    %c0_i32_0 = arith.constant 0 : i32
    return %arg0, %arg1, %c0_i32 : i32, i32, i32
  }
  func.func @transform_3(%arg0: i32, %arg1: i32) -> (i32, i32, i32, i32) {
    %c0_i32 = arith.constant 0 : i32
    %c0_i32_0 = arith.constant 0 : i32
    %c0_i32_1 = arith.constant 0 : i32
    return %arg0, %arg1, %c0_i32, %c0_i32_0 : i32, i32, i32, i32
  }
  func.func @transform_4(%arg0: i32, %arg1: i32) -> (i32, i32, i32, i32) {
    %c0_i32 = arith.constant 0 : i32
    %c0_i32_0 = arith.constant 0 : i32
    %c0_i32_1 = arith.constant 0 : i32
    return %arg0, %arg1, %c0_i32, %c0_i32_0 : i32, i32, i32, i32
  }
}

module attributes {stable_mosaic.version = 11 : i64} {
  func.func @_matmul_tanh_kernel(%arg0: i32, %arg1: i32, %arg2: memref<1x1024x256xbf16, #tpu.memory_space<vmem>>, %arg3: memref<1x256x128xbf16, #tpu.memory_space<vmem>>, %arg4: memref<1x1024x128xf32, #tpu.memory_space<vmem>>) attributes {dimension_semantics = [#tpu.dimension_semantics<parallel>, #tpu.dimension_semantics<parallel>], iteration_bounds = array<i64: 4, 2>, scalar_prefetch = 0 : i64, scratch_operands = 0 : i64, tpu.core_type = #tpu.core_type<tc>, window_params = [{transform_indices = @transform_0, window_bounds = array<i64: 1, 1024, 256>}, {transform_indices = @transform_1, window_bounds = array<i64: 1, 256, 128>}, {transform_indices = @transform_2, window_bounds = array<i64: 1, 1024, 128>}]} {
    %c0 = arith.constant 0 : index
    %c0_0 = arith.constant 0 : index
    %c0_1 = arith.constant 0 : index
    %0 = vector.load %arg2[%c0, %c0_0, %c0_1] : memref<1x1024x256xbf16, #tpu.memory_space<vmem>>, vector<1x1024x256xbf16>
    %1 = vector.shape_cast %0 : vector<1x1024x256xbf16> to vector<1024x256xbf16>
    %c0_2 = arith.constant 0 : index
    %c0_3 = arith.constant 0 : index
    %c0_4 = arith.constant 0 : index
    %2 = vector.load %arg3[%c0_2, %c0_3, %c0_4] : memref<1x256x128xbf16, #tpu.memory_space<vmem>>, vector<1x256x128xbf16>
    %3 = vector.shape_cast %2 : vector<1x256x128xbf16> to vector<256x128xbf16>
    %cst = arith.constant dense<0.000000e+00> : vector<1024x128xf32>
    %4 = tpu.matmul %1, %3, %cst {dimension_numbers = #tpu.dot_dimension_numbers<[1], [0], [0], [1], [0, 0, 1, 1], [], []>} : vector<1024x256xbf16>, vector<256x128xbf16>, vector<1024x128xf32> -> vector<1024x128xf32>
    %5 = math.tanh %4 : vector<1024x128xf32>
    %c0_5 = arith.constant 0 : index
    %c0_6 = arith.constant 0 : index
    %c0_7 = arith.constant 0 : index
    %6 = vector.load %arg4[%c0_5, %c0_6, %c0_7] : memref<1x1024x128xf32, #tpu.memory_space<vmem>>, vector<1x1024x128xf32>
    %7 = vector.shape_cast %6 : vector<1x1024x128xf32> to vector<1024x128xf32>
    %8 = vector.shape_cast %5 : vector<1024x128xf32> to vector<1x1024x128xf32>
    tpu.vector_store %arg4[%c0_5, %c0_6, %c0_7], %8 {strides = array<i32>} : memref<1x1024x128xf32, #tpu.memory_space<vmem>>, vector<1x1024x128xf32>,
    return
  }
  func.func @transform_0(%arg0: i32, %arg1: i32) -> (i32, i32, i32) {
    %c0_i32 = arith.constant 0 : i32
    %c0_i32_0 = arith.constant 0 : i32
    return %arg0, %arg1, %c0_i32 : i32, i32, i32
  }
  func.func @transform_1(%arg0: i32, %arg1: i32) -> (i32, i32, i32) {
    %c0_i32 = arith.constant 0 : i32
    %c0_i32_0 = arith.constant 0 : i32
    %c0_i32_1 = arith.constant 0 : i32
    return %arg0, %c0_i32, %c0_i32_0 : i32, i32, i32
  }
  func.func @transform_2(%arg0: i32, %arg1: i32) -> (i32, i32, i32) {
    %c0_i32 = arith.constant 0 : i32
    %c0_i32_0 = arith.constant 0 : i32
    return %arg0, %arg1, %c0_i32 : i32, i32, i32
  }
}

</mosaic_0001>

<bundles_post_ra>
// kernel: squeeze.1
= control target key start
LH: loop header
LB: loop body
LE: loop exit
PB: predicated region body
PF: predicated region fallthrough
CT: control target
= control target key end

     0   :  { %s1411_s0 = inlined_call_operand.vmem [shape: f32[1,2,8192], index: 0, kind: input, shape index: {}]   ;;  %s1412_s1 = inlined_call_operand.vmem [shape: f32[2,4,4,512], index: 1, kind: output, shape index: {}]  }
   0x1   :  { %v1019_v0 = vld [vmem:[%s1411_s0 + $0x7e] sm:$0x3]  ;;  %v1020_v1 = vld [vmem:[%s1411_s0 + $0x7c] sm:$0x3]  ;;  %v1021_v2 = vld [vmem:[%s1411_s0 + $0x7a] sm:$0x3] }
   0x2   :  { %9 = vst [vmem:[#allocation1 + $0x148] sm:$0x3] %v1019_v0  ;;  %14 = vst [vmem:[#allocation1 + $0x48] sm:$0x3] %v1020_v1  ;;  %v1022_v3 = vld [vmem:[%s1411_s0 + $0x78] sm:$0x3] }
   0x3   :  { %19 = vst [vmem:[#allocation1 + $0x120] sm:$0x3] %v1021_v2  ;;  %v1023_v4 = vld [vmem:[%s1411_s0 + $0x76] sm:$0x3]  ;;  %v1024_v5 = vld [vmem:[%s1411_s0 + $0x74] sm:$0x3] }
   0x4   :  { %24 = vst [vmem:[#allocation1 + $0x1e0] sm:$0x3] %v1022_v3  ;;  %29 = vst [vmem:[#allocation1 + $0x1a8] sm:$0x3] %v1023_v4  ;;  %v1025_v6 = vld [vmem:[%s1411_s0 + $0x72] sm:$0x3] }
   0x5   :  { %34 = vst [vmem:[#allocation1 + $0x90] sm:$0x3] %v1024_v5  ;;  %v1026_v7 = vld [vmem:[%s1411_s0 + $0x70] sm:$0x3]  ;;  %v1027_v8 = vld [vmem:[%s1411_s0 + $0x6e] sm:$0x3] }
   0x6   :  { %39 = vst [vmem:[#allocation1 + $0xc8] sm:$0x3] %v1025_v6  ;;  %44 = vst [vmem:[#allocation1 + $0x1b0] sm:$0x3] %v1026_v7  ;;  %v1028_v9 = vld [vmem:[%s1411_s0 + $0x6c] sm:$0x3] }
   0x7   :  { %49 = vst [vmem:[#allocation1 + $0x78] sm:$0x3] %v1027_v8  ;;  %v1029_v10 = vld [vmem:[%s1411_s0 + $0x6a] sm:$0x3]  ;;  %v1030_v11 = vld [vmem:[%s1411_s0 + $0x68] sm:$0x3] }
   0x8   :  { %54 = vst [vmem:[#allocation1 + $0xe8] sm:$0x3] %v1028_v9  ;;  %59 = vst [vmem:[#allocation1 + $0xe0] sm:$0x3] %v1029_v10  ;;  %v1031_v12 = vld [vmem:[%s1411_s0 + $0x66] sm:$0x3] }
   0x9   :  { %64 = vst [vmem:[#allocation1 + $0x160] sm:$0x3] %v1030_v11  ;;  %v1032_v13 = vld [vmem:[%s1411_s0 + $0x64] sm:$0x3]  ;;  %v1033_v14 = vld [vmem:[%s1411_s0 + $0x62] sm:$0x3] }
   0xa   :  { %69 = vst [vmem:[#allocation1 + $0xd8] sm:$0x3] %v1031_v12  ;;  %74 = vst [vmem:[#allocation1 + $0xa8] sm:$0x3] %v1032_v13  ;;  %v1034_v15 = vld [vmem:[%s1411_s0 + $0x60] sm:$0x3] }
   0xb   :  { %79 = vst [vmem:[#allocation1 + $0xf0] sm:$0x3] %v1033_v14  ;;  %v1035_v16 = vld [vmem:[%s1411_s0 + $0x5e] sm:$0x3]  ;;  %v1036_v17 = vld [vmem:[%s1411_s0 + $0x5c] sm:$0x3] }
   0xc   :  { %84 = vst [vmem:[#allocation1 + $0x198] sm:$0x3] %v1034_v15  ;;  %89 = vst [vmem:[#allocation1 + $0x118] sm:$0x3] %v1035_v16  ;;  %v1037_v18 = vld [vmem:[%s1411_s0 + $0x5a] sm:$0x3] }
   0xd   :  { %94 = vst [vmem:[#allocation1 + $0x70] sm:$0x3] %v1036_v17  ;;  %v1038_v19 = vld [vmem:[%s1411_s0 + $0x58] sm:$0x3]  ;;  %v1039_v20 = vld [vmem:[%s1411_s0 + $0x56] sm:$0x3] }
   0xe   :  { %99 = vst [vmem:[#allocation1 + $0xc0] sm:$0x3] %v1037_v18  ;;  %104 = vst [vmem:[#allocation1 + $0xb8] sm:$0x3] %v1038_v19  ;;  %v1040_v21 = vld [vmem:[%s1411_s0 + $0x54] sm:$0x3] }
   0xf   :  { %109 = vst [vmem:[#allocation1 + $0x178] sm:$0x3] %v1039_v20  ;;  %v1041_v22 = vld [vmem:[%s1411_s0 + $0x52] sm:$0x3]  ;;  %v1042_v23 = vld [vmem:[%s1411_s0 + $0x50] sm:$0x3] }
  0x10   :  { %114 = vst [vmem:[#allocation1 + $0x50] sm:$0x3] %v1040_v21  ;;  %119 = vst [vmem:[#allocation1 + $0x40] sm:$0x3] %v1041_v22  ;;  %v1043_v24 = vld [vmem:[%s1411_s0 + $0x4e] sm:$0x3] }
  0x11   :  { %124 = vst [vmem:[#allocation1 + $0x1d0] sm:$0x3] %v1042_v23  ;;  %v1044_v25 = vld [vmem:[%s1411_s0 + $0x4c] sm:$0x3]  ;;  %v1045_v26 = vld [vmem:[%s1411_s0 + $0x4a] sm:$0x3] }
  0x12   :  { %129 = vst [vmem:[#allocation1 + $0x10] sm:$0x3] %v1043_v24  ;;  %134 = vst [vmem:[#allocation1 + $0x100] sm:$0x3] %v1044_v25  ;;  %v1046_v27 = vld [vmem:[%s1411_s0 + $0x48] sm:$0x3] }
  0x13   :  { %139 = vst [vmem:[#allocation1 + $0x98] sm:$0x3] %v1045_v26  ;;  %v1047_v28 = vld [vmem:[%s1411_s0 + $0x46] sm:$0x3]  ;;  %v1048_v29 = vld [vmem:[%s1411_s0 + $0x44] sm:$0x3] }
  0x14   :  { %144 = vst [vmem:[#allocation1 + $0x1c8] sm:$0x3] %v1046_v27  ;;  %149 = vst [vmem:[#allocation1 + $0x18] sm:$0x3] %v1047_v28  ;;  %v1049_v30 = vld [vmem:[%s1411_s0 + $0x42] sm:$0x3] }
  0x15   :  { %154 = vst [vmem:[#allocation1 + $0x1f8] sm:$0x3] %v1048_v29  ;;  %v1050_v31 = vld [vmem:[%s1411_s0 + $0x40] sm:$0x3]  ;;  %v1051_v32 = vld [vmem:[%s1411_s0 + $0x3e] sm:$0x3] }
  0x16   :  { %159 = vst [vmem:[#allocation1 + $0x108] sm:$0x3] %v1049_v30  ;;  %164 = vst [vmem:[#allocation1 + $0x1f0] sm:$0x3] %v1050_v31  ;;  %v1052_v33 = vld [vmem:[%s1411_s0 + $0x3c] sm:$0x3] }
  0x17   :  { %169 = vst [vmem:[#allocation1 + $0xb0] sm:$0x3] %v1051_v32  ;;  %v1053_v34 = vld [vmem:[%s1411_s0 + $0x3a] sm:$0x3]  ;;  %v1054_v35 = vld [vmem:[%s1411_s0 + $0x38] sm:$0x3] }
  0x18   :  { %174 = vst [vmem:[#allocation1 + $0x28] sm:$0x3] %v1052_v33  ;;  %179 = vst [vmem:[#allocation1 + $0xf8] sm:$0x3] %v1053_v34  ;;  %v1055_v36 = vld [vmem:[%s1411_s0 + $0x36] sm:$0x3] }
  0x19   :  { %184 = vst [vmem:[#allocation1 + $0x130] sm:$0x3] %v1054_v35  ;;  %v1056_v37 = vld [vmem:[%s1411_s0 + $0x34] sm:$0x3]  ;;  %v1057_v38 = vld [vmem:[%s1411_s0 + $0x32] sm:$0x3] }
  0x1a   :  { %189 = vst [vmem:[#allocation1 + $0x1b8] sm:$0x3] %v1055_v36  ;;  %194 = vst [vmem:[#allocation1] sm:$0x3] %v1056_v37  ;;  %v1058_v39 = vld [vmem:[%s1411_s0 + $0x30] sm:$0x3] }
  0x1b   :  { %199 = vst [vmem:[#allocation1 + $0x1d8] sm:$0x3] %v1057_v38  ;;  %v1059_v40 = vld [vmem:[%s1411_s0 + $0x2e] sm:$0x3]  ;;  %v1060_v41 = vld [vmem:[%s1411_s0 + $0x2c] sm:$0x3] }
  0x1c   :  { %204 = vst [vmem:[#allocation1 + $0xd0] sm:$0x3] %v1058_v39  ;;  %209 = vst [vmem:[#allocation1 + $0x58] sm:$0x3] %v1059_v40  ;;  %v1061_v42 = vld [vmem:[%s1411_s0 + $0x2a] sm:$0x3] }
  0x1d   :  { %214 = vst [vmem:[#allocation1 + $0x8] sm:$0x3] %v1060_v41  ;;  %v1062_v43 = vld [vmem:[%s1411_s0 + $0x28] sm:$0x3]  ;;  %v1063_v44 = vld [vmem:[%s1411_s0 + $0x26] sm:$0x3] }
  0x1e   :  { %219 = vst [vmem:[#allocation1 + $0x110] sm:$0x3] %v1061_v42  ;;  %224 = vst [vmem:[#allocation1 + $0x180] sm:$0x3] %v1062_v43  ;;  %v1064_v45 = vld [vmem:[%s1411_s0 + $0x24] sm:$0x3] }
  0x1f   :  { %229 = vst [vmem:[#allocation1 + $0x188] sm:$0x3] %v1063_v44  ;;  %v1065_v46 = vld [vmem:[%s1411_s0 + $0x22] sm:$0x3]  ;;  %v1066_v47 = vld [vmem:[%s1411_s0 + $0x20] sm:$0x3] }
  0x20   :  { %234 = vst [vmem:[#allocation1 + $0x168] sm:$0x3] %v1064_v45  ;;  %239 = vst [vmem:[#allocation1 + $0x20] sm:$0x3] %v1065_v46  ;;  %v1067_v48 = vld [vmem:[%s1411_s0 + $0x1e] sm:$0x3] }
  0x21   :  { %244 = vst [vmem:[#allocation1 + $0x128] sm:$0x3] %v1066_v47  ;;  %v1068_v49 = vld [vmem:[%s1411_s0 + $0x1c] sm:$0x3]  ;;  %v1069_v50 = vld [vmem:[%s1411_s0 + $0x1a] sm:$0x3] }
  0x22   :  { %249 = vst [vmem:[#allocation1 + $0x140] sm:$0x3] %v1067_v48  ;;  %254 = vst [vmem:[#allocation1 + $0x170] sm:$0x3] %v1068_v49  ;;  %v1070_v51 = vld [vmem:[%s1411_s0 + $0x18] sm:$0x3] }
  0x23   :  { %259 = vst [vmem:[#allocation1 + $0x150] sm:$0x3] %v1069_v50  ;;  %v1071_v52 = vld [vmem:[%s1411_s0 + $0x16] sm:$0x3]  ;;  %v1072_v53 = vld [vmem:[%s1411_s0 + $0x14] sm:$0x3] }
  0x24   :  { %264 = vst [vmem:[#allocation1 + $0x30] sm:$0x3] %v1070_v51  ;;  %269 = vst [vmem:[#allocation1 + $0x88] sm:$0x3] %v1071_v52  ;;  %v1073_v54 = vld [vmem:[%s1411_s0 + $0x12] sm:$0x3] }
  0x25   :  { %274 = vst [vmem:[#allocation1 + $0x80] sm:$0x3] %v1072_v53  ;;  %v1074_v55 = vld [vmem:[%s1411_s0 + $0x10] sm:$0x3]  ;;  %v1075_v56 = vld [vmem:[%s1411_s0 + $0xe] sm:$0x3] }
  0x26   :  { %279 = vst [vmem:[#allocation1 + $0x190] sm:$0x3] %v1073_v54  ;;  %284 = vst [vmem:[#allocation1 + $0x68] sm:$0x3] %v1074_v55  ;;  %v1076_v57 = vld [vmem:[%s1411_s0 + $0xc] sm:$0x3] }
  0x27   :  { %289 = vst [vmem:[#allocation1 + $0x60] sm:$0x3] %v1075_v56  ;;  %v1077_v58 = vld [vmem:[%s1411_s0 + $0xa] sm:$0x3]  ;;  %v1078_v59 = vld [vmem:[%s1411_s0 + $0x8] sm:$0x3] }
  0x28   :  { %294 = vst [vmem:[#allocation1 + $0x1c0] sm:$0x3] %v1076_v57  ;;  %299 = vst [vmem:[#allocation1 + $0x138] sm:$0x3] %v1077_v58  ;;  %v1079_v60 = vld [vmem:[%s1411_s0 + $0x6] sm:$0x3] }
  0x29   :  { %304 = vst [vmem:[#allocation1 + $0x38] sm:$0x3] %v1078_v59  ;;  %v1080_v61 = vld [vmem:[%s1411_s0 + $0x4] sm:$0x3]  ;;  %v1081_v62 = vld [vmem:[%s1411_s0 + $0x2] sm:$0x3] }
  0x2a   :  { %309 = vst [vmem:[#allocation1 + $0xa0] sm:$0x3] %v1079_v60  ;;  %314 = vst [vmem:[#allocation1 + $0x1e8] sm:$0x3] %v1080_v61  ;;  %v319_v63 = vld [vmem:[%s1411_s0] sm:$0x3] }
  0x2b   :  { %318 = vst [vmem:[#allocation1 + $0x1a0] sm:$0x3] %v1081_v62  ;;  %v452_v0 = vld [vmem:[#allocation1 + $0x8] sm:$0x3]   ;;  %v458_v1 = vld [vmem:[#allocation1 + $0x58] sm:$0x3]  }
  0x2c   :  { %320 = vst [vmem:[#allocation1 + $0x158] sm:$0x3] %v319_v63  ;;  %v434_v2 = vld [vmem:[#allocation1 + $0x188] sm:$0x3]   ;;  %v440_v3 = vld [vmem:[#allocation1 + $0x180] sm:$0x3]  }
  0x2d   :  { %v446_v4 = vld [vmem:[#allocation1 + $0x110] sm:$0x3]   ;;  %454 = vst [vmem:[#allocation0 + $0x31] sm:$0x1] %v452_v0   ;;  %456 = vst [vmem:[#allocation0 + $0xb0] sm:$0x2] %v452_v0  }
  0x2e   :  { %460 = vst [vmem:[#allocation0 + $0x39] sm:$0x1] %v458_v1   ;;  %462 = vst [vmem:[#allocation0 + $0xb8] sm:$0x2] %v458_v1   ;;  %v416_v5 = vld [vmem:[#allocation1 + $0x128] sm:$0x3]  }
  0x2f   :  { %v422_v6 = vld [vmem:[#allocation1 + $0x20] sm:$0x3]   ;;  %v428_v7 = vld [vmem:[#allocation1 + $0x168] sm:$0x3]   ;;  %436 = vst [vmem:[#allocation0 + $0x38] sm:$0x1] %v434_v2  }
  0x30   :  { %438 = vst [vmem:[#allocation0 + $0xb7] sm:$0x2] %v434_v2   ;;  %442 = vst [vmem:[#allocation0 + $0x21] sm:$0x1] %v440_v3   ;;  %v398_v8 = vld [vmem:[#allocation1 + $0x150] sm:$0x3]  }
  0x31   :  { %444 = vst [vmem:[#allocation0 + $0xa0] sm:$0x2] %v440_v3   ;;  %448 = vst [vmem:[#allocation0 + $0x29] sm:$0x1] %v446_v4   ;;  %v404_v9 = vld [vmem:[#allocation1 + $0x170] sm:$0x3]  }
  0x32   :  { %450 = vst [vmem:[#allocation0 + $0xa8] sm:$0x2] %v446_v4   ;;  %v410_v10 = vld [vmem:[#allocation1 + $0x140] sm:$0x3]   ;;  %418 = vst [vmem:[#allocation0 + $0x20] sm:$0x1] %v416_v5  }
  0x33   :  { %420 = vst [vmem:[#allocation0 + $0x9f] sm:$0x2] %v416_v5   ;;  %424 = vst [vmem:[#allocation0 + $0x28] sm:$0x1] %v422_v6   ;;  %v380_v11 = vld [vmem:[#allocation1 + $0x80] sm:$0x3]  }
  0x34   :  { %426 = vst [vmem:[#allocation0 + $0xa7] sm:$0x2] %v422_v6   ;;  %430 = vst [vmem:[#allocation0 + $0x30] sm:$0x1] %v428_v7   ;;  %v386_v12 = vld [vmem:[#allocation1 + $0x88] sm:$0x3]  }
  0x35   :  { %432 = vst [vmem:[#allocation0 + $0xaf] sm:$0x2] %v428_v7   ;;  %v392_v13 = vld [vmem:[#allocation1 + $0x30] sm:$0x3]   ;;  %400 = vst [vmem:[#allocation0 + $0xb] sm:$0x1] %v398_v8  }
  0x36   :  { %402 = vst [vmem:[#allocation0 + $0x8a] sm:$0x2] %v398_v8   ;;  %406 = vst [vmem:[#allocation0 + $0x13] sm:$0x1] %v404_v9   ;;  %v362_v14 = vld [vmem:[#allocation1 + $0x60] sm:$0x3]  }
  0x37   :  { %408 = vst [vmem:[#allocation0 + $0x92] sm:$0x2] %v404_v9   ;;  %412 = vst [vmem:[#allocation0 + $0x1b] sm:$0x1] %v410_v10   ;;  %v368_v15 = vld [vmem:[#allocation1 + $0x68] sm:$0x3]  }
  0x38   :  { %414 = vst [vmem:[#allocation0 + $0x9a] sm:$0x2] %v410_v10   ;;  %v374_v16 = vld [vmem:[#allocation1 + $0x190] sm:$0x3]   ;;  %382 = vst [vmem:[#allocation0 + $0x12] sm:$0x1] %v380_v11  }
  0x39   :  { %384 = vst [vmem:[#allocation0 + $0x91] sm:$0x2] %v380_v11   ;;  %388 = vst [vmem:[#allocation0 + $0x1a] sm:$0x1] %v386_v12   ;;  %v344_v17 = vld [vmem:[#allocation1 + $0x38] sm:$0x3]  }
  0x3a   :  { %390 = vst [vmem:[#allocation0 + $0x99] sm:$0x2] %v386_v12   ;;  %394 = vst [vmem:[#allocation0 + $0x3] sm:$0x1] %v392_v13   ;;  %v350_v18 = vld [vmem:[#allocation1 + $0x138] sm:$0x3]  }
  0x3b   :  { %396 = vst [vmem:[#allocation0 + $0x82] sm:$0x2] %v392_v13   ;;  %v356_v19 = vld [vmem:[#allocation1 + $0x1c0] sm:$0x3]   ;;  %364 = vst [vmem:[#allocation0 + $0x19] sm:$0x1] %v362_v14  }
  0x3c   :  { %366 = vst [vmem:[#allocation0 + $0x98] sm:$0x2] %v362_v14   ;;  %370 = vst [vmem:[#allocation0 + $0x2] sm:$0x1] %v368_v15   ;;  %v326_v20 = vld [vmem:[#allocation1 + $0x1a0] sm:$0x3]  }
  0x3d   :  { %372 = vst [vmem:[#allocation0 + $0x81] sm:$0x2] %v368_v15   ;;  %376 = vst [vmem:[#allocation0 + $0xa] sm:$0x1] %v374_v16   ;;  %v332_v21 = vld [vmem:[#allocation1 + $0x1e8] sm:$0x3]  }
  0x3e   :  { %378 = vst [vmem:[#allocation0 + $0x89] sm:$0x2] %v374_v16   ;;  %v338_v22 = vld [vmem:[#allocation1 + $0xa0] sm:$0x3]   ;;  %346 = vst [vmem:[#allocation0 + $0x1] sm:$0x1] %v344_v17  }
  0x3f   :  { %348 = vst [vmem:[#allocation0 + $0x80] sm:$0x2] %v344_v17   ;;  %352 = vst [vmem:[#allocation0 + $0x9] sm:$0x1] %v350_v18   ;;  %v321_v23 = vld [vmem:[#allocation1 + $0x158] sm:$0x3]  }
  0x40   :  { %354 = vst [vmem:[#allocation0 + $0x88] sm:$0x2] %v350_v18   ;;  %358 = vst [vmem:[#allocation0 + $0x11] sm:$0x1] %v356_v19   ;;  %v464_v24 = vld [vmem:[#allocation1 + $0xd0] sm:$0x3]  }
  0x41   :  { %360 = vst [vmem:[#allocation0 + $0x90] sm:$0x2] %v356_v19   ;;  %328 = vst [vmem:[#allocation0 + $0x8] sm:$0x1] %v326_v20   ;;  %v470_v25 = vld [vmem:[#allocation1 + $0x1d8] sm:$0x3]  }
  0x42   :  { %330 = vst [vmem:[#allocation0 + $0x87] sm:$0x2] %v326_v20   ;;  %334 = vst [vmem:[#allocation0 + $0x10] sm:$0x1] %v332_v21   ;;  %v476_v26 = vld [vmem:[#allocation1] sm:$0x3]  }
  0x43   :  { %336 = vst [vmem:[#allocation0 + $0x8f] sm:$0x2] %v332_v21   ;;  %340 = vst [vmem:[#allocation0 + $0x18] sm:$0x1] %v338_v22   ;;  %v482_v27 = vld [vmem:[#allocation1 + $0x1b8] sm:$0x3]  }
  0x44   :  { %342 = vst [vmem:[#allocation0 + $0x97] sm:$0x2] %v338_v22   ;;  %322 = vst [vmem:[#allocation0] sm:$0x1] %v321_v23   ;;  %v488_v28 = vld [vmem:[#allocation1 + $0x130] sm:$0x3]  }
  0x45   :  { %324 = vst [vmem:[#allocation0 + $0x7f] sm:$0x2] %v321_v23   ;;  %466 = vst [vmem:[#allocation0 + $0x22] sm:$0x1] %v464_v24   ;;  %v494_v29 = vld [vmem:[#allocation1 + $0xf8] sm:$0x3]  }
  0x46   :  { %468 = vst [vmem:[#allocation0 + $0xa1] sm:$0x2] %v464_v24   ;;  %472 = vst [vmem:[#allocation0 + $0x2a] sm:$0x1] %v470_v25   ;;  %v500_v30 = vld [vmem:[#allocation1 + $0x28] sm:$0x3]  }
  0x47   :  { %474 = vst [vmem:[#allocation0 + $0xa9] sm:$0x2] %v470_v25   ;;  %478 = vst [vmem:[#allocation0 + $0x32] sm:$0x1] %v476_v26   ;;  %v506_v31 = vld [vmem:[#allocation1 + $0xb0] sm:$0x3]  }
  0x48   :  { %480 = vst [vmem:[#allocation0 + $0xb1] sm:$0x2] %v476_v26   ;;  %484 = vst [vmem:[#allocation0 + $0x3a] sm:$0x1] %v482_v27   ;;  %v512_v32 = vld [vmem:[#allocation1 + $0x1f0] sm:$0x3]  }
  0x49   :  { %486 = vst [vmem:[#allocation0 + $0xb9] sm:$0x2] %v482_v27   ;;  %490 = vst [vmem:[#allocation0 + $0x23] sm:$0x1] %v488_v28   ;;  %v518_v33 = vld [vmem:[#allocation1 + $0x108] sm:$0x3]  }
  0x4a   :  { %492 = vst [vmem:[#allocation0 + $0xa2] sm:$0x2] %v488_v28   ;;  %496 = vst [vmem:[#allocation0 + $0x2b] sm:$0x1] %v494_v29   ;;  %v524_v34 = vld [vmem:[#allocation1 + $0x1f8] sm:$0x3]  }
  0x4b   :  { %498 = vst [vmem:[#allocation0 + $0xaa] sm:$0x2] %v494_v29   ;;  %502 = vst [vmem:[#allocation0 + $0x33] sm:$0x1] %v500_v30   ;;  %v530_v35 = vld [vmem:[#allocation1 + $0x18] sm:$0x3]  }
  0x4c   :  { %504 = vst [vmem:[#allocation0 + $0xb2] sm:$0x2] %v500_v30   ;;  %508 = vst [vmem:[#allocation0 + $0x3b] sm:$0x1] %v506_v31   ;;  %v536_v36 = vld [vmem:[#allocation1 + $0x1c8] sm:$0x3]  }
  0x4d   :  { %510 = vst [vmem:[#allocation0 + $0xba] sm:$0x2] %v506_v31   ;;  %514 = vst [vmem:[#allocation0 + $0x40] sm:$0x1] %v512_v32   ;;  %v542_v37 = vld [vmem:[#allocation1 + $0x98] sm:$0x3]  }
  0x4e   :  { %516 = vst [vmem:[#allocation0 + $0xbf] sm:$0x2] %v512_v32   ;;  %520 = vst [vmem:[#allocation0 + $0x48] sm:$0x1] %v518_v33   ;;  %v548_v38 = vld [vmem:[#allocation1 + $0x100] sm:$0x3]  }
  0x4f   :  { %522 = vst [vmem:[#allocation0 + $0xc7] sm:$0x2] %v518_v33   ;;  %526 = vst [vmem:[#allocation0 + $0x50] sm:$0x1] %v524_v34   ;;  %v554_v39 = vld [vmem:[#allocation1 + $0x10] sm:$0x3]  }
  0x50   :  { %528 = vst [vmem:[#allocation0 + $0xcf] sm:$0x2] %v524_v34   ;;  %532 = vst [vmem:[#allocation0 + $0x58] sm:$0x1] %v530_v35   ;;  %v560_v40 = vld [vmem:[#allocation1 + $0x1d0] sm:$0x3]  }
  0x51   :  { %534 = vst [vmem:[#allocation0 + $0xd7] sm:$0x2] %v530_v35   ;;  %538 = vst [vmem:[#allocation0 + $0x41] sm:$0x1] %v536_v36   ;;  %v566_v41 = vld [vmem:[#allocation1 + $0x40] sm:$0x3]  }
  0x52   :  { %540 = vst [vmem:[#allocation0 + $0xc0] sm:$0x2] %v536_v36   ;;  %544 = vst [vmem:[#allocation0 + $0x49] sm:$0x1] %v542_v37   ;;  %v572_v42 = vld [vmem:[#allocation1 + $0x50] sm:$0x3]  }
  0x53   :  { %546 = vst [vmem:[#allocation0 + $0xc8] sm:$0x2] %v542_v37   ;;  %550 = vst [vmem:[#allocation0 + $0x51] sm:$0x1] %v548_v38   ;;  %v578_v43 = vld [vmem:[#allocation1 + $0x178] sm:$0x3]  }
  0x54   :  { %552 = vst [vmem:[#allocation0 + $0xd0] sm:$0x2] %v548_v38   ;;  %556 = vst [vmem:[#allocation0 + $0x59] sm:$0x1] %v554_v39   ;;  %v584_v44 = vld [vmem:[#allocation1 + $0xb8] sm:$0x3]  }
  0x55   :  { %558 = vst [vmem:[#allocation0 + $0xd8] sm:$0x2] %v554_v39   ;;  %562 = vst [vmem:[#allocation0 + $0x42] sm:$0x1] %v560_v40   ;;  %v590_v45 = vld [vmem:[#allocation1 + $0xc0] sm:$0x3]  }
  0x56   :  { %564 = vst [vmem:[#allocation0 + $0xc1] sm:$0x2] %v560_v40   ;;  %568 = vst [vmem:[#allocation0 + $0x4a] sm:$0x1] %v566_v41   ;;  %v596_v46 = vld [vmem:[#allocation1 + $0x70] sm:$0x3]  }
  0x57   :  { %570 = vst [vmem:[#allocation0 + $0xc9] sm:$0x2] %v566_v41   ;;  %574 = vst [vmem:[#allocation0 + $0x52] sm:$0x1] %v572_v42   ;;  %v602_v47 = vld [vmem:[#allocation1 + $0x118] sm:$0x3]  }
  0x58   :  { %576 = vst [vmem:[#allocation0 + $0xd1] sm:$0x2] %v572_v42   ;;  %580 = vst [vmem:[#allocation0 + $0x5a] sm:$0x1] %v578_v43   ;;  %v608_v48 = vld [vmem:[#allocation1 + $0x198] sm:$0x3]  }
  0x59   :  { %582 = vst [vmem:[#allocation0 + $0xd9] sm:$0x2] %v578_v43   ;;  %586 = vst [vmem:[#allocation0 + $0x43] sm:$0x1] %v584_v44   ;;  %v614_v49 = vld [vmem:[#allocation1 + $0xf0] sm:$0x3]  }
  0x5a   :  { %588 = vst [vmem:[#allocation0 + $0xc2] sm:$0x2] %v584_v44   ;;  %592 = vst [vmem:[#allocation0 + $0x4b] sm:$0x1] %v590_v45   ;;  %v620_v50 = vld [vmem:[#allocation1 + $0xa8] sm:$0x3]  }
  0x5b   :  { %594 = vst [vmem:[#allocation0 + $0xca] sm:$0x2] %v590_v45   ;;  %598 = vst [vmem:[#allocation0 + $0x53] sm:$0x1] %v596_v46   ;;  %v626_v51 = vld [vmem:[#allocation1 + $0xd8] sm:$0x3]  }
  0x5c   :  { %600 = vst [vmem:[#allocation0 + $0xd2] sm:$0x2] %v596_v46   ;;  %604 = vst [vmem:[#allocation0 + $0x5b] sm:$0x1] %v602_v47   ;;  %v632_v52 = vld [vmem:[#allocation1 + $0x160] sm:$0x3]  }
  0x5d   :  { %606 = vst [vmem:[#allocation0 + $0xda] sm:$0x2] %v602_v47   ;;  %610 = vst [vmem:[#allocation0 + $0x60] sm:$0x1] %v608_v48   ;;  %v638_v53 = vld [vmem:[#allocation1 + $0xe0] sm:$0x3]  }
  0x5e   :  { %612 = vst [vmem:[#allocation0 + $0xdf] sm:$0x2] %v608_v48   ;;  %616 = vst [vmem:[#allocation0 + $0x68] sm:$0x1] %v614_v49   ;;  %v644_v54 = vld [vmem:[#allocation1 + $0xe8] sm:$0x3]  }
  0x5f   :  { %618 = vst [vmem:[#allocation0 + $0xe7] sm:$0x2] %v614_v49   ;;  %622 = vst [vmem:[#allocation0 + $0x70] sm:$0x1] %v620_v50   ;;  %v650_v55 = vld [vmem:[#allocation1 + $0x78] sm:$0x3]  }
  0x60   :  { %624 = vst [vmem:[#allocation0 + $0xef] sm:$0x2] %v620_v50   ;;  %628 = vst [vmem:[#allocation0 + $0x78] sm:$0x1] %v626_v51   ;;  %v656_v56 = vld [vmem:[#allocation1 + $0x1b0] sm:$0x3]  }
  0x61   :  { %630 = vst [vmem:[#allocation0 + $0xf7] sm:$0x2] %v626_v51   ;;  %634 = vst [vmem:[#allocation0 + $0x61] sm:$0x1] %v632_v52   ;;  %v662_v57 = vld [vmem:[#allocation1 + $0xc8] sm:$0x3]  }
  0x62   :  { %636 = vst [vmem:[#allocation0 + $0xe0] sm:$0x2] %v632_v52   ;;  %640 = vst [vmem:[#allocation0 + $0x69] sm:$0x1] %v638_v53   ;;  %v668_v58 = vld [vmem:[#allocation1 + $0x90] sm:$0x3]  }
  0x63   :  { %642 = vst [vmem:[#allocation0 + $0xe8] sm:$0x2] %v638_v53   ;;  %646 = vst [vmem:[#allocation0 + $0x71] sm:$0x1] %v644_v54   ;;  %v674_v59 = vld [vmem:[#allocation1 + $0x1a8] sm:$0x3]  }
  0x64   :  { %648 = vst [vmem:[#allocation0 + $0xf0] sm:$0x2] %v644_v54   ;;  %652 = vst [vmem:[#allocation0 + $0x79] sm:$0x1] %v650_v55   ;;  %v680_v60 = vld [vmem:[#allocation1 + $0x1e0] sm:$0x3]  }
  0x65   :  { %654 = vst [vmem:[#allocation0 + $0xf8] sm:$0x2] %v650_v55   ;;  %658 = vst [vmem:[#allocation0 + $0x62] sm:$0x1] %v656_v56   ;;  %v686_v61 = vld [vmem:[#allocation1 + $0x120] sm:$0x3]  }
  0x66   :  { %660 = vst [vmem:[#allocation0 + $0xe1] sm:$0x2] %v656_v56   ;;  %664 = vst [vmem:[#allocation0 + $0x6a] sm:$0x1] %v662_v57   ;;  %v692_v62 = vld [vmem:[#allocation1 + $0x48] sm:$0x3]  }
  0x67   :  { %666 = vst [vmem:[#allocation0 + $0xe9] sm:$0x2] %v662_v57   ;;  %670 = vst [vmem:[#allocation0 + $0x72] sm:$0x1] %v668_v58   ;;  %v698_v63 = vld [vmem:[#allocation1 + $0x148] sm:$0x3]  }
  0x68   :  { %672 = vst [vmem:[#allocation0 + $0xf1] sm:$0x2] %v668_v58   ;;  %676 = vst [vmem:[#allocation0 + $0x7a] sm:$0x1] %v674_v59   ;;  %v707_v0 = vld [vmem:[#allocation0] sm:$0xf] }
  0x69   :  { %678 = vst [vmem:[#allocation0 + $0xf9] sm:$0x2] %v674_v59   ;;  %682 = vst [vmem:[#allocation0 + $0x63] sm:$0x1] %v680_v60   ;;  %v712_v1 = vld [vmem:[#allocation0 + $0x8] sm:$0xf] }
  0x6a   :  { %684 = vst [vmem:[#allocation0 + $0xe2] sm:$0x2] %v680_v60   ;;  %688 = vst [vmem:[#allocation0 + $0x6b] sm:$0x1] %v686_v61   ;;  %v718_v2 = vld [vmem:[#allocation0 + $0x10] sm:$0xf] }
  0x6b   :  { %690 = vst [vmem:[#allocation0 + $0xea] sm:$0x2] %v686_v61   ;;  %694 = vst [vmem:[#allocation0 + $0x73] sm:$0x1] %v692_v62   ;;  %v725_v3 = vld [vmem:[#allocation0 + $0x18] sm:$0xf] }
  0x6c   :  { %696 = vst [vmem:[#allocation0 + $0xf2] sm:$0x2] %v692_v62   ;;  %700 = vst [vmem:[#allocation0 + $0x7b] sm:$0x1] %v698_v63   ;;  %v732_v4 = vld [vmem:[#allocation0 + $0x20] sm:$0xf] }
  0x6d   :  { %702 = vst [vmem:[#allocation0 + $0xfa] sm:$0x2] %v698_v63   ;;  %710 = vst [vmem:[%s1412_s1] sm:$0xf] %v707_v0  ;;  %v739_v5 = vld [vmem:[#allocation0 + $0x28] sm:$0xf] }
  0x6e   :  { %1082 = vst [vmem:[%s1412_s1 + $0x4] sm:$0xf] %v712_v1  ;;  %1083 = vst [vmem:[%s1412_s1 + $0x8] sm:$0xf] %v718_v2  ;;  %v746_v6 = vld [vmem:[#allocation0 + $0x30] sm:$0xf] }
  0x6f   :  { %1084 = vst [vmem:[%s1412_s1 + $0xc] sm:$0xf] %v725_v3  ;;  %1085 = vst [vmem:[%s1412_s1 + $0x10] sm:$0xf] %v732_v4  ;;  %v753_v7 = vld [vmem:[#allocation0 + $0x38] sm:$0xf] }
  0x70   :  { %1086 = vst [vmem:[%s1412_s1 + $0x14] sm:$0xf] %v739_v5  ;;  %1087 = vst [vmem:[%s1412_s1 + $0x18] sm:$0xf] %v746_v6  ;;  %v760_v8 = vld [vmem:[#allocation0 + $0x40] sm:$0xf] }
  0x71   :  { %v767_v9 = vld [vmem:[#allocation0 + $0x48] sm:$0xf]  ;;  %1088 = vst [vmem:[%s1412_s1 + $0x1c] sm:$0xf] %v753_v7  ;;  %1089 = vst [vmem:[%s1412_s1 + $0x20] sm:$0xf] %v760_v8 }
  0x72   :  { %1090 = vst [vmem:[%s1412_s1 + $0x24] sm:$0xf] %v767_v9  ;;  %v774_v10 = vld [vmem:[#allocation0 + $0x50] sm:$0xf]  ;;  %v781_v11 = vld [vmem:[#allocation0 + $0x58] sm:$0xf] }
  0x73   :  { %v816_v12 = vld [vmem:[#allocation0 + $0x80] sm:$0xf]  ;;  %1091 = vst [vmem:[%s1412_s1 + $0x28] sm:$0xf] %v774_v10  ;;  %1092 = vst [vmem:[%s1412_s1 + $0x2c] sm:$0xf] %v781_v11 }
  0x74   :  { %1097 = vst [vmem:[%s1412_s1 + $0x40] sm:$0xf] %v816_v12  ;;  %v823_v13 = vld [vmem:[#allocation0 + $0x88] sm:$0xf]  ;;  %v830_v14 = vld [vmem:[#allocation0 + $0x90] sm:$0xf] }
  0x75   :  { %v837_v15 = vld [vmem:[#allocation0 + $0x98] sm:$0xf]  ;;  %1098 = vst [vmem:[%s1412_s1 + $0x44] sm:$0xf] %v823_v13  ;;  %1099 = vst [vmem:[%s1412_s1 + $0x48] sm:$0xf] %v830_v14 }
  0x76   :  { %1100 = vst [vmem:[%s1412_s1 + $0x4c] sm:$0xf] %v837_v15  ;;  %v844_v16 = vld [vmem:[#allocation0 + $0xa0] sm:$0xf]  ;;  %v851_v17 = vld [vmem:[#allocation0 + $0xa8] sm:$0xf] }
  0x77   :  { %v858_v18 = vld [vmem:[#allocation0 + $0xb0] sm:$0xf]  ;;  %v788_v19 = vld [vmem:[#allocation0 + $0x60] sm:$0xf]  ;;  %v795_v20 = vld [vmem:[#allocation0 + $0x68] sm:$0xf] }
  0x78   :  { %1101 = vst [vmem:[%s1412_s1 + $0x50] sm:$0xf] %v844_v16  ;;  %1102 = vst [vmem:[%s1412_s1 + $0x54] sm:$0xf] %v851_v17  ;;  %v865_v21 = vld [vmem:[#allocation0 + $0xb8] sm:$0xf] }
  0x79   :  { %1103 = vst [vmem:[%s1412_s1 + $0x58] sm:$0xf] %v858_v18  ;;  %1093 = vst [vmem:[%s1412_s1 + $0x30] sm:$0xf] %v788_v19  ;;  %v802_v22 = vld [vmem:[#allocation0 + $0x70] sm:$0xf] }
  0x7a   :  { %1094 = vst [vmem:[%s1412_s1 + $0x34] sm:$0xf] %v795_v20  ;;  %v809_v23 = vld [vmem:[#allocation0 + $0x78] sm:$0xf]  ;;  %1104 = vst [vmem:[%s1412_s1 + $0x5c] sm:$0xf] %v865_v21 }
  0x7b   :  { %v872_v24 = vld [vmem:[#allocation0 + $0xc0] sm:$0xf]  ;;  %1095 = vst [vmem:[%s1412_s1 + $0x38] sm:$0xf] %v802_v22  ;;  %1096 = vst [vmem:[%s1412_s1 + $0x3c] sm:$0xf] %v809_v23 }
  0x7c   :  { %1105 = vst [vmem:[%s1412_s1 + $0x60] sm:$0xf] %v872_v24  ;;  %v879_v25 = vld [vmem:[#allocation0 + $0xc8] sm:$0xf]  ;;  %v886_v26 = vld [vmem:[#allocation0 + $0xd0] sm:$0xf] }
  0x7d   :  { %v893_v27 = vld [vmem:[#allocation0 + $0xd8] sm:$0xf]  ;;  %1106 = vst [vmem:[%s1412_s1 + $0x64] sm:$0xf] %v879_v25  ;;  %1107 = vst [vmem:[%s1412_s1 + $0x68] sm:$0xf] %v886_v26 }
  0x7e   :  { %1108 = vst [vmem:[%s1412_s1 + $0x6c] sm:$0xf] %v893_v27  ;;  %v900_v28 = vld [vmem:[#allocation0 + $0xe0] sm:$0xf]  ;;  %v907_v29 = vld [vmem:[#allocation0 + $0xe8] sm:$0xf] }
  0x7f   :  { %v914_v30 = vld [vmem:[#allocation0 + $0xf0] sm:$0xf]  ;;  %1109 = vst [vmem:[%s1412_s1 + $0x70] sm:$0xf] %v900_v28  ;;  %1110 = vst [vmem:[%s1412_s1 + $0x74] sm:$0xf] %v907_v29 }
  0x80   :  { %1111 = vst [vmem:[%s1412_s1 + $0x78] sm:$0xf] %v914_v30  ;;  %v921_v31 = vld [vmem:[#allocation0 + $0xf8] sm:$0xf] }
  0x81   :  { %1112 = vst [vmem:[%s1412_s1 + $0x7c] sm:$0xf] %v921_v31 }

// kernel: generator_forward.5
= control target key start
LH: loop header
LB: loop body
LE: loop exit
PB: predicated region body
PF: predicated region fallthrough
CT: control target
= control target key end

     0   :  { %v7204_v3 = vmov 0   ;;  %vm4768_vm0 = vcmask 1041408   ;;  %s10517_s1 = inlined_call_operand.vmem [shape: bf16[1,128,8192], index: 1, kind: input, shape index: {}]   ;;  %s10518_s0 = inlined_call_operand.vmem [shape: bf16[1,2,128], index: 0, kind: input, shape index: {}]   ;;  %s10519_s2 = inlined_call_operand.vmem [shape: f32[1,2,8192], index: 2, kind: output, shape index: {0}]   ;;  %s10520_s3 = inlined_call_operand.vmem [shape: f32[1,1,1,8192], index: 3, kind: output, shape index: {1}]   ;;  %s10521_s4 = inlined_call_operand.vmem [shape: f32[1,1,1,8192], index: 4, kind: output, shape index: {2}]  }
   0x1   :  { %v464_v0 = vld [vmem:[%s10517_s1 + $0xe00] sm:$0xff]  ;;  %v465_v2 = vld [vmem:[%s10517_s1 + $0xe08] sm:$0xff]  ;;  %3120 = vmatprep.mubr.bf16.mxu0 %v7204_v3  ;;  %3161 = vmatprep.mubr.bf16.mxu1 %v7204_v3  ;;  %v466_v63 = vld [vmem:[%s10517_s1 + $0xe10] sm:$0xff] }
   0x2   :  { %v496_v1 = vld [vmem:[%s10517_s1 + $0xf00] sm:$0xff]  ;;  %v497_v5 = vld [vmem:[%s10517_s1 + $0xf08] sm:$0xff] }
   0x3   :  { %v7134_v4 = vcombine.high %v464_v0, %v496_v1  ;;  %v7133_v6 = vcombine.low %v464_v0, %v496_v1  ;;  %v400_v7 = vld [vmem:[%s10517_s1 + $0xc00] sm:$0xff]  ;;  %v7136_v9 = vcombine.high %v465_v2, %v497_v5  ;;  %v7135_v10 = vcombine.low %v465_v2, %v497_v5  ;;  %v401_v12 = vld [vmem:[%s10517_s1 + $0xc08] sm:$0xff]  ;;  %v498_v0 = vld [vmem:[%s10517_s1 + $0xf10] sm:$0xff] }
   0x4   :  { %v432_v8 = vld [vmem:[%s10517_s1 + $0xd00] sm:$0xff]  ;;  %v433_v13 = vld [vmem:[%s10517_s1 + $0xd08] sm:$0xff]  ;;  %v467_v1 = vld [vmem:[%s10517_s1 + $0xe18] sm:$0xff] }
   0x5   :  { %v7070_v11 = vcombine.high %v400_v7, %v432_v8  ;;  %v336_v14 = vld [vmem:[%s10517_s1 + $0xa00] sm:$0xff]  ;;  %3088 = vmatprep.subr.bf16.mxu0 %v7134_v4  ;;  %v7072_v15 = vcombine.high %v401_v12, %v433_v13  ;;  %v337_v17 = vld [vmem:[%s10517_s1 + $0xa08] sm:$0xff]  ;;  %3129 = vmatprep.subr.bf16.mxu1 %v7136_v9  ;;  %v7069_v19 = vcombine.low %v400_v7, %v432_v8  ;;  %v499_v2 = vld [vmem:[%s10517_s1 + $0xf18] sm:$0xff] }
   0x6   :  { %v368_v16 = vld [vmem:[%s10517_s1 + $0xb00] sm:$0xff]  ;;  %v369_v18 = vld [vmem:[%s10517_s1 + $0xb08] sm:$0xff]  ;;  %3089 = vmatpush1.bf16.msra.mxu0 %v7133_v6  ;;  %3130 = vmatpush1.bf16.msra.mxu1 %v7135_v10  ;;  %v7071_v20 = vcombine.low %v401_v12, %v433_v13  ;;  %v7138_v6 = vcombine.high %v466_v63, %v498_v0  ;;  %v7140_v7 = vcombine.high %v467_v1, %v499_v2  ;;  %v402_v8 = vld [vmem:[%s10517_s1 + $0xc10] sm:$0xff] }
   0x7   :  { %3090 = vmatprep.subr.bf16.mxu0 %v7070_v11  ;;  %v7006_v21 = vcombine.high %v336_v14, %v368_v16  ;;  %3131 = vmatprep.subr.bf16.mxu1 %v7072_v15  ;;  %v7008_v22 = vcombine.high %v337_v17, %v369_v18  ;;  %v272_v23 = vld [vmem:[%s10517_s1 + $0x800] sm:$0xff]  ;;  %v273_v25 = vld [vmem:[%s10517_s1 + $0x808] sm:$0xff]  ;;  %v7005_v27 = vcombine.low %v336_v14, %v368_v16  ;;  %v434_v9 = vld [vmem:[%s10517_s1 + $0xd10] sm:$0xff] }
   0x8   :  { %v304_v24 = vld [vmem:[%s10517_s1 + $0x900] sm:$0xff]  ;;  %v305_v26 = vld [vmem:[%s10517_s1 + $0x908] sm:$0xff]  ;;  %v7007_v28 = vcombine.low %v337_v17, %v369_v18  ;;  %v403_v10 = vld [vmem:[%s10517_s1 + $0xc18] sm:$0xff]  ;;  %v7137_v13 = vcombine.low %v466_v63, %v498_v0  ;;  %v7139_v14 = vcombine.low %v467_v1, %v499_v2  ;;  %v7074_v15 = vcombine.high %v402_v8, %v434_v9 }
   0x9   :  { %v6942_v29 = vcombine.high %v272_v23, %v304_v24  ;;  %v6944_v30 = vcombine.high %v273_v25, %v305_v26  ;;  %v208_v31 = vld [vmem:[%s10517_s1 + $0x600] sm:$0xff]  ;;  %v209_v33 = vld [vmem:[%s10517_s1 + $0x608] sm:$0xff]  ;;  %v6941_v35 = vcombine.low %v272_v23, %v304_v24  ;;  %v6943_v36 = vcombine.low %v273_v25, %v305_v26  ;;  %v435_v11 = vld [vmem:[%s10517_s1 + $0xd18] sm:$0xff] }
   0xa   :  { %3091 = vmatpush1.bf16.msra.mxu0 %v7069_v19  ;;  %3132 = vmatpush1.bf16.msra.mxu1 %v7071_v20  ;;  %v240_v32 = vld [vmem:[%s10517_s1 + $0x700] sm:$0xff]  ;;  %v241_v34 = vld [vmem:[%s10517_s1 + $0x708] sm:$0xff]  ;;  %v7076_v16 = vcombine.high %v403_v10, %v435_v11  ;;  %v338_v17 = vld [vmem:[%s10517_s1 + $0xa10] sm:$0xff] }
   0xb   :  { %3092 = vmatprep.subr.bf16.mxu0 %v7006_v21  ;;  %3133 = vmatprep.subr.bf16.mxu1 %v7008_v22  ;;  %v6878_v37 = vcombine.high %v208_v31, %v240_v32  ;;  %v6880_v38 = vcombine.high %v209_v33, %v241_v34  ;;  %v144_v39 = vld [vmem:[%s10517_s1 + $0x400] sm:$0xff]  ;;  %v145_v41 = vld [vmem:[%s10517_s1 + $0x408] sm:$0xff]  ;;  %v6877_v43 = vcombine.low %v208_v31, %v240_v32  ;;  %v370_v18 = vld [vmem:[%s10517_s1 + $0xb10] sm:$0xff] }
   0xc   :  { %v176_v40 = vld [vmem:[%s10517_s1 + $0x500] sm:$0xff]  ;;  %v177_v42 = vld [vmem:[%s10517_s1 + $0x508] sm:$0xff]  ;;  %v6879_v44 = vcombine.low %v209_v33, %v241_v34  ;;  %v339_v19 = vld [vmem:[%s10517_s1 + $0xa18] sm:$0xff]  ;;  %v7073_v21 = vcombine.low %v402_v8, %v434_v9  ;;  %v7075_v22 = vcombine.low %v403_v10, %v435_v11  ;;  %v7010_v23 = vcombine.high %v338_v17, %v370_v18 }
   0xd   :  { %v6814_v45 = vcombine.high %v144_v39, %v176_v40  ;;  %v6816_v46 = vcombine.high %v145_v41, %v177_v42  ;;  %v80_v47 = vld [vmem:[%s10517_s1 + $0x200] sm:$0xff]  ;;  %v81_v49 = vld [vmem:[%s10517_s1 + $0x208] sm:$0xff]  ;;  %v6813_v51 = vcombine.low %v144_v39, %v176_v40  ;;  %v6815_v52 = vcombine.low %v145_v41, %v177_v42  ;;  %v371_v20 = vld [vmem:[%s10517_s1 + $0xb18] sm:$0xff] }
   0xe   :  { %3093 = vmatpush1.bf16.msra.mxu0 %v7005_v27  ;;  %3134 = vmatpush1.bf16.msra.mxu1 %v7007_v28  ;;  %v112_v48 = vld [vmem:[%s10517_s1 + $0x300] sm:$0xff]  ;;  %v113_v50 = vld [vmem:[%s10517_s1 + $0x308] sm:$0xff]  ;;  %v7012_v24 = vcombine.high %v339_v19, %v371_v20  ;;  %v274_v25 = vld [vmem:[%s10517_s1 + $0x810] sm:$0xff] }
   0xf   :  { %3094 = vmatprep.subr.bf16.mxu0 %v6942_v29  ;;  %3135 = vmatprep.subr.bf16.mxu1 %v6944_v30  ;;  %v6750_v53 = vcombine.high %v80_v47, %v112_v48  ;;  %v6752_v54 = vcombine.high %v81_v49, %v113_v50  ;;  %v16_v55 = vld [vmem:[%s10517_s1] sm:$0xff]  ;;  %v17_v57 = vld [vmem:[%s10517_s1 + $0x8] sm:$0xff]  ;;  %v6749_v59 = vcombine.low %v80_v47, %v112_v48  ;;  %v306_v26 = vld [vmem:[%s10517_s1 + $0x910] sm:$0xff] }
  0x10   :  { %v48_v56 = vld [vmem:[%s10517_s1 + $0x100] sm:$0xff]  ;;  %v49_v58 = vld [vmem:[%s10517_s1 + $0x108] sm:$0xff]  ;;  %v6751_v60 = vcombine.low %v81_v49, %v113_v50  ;;  %v275_v27 = vld [vmem:[%s10517_s1 + $0x818] sm:$0xff]  ;;  %v7009_v29 = vcombine.low %v338_v17, %v370_v18  ;;  %v7011_v30 = vcombine.low %v339_v19, %v371_v20  ;;  %v6946_v31 = vcombine.high %v274_v25, %v306_v26 }
  0x11   :  { %v6686_v61 = vcombine.high %v16_v55, %v48_v56  ;;  %v6688_v62 = vcombine.high %v17_v57, %v49_v58  ;;  %v6685_v4 = vcombine.low %v16_v55, %v48_v56  ;;  %v6687_v5 = vcombine.low %v17_v57, %v49_v58  ;;  %v7357_v12 = vld [vmem:[%s10518_s0] sm:$0x1]  ;;  %v307_v28 = vld [vmem:[%s10517_s1 + $0x918] sm:$0xff]  ;;  %v210_v33 = vld [vmem:[%s10517_s1 + $0x610] sm:$0xff] }
  0x12   :  { %3095 = vmatpush1.bf16.msra.mxu0 %v6941_v35  ;;  %3136 = vmatpush1.bf16.msra.mxu1 %v6943_v36  ;;  %v6948_v32 = vcombine.high %v275_v27, %v307_v28  ;;  %v242_v34 = vld [vmem:[%s10517_s1 + $0x710] sm:$0xff]  ;;  %v211_v35 = vld [vmem:[%s10517_s1 + $0x618] sm:$0xff]  ;;  %v468_v1 = vld [vmem:[%s10517_s1 + $0xe20] sm:$0xff] }
  0x13   :  { %3096 = vmatprep.subr.bf16.mxu0 %v6878_v37  ;;  %3137 = vmatprep.subr.bf16.mxu1 %v6880_v38  ;;  %v243_v36 = vld [vmem:[%s10517_s1 + $0x718] sm:$0xff]  ;;  %v6945_v37 = vcombine.low %v274_v25, %v306_v26  ;;  %v6947_v38 = vcombine.low %v275_v27, %v307_v28  ;;  %v6882_v39 = vcombine.high %v210_v33, %v242_v34  ;;  %v146_v41 = vld [vmem:[%s10517_s1 + $0x410] sm:$0xff]  ;;  %v500_v2 = vld [vmem:[%s10517_s1 + $0xf20] sm:$0xff] }
  0x14   :  { %v6884_v40 = vcombine.high %v211_v35, %v243_v36  ;;  %v178_v42 = vld [vmem:[%s10517_s1 + $0x510] sm:$0xff]  ;;  %v7142_v8 = vcombine.high %v468_v1, %v500_v2  ;;  %v404_v10 = vld [vmem:[%s10517_s1 + $0xc20] sm:$0xff] }
  0x15   :  { %v6818_v47 = vcombine.high %v146_v41, %v178_v42  ;;  %v82_v49 = vld [vmem:[%s10517_s1 + $0x210] sm:$0xff]  ;;  %v436_v11 = vld [vmem:[%s10517_s1 + $0xd20] sm:$0xff] }
  0x16   :  { %3097 = vmatpush1.bf16.msra.mxu0 %v6877_v43  ;;  %3138 = vmatpush1.bf16.msra.mxu1 %v6879_v44  ;;  %v147_v43 = vld [vmem:[%s10517_s1 + $0x418] sm:$0xff]  ;;  %v114_v50 = vld [vmem:[%s10517_s1 + $0x310] sm:$0xff]  ;;  %v7078_v17 = vcombine.high %v404_v10, %v436_v11  ;;  %v340_v19 = vld [vmem:[%s10517_s1 + $0xa20] sm:$0xff] }
  0x17   :  { %3098 = vmatprep.subr.bf16.mxu0 %v6814_v45  ;;  %3139 = vmatprep.subr.bf16.mxu1 %v6816_v46  ;;  %v179_v44 = vld [vmem:[%s10517_s1 + $0x518] sm:$0xff]  ;;  %v6881_v45 = vcombine.low %v210_v33, %v242_v34  ;;  %v6883_v46 = vcombine.low %v211_v35, %v243_v36  ;;  %v6754_v55 = vcombine.high %v82_v49, %v114_v50  ;;  %v18_v57 = vld [vmem:[%s10517_s1 + $0x10] sm:$0xff]  ;;  %v372_v20 = vld [vmem:[%s10517_s1 + $0xb20] sm:$0xff] }
  0x18   :  { %v6820_v48 = vcombine.high %v147_v43, %v179_v44  ;;  %v50_v58 = vld [vmem:[%s10517_s1 + $0x110] sm:$0xff]  ;;  %v7014_v25 = vcombine.high %v340_v19, %v372_v20  ;;  %v276_v27 = vld [vmem:[%s10517_s1 + $0x820] sm:$0xff] }
  0x19   :  { %v6690_v63 = vcombine.high %v18_v57, %v50_v58  ;;  %v308_v28 = vld [vmem:[%s10517_s1 + $0x920] sm:$0xff] }
  0x1a   :  { %3099 = vmatpush1.bf16.msra.mxu0 %v6813_v51  ;;  %3140 = vmatpush1.bf16.msra.mxu1 %v6815_v52  ;;  %v83_v51 = vld [vmem:[%s10517_s1 + $0x218] sm:$0xff]  ;;  %v6950_v33 = vcombine.high %v276_v27, %v308_v28  ;;  %v212_v35 = vld [vmem:[%s10517_s1 + $0x620] sm:$0xff] }
  0x1b   :  { %3100 = vmatprep.subr.bf16.mxu0 %v6750_v53  ;;  %3141 = vmatprep.subr.bf16.mxu1 %v6752_v54  ;;  %v115_v52 = vld [vmem:[%s10517_s1 + $0x318] sm:$0xff]  ;;  %v6817_v53 = vcombine.low %v146_v41, %v178_v42  ;;  %v6819_v54 = vcombine.low %v147_v43, %v179_v44  ;;  %v244_v36 = vld [vmem:[%s10517_s1 + $0x720] sm:$0xff] }
  0x1c   :  { %v6756_v56 = vcombine.high %v83_v51, %v115_v52  ;;  %v6886_v41 = vcombine.high %v212_v35, %v244_v36  ;;  %v148_v43 = vld [vmem:[%s10517_s1 + $0x420] sm:$0xff] }
  0x1d   :  { %v180_v44 = vld [vmem:[%s10517_s1 + $0x520] sm:$0xff] }
  0x1e   :  { %3101 = vmatpush1.bf16.msra.mxu0 %v6749_v59  ;;  %3142 = vmatpush1.bf16.msra.mxu1 %v6751_v60  ;;  %v19_v59 = vld [vmem:[%s10517_s1 + $0x18] sm:$0xff] }
  0x1f   :  { %3102 = vmatprep.subr.bf16.mxu0 %v6686_v61  ;;  %3143 = vmatprep.subr.bf16.mxu1 %v6688_v62  ;;  %v51_v60 = vld [vmem:[%s10517_s1 + $0x118] sm:$0xff]  ;;  %v6753_v61 = vcombine.low %v82_v49, %v114_v50  ;;  %v6755_v62 = vcombine.low %v83_v51, %v115_v52  ;;  %v6822_v49 = vcombine.high %v148_v43, %v180_v44  ;;  %v84_v51 = vld [vmem:[%s10517_s1 + $0x220] sm:$0xff] }
  0x20   :  { %v6692_v0 = vcombine.high %v19_v59, %v51_v60  ;;  %v116_v52 = vld [vmem:[%s10517_s1 + $0x320] sm:$0xff] }
  0x22   :  { %3103 = vmatpush1.bf16.msra.mxu0 %v6685_v4  ;;  %3144 = vmatpush1.bf16.msra.mxu1 %v6687_v5  ;;  %v469_v4 = vld [vmem:[%s10517_s1 + $0xe28] sm:$0xff] }
  0x23   :  { %3170 = vmatprep.subr.bf16.mxu0 %v7138_v6  ;;  %3211 = vmatprep.subr.bf16.mxu1 %v7140_v7  ;;  %v501_v5 = vld [vmem:[%s10517_s1 + $0xf28] sm:$0xff]  ;;  %v6689_v6 = vcombine.low %v18_v57, %v50_v58  ;;  %v6691_v7 = vcombine.low %v19_v59, %v51_v60  ;;  %v6758_v57 = vcombine.high %v84_v51, %v116_v52  ;;  %v20_v59 = vld [vmem:[%s10517_s1 + $0x20] sm:$0xff] }
  0x24   :  { %v7144_v9 = vcombine.high %v469_v4, %v501_v5  ;;  %v52_v60 = vld [vmem:[%s10517_s1 + $0x120] sm:$0xff] }
  0x25   :  { %3121 = vmatmul.mubr.bf16.vlgmr.msra.gmra.mxu0 %v7357_v12  ;;  %3162 = vmatmul.mubr.bf16.vlgmr.msra.gmra.mxu1 %v7357_v12 }
  0x26   :  { %3171 = vmatpush1.bf16.msra.mxu0 %v7137_v13  ;;  %3212 = vmatpush1.bf16.msra.mxu1 %v7139_v14  ;;  %v405_v13 = vld [vmem:[%s10517_s1 + $0xc28] sm:$0xff] }
  0x27   :  { %3172 = vmatprep.subr.bf16.mxu0 %v7074_v15  ;;  %3213 = vmatprep.subr.bf16.mxu1 %v7076_v16  ;;  %v437_v14 = vld [vmem:[%s10517_s1 + $0xd28] sm:$0xff]  ;;  %v7141_v15 = vcombine.low %v468_v1, %v500_v2  ;;  %v7143_v16 = vcombine.low %v469_v4, %v501_v5  ;;  %v6694_v1 = vcombine.high %v20_v59, %v52_v60  ;;  %v470_v4 = vld [vmem:[%s10517_s1 + $0xe30] sm:$0xff] }
  0x28   :  { %3202 = vmatprep.mubr.bf16.mxu0 %v7204_v3  ;;  %3243 = vmatprep.mubr.bf16.mxu1 %v7204_v3  ;;  %v7080_v18 = vcombine.high %v405_v13, %v437_v14  ;;  %v502_v5 = vld [vmem:[%s10517_s1 + $0xf30] sm:$0xff] }
  0x2a   :  { %3173 = vmatpush1.bf16.msra.mxu0 %v7073_v21  ;;  %3214 = vmatpush1.bf16.msra.mxu1 %v7075_v22  ;;  %v341_v21 = vld [vmem:[%s10517_s1 + $0xa28] sm:$0xff] }
  0x2b   :  { %3174 = vmatprep.subr.bf16.mxu0 %v7010_v23  ;;  %3215 = vmatprep.subr.bf16.mxu1 %v7012_v24  ;;  %v373_v22 = vld [vmem:[%s10517_s1 + $0xb28] sm:$0xff]  ;;  %v7077_v23 = vcombine.low %v404_v10, %v436_v11  ;;  %v7079_v24 = vcombine.low %v405_v13, %v437_v14  ;;  %v7146_v10 = vcombine.high %v470_v4, %v502_v5  ;;  %v406_v13 = vld [vmem:[%s10517_s1 + $0xc30] sm:$0xff] }
  0x2c   :  { %v7016_v26 = vcombine.high %v341_v21, %v373_v22  ;;  %v438_v14 = vld [vmem:[%s10517_s1 + $0xd30] sm:$0xff] }
  0x2e   :  { %3175 = vmatpush1.bf16.msra.mxu0 %v7009_v29  ;;  %3216 = vmatpush1.bf16.msra.mxu1 %v7011_v30  ;;  %v277_v29 = vld [vmem:[%s10517_s1 + $0x828] sm:$0xff] }
  0x2f   :  { %3176 = vmatprep.subr.bf16.mxu0 %v6946_v31  ;;  %3217 = vmatprep.subr.bf16.mxu1 %v6948_v32  ;;  %v309_v30 = vld [vmem:[%s10517_s1 + $0x928] sm:$0xff]  ;;  %v7013_v31 = vcombine.low %v340_v19, %v372_v20  ;;  %v7015_v32 = vcombine.low %v341_v21, %v373_v22  ;;  %v7082_v19 = vcombine.high %v406_v13, %v438_v14  ;;  %v342_v21 = vld [vmem:[%s10517_s1 + $0xa30] sm:$0xff] }
  0x30   :  { %v6952_v34 = vcombine.high %v277_v29, %v309_v30  ;;  %v374_v22 = vld [vmem:[%s10517_s1 + $0xb30] sm:$0xff] }
  0x32   :  { %3177 = vmatpush1.bf16.msra.mxu0 %v6945_v37  ;;  %3218 = vmatpush1.bf16.msra.mxu1 %v6947_v38  ;;  %v213_v37 = vld [vmem:[%s10517_s1 + $0x628] sm:$0xff] }
  0x33   :  { %3178 = vmatprep.subr.bf16.mxu0 %v6882_v39  ;;  %3219 = vmatprep.subr.bf16.mxu1 %v6884_v40  ;;  %v245_v38 = vld [vmem:[%s10517_s1 + $0x728] sm:$0xff]  ;;  %v6949_v39 = vcombine.low %v276_v27, %v308_v28  ;;  %v6951_v40 = vcombine.low %v277_v29, %v309_v30  ;;  %v7018_v27 = vcombine.high %v342_v21, %v374_v22  ;;  %v278_v29 = vld [vmem:[%s10517_s1 + $0x830] sm:$0xff] }
  0x34   :  { %v6888_v42 = vcombine.high %v213_v37, %v245_v38  ;;  %v310_v30 = vld [vmem:[%s10517_s1 + $0x930] sm:$0xff] }
  0x36   :  { %3179 = vmatpush1.bf16.msra.mxu0 %v6881_v45  ;;  %3220 = vmatpush1.bf16.msra.mxu1 %v6883_v46  ;;  %v149_v45 = vld [vmem:[%s10517_s1 + $0x428] sm:$0xff] }
  0x37   :  { %3180 = vmatprep.subr.bf16.mxu0 %v6818_v47  ;;  %3221 = vmatprep.subr.bf16.mxu1 %v6820_v48  ;;  %v181_v46 = vld [vmem:[%s10517_s1 + $0x528] sm:$0xff]  ;;  %v6885_v47 = vcombine.low %v212_v35, %v244_v36  ;;  %v6887_v48 = vcombine.low %v213_v37, %v245_v38  ;;  %v6954_v35 = vcombine.high %v278_v29, %v310_v30  ;;  %v214_v37 = vld [vmem:[%s10517_s1 + $0x630] sm:$0xff] }
  0x38   :  { %v6824_v50 = vcombine.high %v149_v45, %v181_v46  ;;  %v246_v38 = vld [vmem:[%s10517_s1 + $0x730] sm:$0xff] }
  0x3a   :  { %3181 = vmatpush1.bf16.msra.mxu0 %v6817_v53  ;;  %3222 = vmatpush1.bf16.msra.mxu1 %v6819_v54  ;;  %v85_v53 = vld [vmem:[%s10517_s1 + $0x228] sm:$0xff] }
  0x3b   :  { %3182 = vmatprep.subr.bf16.mxu0 %v6754_v55  ;;  %3223 = vmatprep.subr.bf16.mxu1 %v6756_v56  ;;  %v117_v54 = vld [vmem:[%s10517_s1 + $0x328] sm:$0xff]  ;;  %v6821_v55 = vcombine.low %v148_v43, %v180_v44  ;;  %v6823_v56 = vcombine.low %v149_v45, %v181_v46  ;;  %v6890_v43 = vcombine.high %v214_v37, %v246_v38  ;;  %v150_v45 = vld [vmem:[%s10517_s1 + $0x430] sm:$0xff] }
  0x3c   :  { %v6760_v58 = vcombine.high %v85_v53, %v117_v54  ;;  %v182_v46 = vld [vmem:[%s10517_s1 + $0x530] sm:$0xff] }
  0x3e   :  { %3183 = vmatpush1.bf16.msra.mxu0 %v6753_v61  ;;  %3224 = vmatpush1.bf16.msra.mxu1 %v6755_v62  ;;  %v21_v61 = vld [vmem:[%s10517_s1 + $0x28] sm:$0xff] }
  0x3f   :  { %3184 = vmatprep.subr.bf16.mxu0 %v6690_v63  ;;  %3225 = vmatprep.subr.bf16.mxu1 %v6692_v0  ;;  %v53_v62 = vld [vmem:[%s10517_s1 + $0x128] sm:$0xff]  ;;  %v6757_v63 = vcombine.low %v84_v51, %v116_v52  ;;  %v6759_v0 = vcombine.low %v85_v53, %v117_v54  ;;  %v6826_v51 = vcombine.high %v150_v45, %v182_v46  ;;  %v86_v53 = vld [vmem:[%s10517_s1 + $0x230] sm:$0xff] }
  0x40   :  { %v6696_v2 = vcombine.high %v21_v61, %v53_v62  ;;  %v118_v54 = vld [vmem:[%s10517_s1 + $0x330] sm:$0xff] }
  0x42   :  { %3185 = vmatpush1.bf16.msra.mxu0 %v6689_v6  ;;  %3226 = vmatpush1.bf16.msra.mxu1 %v6691_v7  ;;  %v471_v6 = vld [vmem:[%s10517_s1 + $0xe38] sm:$0xff] }
  0x43   :  { %3252 = vmatprep.subr.bf16.mxu0 %v7142_v8  ;;  %3293 = vmatprep.subr.bf16.mxu1 %v7144_v9  ;;  %v503_v7 = vld [vmem:[%s10517_s1 + $0xf38] sm:$0xff]  ;;  %v6693_v8 = vcombine.low %v20_v59, %v52_v60  ;;  %v6695_v9 = vcombine.low %v21_v61, %v53_v62  ;;  %v6762_v59 = vcombine.high %v86_v53, %v118_v54  ;;  %v22_v61 = vld [vmem:[%s10517_s1 + $0x30] sm:$0xff] }
  0x44   :  { %v7148_v11 = vcombine.high %v471_v6, %v503_v7  ;;  %v54_v62 = vld [vmem:[%s10517_s1 + $0x130] sm:$0xff] }
  0x45   :  { %3203 = vmatmul.mubr.bf16.vlgmr.msra.gmra.mxu0 %v7357_v12  ;;  %3244 = vmatmul.mubr.bf16.vlgmr.msra.gmra.mxu1 %v7357_v12 }
  0x46   :  { %3253 = vmatpush1.bf16.msra.mxu0 %v7141_v15  ;;  %3294 = vmatpush1.bf16.msra.mxu1 %v7143_v16  ;;  %v407_v15 = vld [vmem:[%s10517_s1 + $0xc38] sm:$0xff] }
  0x47   :  { %3254 = vmatprep.subr.bf16.mxu0 %v7078_v17  ;;  %3295 = vmatprep.subr.bf16.mxu1 %v7080_v18  ;;  %v439_v16 = vld [vmem:[%s10517_s1 + $0xd38] sm:$0xff]  ;;  %v7145_v17 = vcombine.low %v470_v4, %v502_v5  ;;  %v7147_v18 = vcombine.low %v471_v6, %v503_v7  ;;  %v6698_v4 = vcombine.high %v22_v61, %v54_v62  ;;  %v472_v6 = vld [vmem:[%s10517_s1 + $0xe40] sm:$0xff] }
  0x48   :  { %3284 = vmatprep.mubr.bf16.mxu0 %v7204_v3  ;;  %3325 = vmatprep.mubr.bf16.mxu1 %v7204_v3  ;;  %v7084_v20 = vcombine.high %v407_v15, %v439_v16  ;;  %v504_v7 = vld [vmem:[%s10517_s1 + $0xf40] sm:$0xff] }
  0x4a   :  { %3255 = vmatpush1.bf16.msra.mxu0 %v7077_v23  ;;  %3296 = vmatpush1.bf16.msra.mxu1 %v7079_v24  ;;  %v343_v23 = vld [vmem:[%s10517_s1 + $0xa38] sm:$0xff] }
  0x4b   :  { %3256 = vmatprep.subr.bf16.mxu0 %v7014_v25  ;;  %3297 = vmatprep.subr.bf16.mxu1 %v7016_v26  ;;  %v375_v24 = vld [vmem:[%s10517_s1 + $0xb38] sm:$0xff]  ;;  %v7081_v25 = vcombine.low %v406_v13, %v438_v14  ;;  %v7083_v26 = vcombine.low %v407_v15, %v439_v16  ;;  %v7150_v13 = vcombine.high %v472_v6, %v504_v7  ;;  %v408_v15 = vld [vmem:[%s10517_s1 + $0xc40] sm:$0xff] }
  0x4c   :  { %v7020_v28 = vcombine.high %v343_v23, %v375_v24  ;;  %v440_v16 = vld [vmem:[%s10517_s1 + $0xd40] sm:$0xff] }
  0x4e   :  { %3257 = vmatpush1.bf16.msra.mxu0 %v7013_v31  ;;  %3298 = vmatpush1.bf16.msra.mxu1 %v7015_v32  ;;  %v279_v31 = vld [vmem:[%s10517_s1 + $0x838] sm:$0xff] }
  0x4f   :  { %3258 = vmatprep.subr.bf16.mxu0 %v6950_v33  ;;  %3299 = vmatprep.subr.bf16.mxu1 %v6952_v34  ;;  %v311_v32 = vld [vmem:[%s10517_s1 + $0x938] sm:$0xff]  ;;  %v7017_v33 = vcombine.low %v342_v21, %v374_v22  ;;  %v7019_v34 = vcombine.low %v343_v23, %v375_v24  ;;  %v7086_v21 = vcombine.high %v408_v15, %v440_v16  ;;  %v344_v23 = vld [vmem:[%s10517_s1 + $0xa40] sm:$0xff] }
  0x50   :  { %v6956_v36 = vcombine.high %v279_v31, %v311_v32  ;;  %v376_v24 = vld [vmem:[%s10517_s1 + $0xb40] sm:$0xff] }
  0x52   :  { %3259 = vmatpush1.bf16.msra.mxu0 %v6949_v39  ;;  %3300 = vmatpush1.bf16.msra.mxu1 %v6951_v40  ;;  %v215_v39 = vld [vmem:[%s10517_s1 + $0x638] sm:$0xff] }
  0x53   :  { %3260 = vmatprep.subr.bf16.mxu0 %v6886_v41  ;;  %3301 = vmatprep.subr.bf16.mxu1 %v6888_v42  ;;  %v247_v40 = vld [vmem:[%s10517_s1 + $0x738] sm:$0xff]  ;;  %v6953_v41 = vcombine.low %v278_v29, %v310_v30  ;;  %v6955_v42 = vcombine.low %v279_v31, %v311_v32  ;;  %v7022_v29 = vcombine.high %v344_v23, %v376_v24  ;;  %v280_v31 = vld [vmem:[%s10517_s1 + $0x840] sm:$0xff] }
  0x54   :  { %v6892_v44 = vcombine.high %v215_v39, %v247_v40  ;;  %v312_v32 = vld [vmem:[%s10517_s1 + $0x940] sm:$0xff] }
  0x56   :  { %3261 = vmatpush1.bf16.msra.mxu0 %v6885_v47  ;;  %3302 = vmatpush1.bf16.msra.mxu1 %v6887_v48  ;;  %v151_v47 = vld [vmem:[%s10517_s1 + $0x438] sm:$0xff] }
  0x57   :  { %3262 = vmatprep.subr.bf16.mxu0 %v6822_v49  ;;  %3303 = vmatprep.subr.bf16.mxu1 %v6824_v50  ;;  %v183_v48 = vld [vmem:[%s10517_s1 + $0x538] sm:$0xff]  ;;  %v6889_v49 = vcombine.low %v214_v37, %v246_v38  ;;  %v6891_v50 = vcombine.low %v215_v39, %v247_v40  ;;  %v6958_v37 = vcombine.high %v280_v31, %v312_v32  ;;  %v216_v39 = vld [vmem:[%s10517_s1 + $0x640] sm:$0xff] }
  0x58   :  { %v6828_v52 = vcombine.high %v151_v47, %v183_v48  ;;  %v248_v40 = vld [vmem:[%s10517_s1 + $0x740] sm:$0xff] }
  0x5a   :  { %3263 = vmatpush1.bf16.msra.mxu0 %v6821_v55  ;;  %3304 = vmatpush1.bf16.msra.mxu1 %v6823_v56  ;;  %v87_v55 = vld [vmem:[%s10517_s1 + $0x238] sm:$0xff] }
  0x5b   :  { %3264 = vmatprep.subr.bf16.mxu0 %v6758_v57  ;;  %3305 = vmatprep.subr.bf16.mxu1 %v6760_v58  ;;  %v119_v56 = vld [vmem:[%s10517_s1 + $0x338] sm:$0xff]  ;;  %v6825_v57 = vcombine.low %v150_v45, %v182_v46  ;;  %v6827_v58 = vcombine.low %v151_v47, %v183_v48  ;;  %v6894_v45 = vcombine.high %v216_v39, %v248_v40  ;;  %v152_v47 = vld [vmem:[%s10517_s1 + $0x440] sm:$0xff] }
  0x5c   :  { %v6764_v60 = vcombine.high %v87_v55, %v119_v56  ;;  %v184_v48 = vld [vmem:[%s10517_s1 + $0x540] sm:$0xff] }
  0x5e   :  { %3265 = vmatpush1.bf16.msra.mxu0 %v6757_v63  ;;  %3306 = vmatpush1.bf16.msra.mxu1 %v6759_v0  ;;  %v23_v63 = vld [vmem:[%s10517_s1 + $0x38] sm:$0xff] }
  0x5f   :  { %3266 = vmatprep.subr.bf16.mxu0 %v6694_v1  ;;  %3307 = vmatprep.subr.bf16.mxu1 %v6696_v2  ;;  %v55_v0 = vld [vmem:[%s10517_s1 + $0x138] sm:$0xff]  ;;  %v6761_v1 = vcombine.low %v86_v53, %v118_v54  ;;  %v6763_v2 = vcombine.low %v87_v55, %v119_v56  ;;  %v6830_v53 = vcombine.high %v152_v47, %v184_v48  ;;  %v88_v55 = vld [vmem:[%s10517_s1 + $0x240] sm:$0xff] }
  0x60   :  { %v6700_v5 = vcombine.high %v23_v63, %v55_v0  ;;  %v120_v56 = vld [vmem:[%s10517_s1 + $0x340] sm:$0xff] }
  0x62   :  { %3267 = vmatpush1.bf16.msra.mxu0 %v6693_v8  ;;  %3308 = vmatpush1.bf16.msra.mxu1 %v6695_v9  ;;  %v473_v8 = vld [vmem:[%s10517_s1 + $0xe48] sm:$0xff] }
  0x63   :  { %3334 = vmatprep.subr.bf16.mxu0 %v7146_v10  ;;  %3375 = vmatprep.subr.bf16.mxu1 %v7148_v11  ;;  %v505_v9 = vld [vmem:[%s10517_s1 + $0xf48] sm:$0xff]  ;;  %v6697_v10 = vcombine.low %v22_v61, %v54_v62  ;;  %v6699_v11 = vcombine.low %v23_v63, %v55_v0  ;;  %v6766_v61 = vcombine.high %v88_v55, %v120_v56  ;;  %v24_v63 = vld [vmem:[%s10517_s1 + $0x40] sm:$0xff] }
  0x64   :  { %v7152_v14 = vcombine.high %v473_v8, %v505_v9  ;;  %v56_v0 = vld [vmem:[%s10517_s1 + $0x140] sm:$0xff] }
  0x65   :  { %3285 = vmatmul.mubr.bf16.vlgmr.msra.gmra.mxu0 %v7357_v12  ;;  %3326 = vmatmul.mubr.bf16.vlgmr.msra.gmra.mxu1 %v7357_v12 }
  0x66   :  { %3335 = vmatpush1.bf16.msra.mxu0 %v7145_v17  ;;  %3376 = vmatpush1.bf16.msra.mxu1 %v7147_v18  ;;  %v409_v17 = vld [vmem:[%s10517_s1 + $0xc48] sm:$0xff] }
  0x67   :  { %3336 = vmatprep.subr.bf16.mxu0 %v7082_v19  ;;  %3377 = vmatprep.subr.bf16.mxu1 %v7084_v20  ;;  %v441_v18 = vld [vmem:[%s10517_s1 + $0xd48] sm:$0xff]  ;;  %v7149_v19 = vcombine.low %v472_v6, %v504_v7  ;;  %v7151_v20 = vcombine.low %v473_v8, %v505_v9  ;;  %v6702_v6 = vcombine.high %v24_v63, %v56_v0  ;;  %v474_v8 = vld [vmem:[%s10517_s1 + $0xe50] sm:$0xff] }
  0x68   :  { %3366 = vmatprep.mubr.bf16.mxu0 %v7204_v3  ;;  %3407 = vmatprep.mubr.bf16.mxu1 %v7204_v3  ;;  %v7088_v22 = vcombine.high %v409_v17, %v441_v18  ;;  %v506_v9 = vld [vmem:[%s10517_s1 + $0xf50] sm:$0xff] }
  0x6a   :  { %3337 = vmatpush1.bf16.msra.mxu0 %v7081_v25  ;;  %3378 = vmatpush1.bf16.msra.mxu1 %v7083_v26  ;;  %v345_v25 = vld [vmem:[%s10517_s1 + $0xa48] sm:$0xff] }
  0x6b   :  { %3338 = vmatprep.subr.bf16.mxu0 %v7018_v27  ;;  %3379 = vmatprep.subr.bf16.mxu1 %v7020_v28  ;;  %v377_v26 = vld [vmem:[%s10517_s1 + $0xb48] sm:$0xff]  ;;  %v7085_v27 = vcombine.low %v408_v15, %v440_v16  ;;  %v7087_v28 = vcombine.low %v409_v17, %v441_v18  ;;  %v7154_v15 = vcombine.high %v474_v8, %v506_v9  ;;  %v410_v17 = vld [vmem:[%s10517_s1 + $0xc50] sm:$0xff] }
  0x6c   :  { %v7024_v30 = vcombine.high %v345_v25, %v377_v26  ;;  %v442_v18 = vld [vmem:[%s10517_s1 + $0xd50] sm:$0xff] }
  0x6e   :  { %3339 = vmatpush1.bf16.msra.mxu0 %v7017_v33  ;;  %3380 = vmatpush1.bf16.msra.mxu1 %v7019_v34  ;;  %v281_v33 = vld [vmem:[%s10517_s1 + $0x848] sm:$0xff] }
  0x6f   :  { %3340 = vmatprep.subr.bf16.mxu0 %v6954_v35  ;;  %3381 = vmatprep.subr.bf16.mxu1 %v6956_v36  ;;  %v313_v34 = vld [vmem:[%s10517_s1 + $0x948] sm:$0xff]  ;;  %v7021_v35 = vcombine.low %v344_v23, %v376_v24  ;;  %v7023_v36 = vcombine.low %v345_v25, %v377_v26  ;;  %v7090_v23 = vcombine.high %v410_v17, %v442_v18  ;;  %v346_v25 = vld [vmem:[%s10517_s1 + $0xa50] sm:$0xff] }
  0x70   :  { %v6960_v38 = vcombine.high %v281_v33, %v313_v34  ;;  %v378_v26 = vld [vmem:[%s10517_s1 + $0xb50] sm:$0xff] }
  0x72   :  { %3341 = vmatpush1.bf16.msra.mxu0 %v6953_v41  ;;  %3382 = vmatpush1.bf16.msra.mxu1 %v6955_v42  ;;  %v217_v41 = vld [vmem:[%s10517_s1 + $0x648] sm:$0xff] }
  0x73   :  { %3342 = vmatprep.subr.bf16.mxu0 %v6890_v43  ;;  %3383 = vmatprep.subr.bf16.mxu1 %v6892_v44  ;;  %v249_v42 = vld [vmem:[%s10517_s1 + $0x748] sm:$0xff]  ;;  %v6957_v43 = vcombine.low %v280_v31, %v312_v32  ;;  %v6959_v44 = vcombine.low %v281_v33, %v313_v34  ;;  %v7026_v31 = vcombine.high %v346_v25, %v378_v26  ;;  %v282_v33 = vld [vmem:[%s10517_s1 + $0x850] sm:$0xff] }
  0x74   :  { %v6896_v46 = vcombine.high %v217_v41, %v249_v42  ;;  %v314_v34 = vld [vmem:[%s10517_s1 + $0x950] sm:$0xff] }
  0x76   :  { %3343 = vmatpush1.bf16.msra.mxu0 %v6889_v49  ;;  %3384 = vmatpush1.bf16.msra.mxu1 %v6891_v50  ;;  %v153_v49 = vld [vmem:[%s10517_s1 + $0x448] sm:$0xff] }
  0x77   :  { %3344 = vmatprep.subr.bf16.mxu0 %v6826_v51  ;;  %3385 = vmatprep.subr.bf16.mxu1 %v6828_v52  ;;  %v185_v50 = vld [vmem:[%s10517_s1 + $0x548] sm:$0xff]  ;;  %v6893_v51 = vcombine.low %v216_v39, %v248_v40  ;;  %v6895_v52 = vcombine.low %v217_v41, %v249_v42  ;;  %v6962_v39 = vcombine.high %v282_v33, %v314_v34  ;;  %v218_v41 = vld [vmem:[%s10517_s1 + $0x650] sm:$0xff] }
  0x78   :  { %v6832_v54 = vcombine.high %v153_v49, %v185_v50  ;;  %v250_v42 = vld [vmem:[%s10517_s1 + $0x750] sm:$0xff] }
  0x7a   :  { %3345 = vmatpush1.bf16.msra.mxu0 %v6825_v57  ;;  %3386 = vmatpush1.bf16.msra.mxu1 %v6827_v58  ;;  %v89_v57 = vld [vmem:[%s10517_s1 + $0x248] sm:$0xff] }
  0x7b   :  { %3346 = vmatprep.subr.bf16.mxu0 %v6762_v59  ;;  %3387 = vmatprep.subr.bf16.mxu1 %v6764_v60  ;;  %v121_v58 = vld [vmem:[%s10517_s1 + $0x348] sm:$0xff]  ;;  %v6829_v59 = vcombine.low %v152_v47, %v184_v48  ;;  %v6831_v60 = vcombine.low %v153_v49, %v185_v50  ;;  %v6898_v47 = vcombine.high %v218_v41, %v250_v42  ;;  %v154_v49 = vld [vmem:[%s10517_s1 + $0x450] sm:$0xff] }
  0x7c   :  { %v6768_v62 = vcombine.high %v89_v57, %v121_v58  ;;  %v186_v50 = vld [vmem:[%s10517_s1 + $0x550] sm:$0xff] }
  0x7e   :  { %3347 = vmatpush1.bf16.msra.mxu0 %v6761_v1  ;;  %3388 = vmatpush1.bf16.msra.mxu1 %v6763_v2  ;;  %v25_v1 = vld [vmem:[%s10517_s1 + $0x48] sm:$0xff] }
  0x7f   :  { %3348 = vmatprep.subr.bf16.mxu0 %v6698_v4  ;;  %3389 = vmatprep.subr.bf16.mxu1 %v6700_v5  ;;  %v57_v2 = vld [vmem:[%s10517_s1 + $0x148] sm:$0xff]  ;;  %v6765_v4 = vcombine.low %v88_v55, %v120_v56  ;;  %v6767_v5 = vcombine.low %v89_v57, %v121_v58  ;;  %v6834_v55 = vcombine.high %v154_v49, %v186_v50  ;;  %v90_v57 = vld [vmem:[%s10517_s1 + $0x250] sm:$0xff] }
  0x80   :  { %v6704_v7 = vcombine.high %v25_v1, %v57_v2  ;;  %v122_v58 = vld [vmem:[%s10517_s1 + $0x350] sm:$0xff] }
  0x82   :  { %3349 = vmatpush1.bf16.msra.mxu0 %v6697_v10  ;;  %3390 = vmatpush1.bf16.msra.mxu1 %v6699_v11  ;;  %v475_v10 = vld [vmem:[%s10517_s1 + $0xe58] sm:$0xff] }
  0x83   :  { %3416 = vmatprep.subr.bf16.mxu0 %v7150_v13  ;;  %3457 = vmatprep.subr.bf16.mxu1 %v7152_v14  ;;  %v507_v11 = vld [vmem:[%s10517_s1 + $0xf58] sm:$0xff]  ;;  %v6701_v13 = vcombine.low %v24_v63, %v56_v0  ;;  %v6703_v14 = vcombine.low %v25_v1, %v57_v2  ;;  %v6770_v63 = vcombine.high %v90_v57, %v122_v58  ;;  %v26_v1 = vld [vmem:[%s10517_s1 + $0x50] sm:$0xff] }
  0x84   :  { %v7156_v16 = vcombine.high %v475_v10, %v507_v11  ;;  %v58_v2 = vld [vmem:[%s10517_s1 + $0x150] sm:$0xff] }
  0x85   :  { %3367 = vmatmul.mubr.bf16.vlgmr.msra.gmra.mxu0 %v7357_v12  ;;  %3408 = vmatmul.mubr.bf16.vlgmr.msra.gmra.mxu1 %v7357_v12 }
  0x86   :  { %3417 = vmatpush1.bf16.msra.mxu0 %v7149_v19  ;;  %3458 = vmatpush1.bf16.msra.mxu1 %v7151_v20  ;;  %v411_v19 = vld [vmem:[%s10517_s1 + $0xc58] sm:$0xff] }
  0x87   :  { %3418 = vmatprep.subr.bf16.mxu0 %v7086_v21  ;;  %3459 = vmatprep.subr.bf16.mxu1 %v7088_v22  ;;  %v443_v20 = vld [vmem:[%s10517_s1 + $0xd58] sm:$0xff]  ;;  %v7153_v21 = vcombine.low %v474_v8, %v506_v9  ;;  %v7155_v22 = vcombine.low %v475_v10, %v507_v11  ;;  %v6706_v8 = vcombine.high %v26_v1, %v58_v2  ;;  %v476_v10 = vld [vmem:[%s10517_s1 + $0xe60] sm:$0xff] }
  0x88   :  { %3448 = vmatprep.mubr.bf16.mxu0 %v7204_v3  ;;  %3489 = vmatprep.mubr.bf16.mxu1 %v7204_v3  ;;  %v7092_v24 = vcombine.high %v411_v19, %v443_v20  ;;  %v508_v11 = vld [vmem:[%s10517_s1 + $0xf60] sm:$0xff] }
  0x8a   :  { %3419 = vmatpush1.bf16.msra.mxu0 %v7085_v27  ;;  %3460 = vmatpush1.bf16.msra.mxu1 %v7087_v28  ;;  %v347_v27 = vld [vmem:[%s10517_s1 + $0xa58] sm:$0xff] }
  0x8b   :  { %3420 = vmatprep.subr.bf16.mxu0 %v7022_v29  ;;  %3461 = vmatprep.subr.bf16.mxu1 %v7024_v30  ;;  %v379_v28 = vld [vmem:[%s10517_s1 + $0xb58] sm:$0xff]  ;;  %v7089_v29 = vcombine.low %v410_v17, %v442_v18  ;;  %v7091_v30 = vcombine.low %v411_v19, %v443_v20  ;;  %v7158_v17 = vcombine.high %v476_v10, %v508_v11  ;;  %v412_v19 = vld [vmem:[%s10517_s1 + $0xc60] sm:$0xff] }
  0x8c   :  { %v7028_v32 = vcombine.high %v347_v27, %v379_v28  ;;  %v444_v20 = vld [vmem:[%s10517_s1 + $0xd60] sm:$0xff] }
  0x8e   :  { %3421 = vmatpush1.bf16.msra.mxu0 %v7021_v35  ;;  %3462 = vmatpush1.bf16.msra.mxu1 %v7023_v36  ;;  %v283_v35 = vld [vmem:[%s10517_s1 + $0x858] sm:$0xff] }
  0x8f   :  { %3422 = vmatprep.subr.bf16.mxu0 %v6958_v37  ;;  %3463 = vmatprep.subr.bf16.mxu1 %v6960_v38  ;;  %v315_v36 = vld [vmem:[%s10517_s1 + $0x958] sm:$0xff]  ;;  %v7025_v37 = vcombine.low %v346_v25, %v378_v26  ;;  %v7027_v38 = vcombine.low %v347_v27, %v379_v28  ;;  %v7094_v25 = vcombine.high %v412_v19, %v444_v20  ;;  %v348_v27 = vld [vmem:[%s10517_s1 + $0xa60] sm:$0xff] }
  0x90   :  { %v6964_v40 = vcombine.high %v283_v35, %v315_v36  ;;  %v380_v28 = vld [vmem:[%s10517_s1 + $0xb60] sm:$0xff] }
  0x92   :  { %3423 = vmatpush1.bf16.msra.mxu0 %v6957_v43  ;;  %3464 = vmatpush1.bf16.msra.mxu1 %v6959_v44  ;;  %v219_v43 = vld [vmem:[%s10517_s1 + $0x658] sm:$0xff] }
  0x93   :  { %3424 = vmatprep.subr.bf16.mxu0 %v6894_v45  ;;  %3465 = vmatprep.subr.bf16.mxu1 %v6896_v46  ;;  %v251_v44 = vld [vmem:[%s10517_s1 + $0x758] sm:$0xff]  ;;  %v6961_v45 = vcombine.low %v282_v33, %v314_v34  ;;  %v6963_v46 = vcombine.low %v283_v35, %v315_v36  ;;  %v7030_v33 = vcombine.high %v348_v27, %v380_v28  ;;  %v284_v35 = vld [vmem:[%s10517_s1 + $0x860] sm:$0xff] }
  0x94   :  { %v6900_v48 = vcombine.high %v219_v43, %v251_v44  ;;  %v316_v36 = vld [vmem:[%s10517_s1 + $0x960] sm:$0xff] }
  0x96   :  { %3425 = vmatpush1.bf16.msra.mxu0 %v6893_v51  ;;  %3466 = vmatpush1.bf16.msra.mxu1 %v6895_v52  ;;  %v155_v51 = vld [vmem:[%s10517_s1 + $0x458] sm:$0xff] }
  0x97   :  { %3426 = vmatprep.subr.bf16.mxu0 %v6830_v53  ;;  %3467 = vmatprep.subr.bf16.mxu1 %v6832_v54  ;;  %v187_v52 = vld [vmem:[%s10517_s1 + $0x558] sm:$0xff]  ;;  %v6897_v53 = vcombine.low %v218_v41, %v250_v42  ;;  %v6899_v54 = vcombine.low %v219_v43, %v251_v44  ;;  %v6966_v41 = vcombine.high %v284_v35, %v316_v36  ;;  %v220_v43 = vld [vmem:[%s10517_s1 + $0x660] sm:$0xff] }
  0x98   :  { %v6836_v56 = vcombine.high %v155_v51, %v187_v52  ;;  %v252_v44 = vld [vmem:[%s10517_s1 + $0x760] sm:$0xff] }
  0x9a   :  { %3427 = vmatpush1.bf16.msra.mxu0 %v6829_v59  ;;  %3468 = vmatpush1.bf16.msra.mxu1 %v6831_v60  ;;  %v91_v59 = vld [vmem:[%s10517_s1 + $0x258] sm:$0xff] }
  0x9b   :  { %3428 = vmatprep.subr.bf16.mxu0 %v6766_v61  ;;  %3469 = vmatprep.subr.bf16.mxu1 %v6768_v62  ;;  %v123_v60 = vld [vmem:[%s10517_s1 + $0x358] sm:$0xff]  ;;  %v6833_v61 = vcombine.low %v154_v49, %v186_v50  ;;  %v6835_v62 = vcombine.low %v155_v51, %v187_v52  ;;  %v6902_v49 = vcombine.high %v220_v43, %v252_v44  ;;  %v156_v51 = vld [vmem:[%s10517_s1 + $0x460] sm:$0xff] }
  0x9c   :  { %v6772_v0 = vcombine.high %v91_v59, %v123_v60  ;;  %v188_v52 = vld [vmem:[%s10517_s1 + $0x560] sm:$0xff] }
  0x9e   :  { %3429 = vmatpush1.bf16.msra.mxu0 %v6765_v4  ;;  %3470 = vmatpush1.bf16.msra.mxu1 %v6767_v5  ;;  %v27_v4 = vld [vmem:[%s10517_s1 + $0x58] sm:$0xff] }
  0x9f   :  { %3430 = vmatprep.subr.bf16.mxu0 %v6702_v6  ;;  %3471 = vmatprep.subr.bf16.mxu1 %v6704_v7  ;;  %v59_v5 = vld [vmem:[%s10517_s1 + $0x158] sm:$0xff]  ;;  %v6769_v6 = vcombine.low %v90_v57, %v122_v58  ;;  %v6771_v7 = vcombine.low %v91_v59, %v123_v60  ;;  %v6838_v57 = vcombine.high %v156_v51, %v188_v52  ;;  %v92_v59 = vld [vmem:[%s10517_s1 + $0x260] sm:$0xff] }
  0xa0   :  { %v6708_v9 = vcombine.high %v27_v4, %v59_v5  ;;  %v124_v60 = vld [vmem:[%s10517_s1 + $0x360] sm:$0xff] }
  0xa2   :  { %3431 = vmatpush1.bf16.msra.mxu0 %v6701_v13  ;;  %3472 = vmatpush1.bf16.msra.mxu1 %v6703_v14  ;;  %v477_v13 = vld [vmem:[%s10517_s1 + $0xe68] sm:$0xff] }
  0xa3   :  { %3498 = vmatprep.subr.bf16.mxu0 %v7154_v15  ;;  %3539 = vmatprep.subr.bf16.mxu1 %v7156_v16  ;;  %v509_v14 = vld [vmem:[%s10517_s1 + $0xf68] sm:$0xff]  ;;  %v6705_v15 = vcombine.low %v26_v1, %v58_v2  ;;  %v6707_v16 = vcombine.low %v27_v4, %v59_v5  ;;  %v6774_v1 = vcombine.high %v92_v59, %v124_v60  ;;  %v28_v4 = vld [vmem:[%s10517_s1 + $0x60] sm:$0xff] }
  0xa4   :  { %v7160_v18 = vcombine.high %v477_v13, %v509_v14  ;;  %v60_v5 = vld [vmem:[%s10517_s1 + $0x160] sm:$0xff] }
  0xa5   :  { %3449 = vmatmul.mubr.bf16.vlgmr.msra.gmra.mxu0 %v7357_v12  ;;  %3490 = vmatmul.mubr.bf16.vlgmr.msra.gmra.mxu1 %v7357_v12 }
  0xa6   :  { %3499 = vmatpush1.bf16.msra.mxu0 %v7153_v21  ;;  %3540 = vmatpush1.bf16.msra.mxu1 %v7155_v22  ;;  %v413_v21 = vld [vmem:[%s10517_s1 + $0xc68] sm:$0xff] }
  0xa7   :  { %3500 = vmatprep.subr.bf16.mxu0 %v7090_v23  ;;  %3541 = vmatprep.subr.bf16.mxu1 %v7092_v24  ;;  %v445_v22 = vld [vmem:[%s10517_s1 + $0xd68] sm:$0xff]  ;;  %v7157_v23 = vcombine.low %v476_v10, %v508_v11  ;;  %v7159_v24 = vcombine.low %v477_v13, %v509_v14  ;;  %v6710_v10 = vcombine.high %v28_v4, %v60_v5  ;;  %v478_v13 = vld [vmem:[%s10517_s1 + $0xe70] sm:$0xff] }
  0xa8   :  { %3530 = vmatprep.mubr.bf16.mxu0 %v7204_v3  ;;  %3571 = vmatprep.mubr.bf16.mxu1 %v7204_v3  ;;  %v7096_v26 = vcombine.high %v413_v21, %v445_v22  ;;  %v510_v14 = vld [vmem:[%s10517_s1 + $0xf70] sm:$0xff] }
  0xaa   :  { %3501 = vmatpush1.bf16.msra.mxu0 %v7089_v29  ;;  %3542 = vmatpush1.bf16.msra.mxu1 %v7091_v30  ;;  %v349_v29 = vld [vmem:[%s10517_s1 + $0xa68] sm:$0xff] }
  0xab   :  { %3502 = vmatprep.subr.bf16.mxu0 %v7026_v31  ;;  %3543 = vmatprep.subr.bf16.mxu1 %v7028_v32  ;;  %v381_v30 = vld [vmem:[%s10517_s1 + $0xb68] sm:$0xff]  ;;  %v7875_v31 = vld [vmem:[%s10518_s0] sm:$0x1]  ;;  %v7093_v32 = vcombine.low %v412_v19, %v444_v20  ;;  %v7162_v19 = vcombine.high %v478_v13, %v510_v14 }
  0xac   :  { %v7032_v34 = vcombine.high %v349_v29, %v381_v30 }
  0xae   :  { %3503 = vmatpush1.bf16.msra.mxu0 %v7025_v37  ;;  %3544 = vmatpush1.bf16.msra.mxu1 %v7027_v38  ;;  %v285_v37 = vld [vmem:[%s10517_s1 + $0x868] sm:$0xff] }
  0xaf   :  { %3504 = vmatprep.subr.bf16.mxu0 %v6962_v39  ;;  %3545 = vmatprep.subr.bf16.mxu1 %v6964_v40  ;;  %v317_v38 = vld [vmem:[%s10517_s1 + $0x968] sm:$0xff]  ;;  %v7029_v39 = vcombine.low %v348_v27, %v380_v28  ;;  %v7031_v40 = vcombine.low %v349_v29, %v381_v30  ;;  %v447_v27 = vld [vmem:[%s10517_s1 + $0xd78] sm:$0xff]  ;;  %v7161_v28 = vcombine.low %v478_v13, %v510_v14 }
  0xb0   :  { %v6968_v42 = vcombine.high %v285_v37, %v317_v38 }
  0xb2   :  { %3505 = vmatpush1.bf16.msra.mxu0 %v6961_v45  ;;  %3546 = vmatpush1.bf16.msra.mxu1 %v6963_v46  ;;  %v221_v45 = vld [vmem:[%s10517_s1 + $0x668] sm:$0xff] }
  0xb3   :  { %3506 = vmatprep.subr.bf16.mxu0 %v6898_v47  ;;  %3547 = vmatprep.subr.bf16.mxu1 %v6900_v48  ;;  %v253_v46 = vld [vmem:[%s10517_s1 + $0x768] sm:$0xff]  ;;  %v6965_v47 = vcombine.low %v284_v35, %v316_v36  ;;  %v6967_v48 = vcombine.low %v285_v37, %v317_v38  ;;  %v382_v35 = vld [vmem:[%s10517_s1 + $0xb70] sm:$0xff]  ;;  %v351_v37 = vld [vmem:[%s10517_s1 + $0xa78] sm:$0xff] }
  0xb4   :  { %v6904_v50 = vcombine.high %v221_v45, %v253_v46  ;;  %v383_v38 = vld [vmem:[%s10517_s1 + $0xb78] sm:$0xff] }
  0xb6   :  { %3507 = vmatpush1.bf16.msra.mxu0 %v6897_v53  ;;  %3548 = vmatpush1.bf16.msra.mxu1 %v6899_v54  ;;  %v157_v53 = vld [vmem:[%s10517_s1 + $0x468] sm:$0xff] }
  0xb7   :  { %3508 = vmatprep.subr.bf16.mxu0 %v6834_v55  ;;  %3549 = vmatprep.subr.bf16.mxu1 %v6836_v56  ;;  %v189_v54 = vld [vmem:[%s10517_s1 + $0x568] sm:$0xff]  ;;  %v6901_v55 = vcombine.low %v220_v43, %v252_v44  ;;  %v6903_v56 = vcombine.low %v221_v45, %v253_v46  ;;  %v7206_v46 = vmov 1966171168  }
  0xb8   :  { %v6840_v58 = vcombine.high %v157_v53, %v189_v54 }
  0xba   :  { %3509 = vmatpush1.bf16.msra.mxu0 %v6833_v61  ;;  %3550 = vmatpush1.bf16.msra.mxu1 %v6835_v62  ;;  %v93_v61 = vld [vmem:[%s10517_s1 + $0x268] sm:$0xff] }
  0xbb   :  { %3510 = vmatprep.subr.bf16.mxu0 %v6770_v63  ;;  %3551 = vmatprep.subr.bf16.mxu1 %v6772_v0  ;;  %v125_v62 = vld [vmem:[%s10517_s1 + $0x368] sm:$0xff]  ;;  %v6837_v63 = vcombine.low %v156_v51, %v188_v52  ;;  %v6839_v0 = vcombine.low %v157_v53, %v189_v54  ;;  %v318_v51 = vld [vmem:[%s10517_s1 + $0x970] sm:$0xff]  ;;  %v287_v53 = vld [vmem:[%s10517_s1 + $0x878] sm:$0xff] }
  0xbc   :  { %v6776_v2 = vcombine.high %v93_v61, %v125_v62  ;;  %v319_v54 = vld [vmem:[%s10517_s1 + $0x978] sm:$0xff] }
  0xbd   :  { %v6971_v13 = vcombine.low %v287_v53, %v319_v54 }
  0xbe   :  { %3511 = vmatpush1.bf16.msra.mxu0 %v6769_v6  ;;  %3552 = vmatpush1.bf16.msra.mxu1 %v6771_v7  ;;  %v29_v6 = vld [vmem:[%s10517_s1 + $0x68] sm:$0xff] }
  0xbf   :  { %3512 = vmatprep.subr.bf16.mxu0 %v6706_v8  ;;  %3553 = vmatprep.subr.bf16.mxu1 %v6708_v9  ;;  %v61_v7 = vld [vmem:[%s10517_s1 + $0x168] sm:$0xff]  ;;  %v6773_v8 = vcombine.low %v92_v59, %v124_v60  ;;  %v6775_v9 = vcombine.low %v93_v61, %v125_v62  ;;  %v7035_v59 = vcombine.low %v351_v37, %v383_v38 }
  0xc0   :  { %v6712_v11 = vcombine.high %v29_v6, %v61_v7 }
  0xc2   :  { %3513 = vmatpush1.bf16.msra.mxu0 %v6705_v15  ;;  %3554 = vmatpush1.bf16.msra.mxu1 %v6707_v16  ;;  %v479_v15 = vld [vmem:[%s10517_s1 + $0xe78] sm:$0xff] }
  0xc3   :  { %3580 = vmatprep.subr.bf16.mxu0 %v7158_v17  ;;  %3621 = vmatprep.subr.bf16.mxu1 %v7160_v18  ;;  %v511_v16 = vld [vmem:[%s10517_s1 + $0xf78] sm:$0xff]  ;;  %v6709_v17 = vcombine.low %v28_v4, %v60_v5  ;;  %v6711_v18 = vcombine.low %v29_v6, %v61_v7 }
  0xc4   :  { %v7164_v20 = vcombine.high %v479_v15, %v511_v16  ;;  %v7163_v29 = vcombine.low %v479_v15, %v511_v16  ;;  %v8018_v5 = vld [vmem:[%s10517_s1 + $0x678] sm:$0xff]  ;;  %v8035_v15 = vld [vmem:[%s10517_s1 + $0x470] sm:$0xff] }
  0xc5   :  { %3531 = vmatmul.mubr.bf16.vlgmr.msra.gmra.mxu0 %v7357_v12  ;;  %3572 = vmatmul.mubr.bf16.vlgmr.msra.gmra.mxu1 %v7875_v31  ;;  %v7095_v12 = vcombine.low %v413_v21, %v445_v22  ;;  %v7205_v21 = vmov 1983009808   ;;  %v8023_v6 = vld [vmem:[%s10517_s1 + $0x778] sm:$0xff]  ;;  %v8040_v16 = vld [vmem:[%s10517_s1 + $0x570] sm:$0xff] }
  0xc6   :  { %3581 = vmatpush1.bf16.msra.mxu0 %v7157_v23  ;;  %3622 = vmatpush1.bf16.msra.mxu1 %v7159_v24  ;;  %v4467_v22 = vunpack.c.l.s4 %v7205_v21  ;;  %v4469_v23 = vlaneseq  ;;  %v414_v24 = vld [vmem:[%s10517_s1 + $0xc70] sm:$0xff]  ;;  %v6908_v21 = vcombine.high %v8018_v5, %v8023_v6 }
  0xc7   :  { %3582 = vmatprep.subr.bf16.mxu0 %v7094_v25  ;;  %3623 = vmatprep.subr.bf16.mxu1 %v7096_v26  ;;  %v446_v25 = vld [vmem:[%s10517_s1 + $0xd70] sm:$0xff]  ;;  %v415_v26 = vld [vmem:[%s10517_s1 + $0xc78] sm:$0xff] }
  0xc8   :  { %3612 = vmatprep.mubr.bf16.mxu0 %v7204_v3  ;;  %3653 = vmatprep.mubr.bf16.mxu1 %v7204_v3  ;;  %v7098_v30 = vcombine.high %v414_v24, %v446_v25 }
  0xca   :  { %3583 = vmatpush1.bf16.msra.mxu0 %v7093_v32  ;;  %3624 = vmatpush1.bf16.msra.mxu1 %v7095_v12  ;;  %v4468_v32 = vunpack.c.0.s8 %v4467_v22  ;;  %v7964_v12 = vshrl.u32 %v4469_v23, 7  ;;  %v8056_v22 = vld [vmem:[%s10517_s1 + $0x578] sm:$0xff]  ;;  %v8061_v23 = vld [vmem:[%s10517_s1 + $0x270] sm:$0xff] }
  0xcb   :  { %3584 = vmatprep.subr.bf16.mxu0 %v7030_v33  ;;  %3625 = vmatprep.subr.bf16.mxu1 %v7032_v34  ;;  %v7100_v33 = vcombine.high %v415_v26, %v447_v27  ;;  %v350_v34 = vld [vmem:[%s10517_s1 + $0xa70] sm:$0xff] }
  0xcc   :  { %v7034_v43 = vcombine.high %v350_v34, %v382_v35  ;;  %v7986_v45 = vsub.s32 %v4468_v32, %v7964_v12 }
  0xce   :  { %3585 = vmatpush1.bf16.msra.mxu0 %v7029_v39  ;;  %3626 = vmatpush1.bf16.msra.mxu1 %v7031_v40  ;;  %v7097_v40 = vcombine.low %v414_v24, %v446_v25  ;;  %v8066_v24 = vld [vmem:[%s10517_s1 + $0x370] sm:$0xff] }
  0xcf   :  { %3586 = vmatprep.subr.bf16.mxu0 %v6966_v41  ;;  %3627 = vmatprep.subr.bf16.mxu1 %v6968_v42  ;;  %v7099_v42 = vcombine.low %v415_v26, %v447_v27 }
  0xd2   :  { %3587 = vmatpush1.bf16.msra.mxu0 %v6965_v47  ;;  %3628 = vmatpush1.bf16.msra.mxu1 %v6967_v48  ;;  %v5286_v47 = vunpack.c.l.s4 %v7206_v46 }
  0xd3   :  { %3588 = vmatprep.subr.bf16.mxu0 %v6902_v49  ;;  %3629 = vmatprep.subr.bf16.mxu1 %v6904_v50  ;;  %v7036_v49 = vcombine.high %v351_v37, %v383_v38  ;;  %v286_v50 = vld [vmem:[%s10517_s1 + $0x870] sm:$0xff]  ;;  %v6778_v37 = vcombine.high %v8061_v23, %v8066_v24 }
  0xd4   :  { %v6970_v60 = vcombine.high %v286_v50, %v318_v51  ;;  %v5287_v62 = vunpack.c.0.s8 %v5286_v47  ;;  %v6969_v4 = vcombine.low %v286_v50, %v318_v51  ;;  %v8099_v38 = vld [vmem:[%s10517_s1 + $0x70] sm:$0xff]  ;;  %v8122_v47 = vld [vmem:[%s10517_s1 + $0x178] sm:$0xff]  ;;  %v8132_v50 = vld [vmem:[%s10517_s1 + $0xf80] sm:$0xff] }
  0xd6   :  { %3589 = vmatpush1.bf16.msra.mxu0 %v6901_v55  ;;  %3630 = vmatpush1.bf16.msra.mxu1 %v6903_v56  ;;  %v7033_v56 = vcombine.low %v350_v34, %v382_v35  ;;  %v6842_v34 = vcombine.high %v8035_v15, %v8040_v16 }
  0xd7   :  { %3590 = vmatprep.subr.bf16.mxu0 %v6838_v57  ;;  %3631 = vmatprep.subr.bf16.mxu1 %v6840_v58 }
  0xda   :  { %3591 = vmatpush1.bf16.msra.mxu0 %v6837_v63  ;;  %3632 = vmatpush1.bf16.msra.mxu1 %v6839_v0  ;;  %v6972_v0 = vcombine.high %v287_v53, %v319_v54 }
  0xdb   :  { %3592 = vmatprep.subr.bf16.mxu0 %v6774_v1  ;;  %3633 = vmatprep.subr.bf16.mxu1 %v6776_v2  ;;  %v8010_v1 = vld [vmem:[%s10517_s1 + $0x670] sm:$0xff] }
  0xdc   :  { %v254_v2 = vld [vmem:[%s10517_s1 + $0x770] sm:$0xff] }
  0xdd   :  { %v6906_v14 = vcombine.high %v8010_v1, %v254_v2 }
  0xde   :  { %3593 = vmatpush1.bf16.msra.mxu0 %v6773_v8  ;;  %3634 = vmatpush1.bf16.msra.mxu1 %v6775_v9 }
  0xdf   :  { %3594 = vmatprep.subr.bf16.mxu0 %v6710_v10  ;;  %3635 = vmatprep.subr.bf16.mxu1 %v6712_v11 }
  0xe2   :  { %3595 = vmatpush1.bf16.msra.mxu0 %v6709_v17  ;;  %3636 = vmatpush1.bf16.msra.mxu1 %v6711_v18  ;;  %v8045_v17 = vld [vmem:[%s10517_s1 + $0x478] sm:$0xff]  ;;  %v8048_v18 = vsub.s32 %v5287_v62, %v7964_v12  ;;  %v8159_v62 = vld [vmem:[%s10517_s1 + $0xd80] sm:$0xff] }
  0xe3   :  { %3662 = vmatprep.subr.bf16.mxu0 %v7162_v19  ;;  %3703 = vmatprep.subr.bf16.mxu1 %v7164_v20  ;;  %v6905_v20 = vcombine.low %v8010_v1, %v254_v2  ;;  %v6843_v35 = vcombine.low %v8045_v17, %v8056_v22  ;;  %v8170_v2 = vld [vmem:[%s10517_s1 + $0xc88] sm:$0xff] }
  0xe5   :  { %v3122_v36 = vpop.f32.mrf.mxu0  ;;  %3613 = vmatmul.mubr.bf16.vlgmr.msra.gmra.mxu0 %v7875_v31  ;;  %v7979_v39 = vpop.f32.mrf.mxu1  ;;  %3654 = vmatmul.mubr.bf16.vlgmr.msra.gmra.mxu1 %v7875_v31 }
  0xe6   :  { %3663 = vmatpush1.bf16.msra.mxu0 %v7161_v28  ;;  %3704 = vmatpush1.bf16.msra.mxu1 %v7163_v29  ;;  %v4769_v7 = vsel %vm4768_vm0, %v3122_v36, 0.0  ;;  %v5689_v8 = vmul.f32 %v3122_v36, %v3122_v36  ;;  %v4783_v9 = vsel %vm4768_vm0, %v7979_v39, 0.0  ;;  %v5691_v27 = vmul.f32 %v7979_v39, %v7979_v39  ;;  %v8075_v29 = vld [vmem:[%s10517_s1 + $0x278] sm:$0xff] }
  0xe7   :  { %v7982_v41 = vpop.f32.mrf.mxu0  ;;  %3664 = vmatprep.subr.bf16.mxu0 %v7098_v30  ;;  %v7988_v48 = vpop.f32.mrf.mxu1  ;;  %3705 = vmatprep.subr.bf16.mxu1 %v7100_v33  ;;  %v4770_v25 = vrot.slane %v4769_v7, 4  ;;  %v4784_v26 = vrot.slane %v4783_v9, 4  ;;  %v6907_v28 = vcombine.low %v8018_v5, %v8023_v6  ;;  %v8080_v30 = vld [vmem:[%s10517_s1 + $0x378] sm:$0xff]  ;;  %v6841_v33 = vcombine.low %v8035_v15, %v8040_v16  ;;  %v8193_v15 = vld [vmem:[%s10517_s1 + $0xb80] sm:$0xff]  ;;  %v8198_v16 = vld [vmem:[%s10517_s1 + $0xa88] sm:$0xff] }
  0xe8   :  { %v4464_v44 = vcombine.low %v3122_v36, %v7982_v41  ;;  %3694 = vmatprep.mubr.bf16.mxu0 %v7204_v3  ;;  %3735 = vmatprep.mubr.bf16.mxu1 %v7204_v3  ;;  %v4465_v57 = vcombine.low %v7979_v39, %v7988_v48  ;;  %v4776_v11 = vsel %vm4768_vm0, %v7982_v41, 0.0  ;;  %v5753_v32 = vsel %vm4768_vm0, %v5689_v8, 0.0  ;;  %v8104_v39 = vld [vmem:[%s10517_s1 + $0x170] sm:$0xff] }
  0xe9   :  { %v3126_v52 = vpop.f32.mrf.mxu0  ;;  %v3167_v55 = vpop.f32.mrf.mxu1  ;;  %v4777_v12 = vrot.slane %v4776_v11, 4  ;;  %v6844_v36 = vcombine.high %v8045_v17, %v8056_v22  ;;  %v6780_v46 = vcombine.high %v8075_v29, %v8080_v30  ;;  %v4771_v51 = vadd.f32 %v4770_v25, %v4769_v7  ;;  %v8203_v17 = vld [vmem:[%s10517_s1 + $0xb88] sm:$0xff] }
  0xea   :  { %3665 = vmatpush1.bf16.msra.mxu0 %v7097_v40  ;;  %3706 = vmatpush1.bf16.msra.mxu1 %v7099_v42  ;;  %v4472_v61 = vrot.slane %v4464_v44, %v7986_v45  ;;  %v4479_v10 = vrot.slane %v4465_v57, %v7986_v45  ;;  %v8109_v40 = vld [vmem:[%s10517_s1 + $0x78] sm:$0xff]  ;;  %v4790_v42 = vsel %vm4768_vm0, %v7988_v48, 0.0  ;;  %v6779_v44 = vcombine.low %v8075_v29, %v8080_v30  ;;  %v8138_v55 = vld [vmem:[%s10517_s1 + $0xe88] sm:$0xff]  ;;  %v8315_v30 = vld [vmem:[%s10517_s1 + $0x380] sm:$0xff] }
  0xeb   :  { %v3127_v58 = vpop.f32.mrf.mxu0  ;;  %3666 = vmatprep.subr.bf16.mxu0 %v7034_v43  ;;  %v3168_v63 = vpop.f32.mrf.mxu1  ;;  %3707 = vmatprep.subr.bf16.mxu1 %v7036_v49  ;;  %v6777_v43 = vcombine.low %v8061_v23, %v8066_v24  ;;  %v8127_v49 = vld [vmem:[%s10517_s1 + $0xe80] sm:$0xff]  ;;  %v5754_v52 = vrot.slane %v5753_v32, 4  ;;  %v4785_v53 = vadd.f32 %v4784_v26, %v4783_v9  ;;  %v5767_v54 = vsel %vm4768_vm0, %v5691_v27, 0.0 }
  0xec   :  { %v4480_v19 = vcombine.low %v4472_v61, %v4479_v10  ;;  %v4778_v57 = vadd.f32 %v4777_v12, %v4776_v11  ;;  %v5690_v58 = vmul.f32 %v7982_v41, %v7982_v41  ;;  %v8154_v61 = vld [vmem:[%s10517_s1 + $0xc80] sm:$0xff]  ;;  %v4791_v63 = vrot.slane %v4790_v42, 4 }
  0xed   :  { %v6715_v41 = vcombine.low %v8109_v40, %v8122_v47  ;;  %v7166_v1 = vcombine.high %v8127_v49, %v8132_v50  ;;  %v5768_v5 = vrot.slane %v5767_v54, 4  ;;  %v7165_v6 = vcombine.low %v8127_v49, %v8132_v50  ;;  %v8186_v9 = vld [vmem:[%s10517_s1 + $0xa80] sm:$0xff] }
  0xee   :  { %3667 = vmatpush1.bf16.msra.mxu0 %v7033_v56  ;;  %3708 = vmatpush1.bf16.msra.mxu1 %v7035_v59  ;;  %4752 = vst [vmem:[%s10519_s2] sm:$0xff] %v4480_v19  ;;  %v8143_v56 = vld [vmem:[%s10517_s1 + $0xf88] sm:$0xff]  ;;  %v6713_v59 = vcombine.low %v8099_v38, %v8104_v39  ;;  %v4772_v10 = vrot.slane %v4771_v51, 2  ;;  %v5755_v11 = vadd.f32 %v5754_v52, %v5753_v32  ;;  %v4779_v19 = vrot.slane %v4778_v57, 2  ;;  %v8222_v32 = vld [vmem:[%s10517_s1 + $0x980] sm:$0xff] }
  0xef   :  { %3668 = vmatprep.subr.bf16.mxu0 %v6970_v60  ;;  %3709 = vmatprep.subr.bf16.mxu1 %v6972_v0  ;;  %v6714_v60 = vcombine.high %v8099_v38, %v8104_v39  ;;  %v6716_v0 = vcombine.high %v8109_v40, %v8122_v47  ;;  %v7167_v7 = vcombine.low %v8138_v55, %v8143_v56 }
  0xf0   :  { %v7168_v8 = vcombine.high %v8138_v55, %v8143_v56  ;;  %v4792_v25 = vadd.f32 %v4791_v63, %v4790_v42  ;;  %v5692_v26 = vmul.f32 %v7988_v48, %v7988_v48  ;;  %v5769_v12 = vadd.f32 %v5768_v5, %v5767_v54  ;;  %v8253_v63 = vld [vmem:[%s10517_s1 + $0x688] sm:$0xff] }
  0xf1   :  { %v4773_v42 = vadd.f32 %v4772_v10, %v4771_v51  ;;  %v8258_v5 = vld [vmem:[%s10517_s1 + $0x788] sm:$0xff]  ;;  %v7040_v51 = vcombine.high %v8198_v16, %v8203_v17 }
  0xf2   :  { %3669 = vmatpush1.bf16.msra.mxu0 %v6969_v4  ;;  %3710 = vmatpush1.bf16.msra.mxu1 %v6971_v13  ;;  %v8175_v4 = vld [vmem:[%s10517_s1 + $0xd88] sm:$0xff]  ;;  %v4786_v13 = vrot.slane %v4785_v53, 2  ;;  %v5774_v48 = vsel %vm4768_vm0, %v5692_v26, 0.0 }
  0xf3   :  { %3670 = vmatprep.subr.bf16.mxu0 %v6906_v14  ;;  %3711 = vmatprep.subr.bf16.mxu1 %v6908_v21  ;;  %v7102_v14 = vcombine.high %v8154_v61, %v8159_v62  ;;  %v7101_v21 = vcombine.low %v8154_v61, %v8159_v62  ;;  %v7103_v22 = vcombine.low %v8170_v2, %v8175_v4  ;;  %v8301_v26 = vld [vmem:[%s10517_s1 + $0x588] sm:$0xff]  ;;  %v5775_v10 = vrot.slane %v5774_v48, 4 }
  0xf4   :  { %v7104_v27 = vcombine.high %v8170_v2, %v8175_v4  ;;  %v4787_v52 = vadd.f32 %v4786_v13, %v4785_v53  ;;  %v4793_v13 = vrot.slane %v4792_v25, 2 }
  0xf6   :  { %3671 = vmatpush1.bf16.msra.mxu0 %v6905_v20  ;;  %3712 = vmatpush1.bf16.msra.mxu1 %v6907_v28  ;;  %v5760_v20 = vsel %vm4768_vm0, %v5690_v58, 0.0  ;;  %v8217_v28 = vld [vmem:[%s10517_s1 + $0x880] sm:$0xff]  ;;  %v4788_v29 = vrot.slane %v4787_v52, 1 }
  0xf7   :  { %3672 = vmatprep.subr.bf16.mxu0 %v6842_v34  ;;  %3713 = vmatprep.subr.bf16.mxu1 %v6844_v36  ;;  %v8238_v36 = vld [vmem:[%s10517_s1 + $0x988] sm:$0xff]  ;;  %v5761_v54 = vrot.slane %v5760_v20, 4  ;;  %v8248_v58 = vld [vmem:[%s10517_s1 + $0x780] sm:$0xff]  ;;  %v4780_v34 = vadd.f32 %v4779_v19, %v4778_v57  ;;  %v5770_v19 = vrot.slane %v5769_v12, 2 }
  0xf8   :  { %v8285_v57 = vld [vmem:[%s10517_s1 + $0x580] sm:$0xff] }
  0xf9   :  { %v8305_v53 = vadd.f32 %v5761_v54, %v5760_v20  ;;  %v4781_v24 = vrot.slane %v4780_v34, 1  ;;  %v8350_v54 = vadd.f32 %v4788_v29, %v4787_v52 }
  0xfa   :  { %3673 = vmatpush1.bf16.msra.mxu0 %v6841_v33  ;;  %3714 = vmatpush1.bf16.msra.mxu1 %v6843_v35  ;;  %v7038_v33 = vcombine.high %v8186_v9, %v8193_v15  ;;  %v8233_v35 = vld [vmem:[%s10517_s1 + $0x888] sm:$0xff] }
  0xfb   :  { %3674 = vmatprep.subr.bf16.mxu0 %v6778_v37  ;;  %3715 = vmatprep.subr.bf16.mxu1 %v6780_v46  ;;  %v8243_v37 = vld [vmem:[%s10517_s1 + $0x680] sm:$0xff]  ;;  %v5756_v46 = vrot.slane %v5755_v11, 2 }
  0xfd   :  { %v8303_v23 = vadd.f32 %v5756_v46, %v5755_v11  ;;  %v8324_v46 = vadd.f32 %v4793_v13, %v4792_v25 }
  0xfe   :  { %3675 = vmatpush1.bf16.msra.mxu0 %v6777_v43  ;;  %3716 = vmatpush1.bf16.msra.mxu1 %v6779_v44  ;;  %v8280_v43 = vld [vmem:[%s10517_s1 + $0x480] sm:$0xff] }
  0xff   :  { %3676 = vmatprep.subr.bf16.mxu0 %v6714_v60  ;;  %3717 = vmatprep.subr.bf16.mxu1 %v6716_v0  ;;  %v8296_v60 = vld [vmem:[%s10517_s1 + $0x488] sm:$0xff]  ;;  %v4774_v0 = vrot.slane %v4773_v42, 1  ;;  %v8310_v44 = vld [vmem:[%s10517_s1 + $0x280] sm:$0xff] }
 0x102   :  { %3677 = vmatpush1.bf16.msra.mxu0 %v6713_v59  ;;  %3718 = vmatpush1.bf16.msra.mxu1 %v6715_v41  ;;  %v8336_v59 = vadd.f32 %v5770_v19, %v5769_v12  ;;  %v5763_v12 = vrot.slane %v8305_v53, 2  ;;  %v5776_v19 = vadd.f32 %v5775_v10, %v5774_v48 }
 0x103   :  { %3744 = vmatprep.subr.bf16.mxu0 %v7166_v1  ;;  %3785 = vmatprep.subr.bf16.mxu1 %v7168_v8  ;;  %v8347_v1 = vadd.f32 %v4774_v0, %v4773_v42  ;;  %v8354_v8 = vadd.f32 %v4781_v24, %v4780_v34  ;;  %v4795_v42 = vrot.slane %v8324_v46, 1 }
 0x104   :  { %v5764_v2 = vadd.f32 %v5763_v12, %v8305_v53  ;;  %v10524_v53 = vcombine.high %v8217_v28, %v8222_v32 }
 0x105   :  { %v3204_v13 = vpop.f32.mrf.mxu0  ;;  %3695 = vmatmul.mubr.bf16.vlgmr.msra.gmra.mxu0 %v7875_v31  ;;  %v3245_v38 = vpop.f32.mrf.mxu1  ;;  %3736 = vmatmul.mubr.bf16.vlgmr.msra.gmra.mxu1 %v7875_v31 }
 0x106   :  { %v4797_v39 = vsel %vm4768_vm0, %v3204_v13, 0.0  ;;  %v5693_v47 = vmul.f32 %v3204_v13, %v3204_v13  ;;  %3745 = vmatpush1.bf16.msra.mxu0 %v7165_v6  ;;  %v4811_v29 = vsel %vm4768_vm0, %v3245_v38, 0.0  ;;  %v5695_v0 = vmul.f32 %v3245_v38, %v3245_v38  ;;  %3786 = vmatpush1.bf16.msra.mxu1 %v7167_v7 }
 0x107   :  { %v4798_v52 = vrot.slane %v4797_v39, 4  ;;  %v3206_v48 = vpop.f32.mrf.mxu0  ;;  %3746 = vmatprep.subr.bf16.mxu0 %v7102_v14  ;;  %v4812_v10 = vrot.slane %v4811_v29, 4  ;;  %v3247_v6 = vpop.f32.mrf.mxu1  ;;  %3787 = vmatprep.subr.bf16.mxu1 %v7104_v27  ;;  %v5777_v14 = vrot.slane %v5776_v19, 2 }
 0x108   :  { %v5781_v34 = vsel %vm4768_vm0, %v5693_v47, 0.0  ;;  %v4481_v49 = vcombine.low %v3204_v13, %v3206_v48  ;;  %v4804_v50 = vsel %vm4768_vm0, %v3206_v48, 0.0  ;;  %3776 = vmatprep.mubr.bf16.mxu0 %v7204_v3  ;;  %v5795_v7 = vsel %vm4768_vm0, %v5695_v0, 0.0  ;;  %3817 = vmatprep.mubr.bf16.mxu1 %v7204_v3 }
 0x109   :  { %v4799_v55 = vadd.f32 %v4798_v52, %v4797_v39  ;;  %v5782_v56 = vrot.slane %v5781_v34, 4  ;;  %v4805_v24 = vrot.slane %v4804_v50, 4  ;;  %v3208_v41 = vpop.f32.mrf.mxu0  ;;  %v4813_v47 = vadd.f32 %v4812_v10, %v4811_v29  ;;  %v3249_v20 = vpop.f32.mrf.mxu1 }
 0x10a   :  { %v5796_v13 = vrot.slane %v5795_v7, 4  ;;  %v5694_v40 = vmul.f32 %v3206_v48, %v3206_v48  ;;  %3747 = vmatpush1.bf16.msra.mxu0 %v7101_v21  ;;  %v4482_v39 = vcombine.low %v3245_v38, %v3247_v6  ;;  %3788 = vmatpush1.bf16.msra.mxu1 %v7103_v22  ;;  %v4489_v20 = vrot.slane %v4481_v49, %v7986_v45 }
 0x10b   :  { %v4800_v27 = vrot.slane %v4799_v55, 2  ;;  %v5783_v25 = vadd.f32 %v5782_v56, %v5781_v34  ;;  %v4806_v11 = vadd.f32 %v4805_v24, %v4804_v50  ;;  %v3209_v41 = vpop.f32.mrf.mxu0  ;;  %3748 = vmatprep.subr.bf16.mxu0 %v7038_v33  ;;  %v4814_v52 = vrot.slane %v4813_v47, 2  ;;  %v3250_v62 = vpop.f32.mrf.mxu1  ;;  %3789 = vmatprep.subr.bf16.mxu1 %v7040_v51 }
 0x10c   :  { %v5788_v29 = vsel %vm4768_vm0, %v5694_v40, 0.0  ;;  %v4818_v61 = vsel %vm4768_vm0, %v3247_v6, 0.0  ;;  %v4796_v38 = vadd.f32 %v4795_v42, %v8324_v46  ;;  %v5778_v33 = vadd.f32 %v5777_v14, %v5776_v19 }
 0x10d   :  { %v4801_v4 = vadd.f32 %v4800_v27, %v4799_v55  ;;  %v4807_v21 = vrot.slane %v4806_v11, 2  ;;  %v5789_v22 = vrot.slane %v5788_v29, 4  ;;  %v4496_v0 = vrot.slane %v4482_v39, %v7986_v45 }
 0x10e   :  { %v4819_v48 = vrot.slane %v4818_v61, 4  ;;  %v10522_v40 = vcombine.low %v8186_v9, %v8193_v15  ;;  %v5784_v34 = vrot.slane %v5783_v25, 2  ;;  %v5797_v10 = vadd.f32 %v5796_v13, %v5795_v7 }
 0x10f   :  { %v4808_v49 = vadd.f32 %v4807_v21, %v4806_v11  ;;  %v5790_v50 = vadd.f32 %v5789_v22, %v5788_v29  ;;  %v10523_v51 = vcombine.low %v8198_v16, %v8203_v17  ;;  %v4802_v46 = vrot.slane %v4801_v4, 1 }
 0x110   :  { %3749 = vmatpush1.bf16.msra.mxu0 %v10522_v40  ;;  %v4815_v12 = vadd.f32 %v4814_v52, %v4813_v47  ;;  %v4497_v19 = vcombine.low %v4489_v20, %v4496_v0  ;;  %v4820_v42 = vadd.f32 %v4819_v48, %v4818_v61  ;;  %v10525_v9 = vcombine.high %v8233_v35, %v8238_v36 }
 0x111   :  { %3790 = vmatpush1.bf16.msra.mxu1 %v10523_v51  ;;  %3750 = vmatprep.subr.bf16.mxu0 %v10524_v53  ;;  %v5281_v15 = vcombine.low %v8347_v1, %v8354_v8  ;;  %v5765_v11 = vrot.slane %v5764_v2, 1  ;;  %v4809_v55 = vrot.slane %v4808_v49, 1  ;;  %v5791_v56 = vrot.slane %v5790_v50, 2  ;;  %v8419_v1 = vld [vmem:[%s10517_s1 + $0x288] sm:$0xff] }
 0x112   :  { %3791 = vmatprep.subr.bf16.mxu1 %v10525_v9  ;;  %v5282_v16 = vcombine.low %v8350_v54, %v4796_v38  ;;  %v5779_v17 = vrot.slane %v5778_v33, 1  ;;  %4753 = vst [vmem:[%s10519_s2 + $0x8] sm:$0xff] %v4497_v19  ;;  %v4821_v7 = vrot.slane %v4820_v42, 2  ;;  %v5696_v24 = vmul.f32 %v3247_v6, %v3247_v6  ;;  %v8424_v54 = vld [vmem:[%s10517_s1 + $0x388] sm:$0xff] }
 0x113   :  { %v10526_v14 = vcombine.low %v8217_v28, %v8222_v32  ;;  %v5785_v8 = vadd.f32 %v5784_v34, %v5783_v25  ;;  %v5798_v47 = vrot.slane %v5797_v10, 2  ;;  %v4810_v13 = vadd.f32 %v4809_v55, %v4808_v49  ;;  %v33_v19 = vld [vmem:[%s10517_s1 + $0x88] sm:$0xff] }
 0x114   :  { %v5792_v27 = vadd.f32 %v5791_v56, %v5790_v50  ;;  %v10527_v6 = vcombine.low %v8233_v35, %v8238_v36  ;;  %v10528_v28 = vcombine.high %v8243_v37, %v8248_v58  ;;  %v4803_v32 = vadd.f32 %v4802_v46, %v4801_v4 }
 0x115   :  { %3751 = vmatpush1.bf16.msra.mxu0 %v10526_v14  ;;  %v4816_v39 = vrot.slane %v4815_v12, 1  ;;  %v4822_v41 = vadd.f32 %v4821_v7, %v4820_v42  ;;  %v5802_v52 = vsel %vm4768_vm0, %v5696_v24, 0.0  ;;  %v10529_v20 = vcombine.high %v8253_v63, %v8258_v5  ;;  %v482_v14 = vld [vmem:[%s10517_s1 + $0xe90] sm:$0xff] }
 0x116   :  { %3792 = vmatpush1.bf16.msra.mxu1 %v10527_v6  ;;  %3752 = vmatprep.subr.bf16.mxu0 %v10528_v28  ;;  %v5772_v25 = vrot.slane %v8336_v59, 1  ;;  %v5793_v29 = vrot.slane %v5792_v27, 1  ;;  %v5803_v61 = vrot.slane %v5802_v52, 4  ;;  %v6784_v35 = vcombine.high %v8419_v1, %v8424_v54 }
 0x117   :  { %3793 = vmatprep.subr.bf16.mxu1 %v10529_v20  ;;  %v10530_v36 = vrot.slane %v8303_v23, 1  ;;  %v5766_v4 = vadd.f32 %v5765_v11, %v5764_v2  ;;  %v5283_v21 = vcombine.low %v4803_v32, %v4810_v13  ;;  %v4823_v22 = vrot.slane %v4822_v41, 1  ;;  %v515_v13 = vld [vmem:[%s10517_s1 + $0xf98] sm:$0xff] }
 0x118   :  { %v10531_v38 = vcombine.low %v8243_v37, %v8248_v58  ;;  %v5780_v0 = vadd.f32 %v5779_v17, %v5778_v33  ;;  %v5786_v48 = vrot.slane %v5785_v8, 1  ;;  %v5799_v40 = vadd.f32 %v5798_v47, %v5797_v10  ;;  %v64_v37 = vld [vmem:[%s10517_s1 + $0x180] sm:$0xff]  ;;  %v483_v47 = vld [vmem:[%s10517_s1 + $0xe98] sm:$0xff] }
 0x119   :  { %v5759_v62 = vadd.f32 %v10530_v36, %v8303_v23  ;;  %v5804_v34 = vadd.f32 %v5803_v61, %v5802_v52  ;;  %v10532_v49 = vcombine.low %v8253_v63, %v8258_v5  ;;  %v10533_v50 = vcombine.high %v8280_v43, %v8285_v57  ;;  %v32_v23 = vld [vmem:[%s10517_s1 + $0x80] sm:$0xff] }
 0x11a   :  { %3753 = vmatpush1.bf16.msra.mxu0 %v10531_v38  ;;  %v5291_v58 = vrot.slane %v5281_v15, %v8048_v18  ;;  %v5298_v2 = vrot.slane %v5282_v16, %v8048_v18  ;;  %v4817_v33 = vadd.f32 %v4816_v39, %v4815_v12  ;;  %v4824_v10 = vadd.f32 %v4823_v22, %v4822_v41  ;;  %v65_v12 = vld [vmem:[%s10517_s1 + $0x188] sm:$0xff] }
 0x11b   :  { %3794 = vmatpush1.bf16.msra.mxu1 %v10532_v49  ;;  %3754 = vmatprep.subr.bf16.mxu0 %v10533_v50  ;;  %v10534_v63 = vcombine.high %v8296_v60, %v8301_v26  ;;  %v5773_v5 = vadd.f32 %v5772_v25, %v8336_v59  ;;  %v5794_v51 = vadd.f32 %v5793_v29, %v5792_v27  ;;  %v5805_v53 = vrot.slane %v5804_v34, 2  ;;  %v354_v49 = vld [vmem:[%s10517_s1 + $0xa90] sm:$0xff] }
 0x11c   :  { %v6783_v46 = vcombine.low %v8419_v1, %v8424_v54  ;;  %v6265_v42 = vcombine.low %v5759_v62, %v5766_v4  ;;  %v5305_v9 = vrot.slane %v5283_v21, %v8048_v18  ;;  %v5284_v15 = vcombine.low %v4817_v33, %v4824_v10  ;;  %v419_v62 = vld [vmem:[%s10517_s1 + $0xc98] sm:$0xff]  ;;  %v386_v50 = vld [vmem:[%s10517_s1 + $0xb90] sm:$0xff] }
 0x11d   :  { %3795 = vmatprep.subr.bf16.mxu1 %v10534_v63  ;;  %v10535_v59 = vcombine.low %v8280_v43, %v8285_v57  ;;  %v6718_v11 = vcombine.high %v32_v23, %v64_v37  ;;  %v6266_v55 = vcombine.low %v5773_v5, %v5780_v0  ;;  %v5787_v56 = vadd.f32 %v5786_v48, %v5785_v8  ;;  %v514_v43 = vld [vmem:[%s10517_s1 + $0xf90] sm:$0xff]  ;;  %v451_v4 = vld [vmem:[%s10517_s1 + $0xd98] sm:$0xff] }
 0x11e   :  { %v5800_v16 = vrot.slane %v5799_v40, 1  ;;  %v5806_v17 = vadd.f32 %v5805_v53, %v5804_v34  ;;  %v10536_v7 = vcombine.low %v8296_v60, %v8301_v26  ;;  %v10537_v24 = vcombine.high %v8310_v44, %v8315_v30 }
 0x11f   :  { %3755 = vmatpush1.bf16.msra.mxu0 %v10535_v59  ;;  %v5313_v57 = vcombine.low %v5291_v58, %v5298_v2  ;;  %v5312_v1 = vrot.slane %v5284_v15, %v8048_v18  ;;  %v6720_v54 = vcombine.high %v33_v19, %v65_v12  ;;  %v6267_v8 = vcombine.low %v5787_v56, %v5794_v51  ;;  %v355_v58 = vld [vmem:[%s10517_s1 + $0xa98] sm:$0xff] }
 0x120   :  { %3796 = vmatpush1.bf16.msra.mxu1 %v10536_v7  ;;  %3756 = vmatprep.subr.bf16.mxu0 %v10537_v24  ;;  %v5807_v60 = vrot.slane %v5806_v17, 1  ;;  %v6717_v26 = vcombine.low %v32_v23, %v64_v37  ;;  %v6275_v27 = vrot.slane %v6265_v42, %v8048_v18  ;;  %v10538_v28 = vcombine.low %v8310_v44, %v8315_v30  ;;  %v450_v30 = vld [vmem:[%s10517_s1 + $0xd90] sm:$0xff]  ;;  %v387_v2 = vld [vmem:[%s10517_s1 + $0xb98] sm:$0xff] }
 0x121   :  { %3797 = vmatprep.subr.bf16.mxu1 %v6784_v35  ;;  %v5314_v6 = vcombine.low %v5305_v9, %v5312_v1  ;;  %v6719_v32 = vcombine.low %v33_v19, %v65_v12  ;;  %v7170_v39 = vcombine.high %v482_v14, %v514_v43  ;;  %v6282_v41 = vrot.slane %v6266_v55, %v8048_v18  ;;  %v418_v35 = vld [vmem:[%s10517_s1 + $0xc90] sm:$0xff]  ;;  %v323_v55 = vld [vmem:[%s10517_s1 + $0x998] sm:$0xff] }
 0x122   :  { %v5801_v52 = vadd.f32 %v5800_v16, %v5799_v40  ;;  %v5808_v20 = vadd.f32 %v5807_v60, %v5806_v17  ;;  %v5321_v25 = vrot.slane %v5313_v57, %v8048_v18  ;;  %v7172_v61 = vcombine.high %v483_v47, %v515_v13  ;;  %v322_v9 = vld [vmem:[%s10517_s1 + $0x990] sm:$0xff] }
 0x123   :  { %3757 = vmatpush1.bf16.msra.mxu0 %v10538_v28  ;;  %v5328_v29 = vrot.slane %v5314_v6, %v8048_v18  ;;  %v6289_v44 = vrot.slane %v6267_v8, %v8048_v18  ;;  %v7169_v22 = vcombine.low %v482_v14, %v514_v43  ;;  %v7171_v38 = vcombine.low %v483_v47, %v515_v13  ;;  %v258_v8 = vld [vmem:[%s10517_s1 + $0x790] sm:$0xff]  ;;  %v8576_v47 = vld [vmem:[%s10517_s1 + $0x798] sm:$0xff] }
 0x124   :  { %3798 = vmatpush1.bf16.msra.mxu1 %v6783_v46  ;;  %3758 = vmatprep.subr.bf16.mxu0 %v6718_v11  ;;  %v6268_v36 = vcombine.low %v5801_v52, %v5808_v20  ;;  %v6297_v0 = vcombine.low %v6275_v27, %v6282_v41  ;;  %v7106_v40 = vcombine.high %v418_v35, %v450_v30  ;;  %v291_v11 = vld [vmem:[%s10517_s1 + $0x898] sm:$0xff]  ;;  %v8586_v20 = vld [vmem:[%s10517_s1 + $0x490] sm:$0xff] }
 0x125   :  { %3799 = vmatprep.subr.bf16.mxu1 %v6720_v54  ;;  %v5329_v21 = vcombine.low %v5321_v25, %v5328_v29  ;;  %v7108_v34 = vcombine.high %v419_v62, %v451_v4  ;;  %v3286_v37 = vpop.f32.mrf.mxu0  ;;  %v8531_v33 = vpop.f32.mrf.mxu1  ;;  %v7105_v10 = vcombine.low %v418_v35, %v450_v30  ;;  %v7107_v63 = vcombine.low %v419_v62, %v451_v4  ;;  %v226_v54 = vld [vmem:[%s10517_s1 + $0x690] sm:$0xff]  ;;  %v8596_v29 = vld [vmem:[%s10517_s1 + $0x498] sm:$0xff] }
 0x126   :  { %v6296_v48 = vrot.slane %v6268_v36, %v8048_v18  ;;  %v6305_v5 = vrot.slane %v6297_v0, %v8048_v18  ;;  %v7042_v46 = vcombine.high %v354_v49, %v386_v50  ;;  %v7044_v42 = vcombine.high %v355_v58, %v387_v2  ;;  %v8591_v25 = vld [vmem:[%s10517_s1 + $0x590] sm:$0xff]  ;;  %v8603_v30 = vld [vmem:[%s10517_s1 + $0x598] sm:$0xff] }
 0x127   :  { %3759 = vmatpush1.bf16.msra.mxu0 %v6717_v26  ;;  %5681 = vst [vmem:[%s10520_s3] sm:$0xff] %v5329_v21  ;;  %v8536_v53 = vpop.f32.mrf.mxu0  ;;  %v8539_v12 = vpop.f32.mrf.mxu1  ;;  %v7041_v16 = vcombine.low %v354_v49, %v386_v50  ;;  %v7043_v17 = vcombine.low %v355_v58, %v387_v2  ;;  %v6980_v1 = vcombine.high %v291_v11, %v323_v55  ;;  %v8571_v26 = vld [vmem:[%s10517_s1 + $0x698] sm:$0xff]  ;;  %v4825_v13 = vsel %vm4768_vm0, %v3286_v37, 0.0  ;;  %v8613_v36 = vld [vmem:[%s10517_s1 + $0x390] sm:$0xff] }
 0x128   :  { %3800 = vmatpush1.bf16.msra.mxu1 %v6719_v32  ;;  %3826 = vmatprep.subr.bf16.mxu0 %v7170_v39  ;;  %v6298_v23 = vcombine.low %v6289_v44, %v6296_v48  ;;  %v4498_v19 = vcombine.low %v3286_v37, %v8536_v53  ;;  %v4499_v24 = vcombine.low %v8531_v33, %v8539_v12  ;;  %v4839_v6 = vsel %vm4768_vm0, %v8531_v33, 0.0  ;;  %v8608_v44 = vld [vmem:[%s10517_s1 + $0x290] sm:$0xff]  ;;  %v8630_v0 = vld [vmem:[%s10517_s1 + $0x398] sm:$0xff] }
 0x129   :  { %3867 = vmatprep.subr.bf16.mxu1 %v7172_v61  ;;  %v3290_v59 = vpop.f32.mrf.mxu0  ;;  %v3331_v56 = vpop.f32.mrf.mxu1  ;;  %v5697_v27 = vmul.f32 %v3286_v37, %v3286_v37  ;;  %v4832_v32 = vsel %vm4768_vm0, %v8536_v53, 0.0  ;;  %v6979_v41 = vcombine.low %v291_v11, %v323_v55  ;;  %v6914_v52 = vcombine.high %v226_v54, %v258_v8  ;;  %v8646_v58 = vld [vmem:[%s10517_s1 + $0x90] sm:$0xff]  ;;  %v8685_v11 = vld [vmem:[%s10517_s1 + $0xea8] sm:$0xff] }
 0x12a   :  { %3777 = vmatmul.mubr.bf16.vlgmr.msra.gmra.mxu0 %v7875_v31  ;;  %v6312_v51 = vrot.slane %v6298_v23, %v8048_v18  ;;  %v4506_v7 = vrot.slane %v4498_v19, %v7986_v45  ;;  %v4513_v60 = vrot.slane %v4499_v24, %v7986_v45  ;;  %v6913_v61 = vcombine.low %v226_v54, %v258_v8  ;;  %v8651_v2 = vld [vmem:[%s10517_s1 + $0x190] sm:$0xff]  ;;  %v8674_v19 = vld [vmem:[%s10517_s1 + $0xea0] sm:$0xff]  ;;  %v8690_v55 = vld [vmem:[%s10517_s1 + $0xfa8] sm:$0xff] }
 0x12b   :  { %3818 = vmatmul.mubr.bf16.vlgmr.msra.gmra.mxu1 %v7875_v31  ;;  %3827 = vmatpush1.bf16.msra.mxu0 %v7169_v22  ;;  %v290_v31 = vld [vmem:[%s10517_s1 + $0x890] sm:$0xff]  ;;  %v3291_v14 = vpop.f32.mrf.mxu0  ;;  %v3332_v57 = vpop.f32.mrf.mxu1  ;;  %v6916_v35 = vcombine.high %v8571_v26, %v8576_v47  ;;  %v4826_v62 = vrot.slane %v4825_v13, 4  ;;  %v4840_v4 = vrot.slane %v4839_v6, 4  ;;  %v5699_v21 = vmul.f32 %v8531_v33, %v8531_v33  ;;  %v8656_v33 = vld [vmem:[%s10517_s1 + $0x98] sm:$0xff]  ;;  %v8701_v24 = vld [vmem:[%s10517_s1 + $0xca0] sm:$0xff] }
 0x12c   :  { %3868 = vmatpush1.bf16.msra.mxu1 %v7171_v38  ;;  %3828 = vmatprep.subr.bf16.mxu0 %v7106_v40  ;;  %v6313_v15 = vcombine.low %v6305_v5, %v6312_v51  ;;  %v6978_v43 = vcombine.high %v290_v31, %v322_v9  ;;  %v6977_v28 = vcombine.low %v290_v31, %v322_v9  ;;  %v8625_v38 = vld [vmem:[%s10517_s1 + $0x298] sm:$0xff]  ;;  %v5809_v48 = vsel %vm4768_vm0, %v5697_v27, 0.0  ;;  %v8706_v14 = vld [vmem:[%s10517_s1 + $0xda0] sm:$0xff]  ;;  %v8717_v54 = vld [vmem:[%s10517_s1 + $0xca8] sm:$0xff] }
 0x12d   :  { %3869 = vmatprep.subr.bf16.mxu1 %v7108_v34  ;;  %3858 = vmatprep.mubr.bf16.mxu0 %v7204_v3  ;;  %v4514_v39 = vcombine.low %v4506_v7, %v4513_v60  ;;  %v6915_v22 = vcombine.low %v8571_v26, %v8576_v47  ;;  %v4833_v40 = vrot.slane %v4832_v32, 4  ;;  %v6849_v34 = vcombine.low %v8586_v20, %v8591_v25  ;;  %v8722_v8 = vld [vmem:[%s10517_s1 + $0xda8] sm:$0xff]  ;;  %v8733_v27 = vld [vmem:[%s10517_s1 + $0xaa0] sm:$0xff] }
 0x12e   :  { %3899 = vmatprep.mubr.bf16.mxu1 %v7204_v3  ;;  %6665 = vst [vmem:[%s10521_s4] sm:$0xff] %v6313_v15  ;;  %v6850_v49 = vcombine.high %v8586_v20, %v8591_v25  ;;  %v6851_v50 = vcombine.low %v8596_v29, %v8603_v30  ;;  %v6852_v23 = vcombine.high %v8596_v29, %v8603_v30  ;;  %v5810_v9 = vrot.slane %v5809_v48, 4  ;;  %v8750_v20 = vld [vmem:[%s10517_s1 + $0xba8] sm:$0xff] }
 0x12f   :  { %3829 = vmatpush1.bf16.msra.mxu0 %v7105_v10  ;;  %4754 = vst [vmem:[%s10519_s2 + $0x10] sm:$0xff] %v4514_v39  ;;  %v6786_v37 = vcombine.high %v8608_v44, %v8613_v36  ;;  %v4846_v10 = vsel %vm4768_vm0, %v8539_v12, 0.0  ;;  %v6787_v5 = vcombine.low %v8625_v38, %v8630_v0  ;;  %v6788_v51 = vcombine.high %v8625_v38, %v8630_v0  ;;  %v8862_v0 = vld [vmem:[%s10517_s1 + $0x3a0] sm:$0xff] }
 0x130   :  { %3870 = vmatpush1.bf16.msra.mxu1 %v7107_v63  ;;  %3830 = vmatprep.subr.bf16.mxu0 %v7042_v46  ;;  %v6785_v63 = vcombine.low %v8608_v44, %v8613_v36  ;;  %v8669_v46 = vld [vmem:[%s10517_s1 + $0x198] sm:$0xff]  ;;  %v4827_v31 = vadd.f32 %v4826_v62, %v4825_v13  ;;  %v4841_v15 = vadd.f32 %v4840_v4, %v4839_v6  ;;  %v5823_v59 = vsel %vm4768_vm0, %v5699_v21, 0.0  ;;  %v8764_v21 = vld [vmem:[%s10517_s1 + $0x8a0] sm:$0xff] }
 0x131   :  { %3871 = vmatprep.subr.bf16.mxu1 %v7044_v42  ;;  %v8679_v42 = vld [vmem:[%s10517_s1 + $0xfa0] sm:$0xff]  ;;  %v4834_v56 = vadd.f32 %v4833_v40, %v4832_v32  ;;  %v6722_v7 = vcombine.high %v8646_v58, %v8651_v2  ;;  %v6724_v57 = vcombine.high %v8656_v33, %v8669_v46  ;;  %v5824_v60 = vrot.slane %v5823_v59, 4 }
 0x132   :  { %v7173_v26 = vcombine.low %v8674_v19, %v8679_v42  ;;  %v7175_v47 = vcombine.low %v8685_v11, %v8690_v55  ;;  %v7176_v13 = vcombine.high %v8685_v11, %v8690_v55  ;;  %v4828_v6 = vrot.slane %v4827_v31, 2 }
 0x133   :  { %3831 = vmatpush1.bf16.msra.mxu0 %v7041_v16  ;;  %v5698_v16 = vmul.f32 %v8536_v53, %v8536_v53  ;;  %v6723_v53 = vcombine.low %v8656_v33, %v8669_v46  ;;  %v4842_v32 = vrot.slane %v4841_v15, 2  ;;  %v7110_v39 = vcombine.high %v8701_v24, %v8706_v14 }
 0x134   :  { %3872 = vmatpush1.bf16.msra.mxu1 %v7043_v17  ;;  %3832 = vmatprep.subr.bf16.mxu0 %v6978_v43  ;;  %v6721_v17 = vcombine.low %v8646_v58, %v8651_v2  ;;  %v4847_v43 = vrot.slane %v4846_v10, 4  ;;  %v4835_v25 = vrot.slane %v4834_v56, 2  ;;  %v5700_v62 = vmul.f32 %v8539_v12, %v8539_v12 }
 0x135   :  { %3873 = vmatprep.subr.bf16.mxu1 %v6980_v1  ;;  %v7174_v1 = vcombine.high %v8674_v19, %v8679_v42  ;;  %v5816_v29 = vsel %vm4768_vm0, %v5698_v16, 0.0  ;;  %v7112_v4 = vcombine.high %v8717_v54, %v8722_v8  ;;  %v8800_v16 = vld [vmem:[%s10517_s1 + $0x6a8] sm:$0xff] }
 0x136   :  { %v4848_v30 = vadd.f32 %v4847_v43, %v4846_v10  ;;  %v8805_v43 = vld [vmem:[%s10517_s1 + $0x7a8] sm:$0xff] }
 0x137   :  { %3833 = vmatpush1.bf16.msra.mxu0 %v6977_v28  ;;  %v5811_v28 = vadd.f32 %v5810_v9, %v5809_v48  ;;  %v5825_v48 = vadd.f32 %v5824_v60, %v5823_v59  ;;  %v5817_v9 = vrot.slane %v5816_v29, 4  ;;  %v8795_v59 = vld [vmem:[%s10517_s1 + $0x7a0] sm:$0xff]  ;;  %v4836_v60 = vadd.f32 %v4835_v25, %v4834_v56 }
 0x138   :  { %3874 = vmatpush1.bf16.msra.mxu1 %v6979_v41  ;;  %3834 = vmatprep.subr.bf16.mxu0 %v6914_v52  ;;  %v8740_v41 = vld [vmem:[%s10517_s1 + $0xba0] sm:$0xff]  ;;  %v8745_v52 = vld [vmem:[%s10517_s1 + $0xaa8] sm:$0xff] }
 0x139   :  { %3875 = vmatprep.subr.bf16.mxu1 %v6916_v35  ;;  %v7111_v35 = vcombine.low %v8717_v54, %v8722_v8  ;;  %v7046_v40 = vcombine.high %v8733_v27, %v8740_v41  ;;  %v5812_v10 = vrot.slane %v5811_v28, 2  ;;  %v8832_v56 = vld [vmem:[%s10517_s1 + $0x5a0] sm:$0xff]  ;;  %v5826_v25 = vrot.slane %v5825_v48, 2 }
 0x13a   :  { %v4837_v36 = vrot.slane %v4836_v60, 1 }
 0x13b   :  { %3835 = vmatpush1.bf16.msra.mxu0 %v6913_v61  ;;  %v7109_v61 = vcombine.low %v8701_v24, %v8706_v14  ;;  %v8850_v44 = vadd.f32 %v5812_v10, %v5811_v28 }
 0x13c   :  { %3876 = vmatpush1.bf16.msra.mxu1 %v6915_v22  ;;  %3836 = vmatprep.subr.bf16.mxu0 %v6850_v49  ;;  %v8769_v22 = vld [vmem:[%s10517_s1 + $0x9a0] sm:$0xff]  ;;  %v8780_v49 = vld [vmem:[%s10517_s1 + $0x8a8] sm:$0xff] }
 0x13d   :  { %3877 = vmatprep.subr.bf16.mxu1 %v6852_v23  ;;  %v8790_v23 = vld [vmem:[%s10517_s1 + $0x6a0] sm:$0xff] }
 0x13f   :  { %3837 = vmatpush1.bf16.msra.mxu0 %v6849_v34  ;;  %v5830_v34 = vsel %vm4768_vm0, %v5700_v62, 0.0  ;;  %v8848_v62 = vld [vmem:[%s10517_s1 + $0x5a8] sm:$0xff] }
 0x140   :  { %3878 = vmatpush1.bf16.msra.mxu1 %v6851_v50  ;;  %3838 = vmatprep.subr.bf16.mxu0 %v6786_v37  ;;  %v8785_v50 = vld [vmem:[%s10517_s1 + $0x9a8] sm:$0xff]  ;;  %v4829_v37 = vadd.f32 %v4828_v6, %v4827_v31  ;;  %v7048_v31 = vcombine.high %v8745_v52, %v8750_v20  ;;  %v5831_v6 = vrot.slane %v5830_v34, 4 }
 0x141   :  { %3879 = vmatprep.subr.bf16.mxu1 %v6788_v51  ;;  %v4843_v51 = vadd.f32 %v4842_v32, %v4841_v15  ;;  %v4849_v32 = vrot.slane %v4848_v30, 2  ;;  %v8852_v15 = vadd.f32 %v5817_v9, %v5816_v29 }
 0x142   :  { %v5832_v46 = vadd.f32 %v5831_v6, %v5830_v34 }
 0x143   :  { %3839 = vmatpush1.bf16.msra.mxu0 %v6785_v63  ;;  %v8827_v63 = vld [vmem:[%s10517_s1 + $0x4a0] sm:$0xff]  ;;  %v4844_v38 = vrot.slane %v4843_v51, 1  ;;  %v8871_v10 = vadd.f32 %v4849_v32, %v4848_v30 }
 0x144   :  { %3880 = vmatpush1.bf16.msra.mxu1 %v6787_v5  ;;  %3840 = vmatprep.subr.bf16.mxu0 %v6722_v7  ;;  %v8843_v7 = vld [vmem:[%s10517_s1 + $0x4a8] sm:$0xff]  ;;  %v8857_v5 = vld [vmem:[%s10517_s1 + $0x2a0] sm:$0xff] }
 0x145   :  { %3881 = vmatprep.subr.bf16.mxu1 %v6724_v57  ;;  %v4830_v57 = vrot.slane %v4829_v37, 1  ;;  %v8897_v9 = vadd.f32 %v4844_v38, %v4843_v51  ;;  %v3368_v32 = vpop.f32.mrf.mxu0  ;;  %v4851_v51 = vrot.slane %v8871_v10, 1 }
 0x147   :  { %3841 = vmatpush1.bf16.msra.mxu0 %v6721_v17  ;;  %v8883_v17 = vadd.f32 %v5826_v25, %v5825_v48  ;;  %v5819_v48 = vrot.slane %v8852_v15, 2  ;;  %v8906_v25 = vadd.f32 %v4837_v36, %v4836_v60  ;;  %v3370_v34 = vpop.f32.mrf.mxu0 }
 0x148   :  { %3882 = vmatpush1.bf16.msra.mxu1 %v6723_v53  ;;  %3908 = vmatprep.subr.bf16.mxu0 %v7174_v1  ;;  %v8894_v1 = vadd.f32 %v4830_v57, %v4829_v37  ;;  %v4853_v37 = vsel %vm4768_vm0, %v3368_v32, 0.0  ;;  %v5701_v57 = vmul.f32 %v3368_v32, %v3368_v32  ;;  %v3409_v53 = vpop.f32.mrf.mxu1  ;;  %v4515_v19 = vcombine.low %v3368_v32, %v3370_v34 }
 0x149   :  { %3949 = vmatprep.subr.bf16.mxu1 %v7176_v13  ;;  %v8903_v13 = vld [vmem:[%s10518_s0] sm:$0x1]  ;;  %v4854_v38 = vrot.slane %v4853_v37, 4  ;;  %v4867_v2 = vsel %vm4768_vm0, %v3409_v53, 0.0  ;;  %v5703_v58 = vmul.f32 %v3409_v53, %v3409_v53  ;;  %v4860_v42 = vsel %vm4768_vm0, %v3370_v34, 0.0  ;;  %v3372_v33 = vpop.f32.mrf.mxu0 }
 0x14a   :  { %3859 = vmatmul.mubr.bf16.vlgmr.msra.gmra.mxu0 %v8903_v13  ;;  %v5837_v60 = vsel %vm4768_vm0, %v5701_v57, 0.0  ;;  %v4868_v6 = vrot.slane %v4867_v2, 4  ;;  %v4861_v36 = vrot.slane %v4860_v42, 4  ;;  %v5702_v29 = vmul.f32 %v3370_v34, %v3370_v34 }
 0x14b   :  { %3900 = vmatmul.mubr.bf16.vlgmr.msra.gmra.mxu1 %v8903_v13  ;;  %3909 = vmatpush1.bf16.msra.mxu0 %v7173_v26  ;;  %v3411_v26 = vpop.f32.mrf.mxu1  ;;  %v4855_v11 = vadd.f32 %v4854_v38, %v4853_v37  ;;  %v5838_v55 = vrot.slane %v5837_v60, 4  ;;  %v4523_v33 = vrot.slane %v4515_v19, %v7986_v45  ;;  %v5820_v54 = vadd.f32 %v5819_v48, %v8852_v15 }
 0x14c   :  { %3950 = vmatpush1.bf16.msra.mxu1 %v7175_v47  ;;  %3910 = vmatprep.subr.bf16.mxu0 %v7110_v39  ;;  %v5851_v47 = vsel %vm4768_vm0, %v5703_v58, 0.0  ;;  %v5833_v39 = vrot.slane %v5832_v46, 2  ;;  %v4869_v57 = vadd.f32 %v4868_v6, %v4867_v2  ;;  %v4862_v12 = vadd.f32 %v4861_v36, %v4860_v42  ;;  %v3373_v58 = vpop.f32.mrf.mxu0 }
 0x14d   :  { %3951 = vmatprep.subr.bf16.mxu1 %v7112_v4  ;;  %3940 = vmatprep.mubr.bf16.mxu0 %v7204_v3  ;;  %v5852_v32 = vrot.slane %v5851_v47, 4  ;;  %v3413_v30 = vpop.f32.mrf.mxu1  ;;  %v4856_v4 = vrot.slane %v4855_v11, 2  ;;  %v5839_v28 = vadd.f32 %v5838_v55, %v5837_v60  ;;  %v4516_v37 = vcombine.low %v3409_v53, %v3411_v26 }
 0x14e   :  { %3981 = vmatprep.mubr.bf16.mxu1 %v7204_v3  ;;  %v4870_v2 = vrot.slane %v4869_v57, 2  ;;  %v5844_v30 = vsel %vm4768_vm0, %v5702_v29, 0.0  ;;  %v4874_v24 = vsel %vm4768_vm0, %v3411_v26, 0.0  ;;  %v4852_v53 = vadd.f32 %v4851_v51, %v8871_v10 }
 0x14f   :  { %3911 = vmatpush1.bf16.msra.mxu0 %v7109_v61  ;;  %v3414_v14 = vpop.f32.mrf.mxu1  ;;  %v4857_v8 = vadd.f32 %v4856_v4, %v4855_v11  ;;  %v4863_v61 = vrot.slane %v4862_v12, 2  ;;  %v4530_v38 = vrot.slane %v4516_v37, %v7986_v45  ;;  %v4875_v34 = vrot.slane %v4874_v24, 4 }
 0x150   :  { %3952 = vmatpush1.bf16.msra.mxu1 %v7111_v35  ;;  %3912 = vmatprep.subr.bf16.mxu0 %v7046_v40  ;;  %v5845_v35 = vrot.slane %v5844_v30, 4  ;;  %v5834_v40 = vadd.f32 %v5833_v39, %v5832_v46  ;;  %v10539_v29 = vcombine.low %v8733_v27, %v8740_v41  ;;  %v5840_v60 = vrot.slane %v5839_v28, 2 }
 0x151   :  { %3953 = vmatprep.subr.bf16.mxu1 %v7048_v31  ;;  %v5853_v6 = vadd.f32 %v5852_v32, %v5851_v47  ;;  %v4864_v19 = vadd.f32 %v4863_v61, %v4862_v12  ;;  %v10540_v31 = vcombine.low %v8745_v52, %v8750_v20  ;;  %v10541_v15 = vcombine.high %v8764_v21, %v8769_v22 }
 0x152   :  { %v5846_v42 = vadd.f32 %v5845_v35, %v5844_v30  ;;  %v4858_v10 = vrot.slane %v4857_v8, 1  ;;  %v4871_v46 = vadd.f32 %v4870_v2, %v4869_v57  ;;  %v4531_v48 = vcombine.low %v4523_v33, %v4530_v38 }
 0x153   :  { %3913 = vmatpush1.bf16.msra.mxu0 %v10539_v29  ;;  %v4876_v51 = vadd.f32 %v4875_v34, %v4874_v24  ;;  %v10542_v27 = vcombine.high %v8780_v49, %v8785_v50  ;;  %v5330_v41 = vcombine.low %v8894_v1, %v8906_v25  ;;  %v5821_v12 = vrot.slane %v5820_v54, 1  ;;  %v8971_v1 = vld [vmem:[%s10517_s1 + $0x2a8] sm:$0xff] }
 0x154   :  { %3954 = vmatpush1.bf16.msra.mxu1 %v10540_v31  ;;  %3914 = vmatprep.subr.bf16.mxu0 %v10541_v15  ;;  %v4865_v11 = vrot.slane %v4864_v19, 1  ;;  %v5847_v55 = vrot.slane %v5846_v42, 2  ;;  %v5331_v52 = vcombine.low %v8897_v9, %v4852_v53  ;;  %v5835_v20 = vrot.slane %v5834_v40, 1  ;;  %4755 = vst [vmem:[%s10519_s2 + $0x18] sm:$0xff] %v4531_v48  ;;  %v8976_v9 = vld [vmem:[%s10517_s1 + $0x3a8] sm:$0xff] }
 0x155   :  { %3955 = vmatprep.subr.bf16.mxu1 %v10542_v27  ;;  %v4877_v47 = vrot.slane %v4876_v51, 2  ;;  %v5704_v36 = vmul.f32 %v3411_v26, %v3411_v26  ;;  %v10543_v39 = vcombine.low %v8764_v21, %v8769_v22  ;;  %v5841_v25 = vadd.f32 %v5840_v60, %v5839_v28  ;;  %v37_v48 = vld [vmem:[%s10517_s1 + $0xa8] sm:$0xff] }
 0x156   :  { %v5854_v57 = vrot.slane %v5853_v6, 2  ;;  %v4866_v32 = vadd.f32 %v4865_v11, %v4864_v19  ;;  %v5848_v4 = vadd.f32 %v5847_v55, %v5846_v42  ;;  %v10544_v26 = vcombine.low %v8780_v49, %v8785_v50 }
 0x157   :  { %3915 = vmatpush1.bf16.msra.mxu0 %v10543_v39  ;;  %v10545_v21 = vcombine.high %v8790_v23, %v8795_v59  ;;  %v4859_v22 = vadd.f32 %v4858_v10, %v4857_v8  ;;  %v4872_v37 = vrot.slane %v4871_v46, 1  ;;  %v4878_v58 = vadd.f32 %v4877_v47, %v4876_v51  ;;  %v486_v39 = vld [vmem:[%s10517_s1 + $0xeb0] sm:$0xff] }
 0x158   :  { %3956 = vmatpush1.bf16.msra.mxu1 %v10544_v26  ;;  %v5858_v2 = vsel %vm4768_vm0, %v5704_v36, 0.0  ;;  %v10546_v33 = vcombine.high %v8800_v16, %v8805_v43  ;;  %v5828_v28 = vrot.slane %v8883_v17, 1  ;;  %v5849_v30 = vrot.slane %v5848_v4, 1 }
 0x159   :  { %3916 = vmatprep.subr.bf16.mxu0 %v10545_v21  ;;  %v5859_v24 = vrot.slane %v5858_v2, 4  ;;  %v6792_v49 = vcombine.high %v8971_v1, %v8976_v9  ;;  %v10547_v50 = vrot.slane %v8850_v44, 1  ;;  %v5822_v8 = vadd.f32 %v5821_v12, %v5820_v54 }
 0x15a   :  { %3957 = vmatprep.subr.bf16.mxu1 %v10546_v33  ;;  %v5332_v61 = vcombine.low %v4859_v22, %v4866_v32  ;;  %v4879_v35 = vrot.slane %v4878_v58, 1  ;;  %v10548_v53 = vcombine.low %v8790_v23, %v8795_v59  ;;  %v5836_v38 = vadd.f32 %v5835_v20, %v5834_v40  ;;  %v68_v23 = vld [vmem:[%s10517_s1 + $0x1a0] sm:$0xff]  ;;  %v519_v32 = vld [vmem:[%s10517_s1 + $0xfb8] sm:$0xff] }
 0x15b   :  { %v5815_v14 = vadd.f32 %v10547_v50, %v8850_v44  ;;  %v5842_v34 = vrot.slane %v5841_v25, 1  ;;  %v5855_v29 = vadd.f32 %v5854_v57, %v5853_v6  ;;  %v5860_v60 = vadd.f32 %v5859_v24, %v5858_v2  ;;  %v36_v44 = vld [vmem:[%s10517_s1 + $0xa0] sm:$0xff]  ;;  %v487_v57 = vld [vmem:[%s10517_s1 + $0xeb8] sm:$0xff] }
 0x15c   :  { %3917 = vmatpush1.bf16.msra.mxu0 %v10548_v53  ;;  %v10549_v19 = vcombine.low %v8800_v16, %v8805_v43  ;;  %v10550_v42 = vcombine.high %v8827_v63, %v8832_v56  ;;  %v5340_v59 = vrot.slane %v5330_v41, %v8048_v18  ;;  %v5347_v54 = vrot.slane %v5331_v52, %v8048_v18 }
 0x15d   :  { %v4873_v40 = vadd.f32 %v4872_v37, %v4871_v46  ;;  %v4880_v6 = vadd.f32 %v4879_v35, %v4878_v58  ;;  %v10551_v16 = vcombine.high %v8843_v7, %v8848_v62  ;;  %v5829_v43 = vadd.f32 %v5828_v28, %v8883_v17  ;;  %v69_v46 = vld [vmem:[%s10517_s1 + $0x1a8] sm:$0xff] }
 0x15e   :  { %3958 = vmatpush1.bf16.msra.mxu1 %v10549_v19  ;;  %3918 = vmatprep.subr.bf16.mxu0 %v10550_v42  ;;  %v5850_v31 = vadd.f32 %v5849_v30, %v5848_v4  ;;  %v5861_v15 = vrot.slane %v5860_v60, 2  ;;  %v6791_v10 = vcombine.low %v8971_v1, %v8976_v9  ;;  %v6314_v51 = vcombine.low %v5815_v14, %v5822_v8  ;;  %v423_v14 = vld [vmem:[%s10517_s1 + $0xcb8] sm:$0xff]  ;;  %v358_v19 = vld [vmem:[%s10517_s1 + $0xab0] sm:$0xff] }
 0x15f   :  { %3959 = vmatprep.subr.bf16.mxu1 %v10551_v16  ;;  %v5354_v27 = vrot.slane %v5332_v61, %v8048_v18  ;;  %v5333_v41 = vcombine.low %v4873_v40, %v4880_v6  ;;  %v10552_v17 = vcombine.low %v8827_v63, %v8832_v56  ;;  %v6726_v12 = vcombine.high %v36_v44, %v68_v23  ;;  %v518_v63 = vld [vmem:[%s10517_s1 + $0xfb0] sm:$0xff]  ;;  %v455_v8 = vld [vmem:[%s10517_s1 + $0xdb8] sm:$0xff] }
 0x160   :  { %v6315_v11 = vcombine.low %v5829_v43, %v5836_v38  ;;  %v5843_v55 = vadd.f32 %v5842_v34, %v5841_v25  ;;  %v5856_v52 = vrot.slane %v5855_v29, 1  ;;  %v5862_v20 = vadd.f32 %v5861_v15, %v5860_v60  ;;  %v390_v42 = vld [vmem:[%s10517_s1 + $0xbb0] sm:$0xff] }
 0x161   :  { %3919 = vmatpush1.bf16.msra.mxu0 %v10552_v17  ;;  %v10553_v47 = vcombine.low %v8843_v7, %v8848_v62  ;;  %v10554_v36 = vcombine.high %v8857_v5, %v8862_v0  ;;  %v5362_v56 = vcombine.low %v5340_v59, %v5347_v54  ;;  %v5361_v1 = vrot.slane %v5333_v41, %v8048_v18  ;;  %v359_v59 = vld [vmem:[%s10517_s1 + $0xab8] sm:$0xff]  ;;  %v326_v41 = vld [vmem:[%s10517_s1 + $0x9b0] sm:$0xff] }
 0x162   :  { %v6728_v9 = vcombine.high %v37_v48, %v69_v46  ;;  %v6316_v25 = vcombine.low %v5843_v55, %v5850_v31  ;;  %v5863_v7 = vrot.slane %v5862_v20, 1  ;;  %v6725_v62 = vcombine.low %v36_v44, %v68_v23  ;;  %v391_v54 = vld [vmem:[%s10517_s1 + $0xbb8] sm:$0xff] }
 0x163   :  { %3960 = vmatpush1.bf16.msra.mxu1 %v10553_v47  ;;  %3920 = vmatprep.subr.bf16.mxu0 %v10554_v36  ;;  %v6324_v4 = vrot.slane %v6314_v51, %v8048_v18  ;;  %v5363_v26 = vcombine.low %v5354_v27, %v5361_v1  ;;  %v10555_v21 = vcombine.low %v8857_v5, %v8862_v0  ;;  %v454_v0 = vld [vmem:[%s10517_s1 + $0xdb0] sm:$0xff]  ;;  %v327_v55 = vld [vmem:[%s10517_s1 + $0x9b8] sm:$0xff] }
 0x164   :  { %3961 = vmatprep.subr.bf16.mxu1 %v6792_v49  ;;  %v6727_v22 = vcombine.low %v37_v48, %v69_v46  ;;  %v7178_v37 = vcombine.high %v486_v39, %v518_v63  ;;  %v6331_v58 = vrot.slane %v6315_v11, %v8048_v18  ;;  %v5857_v2 = vadd.f32 %v5856_v52, %v5855_v29  ;;  %v422_v49 = vld [vmem:[%s10517_s1 + $0xcb0] sm:$0xff]  ;;  %v295_v11 = vld [vmem:[%s10517_s1 + $0x8b8] sm:$0xff] }
 0x165   :  { %3921 = vmatpush1.bf16.msra.mxu0 %v10555_v21  ;;  %v5864_v33 = vadd.f32 %v5863_v7, %v5862_v20  ;;  %v5370_v28 = vrot.slane %v5362_v56, %v8048_v18  ;;  %v5377_v30 = vrot.slane %v5363_v26, %v8048_v18  ;;  %v7180_v24 = vcombine.high %v487_v57, %v519_v32  ;;  %v3450_v23 = vpop.f32.mrf.mxu0  ;;  %v9083_v40 = vpop.f32.mrf.mxu1  ;;  %v294_v27 = vld [vmem:[%s10517_s1 + $0x8b0] sm:$0xff] }
 0x166   :  { %3922 = vmatprep.subr.bf16.mxu0 %v6726_v12  ;;  %v6338_v5 = vrot.slane %v6316_v25, %v8048_v18  ;;  %v7177_v35 = vcombine.low %v486_v39, %v518_v63  ;;  %v7179_v53 = vcombine.low %v487_v57, %v519_v32  ;;  %v6346_v38 = vcombine.low %v6324_v4, %v6331_v58  ;;  %v230_v25 = vld [vmem:[%s10517_s1 + $0x6b0] sm:$0xff]  ;;  %v9123_v57 = vld [vmem:[%s10517_s1 + $0x6b8] sm:$0xff] }
 0x167   :  { %3962 = vmatpush1.bf16.msra.mxu1 %v6791_v10  ;;  %v6317_v50 = vcombine.low %v5857_v2, %v5864_v33  ;;  %v5378_v61 = vcombine.low %v5370_v28, %v5377_v30  ;;  %v7114_v29 = vcombine.high %v422_v49, %v454_v0  ;;  %v7116_v60 = vcombine.high %v423_v14, %v455_v8  ;;  %v9088_v15 = vpop.f32.mrf.mxu0  ;;  %v9091_v46 = vpop.f32.mrf.mxu1  ;;  %v262_v7 = vld [vmem:[%s10517_s1 + $0x7b0] sm:$0xff]  ;;  %v9128_v32 = vld [vmem:[%s10517_s1 + $0x7b8] sm:$0xff] }
 0x168   :  { %3963 = vmatprep.subr.bf16.mxu1 %v6728_v9  ;;  %v7113_v6 = vcombine.low %v422_v49, %v454_v0  ;;  %v7115_v16 = vcombine.low %v423_v14, %v455_v8  ;;  %v6354_v43 = vrot.slane %v6346_v38, %v8048_v18  ;;  %v7050_v10 = vcombine.high %v358_v19, %v390_v42  ;;  %v9138_v28 = vld [vmem:[%s10517_s1 + $0x4b0] sm:$0xff]  ;;  %v9177_v38 = vld [vmem:[%s10517_s1 + $0x2b8] sm:$0xff] }
 0x169   :  { %3923 = vmatpush1.bf16.msra.mxu0 %v6725_v62  ;;  %v6345_v34 = vrot.slane %v6317_v50, %v8048_v18  ;;  %5682 = vst [vmem:[%s10520_s3 + $0x8] sm:$0xff] %v5378_v61  ;;  %v4532_v48 = vcombine.low %v3450_v23, %v9088_v15  ;;  %v7052_v51 = vcombine.high %v359_v59, %v391_v54  ;;  %v3454_v12 = vpop.f32.mrf.mxu0  ;;  %v3495_v52 = vpop.f32.mrf.mxu1  ;;  %v4881_v4 = vsel %vm4768_vm0, %v3450_v23, 0.0  ;;  %v9143_v30 = vld [vmem:[%s10517_s1 + $0x5b0] sm:$0xff] }
 0x16a   :  { %3990 = vmatprep.subr.bf16.mxu0 %v7178_v37  ;;  %v7049_v20 = vcombine.low %v358_v19, %v390_v42  ;;  %v7051_v47 = vcombine.low %v359_v59, %v391_v54  ;;  %v4533_v39 = vcombine.low %v9083_v40, %v9091_v46  ;;  %v6986_v56 = vcombine.high %v294_v27, %v326_v41  ;;  %v9160_v50 = vld [vmem:[%s10517_s1 + $0x2b0] sm:$0xff]  ;;  %v9242_v52 = vld [vmem:[%s10517_s1 + $0xfc8] sm:$0xff] }
 0x16b   :  { %3964 = vmatpush1.bf16.msra.mxu1 %v6727_v22  ;;  %v6347_v44 = vcombine.low %v6338_v5, %v6345_v34  ;;  %v4540_v36 = vrot.slane %v4532_v48, %v7986_v45  ;;  %v3455_v63 = vpop.f32.mrf.mxu0  ;;  %v3496_v1 = vpop.f32.mrf.mxu1  ;;  %v6988_v9 = vcombine.high %v295_v11, %v327_v55  ;;  %v5705_v26 = vmul.f32 %v3450_v23, %v3450_v23  ;;  %v9155_v5 = vld [vmem:[%s10517_s1 + $0x5b8] sm:$0xff]  ;;  %v9165_v14 = vld [vmem:[%s10517_s1 + $0x3b0] sm:$0xff] }
 0x16c   :  { %4031 = vmatprep.subr.bf16.mxu1 %v7180_v24  ;;  %3941 = vmatmul.mubr.bf16.vlgmr.msra.gmra.mxu0 %v8903_v13  ;;  %v4547_v62 = vrot.slane %v4533_v39, %v7986_v45  ;;  %v4895_v21 = vsel %vm4768_vm0, %v9083_v40, 0.0  ;;  %v6985_v22 = vcombine.low %v294_v27, %v326_v41  ;;  %v4888_v37 = vsel %vm4768_vm0, %v9088_v15, 0.0  ;;  %v9148_v24 = vld [vmem:[%s10517_s1 + $0x4b8] sm:$0xff]  ;;  %v9198_v54 = vld [vmem:[%s10517_s1 + $0xb0] sm:$0xff]  ;;  %v9231_v27 = vld [vmem:[%s10517_s1 + $0xfc0] sm:$0xff] }
 0x16d   :  { %3991 = vmatpush1.bf16.msra.mxu0 %v7177_v35  ;;  %v6361_v31 = vrot.slane %v6347_v44, %v8048_v18  ;;  %4022 = vmatprep.mubr.bf16.mxu0 %v7204_v3  ;;  %v6987_v2 = vcombine.low %v295_v11, %v327_v55  ;;  %v6922_v33 = vcombine.high %v230_v25, %v262_v7  ;;  %v4882_v8 = vrot.slane %v4881_v4, 4  ;;  %v9182_v34 = vld [vmem:[%s10517_s1 + $0x3b8] sm:$0xff]  ;;  %v9237_v55 = vld [vmem:[%s10517_s1 + $0xec8] sm:$0xff]  ;;  %v9253_v63 = vld [vmem:[%s10517_s1 + $0xcc0] sm:$0xff] }
 0x16e   :  { %3982 = vmatmul.mubr.bf16.vlgmr.msra.gmra.mxu1 %v8903_v13  ;;  %3992 = vmatprep.subr.bf16.mxu0 %v7114_v29  ;;  %v4548_v58 = vcombine.low %v4540_v36, %v4547_v62  ;;  %v6921_v49 = vcombine.low %v230_v25, %v262_v7  ;;  %v6924_v0 = vcombine.high %v9123_v57, %v9128_v32  ;;  %v4896_v61 = vrot.slane %v4895_v21, 4  ;;  %v9221_v48 = vld [vmem:[%s10517_s1 + $0x1b8] sm:$0xff]  ;;  %v9269_v7 = vld [vmem:[%s10517_s1 + $0xcc8] sm:$0xff] }
 0x16f   :  { %4032 = vmatpush1.bf16.msra.mxu1 %v7179_v53  ;;  %v6362_v17 = vcombine.low %v6354_v43, %v6361_v31  ;;  %4063 = vmatprep.mubr.bf16.mxu1 %v7204_v3  ;;  %v5707_v35 = vmul.f32 %v9083_v40, %v9083_v40  ;;  %v6923_v53 = vcombine.low %v9123_v57, %v9128_v32  ;;  %v5865_v29 = vsel %vm4768_vm0, %v5705_v26, 0.0  ;;  %v9203_v40 = vld [vmem:[%s10517_s1 + $0x1b0] sm:$0xff]  ;;  %v9274_v62 = vld [vmem:[%s10517_s1 + $0xdc8] sm:$0xff] }
 0x170   :  { %4033 = vmatprep.subr.bf16.mxu1 %v7116_v60  ;;  %4756 = vst [vmem:[%s10519_s2 + $0x20] sm:$0xff] %v4548_v58  ;;  %v4889_v60 = vrot.slane %v4888_v37, 4  ;;  %v6857_v19 = vcombine.low %v9138_v28, %v9143_v30  ;;  %v6858_v42 = vcombine.high %v9138_v28, %v9143_v30  ;;  %v6859_v44 = vcombine.low %v9148_v24, %v9155_v5  ;;  %v9297_v28 = vld [vmem:[%s10517_s1 + $0xac8] sm:$0xff] }
 0x171   :  { %3993 = vmatpush1.bf16.msra.mxu0 %v7113_v6  ;;  %6666 = vst [vmem:[%s10521_s4 + $0x8] sm:$0xff] %v6362_v17  ;;  %v6860_v23 = vcombine.high %v9148_v24, %v9155_v5  ;;  %v6794_v59 = vcombine.high %v9160_v50, %v9165_v14  ;;  %v9208_v6 = vld [vmem:[%s10517_s1 + $0xb8] sm:$0xff]  ;;  %v6793_v43 = vcombine.low %v9160_v50, %v9165_v14  ;;  %v5866_v17 = vrot.slane %v5865_v29, 4  ;;  %v9302_v30 = vld [vmem:[%s10517_s1 + $0xbc8] sm:$0xff] }
 0x172   :  { %3994 = vmatprep.subr.bf16.mxu0 %v7050_v10  ;;  %v6795_v31 = vcombine.low %v9177_v38, %v9182_v34  ;;  %v6796_v10 = vcombine.high %v9177_v38, %v9182_v34  ;;  %v4883_v41 = vadd.f32 %v4882_v8, %v4881_v4  ;;  %v4897_v12 = vadd.f32 %v4896_v61, %v4895_v21  ;;  %v9285_v21 = vld [vmem:[%s10517_s1 + $0xac0] sm:$0xff] }
 0x173   :  { %4034 = vmatpush1.bf16.msra.mxu1 %v7115_v16  ;;  %v4902_v16 = vsel %vm4768_vm0, %v9091_v46, 0.0  ;;  %v5879_v11 = vsel %vm4768_vm0, %v5707_v35, 0.0  ;;  %v6729_v36 = vcombine.low %v9198_v54, %v9203_v40  ;;  %v6730_v39 = vcombine.high %v9198_v54, %v9203_v40  ;;  %v9414_v34 = vld [vmem:[%s10517_s1 + $0x3c0] sm:$0xff] }
 0x174   :  { %4035 = vmatprep.subr.bf16.mxu1 %v7052_v51  ;;  %v9226_v51 = vld [vmem:[%s10517_s1 + $0xec0] sm:$0xff]  ;;  %v4903_v1 = vrot.slane %v4902_v16, 4  ;;  %v5880_v57 = vrot.slane %v5879_v11, 4  ;;  %v7183_v4 = vcombine.low %v9237_v55, %v9242_v52  ;;  %v7184_v26 = vcombine.high %v9237_v55, %v9242_v52 }
 0x175   :  { %3995 = vmatpush1.bf16.msra.mxu0 %v7049_v20  ;;  %v4890_v20 = vadd.f32 %v4889_v60, %v4888_v37  ;;  %v7181_v25 = vcombine.low %v9226_v51, %v9231_v27  ;;  %v7182_v32 = vcombine.high %v9226_v51, %v9231_v27  ;;  %v5867_v37 = vadd.f32 %v5866_v17, %v5865_v29  ;;  %v9321_v29 = vld [vmem:[%s10517_s1 + $0x9c0] sm:$0xff] }
 0x176   :  { %3996 = vmatprep.subr.bf16.mxu0 %v6986_v56  ;;  %v9258_v56 = vld [vmem:[%s10517_s1 + $0xdc0] sm:$0xff]  ;;  %v4898_v58 = vrot.slane %v4897_v12, 2  ;;  %v7119_v5 = vcombine.low %v9269_v7, %v9274_v62  ;;  %v4904_v8 = vadd.f32 %v4903_v1, %v4902_v16  ;;  %v5708_v61 = vmul.f32 %v9091_v46, %v9091_v46  ;;  %v9352_v1 = vld [vmem:[%s10517_s1 + $0x6c8] sm:$0xff] }
 0x177   :  { %4036 = vmatpush1.bf16.msra.mxu1 %v7051_v47  ;;  %v5706_v47 = vmul.f32 %v9088_v15, %v9088_v15  ;;  %v6731_v15 = vcombine.low %v9208_v6, %v9221_v48  ;;  %v4891_v24 = vrot.slane %v4890_v20, 2  ;;  %v7120_v35 = vcombine.high %v9269_v7, %v9274_v62 }
 0x178   :  { %4037 = vmatprep.subr.bf16.mxu1 %v6988_v9  ;;  %v6732_v9 = vcombine.high %v9208_v6, %v9221_v48  ;;  %v5881_v60 = vadd.f32 %v5880_v57, %v5879_v11  ;;  %v4899_v17 = vadd.f32 %v4898_v58, %v4897_v12  ;;  %v9357_v57 = vld [vmem:[%s10517_s1 + $0x7c8] sm:$0xff]  ;;  %v4905_v58 = vrot.slane %v4904_v8, 2 }
 0x179   :  { %3997 = vmatpush1.bf16.msra.mxu0 %v6985_v22  ;;  %v4884_v22 = vrot.slane %v4883_v41, 2  ;;  %v5886_v46 = vsel %vm4768_vm0, %v5708_v61, 0.0  ;;  %v9400_v61 = vld [vmem:[%s10517_s1 + $0x5c8] sm:$0xff] }
 0x17a   :  { %3998 = vmatprep.subr.bf16.mxu0 %v6922_v33  ;;  %v9292_v33 = vld [vmem:[%s10517_s1 + $0xbc0] sm:$0xff]  ;;  %v4900_v38 = vrot.slane %v4899_v17, 1 }
 0x17b   :  { %4038 = vmatpush1.bf16.msra.mxu1 %v6987_v2  ;;  %v7117_v2 = vcombine.low %v9253_v63, %v9258_v56  ;;  %v4885_v16 = vadd.f32 %v4884_v22, %v4883_v41  ;;  %v7056_v41 = vcombine.high %v9297_v28, %v9302_v30  ;;  %v5887_v22 = vrot.slane %v5886_v46, 4 }
 0x17c   :  { %4039 = vmatprep.subr.bf16.mxu1 %v6924_v0  ;;  %v7118_v0 = vcombine.high %v9253_v63, %v9258_v56 }
 0x17d   :  { %3999 = vmatpush1.bf16.msra.mxu0 %v6921_v49  ;;  %v5872_v49 = vsel %vm4768_vm0, %v5706_v47, 0.0  ;;  %v9347_v47 = vld [vmem:[%s10517_s1 + $0x7c0] sm:$0xff] }
 0x17e   :  { %4000 = vmatprep.subr.bf16.mxu0 %v6858_v42  ;;  %v5873_v11 = vrot.slane %v5872_v49, 4  ;;  %v4892_v42 = vadd.f32 %v4891_v24, %v4890_v20  ;;  %v9384_v20 = vld [vmem:[%s10517_s1 + $0x5c0] sm:$0xff]  ;;  %v5882_v24 = vrot.slane %v5881_v60, 2 }
 0x17f   :  { %4040 = vmatpush1.bf16.msra.mxu1 %v6923_v53  ;;  %v9316_v53 = vld [vmem:[%s10517_s1 + $0x8c0] sm:$0xff] }
 0x180   :  { %4041 = vmatprep.subr.bf16.mxu1 %v6860_v23  ;;  %v9337_v23 = vld [vmem:[%s10517_s1 + $0x9c8] sm:$0xff]  ;;  %v9404_v12 = vadd.f32 %v5873_v11, %v5872_v49  ;;  %v4893_v14 = vrot.slane %v4892_v42, 1  ;;  %v9449_v11 = vadd.f32 %v4900_v38, %v4899_v17 }
 0x181   :  { %4001 = vmatpush1.bf16.msra.mxu0 %v6857_v19  ;;  %v7054_v19 = vcombine.high %v9285_v21, %v9292_v33 }
 0x182   :  { %4002 = vmatprep.subr.bf16.mxu0 %v6794_v59  ;;  %v9342_v59 = vld [vmem:[%s10517_s1 + $0x6c0] sm:$0xff] }
 0x183   :  { %4042 = vmatpush1.bf16.msra.mxu1 %v6859_v44  ;;  %v9332_v44 = vld [vmem:[%s10517_s1 + $0x8c8] sm:$0xff] }
 0x184   :  { %4043 = vmatprep.subr.bf16.mxu1 %v6796_v10  ;;  %v5868_v10 = vrot.slane %v5867_v37, 2 }
 0x185   :  { %4003 = vmatpush1.bf16.msra.mxu0 %v6793_v43  ;;  %v9379_v43 = vld [vmem:[%s10517_s1 + $0x4c0] sm:$0xff]  ;;  %v3573_v54 = vpop.f32.mrf.mxu1 }
 0x186   :  { %4004 = vmatprep.subr.bf16.mxu0 %v6730_v39  ;;  %v9395_v39 = vld [vmem:[%s10517_s1 + $0x4c8] sm:$0xff]  ;;  %v9402_v50 = vadd.f32 %v5868_v10, %v5867_v37  ;;  %v6928_v37 = vcombine.high %v9352_v1, %v9357_v57  ;;  %v9423_v10 = vadd.f32 %v4905_v58, %v4904_v8  ;;  %v3532_v58 = vpop.f32.mrf.mxu0  ;;  %v4923_v38 = vsel %vm4768_vm0, %v3573_v54, 0.0 }
 0x187   :  { %4044 = vmatpush1.bf16.msra.mxu1 %v6795_v31  ;;  %v9409_v31 = vld [vmem:[%s10517_s1 + $0x2c0] sm:$0xff]  ;;  %v4909_v40 = vsel %vm4768_vm0, %v3532_v58, 0.0  ;;  %v5709_v48 = vmul.f32 %v3532_v58, %v3532_v58 }
 0x188   :  { %4045 = vmatprep.subr.bf16.mxu1 %v6732_v9  ;;  %v4886_v9 = vrot.slane %v4885_v16, 1  ;;  %v4910_v17 = vrot.slane %v4909_v40, 4 }
 0x189   :  { %4005 = vmatpush1.bf16.msra.mxu0 %v6729_v36  ;;  %v9435_v36 = vadd.f32 %v5882_v24, %v5881_v60  ;;  %v5875_v60 = vrot.slane %v9404_v12, 2  ;;  %v5888_v24 = vadd.f32 %v5887_v22, %v5886_v46  ;;  %v3534_v46 = vpop.f32.mrf.mxu0 }
 0x18a   :  { %4072 = vmatprep.subr.bf16.mxu0 %v7182_v32  ;;  %v9446_v32 = vadd.f32 %v4886_v9, %v4885_v16  ;;  %v4907_v16 = vrot.slane %v9423_v10, 1  ;;  %v5711_v9 = vmul.f32 %v3573_v54, %v3573_v54  ;;  %v4549_v51 = vcombine.low %v3532_v58, %v3534_v46 }
 0x18b   :  { %4046 = vmatpush1.bf16.msra.mxu1 %v6731_v15  ;;  %v4916_v27 = vsel %vm4768_vm0, %v3534_v46, 0.0  ;;  %v4911_v55 = vadd.f32 %v4910_v17, %v4909_v40  ;;  %v5710_v15 = vmul.f32 %v3534_v46, %v3534_v46  ;;  %v5876_v7 = vadd.f32 %v5875_v60, %v9404_v12 }
 0x18c   :  { %4113 = vmatprep.subr.bf16.mxu1 %v7184_v26  ;;  %4023 = vmatmul.mubr.bf16.vlgmr.msra.gmra.mxu0 %v8903_v13  ;;  %v9453_v26 = vadd.f32 %v4893_v14, %v4892_v42  ;;  %v4924_v42 = vrot.slane %v4923_v38, 4  ;;  %v4917_v22 = vrot.slane %v4916_v27, 4  ;;  %v3536_v14 = vpop.f32.mrf.mxu0  ;;  %v10558_v12 = vcombine.high %v9316_v53, %v9321_v29 }
 0x18d   :  { %4073 = vmatpush1.bf16.msra.mxu0 %v7181_v25  ;;  %v3575_v25 = vpop.f32.mrf.mxu1  ;;  %4104 = vmatprep.mubr.bf16.mxu0 %v7204_v3 }
 0x18e   :  { %4064 = vmatmul.mubr.bf16.vlgmr.msra.gmra.mxu1 %v8903_v13  ;;  %4074 = vmatprep.subr.bf16.mxu0 %v7118_v0  ;;  %v5893_v13 = vsel %vm4768_vm0, %v5709_v48, 0.0  ;;  %v5889_v0 = vrot.slane %v5888_v24, 2  ;;  %v4925_v48 = vadd.f32 %v4924_v42, %v4923_v38  ;;  %v4918_v8 = vadd.f32 %v4917_v22, %v4916_v27  ;;  %v3537_v17 = vpop.f32.mrf.mxu0 }
 0x18f   :  { %4114 = vmatpush1.bf16.msra.mxu1 %v7183_v4  ;;  %v5894_v52 = vrot.slane %v5893_v13, 4  ;;  %v5907_v4 = vsel %vm4768_vm0, %v5711_v9, 0.0  ;;  %4145 = vmatprep.mubr.bf16.mxu1 %v7204_v3  ;;  %v3577_v6 = vpop.f32.mrf.mxu1  ;;  %v4550_v40 = vcombine.low %v3573_v54, %v3575_v25  ;;  %v5900_v9 = vsel %vm4768_vm0, %v5710_v15, 0.0 }
 0x190   :  { %4115 = vmatprep.subr.bf16.mxu1 %v7120_v35  ;;  %v5908_v58 = vrot.slane %v5907_v4, 4  ;;  %v4912_v35 = vrot.slane %v4911_v55, 2  ;;  %v4926_v38 = vrot.slane %v4925_v48, 2  ;;  %v4557_v6 = vrot.slane %v4549_v51, %v7986_v45 }
 0x191   :  { %4075 = vmatpush1.bf16.msra.mxu0 %v7117_v2  ;;  %v5895_v49 = vadd.f32 %v5894_v52, %v5893_v13  ;;  %v4930_v63 = vsel %vm4768_vm0, %v3575_v25, 0.0  ;;  %v3578_v56 = vpop.f32.mrf.mxu1  ;;  %v4919_v2 = vrot.slane %v4918_v8, 2  ;;  %v4908_v54 = vadd.f32 %v4907_v16, %v9423_v10 }
 0x192   :  { %4076 = vmatprep.subr.bf16.mxu0 %v7054_v19  ;;  %v4913_v62 = vadd.f32 %v4912_v35, %v4911_v55  ;;  %v5890_v19 = vadd.f32 %v5889_v0, %v5888_v24  ;;  %v4564_v46 = vrot.slane %v4550_v40, %v7986_v45  ;;  %v4931_v13 = vrot.slane %v4930_v63, 4 }
 0x193   :  { %4116 = vmatpush1.bf16.msra.mxu1 %v7119_v5  ;;  %v5901_v5 = vrot.slane %v5900_v9, 4  ;;  %v10556_v15 = vcombine.low %v9285_v21, %v9292_v33  ;;  %v5896_v42 = vrot.slane %v5895_v49, 2  ;;  %v5909_v51 = vadd.f32 %v5908_v58, %v5907_v4 }
 0x194   :  { %4117 = vmatprep.subr.bf16.mxu1 %v7056_v41  ;;  %v4920_v27 = vadd.f32 %v4919_v2, %v4918_v8  ;;  %v10557_v41 = vcombine.low %v9297_v28, %v9302_v30  ;;  %v4914_v10 = vrot.slane %v4913_v62, 1  ;;  %v4927_v60 = vadd.f32 %v4926_v38, %v4925_v48 }
 0x195   :  { %4077 = vmatpush1.bf16.msra.mxu0 %v10556_v15  ;;  %v5902_v52 = vadd.f32 %v5901_v5, %v5900_v9  ;;  %v4565_v24 = vcombine.low %v4557_v6, %v4564_v46  ;;  %v4932_v16 = vadd.f32 %v4931_v13, %v4930_v63  ;;  %v10559_v21 = vcombine.high %v9332_v44, %v9337_v23 }
 0x196   :  { %4078 = vmatprep.subr.bf16.mxu0 %v10558_v12  ;;  %v5379_v33 = vcombine.low %v9446_v32, %v9453_v26  ;;  %v5877_v8 = vrot.slane %v5876_v7, 1  ;;  %v4921_v55 = vrot.slane %v4920_v27, 1  ;;  %v5380_v28 = vcombine.low %v9449_v11, %v4908_v54  ;;  %v9518_v32 = vld [vmem:[%s10517_s1 + $0x2c8] sm:$0xff] }
 0x197   :  { %4118 = vmatpush1.bf16.msra.mxu1 %v10557_v41  ;;  %v5903_v4 = vrot.slane %v5902_v52, 2  ;;  %v5891_v30 = vrot.slane %v5890_v19, 1  ;;  %4757 = vst [vmem:[%s10519_s2 + $0x28] sm:$0xff] %v4565_v24  ;;  %v4933_v22 = vrot.slane %v4932_v16, 2  ;;  %v5712_v14 = vmul.f32 %v3575_v25, %v3575_v25  ;;  %v9523_v11 = vld [vmem:[%s10517_s1 + $0x3c8] sm:$0xff] }
 0x198   :  { %4119 = vmatprep.subr.bf16.mxu1 %v10559_v21  ;;  %v10560_v0 = vcombine.low %v9316_v53, %v9321_v29  ;;  %v5897_v26 = vadd.f32 %v5896_v42, %v5895_v49  ;;  %v5910_v48 = vrot.slane %v5909_v51, 2  ;;  %v4922_v58 = vadd.f32 %v4921_v55, %v4920_v27  ;;  %v41_v12 = vld [vmem:[%s10517_s1 + $0xc8] sm:$0xff] }
 0x199   :  { %v5904_v35 = vadd.f32 %v5903_v4, %v5902_v52  ;;  %v10561_v25 = vcombine.low %v9332_v44, %v9337_v23  ;;  %v10562_v53 = vcombine.high %v9342_v59, %v9347_v47  ;;  %v4915_v29 = vadd.f32 %v4914_v10, %v4913_v62  ;;  %v73_v10 = vld [vmem:[%s10517_s1 + $0x1c8] sm:$0xff] }
 0x19a   :  { %4079 = vmatpush1.bf16.msra.mxu0 %v10560_v0  ;;  %v4928_v40 = vrot.slane %v4927_v60, 1  ;;  %v4934_v17 = vadd.f32 %v4933_v22, %v4932_v16  ;;  %v5914_v38 = vsel %vm4768_vm0, %v5712_v14, 0.0  ;;  %v5884_v49 = vrot.slane %v9435_v36, 1  ;;  %v490_v22 = vld [vmem:[%s10517_s1 + $0xed0] sm:$0xff] }
 0x19b   :  { %4120 = vmatpush1.bf16.msra.mxu1 %v10561_v25  ;;  %4080 = vmatprep.subr.bf16.mxu0 %v10562_v53  ;;  %v5905_v6 = vrot.slane %v5904_v35, 1  ;;  %v5915_v9 = vrot.slane %v5914_v38, 4  ;;  %v6800_v44 = vcombine.high %v9518_v32, %v9523_v11  ;;  %v10563_v23 = vrot.slane %v9402_v50, 1 }
 0x19c   :  { %4121 = vmatprep.subr.bf16.mxu1 %v6928_v37  ;;  %v5878_v56 = vadd.f32 %v5877_v8, %v5876_v7  ;;  %v5381_v62 = vcombine.low %v4915_v29, %v4922_v58  ;;  %v4935_v2 = vrot.slane %v4934_v17, 1  ;;  %v10564_v5 = vcombine.low %v9342_v59, %v9347_v47  ;;  %v72_v59 = vld [vmem:[%s10517_s1 + $0x1c0] sm:$0xff] }
 0x19d   :  { %v5871_v63 = vadd.f32 %v10563_v23, %v9402_v50  ;;  %v5892_v54 = vadd.f32 %v5891_v30, %v5890_v19  ;;  %v5898_v37 = vrot.slane %v5897_v26, 1  ;;  %v5911_v46 = vadd.f32 %v5910_v48, %v5909_v51  ;;  %v40_v50 = vld [vmem:[%s10517_s1 + $0xc0] sm:$0xff]  ;;  %v427_v23 = vld [vmem:[%s10517_s1 + $0xcd8] sm:$0xff] }
 0x19e   :  { %4081 = vmatpush1.bf16.msra.mxu0 %v10564_v5  ;;  %v5916_v13 = vadd.f32 %v5915_v9, %v5914_v38  ;;  %v10565_v15 = vcombine.low %v9352_v1, %v9357_v57  ;;  %v10566_v42 = vcombine.high %v9379_v43, %v9384_v20  ;;  %v5389_v47 = vrot.slane %v5379_v33, %v8048_v18  ;;  %v426_v9 = vld [vmem:[%s10517_s1 + $0xcd0] sm:$0xff] }
 0x19f   :  { %v5396_v7 = vrot.slane %v5380_v28, %v8048_v18  ;;  %v4929_v19 = vadd.f32 %v4928_v40, %v4927_v60  ;;  %v4936_v51 = vadd.f32 %v4935_v2, %v4934_v17  ;;  %v10567_v1 = vcombine.high %v9395_v39, %v9400_v61 }
 0x1a0   :  { %4122 = vmatpush1.bf16.msra.mxu1 %v10565_v15  ;;  %4082 = vmatprep.subr.bf16.mxu0 %v10566_v42  ;;  %v5885_v57 = vadd.f32 %v5884_v49, %v9435_v36  ;;  %v5906_v27 = vadd.f32 %v5905_v6, %v5904_v35  ;;  %v5917_v52 = vrot.slane %v5916_v13, 2  ;;  %v6799_v41 = vcombine.low %v9518_v32, %v9523_v11  ;;  %v491_v11 = vld [vmem:[%s10517_s1 + $0xed8] sm:$0xff]  ;;  %v394_v15 = vld [vmem:[%s10517_s1 + $0xbd0] sm:$0xff] }
 0x1a1   :  { %4123 = vmatprep.subr.bf16.mxu1 %v10567_v1  ;;  %v6363_v60 = vcombine.low %v5871_v63, %v5878_v56  ;;  %v5403_v24 = vrot.slane %v5381_v62, %v8048_v18  ;;  %v5382_v16 = vcombine.low %v4929_v19, %v4936_v51  ;;  %v10568_v36 = vcombine.low %v9379_v43, %v9384_v20  ;;  %v522_v43 = vld [vmem:[%s10517_s1 + $0xfd0] sm:$0xff]  ;;  %v459_v63 = vld [vmem:[%s10517_s1 + $0xdd8] sm:$0xff] }
 0x1a2   :  { %v6734_v21 = vcombine.high %v40_v50, %v72_v59  ;;  %v6364_v33 = vcombine.low %v5885_v57, %v5892_v54  ;;  %v5899_v8 = vadd.f32 %v5898_v37, %v5897_v26  ;;  %v5912_v55 = vrot.slane %v5911_v46, 1  ;;  %v523_v26 = vld [vmem:[%s10517_s1 + $0xfd8] sm:$0xff] }
 0x1a3   :  { %4083 = vmatpush1.bf16.msra.mxu0 %v10568_v36  ;;  %v5918_v4 = vadd.f32 %v5917_v52, %v5916_v13  ;;  %v10569_v28 = vcombine.low %v9395_v39, %v9400_v61  ;;  %v10570_v30 = vcombine.high %v9409_v31, %v9414_v34  ;;  %v5411_v20 = vcombine.low %v5389_v47, %v5396_v7  ;;  %v362_v13 = vld [vmem:[%s10517_s1 + $0xad0] sm:$0xff]  ;;  %v363_v47 = vld [vmem:[%s10517_s1 + $0xad8] sm:$0xff] }
 0x1a4   :  { %v5410_v14 = vrot.slane %v5382_v16, %v8048_v18  ;;  %v6736_v0 = vcombine.high %v41_v12, %v73_v10  ;;  %v6365_v32 = vcombine.low %v5899_v8, %v5906_v27  ;;  %v6733_v61 = vcombine.low %v40_v50, %v72_v59  ;;  %v9626_v59 = vld [vmem:[%s10518_s0] sm:$0x1]  ;;  %v395_v7 = vld [vmem:[%s10517_s1 + $0xbd8] sm:$0xff]  ;;  %v330_v16 = vld [vmem:[%s10517_s1 + $0x9d0] sm:$0xff] }
 0x1a5   :  { %4124 = vmatpush1.bf16.msra.mxu1 %v10569_v28  ;;  %4084 = vmatprep.subr.bf16.mxu0 %v10570_v30  ;;  %v5919_v39 = vrot.slane %v5918_v4, 1  ;;  %v6373_v48 = vrot.slane %v6363_v60, %v8048_v18  ;;  %v10571_v35 = vcombine.low %v9409_v31, %v9414_v34  ;;  %v6735_v25 = vcombine.low %v41_v12, %v73_v10  ;;  %v458_v34 = vld [vmem:[%s10517_s1 + $0xdd0] sm:$0xff]  ;;  %v3614_v50 = vpop.f32.mrf.mxu0  ;;  %v9635_v19 = vpop.f32.mrf.mxu1  ;;  %v331_v8 = vld [vmem:[%s10517_s1 + $0x9d8] sm:$0xff] }
 0x1a6   :  { %4125 = vmatprep.subr.bf16.mxu1 %v6800_v44  ;;  %v5412_v58 = vcombine.low %v5403_v24, %v5410_v14  ;;  %v7186_v53 = vcombine.high %v490_v22, %v522_v43  ;;  %v6380_v29 = vrot.slane %v6364_v33, %v8048_v18  ;;  %v5913_v40 = vadd.f32 %v5912_v55, %v5911_v46  ;;  %v298_v24 = vld [vmem:[%s10517_s1 + $0x8d0] sm:$0xff]  ;;  %v299_v33 = vld [vmem:[%s10517_s1 + $0x8d8] sm:$0xff] }
 0x1a7   :  { %4085 = vmatpush1.bf16.msra.mxu0 %v10571_v35  ;;  %v5920_v17 = vadd.f32 %v5919_v39, %v5918_v4  ;;  %v5419_v38 = vrot.slane %v5411_v20, %v8048_v18  ;;  %v7188_v6 = vcombine.high %v491_v11, %v523_v26  ;;  %v6387_v31 = vrot.slane %v6365_v32, %v8048_v18  ;;  %v9640_v52 = vpop.f32.mrf.mxu0  ;;  %v9643_v10 = vpop.f32.mrf.mxu1  ;;  %v234_v32 = vld [vmem:[%s10517_s1 + $0x6d0] sm:$0xff] }
 0x1a8   :  { %4086 = vmatprep.subr.bf16.mxu0 %v6734_v21  ;;  %v5426_v49 = vrot.slane %v5412_v58, %v8048_v18  ;;  %v7185_v62 = vcombine.low %v490_v22, %v522_v43  ;;  %v7187_v2 = vcombine.low %v491_v11, %v523_v26  ;;  %v6395_v5 = vcombine.low %v6373_v48, %v6380_v29  ;;  %v266_v39 = vld [vmem:[%s10517_s1 + $0x7d0] sm:$0xff]  ;;  %v9675_v11 = vld [vmem:[%s10517_s1 + $0x6d8] sm:$0xff] }
 0x1a9   :  { %4126 = vmatpush1.bf16.msra.mxu1 %v6799_v41  ;;  %v6366_v44 = vcombine.low %v5913_v40, %v5920_v17  ;;  %v7122_v37 = vcombine.high %v426_v9, %v458_v34  ;;  %v7124_v46 = vcombine.high %v427_v23, %v459_v63  ;;  %v7121_v51 = vcombine.low %v426_v9, %v458_v34  ;;  %v3618_v21 = vpop.f32.mrf.mxu0  ;;  %v3659_v55 = vpop.f32.mrf.mxu1  ;;  %v9680_v26 = vld [vmem:[%s10517_s1 + $0x7d8] sm:$0xff] }
 0x1aa   :  { %4127 = vmatprep.subr.bf16.mxu1 %v6736_v0  ;;  %v5427_v56 = vcombine.low %v5419_v38, %v5426_v49  ;;  %v7123_v1 = vcombine.low %v427_v23, %v459_v63  ;;  %v6403_v57 = vrot.slane %v6395_v5, %v8048_v18  ;;  %v7058_v41 = vcombine.high %v362_v13, %v394_v15  ;;  %v9690_v38 = vld [vmem:[%s10517_s1 + $0x4d0] sm:$0xff]  ;;  %v9729_v5 = vld [vmem:[%s10517_s1 + $0x2d8] sm:$0xff]  ;;  %v9794_v55 = vld [vmem:[%s10517_s1 + $0xfe8] sm:$0xff] }
 0x1ab   :  { %4087 = vmatpush1.bf16.msra.mxu0 %v6733_v61  ;;  %v6394_v54 = vrot.slane %v6366_v44, %v8048_v18  ;;  %v4566_v12 = vcombine.low %v3614_v50, %v9640_v52  ;;  %v7060_v60 = vcombine.high %v363_v47, %v395_v7  ;;  %v7057_v4 = vcombine.low %v362_v13, %v394_v15  ;;  %v3619_v43 = vpop.f32.mrf.mxu0  ;;  %v3660_v14 = vpop.f32.mrf.mxu1  ;;  %v9695_v49 = vld [vmem:[%s10517_s1 + $0x5d0] sm:$0xff] }
 0x1ac   :  { %4154 = vmatprep.subr.bf16.mxu0 %v7186_v53  ;;  %5683 = vst [vmem:[%s10520_s3 + $0x10] sm:$0xff] %v5427_v56  ;;  %v7059_v28 = vcombine.low %v363_v47, %v395_v7  ;;  %v4567_v22 = vcombine.low %v9635_v19, %v9643_v10  ;;  %v6994_v20 = vcombine.high %v298_v24, %v330_v16  ;;  %v4937_v48 = vsel %vm4768_vm0, %v3614_v50, 0.0  ;;  %v9712_v44 = vld [vmem:[%s10517_s1 + $0x2d0] sm:$0xff]  ;;  %v9805_v43 = vld [vmem:[%s10517_s1 + $0xce0] sm:$0xff] }
 0x1ad   :  { %4128 = vmatpush1.bf16.msra.mxu1 %v6735_v25  ;;  %v6396_v42 = vcombine.low %v6387_v31, %v6394_v54  ;;  %v4574_v30 = vrot.slane %v4566_v12, %v7986_v45  ;;  %v6996_v0 = vcombine.high %v299_v33, %v331_v8  ;;  %v5713_v58 = vmul.f32 %v3614_v50, %v3614_v50  ;;  %v9707_v31 = vld [vmem:[%s10517_s1 + $0x5d8] sm:$0xff]  ;;  %v9717_v23 = vld [vmem:[%s10517_s1 + $0x3d0] sm:$0xff] }
 0x1ae   :  { %4195 = vmatprep.subr.bf16.mxu1 %v7188_v6  ;;  %4105 = vmatmul.mubr.bf16.vlgmr.msra.gmra.mxu0 %v9626_v59  ;;  %v4581_v61 = vrot.slane %v4567_v22, %v7986_v45  ;;  %v4951_v35 = vsel %vm4768_vm0, %v9635_v19, 0.0  ;;  %v6993_v25 = vcombine.low %v298_v24, %v330_v16  ;;  %v4944_v53 = vsel %vm4768_vm0, %v9640_v52, 0.0  ;;  %v9700_v6 = vld [vmem:[%s10517_s1 + $0x4d8] sm:$0xff]  ;;  %v9750_v7 = vld [vmem:[%s10517_s1 + $0xd0] sm:$0xff]  ;;  %v9783_v24 = vld [vmem:[%s10517_s1 + $0xfe0] sm:$0xff] }
 0x1af   :  { %4155 = vmatpush1.bf16.msra.mxu0 %v7185_v62  ;;  %v6410_v27 = vrot.slane %v6396_v42, %v8048_v18  ;;  %4186 = vmatprep.mubr.bf16.mxu0 %v7204_v3  ;;  %v6995_v40 = vcombine.low %v299_v33, %v331_v8  ;;  %v6930_v17 = vcombine.high %v234_v32, %v266_v39  ;;  %v4938_v63 = vrot.slane %v4937_v48, 4  ;;  %v9734_v54 = vld [vmem:[%s10517_s1 + $0x3d8] sm:$0xff]  ;;  %v9789_v8 = vld [vmem:[%s10517_s1 + $0xee8] sm:$0xff] }
 0x1b0   :  { %4146 = vmatmul.mubr.bf16.vlgmr.msra.gmra.mxu1 %v9626_v59  ;;  %4156 = vmatprep.subr.bf16.mxu0 %v7122_v37  ;;  %v4582_v29 = vcombine.low %v4574_v30, %v4581_v61  ;;  %v6929_v9 = vcombine.low %v234_v32, %v266_v39  ;;  %v6932_v34 = vcombine.high %v9675_v11, %v9680_v26  ;;  %v4952_v56 = vrot.slane %v4951_v35, 4  ;;  %v9773_v12 = vld [vmem:[%s10517_s1 + $0x1d8] sm:$0xff]  ;;  %v9821_v39 = vld [vmem:[%s10517_s1 + $0xce8] sm:$0xff] }
 0x1b1   :  { %4196 = vmatpush1.bf16.msra.mxu1 %v7187_v2  ;;  %v6411_v36 = vcombine.low %v6403_v57, %v6410_v27  ;;  %4227 = vmatprep.mubr.bf16.mxu1 %v7204_v3  ;;  %v5715_v62 = vmul.f32 %v9635_v19, %v9635_v19  ;;  %v6931_v2 = vcombine.low %v9675_v11, %v9680_v26  ;;  %v5921_v37 = vsel %vm4768_vm0, %v5713_v58, 0.0  ;;  %v9755_v19 = vld [vmem:[%s10517_s1 + $0x1d0] sm:$0xff]  ;;  %v9826_v61 = vld [vmem:[%s10517_s1 + $0xde8] sm:$0xff] }
 0x1b2   :  { %4197 = vmatprep.subr.bf16.mxu1 %v7124_v46  ;;  %4758 = vst [vmem:[%s10519_s2 + $0x30] sm:$0xff] %v4582_v29  ;;  %v4945_v46 = vrot.slane %v4944_v53, 4  ;;  %v6865_v13 = vcombine.low %v9690_v38, %v9695_v49  ;;  %v6866_v15 = vcombine.high %v9690_v38, %v9695_v49  ;;  %v6867_v42 = vcombine.low %v9700_v6, %v9707_v31  ;;  %v9849_v38 = vld [vmem:[%s10517_s1 + $0xae8] sm:$0xff] }
 0x1b3   :  { %4157 = vmatpush1.bf16.msra.mxu0 %v7121_v51  ;;  %6667 = vst [vmem:[%s10521_s4 + $0x10] sm:$0xff] %v6411_v36  ;;  %v6868_v50 = vcombine.high %v9700_v6, %v9707_v31  ;;  %v6802_v47 = vcombine.high %v9712_v44, %v9717_v23  ;;  %v9760_v51 = vld [vmem:[%s10517_s1 + $0xd8] sm:$0xff]  ;;  %v6801_v57 = vcombine.low %v9712_v44, %v9717_v23  ;;  %v5922_v36 = vrot.slane %v5921_v37, 4  ;;  %v9854_v49 = vld [vmem:[%s10517_s1 + $0xbe8] sm:$0xff] }
 0x1b4   :  { %4158 = vmatprep.subr.bf16.mxu0 %v7058_v41  ;;  %v6803_v27 = vcombine.low %v9729_v5, %v9734_v54  ;;  %v6804_v41 = vcombine.high %v9729_v5, %v9734_v54  ;;  %v4939_v16 = vadd.f32 %v4938_v63, %v4937_v48  ;;  %v4953_v21 = vadd.f32 %v4952_v56, %v4951_v35  ;;  %v9837_v35 = vld [vmem:[%s10517_s1 + $0xae0] sm:$0xff] }
 0x1b5   :  { %4198 = vmatpush1.bf16.msra.mxu1 %v7123_v1  ;;  %v4958_v1 = vsel %vm4768_vm0, %v9643_v10, 0.0  ;;  %v5935_v33 = vsel %vm4768_vm0, %v5715_v62, 0.0  ;;  %v6737_v30 = vcombine.low %v9750_v7, %v9755_v19  ;;  %v6738_v22 = vcombine.high %v9750_v7, %v9755_v19  ;;  %v9966_v54 = vld [vmem:[%s10517_s1 + $0x3e0] sm:$0xff] }
 0x1b6   :  { %4199 = vmatprep.subr.bf16.mxu1 %v7060_v60  ;;  %v9778_v60 = vld [vmem:[%s10517_s1 + $0xee0] sm:$0xff]  ;;  %v4959_v14 = vrot.slane %v4958_v1, 4  ;;  %v5936_v11 = vrot.slane %v5935_v33, 4  ;;  %v7191_v48 = vcombine.low %v9789_v8, %v9794_v55  ;;  %v7192_v58 = vcombine.high %v9789_v8, %v9794_v55 }
 0x1b7   :  { %4159 = vmatpush1.bf16.msra.mxu0 %v7057_v4  ;;  %v4946_v4 = vadd.f32 %v4945_v46, %v4944_v53  ;;  %v7189_v32 = vcombine.low %v9778_v60, %v9783_v24  ;;  %v7190_v26 = vcombine.high %v9778_v60, %v9783_v24  ;;  %v5923_v53 = vadd.f32 %v5922_v36, %v5921_v37  ;;  %v9873_v37 = vld [vmem:[%s10517_s1 + $0x9e0] sm:$0xff] }
 0x1b8   :  { %4160 = vmatprep.subr.bf16.mxu0 %v6994_v20  ;;  %v9810_v20 = vld [vmem:[%s10517_s1 + $0xde0] sm:$0xff]  ;;  %v4954_v29 = vrot.slane %v4953_v21, 2  ;;  %v7127_v31 = vcombine.low %v9821_v39, %v9826_v61  ;;  %v4960_v63 = vadd.f32 %v4959_v14, %v4958_v1  ;;  %v5716_v56 = vmul.f32 %v9643_v10, %v9643_v10  ;;  %v9904_v14 = vld [vmem:[%s10517_s1 + $0x6e8] sm:$0xff] }
 0x1b9   :  { %4200 = vmatpush1.bf16.msra.mxu1 %v7059_v28  ;;  %v5714_v28 = vmul.f32 %v9640_v52, %v9640_v52  ;;  %v6739_v52 = vcombine.low %v9760_v51, %v9773_v12  ;;  %v4947_v6 = vrot.slane %v4946_v4, 2  ;;  %v7128_v62 = vcombine.high %v9821_v39, %v9826_v61 }
 0x1ba   :  { %4201 = vmatprep.subr.bf16.mxu1 %v6996_v0  ;;  %v6740_v0 = vcombine.high %v9760_v51, %v9773_v12  ;;  %v5937_v46 = vadd.f32 %v5936_v11, %v5935_v33  ;;  %v4955_v36 = vadd.f32 %v4954_v29, %v4953_v21  ;;  %v9909_v11 = vld [vmem:[%s10517_s1 + $0x7e8] sm:$0xff]  ;;  %v4961_v29 = vrot.slane %v4960_v63, 2 }
 0x1bb   :  { %4161 = vmatpush1.bf16.msra.mxu0 %v6993_v25  ;;  %v4940_v25 = vrot.slane %v4939_v16, 2  ;;  %v5942_v10 = vsel %vm4768_vm0, %v5716_v56, 0.0  ;;  %v9952_v56 = vld [vmem:[%s10517_s1 + $0x5e8] sm:$0xff] }
 0x1bc   :  { %4162 = vmatprep.subr.bf16.mxu0 %v6930_v17  ;;  %v9844_v17 = vld [vmem:[%s10517_s1 + $0xbe0] sm:$0xff]  ;;  %v4956_v5 = vrot.slane %v4955_v36, 1 }
 0x1bd   :  { %4202 = vmatpush1.bf16.msra.mxu1 %v6995_v40  ;;  %v7125_v40 = vcombine.low %v9805_v43, %v9810_v20  ;;  %v4941_v1 = vadd.f32 %v4940_v25, %v4939_v16  ;;  %v7064_v16 = vcombine.high %v9849_v38, %v9854_v49  ;;  %v5943_v25 = vrot.slane %v5942_v10, 4 }
 0x1be   :  { %4203 = vmatprep.subr.bf16.mxu1 %v6932_v34  ;;  %v7126_v34 = vcombine.high %v9805_v43, %v9810_v20 }
 0x1bf   :  { %4163 = vmatpush1.bf16.msra.mxu0 %v6929_v9  ;;  %v5928_v9 = vsel %vm4768_vm0, %v5714_v28, 0.0  ;;  %v9899_v28 = vld [vmem:[%s10517_s1 + $0x7e0] sm:$0xff] }
 0x1c0   :  { %4164 = vmatprep.subr.bf16.mxu0 %v6866_v15  ;;  %v5929_v33 = vrot.slane %v5928_v9, 4  ;;  %v4948_v15 = vadd.f32 %v4947_v6, %v4946_v4  ;;  %v9936_v4 = vld [vmem:[%s10517_s1 + $0x5e0] sm:$0xff]  ;;  %v5938_v6 = vrot.slane %v5937_v46, 2 }
 0x1c1   :  { %4204 = vmatpush1.bf16.msra.mxu1 %v6931_v2  ;;  %v9868_v2 = vld [vmem:[%s10517_s1 + $0x8e0] sm:$0xff] }
 0x1c2   :  { %4205 = vmatprep.subr.bf16.mxu1 %v6868_v50  ;;  %v9889_v50 = vld [vmem:[%s10517_s1 + $0x9e8] sm:$0xff]  ;;  %v9956_v21 = vadd.f32 %v5929_v33, %v5928_v9  ;;  %v4949_v23 = vrot.slane %v4948_v15, 1  ;;  %v10001_v33 = vadd.f32 %v4956_v5, %v4955_v36 }
 0x1c3   :  { %4165 = vmatpush1.bf16.msra.mxu0 %v6865_v13  ;;  %v7062_v13 = vcombine.high %v9837_v35, %v9844_v17 }
 0x1c4   :  { %4166 = vmatprep.subr.bf16.mxu0 %v6802_v47  ;;  %v9894_v47 = vld [vmem:[%s10517_s1 + $0x6e0] sm:$0xff] }
 0x1c5   :  { %4206 = vmatpush1.bf16.msra.mxu1 %v6867_v42  ;;  %v9884_v42 = vld [vmem:[%s10517_s1 + $0x8e8] sm:$0xff]  ;;  %v3737_v7 = vpop.f32.mrf.mxu1 }
 0x1c6   :  { %4207 = vmatprep.subr.bf16.mxu1 %v6804_v41  ;;  %v5924_v41 = vrot.slane %v5923_v53, 2  ;;  %v4979_v5 = vsel %vm4768_vm0, %v3737_v7, 0.0 }
 0x1c7   :  { %4167 = vmatpush1.bf16.msra.mxu0 %v6801_v57  ;;  %v9931_v57 = vld [vmem:[%s10517_s1 + $0x4e0] sm:$0xff] }
 0x1c8   :  { %4168 = vmatprep.subr.bf16.mxu0 %v6738_v22  ;;  %v9947_v22 = vld [vmem:[%s10517_s1 + $0x4e8] sm:$0xff]  ;;  %v9954_v44 = vadd.f32 %v5924_v41, %v5923_v53  ;;  %v9975_v41 = vadd.f32 %v4961_v29, %v4960_v63  ;;  %v3696_v29 = vpop.f32.mrf.mxu0 }
 0x1c9   :  { %4208 = vmatpush1.bf16.msra.mxu1 %v6803_v27  ;;  %v9961_v27 = vld [vmem:[%s10517_s1 + $0x2e0] sm:$0xff]  ;;  %v4965_v19 = vsel %vm4768_vm0, %v3696_v29, 0.0  ;;  %v5717_v12 = vmul.f32 %v3696_v29, %v3696_v29 }
 0x1ca   :  { %4209 = vmatprep.subr.bf16.mxu1 %v6740_v0  ;;  %v4942_v0 = vrot.slane %v4941_v1, 1  ;;  %v4966_v36 = vrot.slane %v4965_v19, 4 }
 0x1cb   :  { %4169 = vmatpush1.bf16.msra.mxu0 %v6737_v30  ;;  %v9987_v30 = vadd.f32 %v5938_v6, %v5937_v46  ;;  %v5931_v46 = vrot.slane %v9956_v21, 2  ;;  %v5944_v6 = vadd.f32 %v5943_v25, %v5942_v10  ;;  %v3698_v10 = vpop.f32.mrf.mxu0  ;;  %v4980_v25 = vrot.slane %v4979_v5, 4 }
 0x1cc   :  { %4236 = vmatprep.subr.bf16.mxu0 %v7190_v26  ;;  %v9998_v26 = vadd.f32 %v4942_v0, %v4941_v1  ;;  %v4963_v1 = vrot.slane %v9975_v41, 1  ;;  %v5719_v0 = vmul.f32 %v3737_v7, %v3737_v7  ;;  %v4583_v60 = vcombine.low %v3696_v29, %v3698_v10 }
 0x1cd   :  { %4210 = vmatpush1.bf16.msra.mxu1 %v6739_v52  ;;  %v4972_v24 = vsel %vm4768_vm0, %v3698_v10, 0.0  ;;  %v4967_v8 = vadd.f32 %v4966_v36, %v4965_v19  ;;  %v3700_v52 = vpop.f32.mrf.mxu0  ;;  %v5718_v51 = vmul.f32 %v3698_v10, %v3698_v10  ;;  %v5932_v39 = vadd.f32 %v5931_v46, %v9956_v21 }
 0x1ce   :  { %4277 = vmatprep.subr.bf16.mxu1 %v7192_v58  ;;  %4187 = vmatmul.mubr.bf16.vlgmr.msra.gmra.mxu0 %v9626_v59  ;;  %v10005_v58 = vadd.f32 %v4949_v23, %v4948_v15  ;;  %v5949_v15 = vsel %vm4768_vm0, %v5717_v12, 0.0  ;;  %v4973_v23 = vrot.slane %v4972_v24, 4  ;;  %v4981_v12 = vadd.f32 %v4980_v25, %v4979_v5 }
 0x1cf   :  { %4237 = vmatpush1.bf16.msra.mxu0 %v7189_v32  ;;  %v3739_v32 = vpop.f32.mrf.mxu1  ;;  %4268 = vmatprep.mubr.bf16.mxu0 %v7204_v3  ;;  %v5950_v55 = vrot.slane %v5949_v15, 4  ;;  %v3701_v52 = vpop.f32.mrf.mxu0  ;;  %v5956_v5 = vsel %vm4768_vm0, %v5718_v51, 0.0  ;;  %v10572_v51 = vcombine.low %v9837_v35, %v9844_v17  ;;  %v10574_v21 = vcombine.high %v9868_v2, %v9873_v37 }
 0x1d0   :  { %4228 = vmatmul.mubr.bf16.vlgmr.msra.gmra.mxu1 %v9626_v59  ;;  %4238 = vmatprep.subr.bf16.mxu0 %v7126_v34  ;;  %v5945_v34 = vrot.slane %v5944_v6, 2  ;;  %v4974_v53 = vadd.f32 %v4973_v23, %v4972_v24  ;;  %v4584_v19 = vcombine.low %v3737_v7, %v3739_v32  ;;  %v4982_v36 = vrot.slane %v4981_v12, 2 }
 0x1d1   :  { %4278 = vmatpush1.bf16.msra.mxu1 %v7191_v48  ;;  %v5963_v48 = vsel %vm4768_vm0, %v5719_v0, 0.0  ;;  %4309 = vmatprep.mubr.bf16.mxu1 %v7204_v3  ;;  %v3741_v9 = vpop.f32.mrf.mxu1  ;;  %v5951_v63 = vadd.f32 %v5950_v55, %v5949_v15  ;;  %v4986_v43 = vsel %vm4768_vm0, %v3739_v32, 0.0  ;;  %v4964_v7 = vadd.f32 %v4963_v1, %v9975_v41 }
 0x1d2   :  { %4279 = vmatprep.subr.bf16.mxu1 %v7128_v62  ;;  %v5964_v29 = vrot.slane %v5963_v48, 4  ;;  %v4968_v62 = vrot.slane %v4967_v8, 2  ;;  %v4591_v9 = vrot.slane %v4583_v60, %v7986_v45  ;;  %v4598_v0 = vrot.slane %v4584_v19, %v7986_v45 }
 0x1d3   :  { %4239 = vmatpush1.bf16.msra.mxu0 %v7125_v40  ;;  %v3742_v20 = vpop.f32.mrf.mxu1  ;;  %v4975_v40 = vrot.slane %v4974_v53, 2  ;;  %v4987_v10 = vrot.slane %v4986_v43, 4  ;;  %v5952_v15 = vrot.slane %v5951_v63, 2  ;;  %v4983_v46 = vadd.f32 %v4982_v36, %v4981_v12 }
 0x1d4   :  { %4240 = vmatprep.subr.bf16.mxu0 %v7062_v13  ;;  %v4969_v61 = vadd.f32 %v4968_v62, %v4967_v8  ;;  %v5946_v13 = vadd.f32 %v5945_v34, %v5944_v6  ;;  %v5965_v25 = vadd.f32 %v5964_v29, %v5963_v48  ;;  %v4599_v6 = vcombine.low %v4591_v9, %v4598_v0 }
 0x1d5   :  { %4280 = vmatpush1.bf16.msra.mxu1 %v7127_v31  ;;  %v5957_v31 = vrot.slane %v5956_v5, 4  ;;  %v4976_v60 = vadd.f32 %v4975_v40, %v4974_v53  ;;  %v4988_v1 = vadd.f32 %v4987_v10, %v4986_v43  ;;  %v10575_v35 = vcombine.high %v9884_v42, %v9889_v50 }
 0x1d6   :  { %4281 = vmatprep.subr.bf16.mxu1 %v7064_v16  ;;  %v10573_v16 = vcombine.low %v9849_v38, %v9854_v49  ;;  %v4970_v41 = vrot.slane %v4969_v61, 1  ;;  %v5428_v17 = vcombine.low %v9998_v26, %v10005_v58  ;;  %v5933_v53 = vrot.slane %v5932_v39, 1  ;;  %4759 = vst [vmem:[%s10519_s2 + $0x38] sm:$0xff] %v4599_v6  ;;  %v10070_v26 = vld [vmem:[%s10517_s1 + $0x2e8] sm:$0xff] }
 0x1d7   :  { %4241 = vmatpush1.bf16.msra.mxu0 %v10572_v51  ;;  %v5958_v24 = vadd.f32 %v5957_v31, %v5956_v5  ;;  %v4977_v8 = vrot.slane %v4976_v60, 1  ;;  %v5429_v38 = vcombine.low %v10001_v33, %v4964_v7  ;;  %v5947_v49 = vrot.slane %v5946_v13, 1  ;;  %v10075_v33 = vld [vmem:[%s10517_s1 + $0x3e8] sm:$0xff] }
 0x1d8   :  { %4242 = vmatprep.subr.bf16.mxu0 %v10574_v21  ;;  %v4989_v48 = vrot.slane %v4988_v1, 2  ;;  %v5720_v23 = vmul.f32 %v3739_v32, %v3739_v32  ;;  %v10576_v34 = vcombine.low %v9868_v2, %v9873_v37  ;;  %v5953_v58 = vadd.f32 %v5952_v15, %v5951_v63  ;;  %v45_v6 = vld [vmem:[%s10517_s1 + $0xe8] sm:$0xff] }
 0x1d9   :  { %4282 = vmatpush1.bf16.msra.mxu1 %v10573_v16  ;;  %v5959_v55 = vrot.slane %v5958_v24, 2  ;;  %v5966_v12 = vrot.slane %v5965_v25, 2  ;;  %v4978_v29 = vadd.f32 %v4977_v8, %v4976_v60  ;;  %v10577_v32 = vcombine.low %v9884_v42, %v9889_v50 }
 0x1da   :  { %4283 = vmatprep.subr.bf16.mxu1 %v10575_v35  ;;  %v10578_v2 = vcombine.high %v9894_v47, %v9899_v28  ;;  %v4971_v37 = vadd.f32 %v4970_v41, %v4969_v61  ;;  %v4984_v19 = vrot.slane %v4983_v46, 1  ;;  %v4990_v52 = vadd.f32 %v4989_v48, %v4988_v1 }
 0x1db   :  { %4243 = vmatpush1.bf16.msra.mxu0 %v10576_v34  ;;  %v5960_v62 = vadd.f32 %v5959_v55, %v5958_v24  ;;  %v5970_v36 = vsel %vm4768_vm0, %v5720_v23, 0.0  ;;  %v10579_v9 = vcombine.high %v9904_v14, %v9909_v11  ;;  %v5940_v63 = vrot.slane %v9987_v30, 1  ;;  %v494_v34 = vld [vmem:[%s10517_s1 + $0xef0] sm:$0xff] }
 0x1dc   :  { %4244 = vmatprep.subr.bf16.mxu0 %v10578_v2  ;;  %v5971_v43 = vrot.slane %v5970_v36, 4  ;;  %v6808_v42 = vcombine.high %v10070_v26, %v10075_v33  ;;  %v10580_v50 = vrot.slane %v9954_v44, 1  ;;  %v5934_v61 = vadd.f32 %v5933_v53, %v5932_v39 }
 0x1dd   :  { %4284 = vmatpush1.bf16.msra.mxu1 %v10577_v32  ;;  %v5961_v5 = vrot.slane %v5960_v62, 1  ;;  %v5430_v40 = vcombine.low %v4971_v37, %v4978_v29  ;;  %v4991_v31 = vrot.slane %v4990_v52, 1  ;;  %v10581_v7 = vcombine.low %v9894_v47, %v9899_v28  ;;  %v76_v47 = vld [vmem:[%s10517_s1 + $0x1e0] sm:$0xff]  ;;  %v527_v29 = vld [vmem:[%s10517_s1 + $0xff8] sm:$0xff] }
 0x1de   :  { %4285 = vmatprep.subr.bf16.mxu1 %v10579_v9  ;;  %v5927_v20 = vadd.f32 %v10580_v50, %v9954_v44  ;;  %v5948_v0 = vadd.f32 %v5947_v49, %v5946_v13  ;;  %v5954_v10 = vrot.slane %v5953_v58, 1  ;;  %v5967_v51 = vadd.f32 %v5966_v12, %v5965_v25  ;;  %v44_v44 = vld [vmem:[%s10517_s1 + $0xe0] sm:$0xff]  ;;  %v495_v12 = vld [vmem:[%s10517_s1 + $0xef8] sm:$0xff] }
 0x1df   :  { %4245 = vmatpush1.bf16.msra.mxu0 %v10581_v7  ;;  %v5972_v15 = vadd.f32 %v5971_v43, %v5970_v36  ;;  %v10582_v60 = vcombine.low %v9904_v14, %v9909_v11  ;;  %v10583_v24 = vcombine.high %v9931_v57, %v9936_v4  ;;  %v5438_v28 = vrot.slane %v5428_v17, %v8048_v18 }
 0x1e0   :  { %v5445_v39 = vrot.slane %v5429_v38, %v8048_v18  ;;  %v4985_v13 = vadd.f32 %v4984_v19, %v4983_v46  ;;  %v4992_v25 = vadd.f32 %v4991_v31, %v4990_v52  ;;  %v10584_v14 = vcombine.high %v9947_v22, %v9952_v56  ;;  %v77_v46 = vld [vmem:[%s10517_s1 + $0x1e8] sm:$0xff] }
 0x1e1   :  { %4286 = vmatpush1.bf16.msra.mxu1 %v10582_v60  ;;  %4246 = vmatprep.subr.bf16.mxu0 %v10583_v24  ;;  %v5941_v11 = vadd.f32 %v5940_v63, %v9987_v30  ;;  %v5962_v16 = vadd.f32 %v5961_v5, %v5960_v62  ;;  %v5973_v21 = vrot.slane %v5972_v15, 2  ;;  %v6807_v41 = vcombine.low %v10070_v26, %v10075_v33  ;;  %v366_v60 = vld [vmem:[%s10517_s1 + $0xaf0] sm:$0xff] }
 0x1e2   :  { %4287 = vmatprep.subr.bf16.mxu1 %v10584_v14  ;;  %v6412_v1 = vcombine.low %v5927_v20, %v5934_v61  ;;  %v5452_v35 = vrot.slane %v5430_v40, %v8048_v18  ;;  %v5431_v17 = vcombine.low %v4985_v13, %v4992_v25  ;;  %v10585_v30 = vcombine.low %v9931_v57, %v9936_v4  ;;  %v526_v57 = vld [vmem:[%s10517_s1 + $0xff0] sm:$0xff]  ;;  %v431_v20 = vld [vmem:[%s10517_s1 + $0xcf8] sm:$0xff] }
 0x1e3   :  { %v6742_v53 = vcombine.high %v44_v44, %v76_v47  ;;  %v6413_v8 = vcombine.low %v5941_v11, %v5948_v0  ;;  %v5955_v55 = vadd.f32 %v5954_v10, %v5953_v58  ;;  %v5968_v38 = vrot.slane %v5967_v51, 1  ;;  %v463_v61 = vld [vmem:[%s10517_s1 + $0xdf8] sm:$0xff]  ;;  %v398_v24 = vld [vmem:[%s10517_s1 + $0xbf0] sm:$0xff] }
 0x1e4   :  { %4247 = vmatpush1.bf16.msra.mxu0 %v10585_v30  ;;  %v5974_v49 = vadd.f32 %v5973_v21, %v5972_v15  ;;  %v10586_v48 = vcombine.low %v9947_v22, %v9952_v56  ;;  %v10587_v23 = vcombine.high %v9961_v27, %v9966_v54  ;;  %v5460_v4 = vcombine.low %v5438_v28, %v5445_v39  ;;  %v367_v28 = vld [vmem:[%s10517_s1 + $0xaf8] sm:$0xff] }
 0x1e5   :  { %v5459_v26 = vrot.slane %v5431_v17, %v8048_v18  ;;  %v6744_v33 = vcombine.high %v45_v6, %v77_v46  ;;  %v6414_v58 = vcombine.low %v5955_v55, %v5962_v16  ;;  %v6741_v56 = vcombine.low %v44_v44, %v76_v47  ;;  %v399_v39 = vld [vmem:[%s10517_s1 + $0xbf8] sm:$0xff] }
 0x1e6   :  { %4288 = vmatpush1.bf16.msra.mxu1 %v10586_v48  ;;  %4248 = vmatprep.subr.bf16.mxu0 %v10587_v23  ;;  %v5975_v22 = vrot.slane %v5974_v49, 1  ;;  %v6422_v62 = vrot.slane %v6412_v1, %v8048_v18  ;;  %v10588_v2 = vcombine.low %v9961_v27, %v9966_v54  ;;  %v6743_v37 = vcombine.low %v45_v6, %v77_v46  ;;  %v462_v54 = vld [vmem:[%s10517_s1 + $0xdf0] sm:$0xff] }
 0x1e7   :  { %4289 = vmatprep.subr.bf16.mxu1 %v6808_v42  ;;  %v5461_v32 = vcombine.low %v5452_v35, %v5459_v26  ;;  %v7194_v19 = vcombine.high %v494_v34, %v526_v57  ;;  %v6429_v52 = vrot.slane %v6413_v8, %v8048_v18  ;;  %v5969_v36 = vadd.f32 %v5968_v38, %v5967_v51  ;;  %v430_v42 = vld [vmem:[%s10517_s1 + $0xcf0] sm:$0xff]  ;;  %v335_v8 = vld [vmem:[%s10517_s1 + $0x9f8] sm:$0xff] }
 0x1e8   :  { %4249 = vmatpush1.bf16.msra.mxu0 %v10588_v2  ;;  %v5976_v9 = vadd.f32 %v5975_v22, %v5974_v49  ;;  %v5468_v63 = vrot.slane %v5460_v4, %v8048_v18  ;;  %v7196_v43 = vcombine.high %v495_v12, %v527_v29  ;;  %v6436_v27 = vrot.slane %v6414_v58, %v8048_v18  ;;  %v334_v35 = vld [vmem:[%s10517_s1 + $0x9f0] sm:$0xff]  ;;  %v239_v22 = vld [vmem:[%s10517_s1 + $0x6f8] sm:$0xff] }
 0x1e9   :  { %4250 = vmatprep.subr.bf16.mxu0 %v6742_v53  ;;  %v5475_v5 = vrot.slane %v5461_v32, %v8048_v18  ;;  %v7193_v31 = vcombine.low %v494_v34, %v526_v57  ;;  %v7195_v7 = vcombine.low %v495_v12, %v527_v29  ;;  %v6444_v0 = vcombine.low %v6422_v62, %v6429_v52  ;;  %v303_v53 = vld [vmem:[%s10517_s1 + $0x8f8] sm:$0xff] }
 0x1ea   :  { %4290 = vmatpush1.bf16.msra.mxu1 %v6807_v41  ;;  %v6415_v50 = vcombine.low %v5969_v36, %v5976_v9  ;;  %v7130_v51 = vcombine.high %v430_v42, %v462_v54  ;;  %v7132_v15 = vcombine.high %v431_v20, %v463_v61  ;;  %v3778_v47 = vpop.f32.mrf.mxu0  ;;  %v7129_v25 = vcombine.low %v430_v42, %v462_v54  ;;  %v174_v9 = vld [vmem:[%s10517_s1 + $0x4f0] sm:$0xff]  ;;  %v175_v54 = vld [vmem:[%s10517_s1 + $0x4f8] sm:$0xff] }
 0x1eb   :  { %4291 = vmatprep.subr.bf16.mxu1 %v6744_v33  ;;  %v5476_v40 = vcombine.low %v5468_v63, %v5475_v5  ;;  %v3819_v13 = vpop.f32.mrf.mxu1  ;;  %v7131_v14 = vcombine.low %v431_v20, %v463_v61  ;;  %v6452_v11 = vrot.slane %v6444_v0, %v8048_v18  ;;  %v7066_v41 = vcombine.high %v366_v60, %v398_v24  ;;  %v270_v33 = vld [vmem:[%s10517_s1 + $0x7f0] sm:$0xff] }
 0x1ec   :  { %4251 = vmatpush1.bf16.msra.mxu0 %v6741_v56  ;;  %v6443_v10 = vrot.slane %v6415_v50, %v8048_v18  ;;  %v10185_v21 = vpop.f32.mrf.mxu0  ;;  %v7068_v1 = vcombine.high %v367_v28, %v399_v39  ;;  %v7065_v38 = vcombine.low %v366_v60, %v398_v24  ;;  %v7067_v49 = vcombine.low %v367_v28, %v399_v39  ;;  %v271_v56 = vld [vmem:[%s10517_s1 + $0x7f8] sm:$0xff]  ;;  %v206_v63 = vld [vmem:[%s10517_s1 + $0x5f0] sm:$0xff] }
 0x1ed   :  { %4318 = vmatprep.subr.bf16.mxu0 %v7194_v19  ;;  %5684 = vst [vmem:[%s10520_s3 + $0x18] sm:$0xff] %v5476_v40  ;;  %v4600_v6 = vcombine.low %v3778_v47, %v10185_v21  ;;  %v10188_v46 = vpop.f32.mrf.mxu1  ;;  %v7004_v26 = vcombine.high %v303_v53, %v335_v8  ;;  %v4993_v12 = vsel %vm4768_vm0, %v3778_v47, 0.0  ;;  %v5721_v29 = vmul.f32 %v3778_v47, %v3778_v47  ;;  %v111_v47 = vld [vmem:[%s10517_s1 + $0x2f8] sm:$0xff] }
 0x1ee   :  { %4292 = vmatpush1.bf16.msra.mxu1 %v6743_v37  ;;  %v6445_v44 = vcombine.low %v6436_v27, %v6443_v10  ;;  %v3782_v30 = vpop.f32.mrf.mxu0  ;;  %v4601_v23 = vcombine.low %v3819_v13, %v10188_v46  ;;  %v5007_v62 = vsel %vm4768_vm0, %v3819_v13, 0.0  ;;  %v5000_v2 = vsel %vm4768_vm0, %v10185_v21, 0.0  ;;  %v207_v27 = vld [vmem:[%s10517_s1 + $0x5f8] sm:$0xff]  ;;  %v110_v10 = vld [vmem:[%s10517_s1 + $0x2f0] sm:$0xff] }
 0x1ef   :  { %4359 = vmatprep.subr.bf16.mxu1 %v7196_v43  ;;  %4269 = vmatmul.mubr.bf16.vlgmr.msra.gmra.mxu0 %v9626_v59  ;;  %v3823_v55 = vpop.f32.mrf.mxu1  ;;  %v4608_v48 = vrot.slane %v4600_v6, %v7986_v45  ;;  %v7003_v19 = vcombine.low %v303_v53, %v335_v8  ;;  %v6940_v36 = vcombine.high %v239_v22, %v271_v56  ;;  %v4994_v5 = vrot.slane %v4993_v12, 4  ;;  %v143_v28 = vld [vmem:[%s10517_s1 + $0x3f8] sm:$0xff] }
 0x1f0   :  { %4319 = vmatpush1.bf16.msra.mxu0 %v7193_v31  ;;  %v6459_v16 = vrot.slane %v6445_v44, %v8048_v18  ;;  %4350 = vmatprep.mubr.bf16.mxu0 %v7204_v3  ;;  %v3783_v34 = vpop.f32.mrf.mxu0  ;;  %v4615_v58 = vrot.slane %v4601_v23, %v7986_v45  ;;  %v5008_v43 = vrot.slane %v5007_v62, 4  ;;  %v5723_v42 = vmul.f32 %v3819_v13, %v3819_v13  ;;  %v47_v30 = vld [vmem:[%s10517_s1 + $0xf8] sm:$0xff] }
 0x1f1   :  { %4310 = vmatmul.mubr.bf16.vlgmr.msra.gmra.mxu1 %v9626_v59  ;;  %4320 = vmatprep.subr.bf16.mxu0 %v7130_v51  ;;  %v302_v59 = vld [vmem:[%s10517_s1 + $0x8f0] sm:$0xff]  ;;  %v3824_v4 = vpop.f32.mrf.mxu1  ;;  %v5977_v50 = vsel %vm4768_vm0, %v5721_v29, 0.0  ;;  %v5001_v20 = vrot.slane %v5000_v2, 4  ;;  %v6939_v40 = vcombine.low %v239_v22, %v271_v56  ;;  %v6874_v31 = vcombine.high %v174_v9, %v206_v63  ;;  %v79_v53 = vld [vmem:[%s10517_s1 + $0x1f8] sm:$0xff] }
 0x1f2   :  { %4360 = vmatpush1.bf16.msra.mxu1 %v7195_v7  ;;  %v6460_v17 = vcombine.low %v6452_v11, %v6459_v16  ;;  %4391 = vmatprep.mubr.bf16.mxu1 %v7204_v3  ;;  %v7002_v57 = vcombine.high %v302_v59, %v334_v35  ;;  %v238_v3 = vld [vmem:[%s10517_s1 + $0x6f0] sm:$0xff]  ;;  %v7001_v32 = vcombine.low %v302_v59, %v334_v35  ;;  %v5014_v7 = vsel %vm4768_vm0, %v10188_v46, 0.0 }
 0x1f3   :  { %4361 = vmatprep.subr.bf16.mxu1 %v7132_v15  ;;  %v4616_v37 = vcombine.low %v4608_v48, %v4615_v58  ;;  %v6938_v52 = vcombine.high %v238_v3, %v270_v33  ;;  %v6937_v61 = vcombine.low %v238_v3, %v270_v33  ;;  %v6876_v0 = vcombine.high %v175_v54, %v207_v27  ;;  %v142_v51 = vld [vmem:[%s10517_s1 + $0x3f0] sm:$0xff] }
 0x1f4   :  { %4321 = vmatpush1.bf16.msra.mxu0 %v7129_v25  ;;  %6668 = vst [vmem:[%s10521_s4 + $0x18] sm:$0xff] %v6460_v17  ;;  %v4995_v15 = vadd.f32 %v4994_v5, %v4993_v12  ;;  %v5978_v60 = vrot.slane %v5977_v50, 4  ;;  %v5009_v24 = vadd.f32 %v5008_v43, %v5007_v62  ;;  %v5991_v44 = vsel %vm4768_vm0, %v5723_v42, 0.0  ;;  %v78_v59 = vld [vmem:[%s10517_s1 + $0x1f0] sm:$0xff] }
 0x1f5   :  { %4322 = vmatprep.subr.bf16.mxu0 %v7066_v41  ;;  %4760 = vst [vmem:[%s10519_s2 + $0x40] sm:$0xff] %v4616_v37  ;;  %v5002_v39 = vadd.f32 %v5001_v20, %v5000_v2  ;;  %v5722_v13 = vmul.f32 %v10185_v21, %v10185_v21  ;;  %v6873_v25 = vcombine.low %v174_v9, %v206_v63  ;;  %v5992_v41 = vrot.slane %v5991_v44, 4 }
 0x1f6   :  { %4362 = vmatpush1.bf16.msra.mxu1 %v7131_v14  ;;  %v5015_v14 = vrot.slane %v5014_v7, 4  ;;  %v6875_v11 = vcombine.low %v175_v54, %v207_v27  ;;  %v6810_v16 = vcombine.high %v110_v10, %v142_v51  ;;  %v6812_v6 = vcombine.high %v111_v47, %v143_v28 }
 0x1f7   :  { %4363 = vmatprep.subr.bf16.mxu1 %v7068_v1  ;;  %v46_v1 = vld [vmem:[%s10517_s1 + $0xf0] sm:$0xff]  ;;  %v4996_v35 = vrot.slane %v4995_v15, 2  ;;  %v5979_v21 = vadd.f32 %v5978_v60, %v5977_v50  ;;  %v5010_v17 = vrot.slane %v5009_v24, 2  ;;  %v5003_v8 = vrot.slane %v5002_v39, 2  ;;  %v7203_v50 = vld [vmem:[%s10518_s0] sm:$0x1] }
 0x1f8   :  { %4323 = vmatpush1.bf16.msra.mxu0 %v7065_v38  ;;  %v5984_v55 = vsel %vm4768_vm0, %v5722_v13, 0.0  ;;  %v6809_v38 = vcombine.low %v110_v10, %v142_v51  ;;  %v5016_v48 = vadd.f32 %v5015_v14, %v5014_v7  ;;  %v5724_v23 = vmul.f32 %v10188_v46, %v10188_v46 }
 0x1f9   :  { %4324 = vmatprep.subr.bf16.mxu0 %v7002_v57  ;;  %v6746_v34 = vcombine.high %v46_v1, %v78_v59  ;;  %v5993_v57 = vadd.f32 %v5992_v41, %v5991_v44  ;;  %v6748_v4 = vcombine.high %v47_v30, %v79_v53  ;;  %v5980_v3 = vrot.slane %v5979_v21, 2 }
 0x1fa   :  { %4364 = vmatpush1.bf16.msra.mxu1 %v7067_v49  ;;  %v6811_v49 = vcombine.low %v111_v47, %v143_v28  ;;  %v5011_v33 = vadd.f32 %v5010_v17, %v5009_v24  ;;  %v5985_v58 = vrot.slane %v5984_v55, 4  ;;  %v5004_v22 = vadd.f32 %v5003_v8, %v5002_v39 }
 0x1fb   :  { %4365 = vmatprep.subr.bf16.mxu1 %v7004_v26  ;;  %v4997_v26 = vadd.f32 %v4996_v35, %v4995_v15  ;;  %v6745_v56 = vcombine.low %v46_v1, %v78_v59  ;;  %v5017_v12 = vrot.slane %v5016_v48, 2  ;;  %v5998_v29 = vsel %vm4768_vm0, %v5724_v23, 0.0 }
 0x1fc   :  { %4325 = vmatpush1.bf16.msra.mxu0 %v7001_v32  ;;  %v6747_v62 = vcombine.low %v47_v30, %v79_v53  ;;  %v5994_v46 = vrot.slane %v5993_v57, 2  ;;  %v10275_v2 = vadd.f32 %v5980_v3, %v5979_v21  ;;  %v5012_v37 = vrot.slane %v5011_v33, 1 }
 0x1fd   :  { %4326 = vmatprep.subr.bf16.mxu0 %v6938_v52  ;;  %v4998_v32 = vrot.slane %v4997_v26, 1  ;;  %v5005_v52 = vrot.slane %v5004_v22, 1  ;;  %v5018_v9 = vadd.f32 %v5017_v12, %v5016_v48 }
 0x1fe   :  { %4366 = vmatpush1.bf16.msra.mxu1 %v7003_v19  ;;  %v5986_v19 = vadd.f32 %v5985_v58, %v5984_v55  ;;  %v10277_v63 = vadd.f32 %v5994_v46, %v5993_v57  ;;  %v5982_v43 = vrot.slane %v10275_v2, 1  ;;  %v10282_v42 = vadd.f32 %v5012_v37, %v5011_v33 }
 0x1ff   :  { %4367 = vmatprep.subr.bf16.mxu1 %v6940_v36  ;;  %v5999_v36 = vrot.slane %v5998_v29, 4  ;;  %v10279_v5 = vadd.f32 %v4998_v32, %v4997_v26  ;;  %v10287_v20 = vadd.f32 %v5005_v52, %v5004_v22 }
 0x200   :  { %4327 = vmatpush1.bf16.msra.mxu0 %v6937_v61  ;;  %v5987_v54 = vrot.slane %v5986_v19, 2 }
 0x201   :  { %4328 = vmatprep.subr.bf16.mxu0 %v6874_v31  ;;  %v6000_v61 = vadd.f32 %v5999_v36, %v5998_v29  ;;  %v5477_v36 = vcombine.low %v10279_v5, %v10287_v20  ;;  %v5996_v20 = vrot.slane %v10277_v63, 1 }
 0x202   :  { %4368 = vmatpush1.bf16.msra.mxu1 %v6939_v40 }
 0x203   :  { %4369 = vmatprep.subr.bf16.mxu1 %v6876_v0  ;;  %v5019_v0 = vrot.slane %v5018_v9, 1  ;;  %v6001_v41 = vrot.slane %v6000_v61, 2 }
 0x204   :  { %4329 = vmatpush1.bf16.msra.mxu0 %v6873_v25 }
 0x205   :  { %4330 = vmatprep.subr.bf16.mxu0 %v6810_v16  ;;  %v5020_v3 = vadd.f32 %v5019_v0, %v5018_v9  ;;  %v6002_v33 = vadd.f32 %v6001_v41, %v6000_v61 }
 0x206   :  { %4370 = vmatpush1.bf16.msra.mxu1 %v6875_v11 }
 0x207   :  { %4371 = vmatprep.subr.bf16.mxu1 %v6812_v6  ;;  %v5478_v9 = vcombine.low %v10282_v42, %v5020_v3 }
 0x208   :  { %4331 = vmatpush1.bf16.msra.mxu0 %v6809_v38 }
 0x209   :  { %4332 = vmatprep.subr.bf16.mxu0 %v6746_v34  ;;  %v5988_v34 = vadd.f32 %v5987_v54, %v5986_v19  ;;  %v5494_v41 = vrot.slane %v5478_v9, %v8048_v18 }
 0x20a   :  { %4372 = vmatpush1.bf16.msra.mxu1 %v6811_v49  ;;  %v3860_v27 = vpop.f32.mrf.mxu0 }
 0x20b   :  { %4373 = vmatprep.subr.bf16.mxu1 %v6748_v4  ;;  %v5021_v40 = vsel %vm4768_vm0, %v3860_v27, 0.0  ;;  %v5725_v31 = vmul.f32 %v3860_v27, %v3860_v27  ;;  %v3901_v7 = vpop.f32.mrf.mxu1  ;;  %v5989_v19 = vrot.slane %v5988_v34, 1 }
 0x20c   :  { %4333 = vmatpush1.bf16.msra.mxu0 %v6745_v56  ;;  %v5022_v10 = vrot.slane %v5021_v40, 4  ;;  %v5035_v51 = vsel %vm4768_vm0, %v3901_v7, 0.0  ;;  %v5727_v15 = vmul.f32 %v3901_v7, %v3901_v7  ;;  %v3862_v60 = vpop.f32.mrf.mxu0 }
 0x20d   :  { %v6005_v24 = vsel %vm4768_vm0, %v5725_v31, 0.0  ;;  %v5036_v44 = vrot.slane %v5035_v51, 4  ;;  %v4617_v47 = vcombine.low %v3860_v27, %v3862_v60  ;;  %v5028_v28 = vsel %vm4768_vm0, %v3862_v60, 0.0  ;;  %v3903_v39 = vpop.f32.mrf.mxu1 }
 0x20e   :  { %4374 = vmatpush1.bf16.msra.mxu1 %v6747_v62  ;;  %v5023_v13 = vadd.f32 %v5022_v10, %v5021_v40  ;;  %v6006_v25 = vrot.slane %v6005_v24, 4  ;;  %v6019_v14 = vsel %vm4768_vm0, %v5727_v15, 0.0  ;;  %v5029_v11 = vrot.slane %v5028_v28, 4  ;;  %v3864_v16 = vpop.f32.mrf.mxu0 }
 0x20f   :  { %4351 = vmatmul.mubr.bf16.vlgmr.msra.gmra.mxu0 %v7203_v50  ;;  %v5037_v6 = vadd.f32 %v5036_v44, %v5035_v51  ;;  %v6020_v1 = vrot.slane %v6019_v14, 4  ;;  %v5726_v59 = vmul.f32 %v3862_v60, %v3862_v60  ;;  %v3905_v35 = vpop.f32.mrf.mxu1  ;;  %v4618_v53 = vcombine.low %v3901_v7, %v3903_v39 }
 0x210   :  { %v5024_v21 = vrot.slane %v5023_v13, 2  ;;  %v6007_v17 = vadd.f32 %v6006_v25, %v6005_v24  ;;  %v5030_v30 = vadd.f32 %v5029_v11, %v5028_v28  ;;  %v3865_v8 = vpop.f32.mrf.mxu0  ;;  %v4625_v38 = vrot.slane %v4617_v47, %v7986_v45 }
 0x211   :  { %4392 = vmatmul.mubr.bf16.vlgmr.msra.gmra.mxu1 %v7203_v50  ;;  %v5038_v55 = vrot.slane %v5037_v6, 2  ;;  %v6012_v49 = vsel %vm4768_vm0, %v5726_v59, 0.0  ;;  %v5042_v48 = vsel %vm4768_vm0, %v3903_v39, 0.0  ;;  %v3906_v23 = vpop.f32.mrf.mxu1  ;;  %v4632_v58 = vrot.slane %v4618_v53, %v7986_v45 }
 0x212   :  { %v5025_v57 = vadd.f32 %v5024_v21, %v5023_v13  ;;  %v5031_v4 = vrot.slane %v5030_v30, 2  ;;  %v6013_v26 = vrot.slane %v6012_v49, 4  ;;  %v5043_v22 = vrot.slane %v5042_v48, 4 }
 0x213   :  { %v6008_v56 = vrot.slane %v6007_v17, 2  ;;  %v6021_v12 = vadd.f32 %v6020_v1, %v6019_v14  ;;  %v5039_v32 = vadd.f32 %v5038_v55, %v5037_v6  ;;  %v4633_v37 = vcombine.low %v4625_v38, %v4632_v58 }
 0x214   :  { %v5032_v29 = vadd.f32 %v5031_v4, %v5030_v30  ;;  %v6014_v62 = vadd.f32 %v6013_v26, %v6012_v49  ;;  %v5026_v46 = vrot.slane %v5025_v57, 1  ;;  %v5044_v52 = vadd.f32 %v5043_v22, %v5042_v48 }
 0x215   :  { %v6003_v50 = vrot.slane %v6002_v33, 1  ;;  %4761 = vst [vmem:[%s10519_s2 + $0x48] sm:$0xff] %v4633_v37  ;;  %v5728_v40 = vmul.f32 %v3903_v39, %v3903_v39  ;;  %v6009_v31 = vadd.f32 %v6008_v56, %v6007_v17  ;;  %v6022_v7 = vrot.slane %v6021_v12, 2 }
 0x216   :  { %v5033_v54 = vrot.slane %v5032_v29, 1  ;;  %v6015_v27 = vrot.slane %v6014_v62, 2  ;;  %v5045_v61 = vrot.slane %v5044_v52, 2  ;;  %v5027_v51 = vadd.f32 %v5026_v46, %v5025_v57 }
 0x217   :  { %v5040_v15 = vrot.slane %v5039_v32, 1  ;;  %v6026_v5 = vsel %vm4768_vm0, %v5728_v40, 0.0  ;;  %v5983_v44 = vadd.f32 %v5982_v43, %v10275_v2  ;;  %v5990_v47 = vadd.f32 %v5989_v19, %v5988_v34 }
 0x218   :  { %v5034_v0 = vadd.f32 %v5033_v54, %v5032_v29  ;;  %v6016_v10 = vadd.f32 %v6015_v27, %v6014_v62  ;;  %v5046_v60 = vadd.f32 %v5045_v61, %v5044_v52  ;;  %v6027_v42 = vrot.slane %v6026_v5, 4 }
 0x219   :  { %v6004_v13 = vadd.f32 %v6003_v50, %v6002_v33  ;;  %v6010_v25 = vrot.slane %v6009_v31, 1  ;;  %v6023_v14 = vadd.f32 %v6022_v7, %v6021_v12  ;;  %v5487_v16 = vrot.slane %v5477_v36, %v8048_v18 }
 0x21a   :  { %v6017_v24 = vrot.slane %v6016_v10, 1  ;;  %v5479_v28 = vcombine.low %v5027_v51, %v5034_v0  ;;  %v5047_v39 = vrot.slane %v5046_v60, 1  ;;  %v6028_v11 = vadd.f32 %v6027_v42, %v6026_v5 }
 0x21b   :  { %v5041_v6 = vadd.f32 %v5040_v15, %v5039_v32  ;;  %v5997_v59 = vadd.f32 %v5996_v20, %v10277_v63  ;;  %v6461_v17 = vcombine.low %v5983_v44, %v5990_v47  ;;  %v6011_v53 = vadd.f32 %v6010_v25, %v6009_v31 }
 0x21c   :  { %v5048_v1 = vadd.f32 %v5047_v39, %v5046_v60  ;;  %v6018_v35 = vadd.f32 %v6017_v24, %v6016_v10  ;;  %v6029_v21 = vrot.slane %v6028_v11, 2  ;;  %v5501_v2 = vrot.slane %v5479_v28, %v8048_v18 }
 0x21d   :  { %v6462_v30 = vcombine.low %v5997_v59, %v6004_v13  ;;  %v6024_v8 = vrot.slane %v6023_v14, 1  ;;  %v5509_v38 = vcombine.low %v5487_v16, %v5494_v41  ;;  %v6471_v57 = vrot.slane %v6461_v17, %v8048_v18 }
 0x21e   :  { %v5480_v43 = vcombine.low %v5041_v6, %v5048_v1  ;;  %v6030_v55 = vadd.f32 %v6029_v21, %v6028_v11  ;;  %v6463_v48 = vcombine.low %v6011_v53, %v6018_v35 }
 0x21f   :  { %v6478_v63 = vrot.slane %v6462_v30, %v8048_v18  ;;  %v6025_v4 = vadd.f32 %v6024_v8, %v6023_v14  ;;  %v5517_v3 = vrot.slane %v5509_v38, %v8048_v18 }
 0x220   :  { %v5508_v49 = vrot.slane %v5480_v43, %v8048_v18  ;;  %v6031_v23 = vrot.slane %v6030_v55, 1  ;;  %v6485_v58 = vrot.slane %v6463_v48, %v8048_v18 }
 0x221   :  { %v6493_v12 = vcombine.low %v6471_v57, %v6478_v63 }
 0x222   :  { %v5510_v34 = vcombine.low %v5501_v2, %v5508_v49  ;;  %v6032_v26 = vadd.f32 %v6031_v23, %v6030_v55 }
 0x223   :  { %v6501_v37 = vrot.slane %v6493_v12, %v8048_v18 }
 0x224   :  { %v5524_v33 = vrot.slane %v5510_v34, %v8048_v18  ;;  %v6464_v22 = vcombine.low %v6025_v4, %v6032_v26 }
 0x226   :  { %v5525_v56 = vcombine.low %v5517_v3, %v5524_v33  ;;  %v6492_v29 = vrot.slane %v6464_v22, %v8048_v18 }
 0x228   :  { %5685 = vst [vmem:[%s10520_s3 + $0x20] sm:$0xff] %v5525_v56  ;;  %v6494_v62 = vcombine.low %v6485_v58, %v6492_v29 }
 0x22a   :  { %v6508_v52 = vrot.slane %v6494_v62, %v8048_v18 }
 0x22c   :  { %v3942_v46 = vpop.f32.mrf.mxu0  ;;  %v6509_v27 = vcombine.low %v6501_v37, %v6508_v52 }
 0x22d   :  { %v5049_v10 = vsel %vm4768_vm0, %v3942_v46, 0.0  ;;  %v5729_v51 = vmul.f32 %v3942_v46, %v3942_v46 }
 0x22e   :  { %v3983_v32 = vpop.f32.mrf.mxu1  ;;  %v3944_v36 = vpop.f32.mrf.mxu0  ;;  %6669 = vst [vmem:[%s10521_s4 + $0x20] sm:$0xff] %v6509_v27  ;;  %v5050_v20 = vrot.slane %v5049_v10, 4 }
 0x22f   :  { %v4634_v19 = vcombine.low %v3942_v46, %v3944_v36  ;;  %v5063_v15 = vsel %vm4768_vm0, %v3983_v32, 0.0  ;;  %v5056_v60 = vsel %vm4768_vm0, %v3944_v36, 0.0  ;;  %v5731_v42 = vmul.f32 %v3983_v32, %v3983_v32 }
 0x230   :  { %v3985_v54 = vpop.f32.mrf.mxu1  ;;  %v3946_v9 = vpop.f32.mrf.mxu0  ;;  %v5064_v24 = vrot.slane %v5063_v15, 4  ;;  %v6033_v44 = vsel %vm4768_vm0, %v5729_v51, 0.0  ;;  %v5057_v47 = vrot.slane %v5056_v60, 4  ;;  %v5051_v39 = vadd.f32 %v5050_v20, %v5049_v10 }
 0x231   :  { %v4642_v61 = vrot.slane %v4634_v19, %v7986_v45  ;;  %v4635_v40 = vcombine.low %v3983_v32, %v3985_v54  ;;  %v5070_v28 = vsel %vm4768_vm0, %v3985_v54, 0.0  ;;  %v6034_v13 = vrot.slane %v6033_v44, 4 }
 0x232   :  { %v3987_v50 = vpop.f32.mrf.mxu1  ;;  %v3947_v31 = vpop.f32.mrf.mxu0  ;;  %v5065_v25 = vadd.f32 %v5064_v24, %v5063_v15  ;;  %v6047_v14 = vsel %vm4768_vm0, %v5731_v42, 0.0  ;;  %v5058_v11 = vadd.f32 %v5057_v47, %v5056_v60  ;;  %v5730_v16 = vmul.f32 %v3944_v36, %v3944_v36 }
 0x233   :  { %v4649_v0 = vrot.slane %v4635_v40, %v7986_v45  ;;  %v5071_v41 = vrot.slane %v5070_v28, 4  ;;  %v6048_v6 = vrot.slane %v6047_v14, 4  ;;  %v5052_v1 = vrot.slane %v5051_v39, 2 }
 0x234   :  { %v3988_v7 = vpop.f32.mrf.mxu1  ;;  %v6035_v59 = vadd.f32 %v6034_v13, %v6033_v44  ;;  %v5066_v35 = vrot.slane %v5065_v25, 2  ;;  %v5059_v21 = vrot.slane %v5058_v11, 2  ;;  %v6040_v17 = vsel %vm4768_vm0, %v5730_v16, 0.0 }
 0x235   :  { %v4650_v5 = vcombine.low %v4642_v61, %v4649_v0  ;;  %v5072_v2 = vadd.f32 %v5071_v41, %v5070_v28  ;;  %v5732_v43 = vmul.f32 %v3985_v54, %v3985_v54  ;;  %v6049_v30 = vadd.f32 %v6048_v6, %v6047_v14 }
 0x236   :  { %v5053_v53 = vadd.f32 %v5052_v1, %v5051_v39  ;;  %v6036_v8 = vrot.slane %v6035_v59, 2  ;;  %v5067_v55 = vadd.f32 %v5066_v35, %v5065_v25  ;;  %v6041_v38 = vrot.slane %v6040_v17, 4 }
 0x237   :  { %4762 = vst [vmem:[%s10519_s2 + $0x50] sm:$0xff] %v4650_v5  ;;  %v5060_v49 = vadd.f32 %v5059_v21, %v5058_v11  ;;  %v5073_v48 = vrot.slane %v5072_v2, 2  ;;  %v6054_v23 = vsel %vm4768_vm0, %v5732_v43, 0.0  ;;  %v6050_v34 = vrot.slane %v6049_v30, 2 }
 0x238   :  { %v5054_v57 = vrot.slane %v5053_v53, 1  ;;  %v10341_v63 = vadd.f32 %v6036_v8, %v6035_v59  ;;  %v5068_v4 = vrot.slane %v5067_v55, 1  ;;  %v6042_v26 = vadd.f32 %v6041_v38, %v6040_v17 }
 0x239   :  { %v5061_v3 = vrot.slane %v5060_v49, 1  ;;  %v6055_v33 = vrot.slane %v6054_v23, 4  ;;  %v5074_v58 = vadd.f32 %v5073_v48, %v5072_v2  ;;  %v10343_v22 = vadd.f32 %v6050_v34, %v6049_v30 }
 0x23a   :  { %v10345_v56 = vadd.f32 %v5054_v57, %v5053_v53  ;;  %v6038_v12 = vrot.slane %v10341_v63, 1  ;;  %v10348_v29 = vadd.f32 %v5068_v4, %v5067_v55  ;;  %v6043_v62 = vrot.slane %v6042_v26, 2 }
 0x23b   :  { %v10350_v32 = vadd.f32 %v5061_v3, %v5060_v49  ;;  %v6056_v37 = vadd.f32 %v6055_v33, %v6054_v23  ;;  %v5075_v54 = vrot.slane %v5074_v58, 1 }
 0x23c   :  { %v6044_v35 = vadd.f32 %v6043_v62, %v6042_v26 }
 0x23d   :  { %v6057_v24 = vrot.slane %v6056_v37, 2  ;;  %v5076_v43 = vadd.f32 %v5075_v54, %v5074_v58  ;;  %v5526_v3 = vcombine.low %v10345_v56, %v10350_v32  ;;  %v6052_v32 = vrot.slane %v10343_v22, 1 }
 0x23e   :  { %v6045_v26 = vrot.slane %v6044_v35, 1 }
 0x23f   :  { %v6058_v30 = vadd.f32 %v6057_v24, %v6056_v37  ;;  %v5527_v58 = vcombine.low %v10348_v29, %v5076_v43 }
 0x241   :  { %v5543_v24 = vrot.slane %v5527_v58, %v8048_v18 }
 0x24c   :  { %v4024_v46 = vpop.f32.mrf.mxu0 }
 0x24d   :  { %v5077_v52 = vsel %vm4768_vm0, %v4024_v46, 0.0  ;;  %v5733_v36 = vmul.f32 %v4024_v46, %v4024_v46 }
 0x24e   :  { %v4065_v19 = vpop.f32.mrf.mxu1  ;;  %v5078_v27 = vrot.slane %v5077_v52, 4  ;;  %v4026_v61 = vpop.f32.mrf.mxu0 }
 0x24f   :  { %v5091_v9 = vsel %vm4768_vm0, %v4065_v19, 0.0  ;;  %v5735_v50 = vmul.f32 %v4065_v19, %v4065_v19  ;;  %v6061_v40 = vsel %vm4768_vm0, %v5733_v36, 0.0  ;;  %v4651_v7 = vcombine.low %v4024_v46, %v4026_v61 }
 0x250   :  { %v5092_v31 = vrot.slane %v5091_v9, 4  ;;  %v5084_v0 = vsel %vm4768_vm0, %v4026_v61, 0.0  ;;  %v4067_v10 = vpop.f32.mrf.mxu1  ;;  %v5079_v51 = vadd.f32 %v5078_v27, %v5077_v52  ;;  %v6062_v15 = vrot.slane %v6061_v40, 4  ;;  %v4028_v20 = vpop.f32.mrf.mxu0 }
 0x251   :  { %v6075_v60 = vsel %vm4768_vm0, %v5735_v50, 0.0  ;;  %v5085_v5 = vrot.slane %v5084_v0, 4  ;;  %v5734_v47 = vmul.f32 %v4026_v61, %v4026_v61  ;;  %v4652_v14 = vcombine.low %v4065_v19, %v4067_v10 }
 0x252   :  { %v5093_v42 = vadd.f32 %v5092_v31, %v5091_v9  ;;  %v6076_v44 = vrot.slane %v6075_v60, 4  ;;  %v4069_v28 = vpop.f32.mrf.mxu1  ;;  %v5080_v39 = vrot.slane %v5079_v51, 2  ;;  %v6063_v13 = vadd.f32 %v6062_v15, %v6061_v40  ;;  %v4029_v11 = vpop.f32.mrf.mxu0 }
 0x253   :  { %v5086_v25 = vadd.f32 %v5085_v5, %v5084_v0  ;;  %v4659_v41 = vrot.slane %v4651_v7, %v7986_v45  ;;  %v6068_v6 = vsel %vm4768_vm0, %v5734_v47, 0.0  ;;  %v5098_v1 = vsel %vm4768_vm0, %v4067_v10, 0.0 }
 0x254   :  { %v5094_v16 = vrot.slane %v5093_v42, 2  ;;  %v4070_v59 = vpop.f32.mrf.mxu1  ;;  %v5081_v21 = vadd.f32 %v5080_v39, %v5079_v51  ;;  %v6069_v2 = vrot.slane %v6068_v6, 4  ;;  %v4666_v53 = vrot.slane %v4652_v14, %v7986_v45 }
 0x255   :  { %v5087_v17 = vrot.slane %v5086_v25, 2  ;;  %v5099_v8 = vrot.slane %v5098_v1, 4  ;;  %v6064_v55 = vrot.slane %v6063_v13, 2  ;;  %v6077_v38 = vadd.f32 %v6076_v44, %v6075_v60 }
 0x256   :  { %v6070_v48 = vadd.f32 %v6069_v2, %v6068_v6  ;;  %v5082_v23 = vrot.slane %v5081_v21, 1  ;;  %v5095_v34 = vadd.f32 %v5094_v16, %v5093_v42  ;;  %v4667_v57 = vcombine.low %v4659_v41, %v4666_v53 }
 0x257   :  { %v5088_v49 = vadd.f32 %v5087_v17, %v5086_v25  ;;  %v5100_v4 = vadd.f32 %v5099_v8, %v5098_v1  ;;  %v6059_v46 = vrot.slane %v6058_v30, 1  ;;  %v5736_v52 = vmul.f32 %v4067_v10, %v4067_v10 }
 0x258   :  { %v6071_v62 = vrot.slane %v6070_v48, 2  ;;  %4763 = vst [vmem:[%s10519_s2 + $0x58] sm:$0xff] %v4667_v57  ;;  %v6065_v36 = vadd.f32 %v6064_v55, %v6063_v13  ;;  %v6078_v19 = vrot.slane %v6077_v38, 2  ;;  %v5083_v9 = vadd.f32 %v5082_v23, %v5081_v21 }
 0x259   :  { %v5089_v33 = vrot.slane %v5088_v49, 1  ;;  %v5101_v37 = vrot.slane %v5100_v4, 2  ;;  %v5096_v50 = vrot.slane %v5095_v34, 1  ;;  %v6082_v56 = vsel %vm4768_vm0, %v5736_v52, 0.0 }
 0x25a   :  { %v6072_v27 = vadd.f32 %v6071_v62, %v6070_v48  ;;  %v6083_v29 = vrot.slane %v6082_v56, 4  ;;  %v6039_v31 = vadd.f32 %v6038_v12, %v10341_v63  ;;  %v6046_v7 = vadd.f32 %v6045_v26, %v6044_v35 }
 0x25b   :  { %v5090_v54 = vadd.f32 %v5089_v33, %v5088_v49  ;;  %v5102_v61 = vadd.f32 %v5101_v37, %v5100_v4  ;;  %v6060_v51 = vadd.f32 %v6059_v46, %v6058_v30  ;;  %v6066_v15 = vrot.slane %v6065_v36, 1 }
 0x25c   :  { %v6073_v40 = vrot.slane %v6072_v27, 1  ;;  %v6079_v60 = vadd.f32 %v6078_v19, %v6077_v38  ;;  %v6084_v5 = vadd.f32 %v6083_v29, %v6082_v56  ;;  %v5536_v20 = vrot.slane %v5526_v3, %v8048_v18 }
 0x25d   :  { %v5528_v0 = vcombine.low %v5083_v9, %v5090_v54  ;;  %v5103_v10 = vrot.slane %v5102_v61, 1  ;;  %v5097_v42 = vadd.f32 %v5096_v50, %v5095_v34  ;;  %v6053_v47 = vadd.f32 %v6052_v32, %v10343_v22 }
 0x25e   :  { %v6074_v28 = vadd.f32 %v6073_v40, %v6072_v27  ;;  %v6085_v39 = vrot.slane %v6084_v5, 2  ;;  %v6510_v13 = vcombine.low %v6039_v31, %v6046_v7  ;;  %v6067_v14 = vadd.f32 %v6066_v15, %v6065_v36 }
 0x25f   :  { %v5104_v44 = vadd.f32 %v5103_v10, %v5102_v61  ;;  %v5550_v63 = vrot.slane %v5528_v0, %v8048_v18  ;;  %v6511_v25 = vcombine.low %v6053_v47, %v6060_v51  ;;  %v6080_v11 = vrot.slane %v6079_v60, 1 }
 0x260   :  { %v6086_v16 = vadd.f32 %v6085_v39, %v6084_v5  ;;  %v5558_v41 = vcombine.low %v5536_v20, %v5543_v24  ;;  %v6512_v1 = vcombine.low %v6067_v14, %v6074_v28  ;;  %v6520_v21 = vrot.slane %v6510_v13, %v8048_v18 }
 0x261   :  { %v5529_v12 = vcombine.low %v5097_v42, %v5104_v44  ;;  %v6527_v22 = vrot.slane %v6511_v25, %v8048_v18  ;;  %v6081_v17 = vadd.f32 %v6080_v11, %v6079_v60 }
 0x262   :  { %v6087_v59 = vrot.slane %v6086_v16, 1  ;;  %v5566_v43 = vrot.slane %v5558_v41, %v8048_v18  ;;  %v6534_v53 = vrot.slane %v6512_v1, %v8048_v18 }
 0x263   :  { %v5557_v6 = vrot.slane %v5529_v12, %v8048_v18  ;;  %v6542_v38 = vcombine.low %v6520_v21, %v6527_v22 }
 0x264   :  { %v6088_v2 = vadd.f32 %v6087_v59, %v6086_v16 }
 0x265   :  { %v5559_v35 = vcombine.low %v5550_v63, %v5557_v6  ;;  %v6550_v57 = vrot.slane %v6542_v38, %v8048_v18 }
 0x266   :  { %v6513_v8 = vcombine.low %v6081_v17, %v6088_v2 }
 0x267   :  { %v5573_v30 = vrot.slane %v5559_v35, %v8048_v18 }
 0x268   :  { %v6541_v49 = vrot.slane %v6513_v8, %v8048_v18 }
 0x269   :  { %v5574_v55 = vcombine.low %v5566_v43, %v5573_v30 }
 0x26a   :  { %v6543_v48 = vcombine.low %v6534_v53, %v6541_v49 }
 0x26b   :  { %5686 = vst [vmem:[%s10520_s3 + $0x28] sm:$0xff] %v5574_v55 }
 0x26c   :  { %v6557_v4 = vrot.slane %v6543_v48, %v8048_v18 }
 0x26e   :  { %v4106_v23 = vpop.f32.mrf.mxu0  ;;  %v6558_v62 = vcombine.low %v6550_v57, %v6557_v4 }
 0x26f   :  { %v5105_v27 = vsel %vm4768_vm0, %v4106_v23, 0.0  ;;  %v5737_v9 = vmul.f32 %v4106_v23, %v4106_v23 }
 0x270   :  { %v4147_v34 = vpop.f32.mrf.mxu1  ;;  %v4108_v3 = vpop.f32.mrf.mxu0  ;;  %6670 = vst [vmem:[%s10521_s4 + $0x28] sm:$0xff] %v6558_v62  ;;  %v5106_v32 = vrot.slane %v5105_v27, 4 }
 0x271   :  { %v4668_v26 = vcombine.low %v4106_v23, %v4108_v3  ;;  %v5119_v50 = vsel %vm4768_vm0, %v4147_v34, 0.0  ;;  %v5112_v61 = vsel %vm4768_vm0, %v4108_v3, 0.0  ;;  %v5739_v29 = vmul.f32 %v4147_v34, %v4147_v34 }
 0x272   :  { %v4149_v33 = vpop.f32.mrf.mxu1  ;;  %v4110_v58 = vpop.f32.mrf.mxu0  ;;  %v5120_v40 = vrot.slane %v5119_v50, 4  ;;  %v6089_v31 = vsel %vm4768_vm0, %v5737_v9, 0.0  ;;  %v5113_v7 = vrot.slane %v5112_v61, 4  ;;  %v5107_v10 = vadd.f32 %v5106_v32, %v5105_v27 }
 0x273   :  { %v4676_v37 = vrot.slane %v4668_v26, %v7986_v45  ;;  %v4669_v52 = vcombine.low %v4147_v34, %v4149_v33  ;;  %v5126_v0 = vsel %vm4768_vm0, %v4149_v33, 0.0  ;;  %v6090_v51 = vrot.slane %v6089_v31, 4 }
 0x274   :  { %v4151_v46 = vpop.f32.mrf.mxu1  ;;  %v4111_v36 = vpop.f32.mrf.mxu0  ;;  %v5121_v15 = vadd.f32 %v5120_v40, %v5119_v50  ;;  %v6103_v60 = vsel %vm4768_vm0, %v5739_v29, 0.0  ;;  %v5114_v5 = vadd.f32 %v5113_v7, %v5112_v61  ;;  %v5738_v20 = vmul.f32 %v4108_v3, %v4108_v3 }
 0x275   :  { %v4683_v54 = vrot.slane %v4669_v52, %v7986_v45  ;;  %v5127_v24 = vrot.slane %v5126_v0, 4  ;;  %v6104_v42 = vrot.slane %v6103_v60, 4  ;;  %v5108_v44 = vrot.slane %v5107_v10, 2 }
 0x276   :  { %v4152_v19 = vpop.f32.mrf.mxu1  ;;  %v6091_v47 = vadd.f32 %v6090_v51, %v6089_v31  ;;  %v5122_v28 = vrot.slane %v5121_v15, 2  ;;  %v5115_v39 = vrot.slane %v5114_v5, 2  ;;  %v6096_v13 = vsel %vm4768_vm0, %v5738_v20, 0.0 }
 0x277   :  { %v4684_v56 = vcombine.low %v4676_v37, %v4683_v54  ;;  %v5128_v63 = vadd.f32 %v5127_v24, %v5126_v0  ;;  %v5740_v12 = vmul.f32 %v4149_v33, %v4149_v33  ;;  %v6105_v25 = vadd.f32 %v6104_v42, %v6103_v60 }
 0x278   :  { %v5109_v14 = vadd.f32 %v5108_v44, %v5107_v10  ;;  %v6092_v11 = vrot.slane %v6091_v47, 2  ;;  %v5123_v16 = vadd.f32 %v5122_v28, %v5121_v15  ;;  %v6097_v41 = vrot.slane %v6096_v13, 4 }
 0x279   :  { %4764 = vst [vmem:[%s10519_s2 + $0x60] sm:$0xff] %v4684_v56  ;;  %v5116_v6 = vadd.f32 %v5115_v39, %v5114_v5  ;;  %v5129_v1 = vrot.slane %v5128_v63, 2  ;;  %v6110_v59 = vsel %vm4768_vm0, %v5740_v12, 0.0  ;;  %v6106_v35 = vrot.slane %v6105_v25, 2 }
 0x27a   :  { %v5110_v21 = vrot.slane %v5109_v14, 1  ;;  %v10404_v22 = vadd.f32 %v6092_v11, %v6091_v47  ;;  %v5124_v17 = vrot.slane %v5123_v16, 1  ;;  %v6098_v2 = vadd.f32 %v6097_v41, %v6096_v13 }
 0x27b   :  { %v5117_v43 = vrot.slane %v5116_v6, 1  ;;  %v6111_v30 = vrot.slane %v6110_v59, 4  ;;  %v5130_v53 = vadd.f32 %v5129_v1, %v5128_v63  ;;  %v10406_v8 = vadd.f32 %v6106_v35, %v6105_v25 }
 0x27c   :  { %v10408_v55 = vadd.f32 %v5110_v21, %v5109_v14  ;;  %v6094_v38 = vrot.slane %v10404_v22, 1  ;;  %v10411_v49 = vadd.f32 %v5124_v17, %v5123_v16  ;;  %v6099_v48 = vrot.slane %v6098_v2, 2 }
 0x27d   :  { %v10413_v34 = vadd.f32 %v5117_v43, %v5116_v6  ;;  %v6112_v57 = vadd.f32 %v6111_v30, %v6110_v59  ;;  %v5131_v33 = vrot.slane %v5130_v53, 1 }
 0x27e   :  { %v6100_v28 = vadd.f32 %v6099_v48, %v6098_v2 }
 0x27f   :  { %v6113_v40 = vrot.slane %v6112_v57, 2  ;;  %v5132_v12 = vadd.f32 %v5131_v33, %v5130_v53  ;;  %v5575_v43 = vcombine.low %v10408_v55, %v10413_v34  ;;  %v6108_v34 = vrot.slane %v10406_v8, 1 }
 0x280   :  { %v6101_v2 = vrot.slane %v6100_v28, 1 }
 0x281   :  { %v6114_v25 = vadd.f32 %v6113_v40, %v6112_v57  ;;  %v5576_v53 = vcombine.low %v10411_v49, %v5132_v12 }
 0x283   :  { %v5592_v40 = vrot.slane %v5576_v53, %v8048_v18 }
 0x28e   :  { %v4188_v23 = vpop.f32.mrf.mxu0 }
 0x28f   :  { %v5133_v4 = vsel %vm4768_vm0, %v4188_v23, 0.0  ;;  %v5741_v3 = vmul.f32 %v4188_v23, %v4188_v23 }
 0x290   :  { %v4229_v26 = vpop.f32.mrf.mxu1  ;;  %v5134_v62 = vrot.slane %v5133_v4, 4  ;;  %v4190_v37 = vpop.f32.mrf.mxu0 }
 0x291   :  { %v5147_v58 = vsel %vm4768_vm0, %v4229_v26, 0.0  ;;  %v5743_v46 = vmul.f32 %v4229_v26, %v4229_v26  ;;  %v6117_v52 = vsel %vm4768_vm0, %v5741_v3, 0.0  ;;  %v4685_v19 = vcombine.low %v4188_v23, %v4190_v37 }
 0x292   :  { %v5148_v36 = vrot.slane %v5147_v58, 4  ;;  %v5140_v54 = vsel %vm4768_vm0, %v4190_v37, 0.0  ;;  %v4231_v27 = vpop.f32.mrf.mxu1  ;;  %v5135_v9 = vadd.f32 %v5134_v62, %v5133_v4  ;;  %v6118_v50 = vrot.slane %v6117_v52, 4  ;;  %v4192_v32 = vpop.f32.mrf.mxu0 }
 0x293   :  { %v6131_v61 = vsel %vm4768_vm0, %v5743_v46, 0.0  ;;  %v5141_v56 = vrot.slane %v5140_v54, 4  ;;  %v5742_v7 = vmul.f32 %v4190_v37, %v4190_v37  ;;  %v4686_v60 = vcombine.low %v4229_v26, %v4231_v27 }
 0x294   :  { %v5149_v29 = vadd.f32 %v5148_v36, %v5147_v58  ;;  %v6132_v31 = vrot.slane %v6131_v61, 4  ;;  %v4233_v0 = vpop.f32.mrf.mxu1  ;;  %v5136_v10 = vrot.slane %v5135_v9, 2  ;;  %v6119_v51 = vadd.f32 %v6118_v50, %v6117_v52  ;;  %v4193_v5 = vpop.f32.mrf.mxu0 }
 0x295   :  { %v5142_v15 = vadd.f32 %v5141_v56, %v5140_v54  ;;  %v4693_v24 = vrot.slane %v4685_v19, %v7986_v45  ;;  %v6124_v42 = vsel %vm4768_vm0, %v5742_v7, 0.0  ;;  %v5154_v44 = vsel %vm4768_vm0, %v4231_v27, 0.0 }
 0x296   :  { %v5150_v20 = vrot.slane %v5149_v29, 2  ;;  %v4234_v47 = vpop.f32.mrf.mxu1  ;;  %v5137_v39 = vadd.f32 %v5136_v10, %v5135_v9  ;;  %v6125_v63 = vrot.slane %v6124_v42, 4  ;;  %v4700_v14 = vrot.slane %v4686_v60, %v7986_v45 }
 0x297   :  { %v5143_v13 = vrot.slane %v5142_v15, 2  ;;  %v5155_v11 = vrot.slane %v5154_v44, 4  ;;  %v6120_v16 = vrot.slane %v6119_v51, 2  ;;  %v6133_v41 = vadd.f32 %v6132_v31, %v6131_v61 }
 0x298   :  { %v6126_v1 = vadd.f32 %v6125_v63, %v6124_v42  ;;  %v5138_v59 = vrot.slane %v5137_v39, 1  ;;  %v5151_v35 = vadd.f32 %v5150_v20, %v5149_v29  ;;  %v4701_v21 = vcombine.low %v4693_v24, %v4700_v14 }
 0x299   :  { %v5144_v6 = vadd.f32 %v5143_v13, %v5142_v15  ;;  %v5156_v17 = vadd.f32 %v5155_v11, %v5154_v44  ;;  %v6115_v23 = vrot.slane %v6114_v25, 1  ;;  %v5744_v4 = vmul.f32 %v4231_v27, %v4231_v27 }
 0x29a   :  { %v6127_v48 = vrot.slane %v6126_v1, 2  ;;  %4765 = vst [vmem:[%s10519_s2 + $0x68] sm:$0xff] %v4701_v21  ;;  %v6121_v3 = vadd.f32 %v6120_v16, %v6119_v51  ;;  %v6134_v26 = vrot.slane %v6133_v41, 2  ;;  %v5139_v58 = vadd.f32 %v5138_v59, %v5137_v39 }
 0x29b   :  { %v5145_v30 = vrot.slane %v5144_v6, 1  ;;  %v5157_v57 = vrot.slane %v5156_v17, 2  ;;  %v5152_v46 = vrot.slane %v5151_v35, 1  ;;  %v6138_v55 = vsel %vm4768_vm0, %v5744_v4, 0.0 }
 0x29c   :  { %v6128_v62 = vadd.f32 %v6127_v48, %v6126_v1  ;;  %v6139_v49 = vrot.slane %v6138_v55, 4  ;;  %v6095_v36 = vadd.f32 %v6094_v38, %v10404_v22  ;;  %v6102_v19 = vadd.f32 %v6101_v2, %v6100_v28 }
 0x29d   :  { %v5146_v33 = vadd.f32 %v5145_v30, %v5144_v6  ;;  %v5158_v37 = vadd.f32 %v5157_v57, %v5156_v17  ;;  %v6116_v9 = vadd.f32 %v6115_v23, %v6114_v25  ;;  %v6122_v50 = vrot.slane %v6121_v3, 1 }
 0x29e   :  { %v6129_v52 = vrot.slane %v6128_v62, 1  ;;  %v6135_v61 = vadd.f32 %v6134_v26, %v6133_v41  ;;  %v6140_v56 = vadd.f32 %v6139_v49, %v6138_v55  ;;  %v5585_v32 = vrot.slane %v5575_v43, %v8048_v18 }
 0x29f   :  { %v5577_v54 = vcombine.low %v5139_v58, %v5146_v33  ;;  %v5159_v27 = vrot.slane %v5158_v37, 1  ;;  %v5153_v29 = vadd.f32 %v5152_v46, %v5151_v35  ;;  %v6109_v7 = vadd.f32 %v6108_v34, %v10406_v8 }
 0x2a0   :  { %v6130_v0 = vadd.f32 %v6129_v52, %v6128_v62  ;;  %v6141_v10 = vrot.slane %v6140_v56, 2  ;;  %v6559_v51 = vcombine.low %v6095_v36, %v6102_v19  ;;  %v6123_v60 = vadd.f32 %v6122_v50, %v6121_v3 }
 0x2a1   :  { %v5160_v31 = vadd.f32 %v5159_v27, %v5158_v37  ;;  %v5599_v22 = vrot.slane %v5577_v54, %v8048_v18  ;;  %v6560_v15 = vcombine.low %v6109_v7, %v6116_v9  ;;  %v6136_v5 = vrot.slane %v6135_v61, 1 }
 0x2a2   :  { %v6142_v20 = vadd.f32 %v6141_v10, %v6140_v56  ;;  %v5607_v24 = vcombine.low %v5585_v32, %v5592_v40  ;;  %v6561_v44 = vcombine.low %v6123_v60, %v6130_v0  ;;  %v6569_v39 = vrot.slane %v6559_v51, %v8048_v18 }
 0x2a3   :  { %v5578_v38 = vcombine.low %v5153_v29, %v5160_v31  ;;  %v6576_v8 = vrot.slane %v6560_v15, %v8048_v18  ;;  %v6137_v13 = vadd.f32 %v6136_v5, %v6135_v61 }
 0x2a4   :  { %v6143_v47 = vrot.slane %v6142_v20, 1  ;;  %v5615_v12 = vrot.slane %v5607_v24, %v8048_v18  ;;  %v6583_v14 = vrot.slane %v6561_v44, %v8048_v18 }
 0x2a5   :  { %v5606_v42 = vrot.slane %v5578_v38, %v8048_v18  ;;  %v6591_v41 = vcombine.low %v6569_v39, %v6576_v8 }
 0x2a6   :  { %v6144_v63 = vadd.f32 %v6143_v47, %v6142_v20 }
 0x2a7   :  { %v5608_v28 = vcombine.low %v5599_v22, %v5606_v42  ;;  %v6599_v21 = vrot.slane %v6591_v41, %v8048_v18 }
 0x2a8   :  { %v6562_v11 = vcombine.low %v6137_v13, %v6144_v63 }
 0x2a9   :  { %v5622_v25 = vrot.slane %v5608_v28, %v8048_v18 }
 0x2aa   :  { %v6590_v6 = vrot.slane %v6562_v11, %v8048_v18 }
 0x2ab   :  { %v5623_v16 = vcombine.low %v5615_v12, %v5622_v25 }
 0x2ac   :  { %v6592_v1 = vcombine.low %v6583_v14, %v6590_v6 }
 0x2ad   :  { %5687 = vst [vmem:[%s10520_s3 + $0x30] sm:$0xff] %v5623_v16 }
 0x2ae   :  { %v6606_v17 = vrot.slane %v6592_v1, %v8048_v18 }
 0x2af   :  { %v4270_v59 = vpop.f32.mrf.mxu0 }
 0x2b0   :  { %v6607_v48 = vcombine.low %v6599_v21, %v6606_v17  ;;  %v5161_v62 = vsel %vm4768_vm0, %v4270_v59, 0.0  ;;  %v5745_v58 = vmul.f32 %v4270_v59, %v4270_v59 }
 0x2b1   :  { %v4311_v35 = vpop.f32.mrf.mxu1  ;;  %v4272_v43 = vpop.f32.mrf.mxu0  ;;  %v5162_v34 = vrot.slane %v5161_v62, 4 }
 0x2b2   :  { %v4702_v2 = vcombine.low %v4270_v59, %v4272_v43  ;;  %6671 = vst [vmem:[%s10521_s4 + $0x30] sm:$0xff] %v6607_v48  ;;  %v5175_v46 = vsel %vm4768_vm0, %v4311_v35, 0.0  ;;  %v5168_v37 = vsel %vm4768_vm0, %v4272_v43, 0.0  ;;  %v5747_v49 = vmul.f32 %v4311_v35, %v4311_v35 }
 0x2b3   :  { %v4313_v30 = vpop.f32.mrf.mxu1  ;;  %v4274_v53 = vpop.f32.mrf.mxu0  ;;  %v5176_v52 = vrot.slane %v5175_v46, 4  ;;  %v6145_v36 = vsel %vm4768_vm0, %v5745_v58, 0.0  ;;  %v5169_v19 = vrot.slane %v5168_v37, 4  ;;  %v5163_v27 = vadd.f32 %v5162_v34, %v5161_v62 }
 0x2b4   :  { %v4710_v57 = vrot.slane %v4702_v2, %v7986_v45  ;;  %v4703_v4 = vcombine.low %v4311_v35, %v4313_v30  ;;  %v5182_v54 = vsel %vm4768_vm0, %v4313_v30, 0.0  ;;  %v6146_v9 = vrot.slane %v6145_v36, 4 }
 0x2b5   :  { %v4315_v23 = vpop.f32.mrf.mxu1  ;;  %v4275_v3 = vpop.f32.mrf.mxu0  ;;  %v5177_v50 = vadd.f32 %v5176_v52, %v5175_v46  ;;  %v6159_v61 = vsel %vm4768_vm0, %v5747_v49, 0.0  ;;  %v5170_v56 = vadd.f32 %v5169_v19, %v5168_v37  ;;  %v5746_v32 = vmul.f32 %v4272_v43, %v4272_v43 }
 0x2b6   :  { %v4717_v33 = vrot.slane %v4703_v4, %v7986_v45  ;;  %v5183_v40 = vrot.slane %v5182_v54, 4  ;;  %v6160_v29 = vrot.slane %v6159_v61, 4  ;;  %v5164_v31 = vrot.slane %v5163_v27, 2 }
 0x2b7   :  { %v4316_v26 = vpop.f32.mrf.mxu1  ;;  %v6147_v7 = vadd.f32 %v6146_v9, %v6145_v36  ;;  %v5178_v0 = vrot.slane %v5177_v50, 2  ;;  %v5171_v10 = vrot.slane %v5170_v56, 2  ;;  %v6152_v51 = vsel %vm4768_vm0, %v5746_v32, 0.0 }
 0x2b8   :  { %v4718_v55 = vcombine.low %v4710_v57, %v4717_v33  ;;  %v5184_v22 = vadd.f32 %v5183_v40, %v5182_v54  ;;  %v5748_v38 = vmul.f32 %v4313_v30, %v4313_v30  ;;  %v6161_v15 = vadd.f32 %v6160_v29, %v6159_v61 }
 0x2b9   :  { %v5165_v60 = vadd.f32 %v5164_v31, %v5163_v27  ;;  %v6148_v5 = vrot.slane %v6147_v7, 2  ;;  %v5179_v20 = vadd.f32 %v5178_v0, %v5177_v50  ;;  %v6153_v24 = vrot.slane %v6152_v51, 4 }
 0x2ba   :  { %4766 = vst [vmem:[%s10519_s2 + $0x70] sm:$0xff] %v4718_v55  ;;  %v5172_v42 = vadd.f32 %v5171_v10, %v5170_v56  ;;  %v5185_v44 = vrot.slane %v5184_v22, 2  ;;  %v6166_v47 = vsel %vm4768_vm0, %v5748_v38, 0.0  ;;  %v6162_v28 = vrot.slane %v6161_v15, 2 }
 0x2bb   :  { %v5166_v39 = vrot.slane %v5165_v60, 1  ;;  %v10467_v8 = vadd.f32 %v6148_v5, %v6147_v7  ;;  %v5180_v13 = vrot.slane %v5179_v20, 1  ;;  %v6154_v63 = vadd.f32 %v6153_v24, %v6152_v51 }
 0x2bc   :  { %v5173_v12 = vrot.slane %v5172_v42, 1  ;;  %v6167_v25 = vrot.slane %v6166_v47, 4  ;;  %v5186_v14 = vadd.f32 %v5185_v44, %v5184_v22  ;;  %v10469_v11 = vadd.f32 %v6162_v28, %v6161_v15 }
 0x2bd   :  { %v10471_v16 = vadd.f32 %v5166_v39, %v5165_v60  ;;  %v6150_v41 = vrot.slane %v10467_v8, 1  ;;  %v10474_v6 = vadd.f32 %v5180_v13, %v5179_v20  ;;  %v6155_v1 = vrot.slane %v6154_v63, 2 }
 0x2be   :  { %v10476_v35 = vadd.f32 %v5173_v12, %v5172_v42  ;;  %v6168_v21 = vadd.f32 %v6167_v25, %v6166_v47  ;;  %v5187_v30 = vrot.slane %v5186_v14, 1 }
 0x2bf   :  { %v6156_v0 = vadd.f32 %v6155_v1, %v6154_v63 }
 0x2c0   :  { %v6169_v52 = vrot.slane %v6168_v21, 2  ;;  %v5188_v38 = vadd.f32 %v5187_v30, %v5186_v14  ;;  %v5624_v12 = vcombine.low %v10471_v16, %v10476_v35  ;;  %v6164_v35 = vrot.slane %v10469_v11, 1 }
 0x2c1   :  { %v6157_v63 = vrot.slane %v6156_v0, 1 }
 0x2c2   :  { %v6170_v15 = vadd.f32 %v6169_v52, %v6168_v21  ;;  %v5625_v14 = vcombine.low %v10474_v6, %v5188_v38 }
 0x2cf   :  { %v4352_v59 = vpop.f32.mrf.mxu0 }
 0x2d0   :  { %v5189_v17 = vsel %vm4768_vm0, %v4352_v59, 0.0  ;;  %v5749_v43 = vmul.f32 %v4352_v59, %v4352_v59 }
 0x2d1   :  { %v4393_v2 = vpop.f32.mrf.mxu1  ;;  %v5190_v48 = vrot.slane %v5189_v17, 4  ;;  %v4354_v57 = vpop.f32.mrf.mxu0 }
 0x2d2   :  { %v5203_v53 = vsel %vm4768_vm0, %v4393_v2, 0.0  ;;  %v5751_v23 = vmul.f32 %v4393_v2, %v4393_v2  ;;  %v6173_v4 = vsel %vm4768_vm0, %v5749_v43, 0.0  ;;  %v4719_v26 = vcombine.low %v4352_v59, %v4354_v57 }
 0x2d3   :  { %v5204_v3 = vrot.slane %v5203_v53, 4  ;;  %v5196_v33 = vsel %vm4768_vm0, %v4354_v57, 0.0  ;;  %v4395_v62 = vpop.f32.mrf.mxu1  ;;  %v5191_v58 = vadd.f32 %v5190_v48, %v5189_v17  ;;  %v6174_v46 = vrot.slane %v6173_v4, 4  ;;  %v4356_v34 = vpop.f32.mrf.mxu0 }
 0x2d4   :  { %v6187_v37 = vsel %vm4768_vm0, %v5751_v23, 0.0  ;;  %v5197_v55 = vrot.slane %v5196_v33, 4  ;;  %v5750_v19 = vmul.f32 %v4354_v57, %v4354_v57  ;;  %v4720_v61 = vcombine.low %v4393_v2, %v4395_v62 }
 0x2d5   :  { %v5205_v49 = vadd.f32 %v5204_v3, %v5203_v53  ;;  %v6188_v36 = vrot.slane %v6187_v37, 4  ;;  %v4397_v54 = vpop.f32.mrf.mxu1  ;;  %v5192_v27 = vrot.slane %v5191_v58, 2  ;;  %v6175_v9 = vadd.f32 %v6174_v46, %v6173_v4  ;;  %v4357_v56 = vpop.f32.mrf.mxu0 }
 0x2d6   :  { %v5198_v50 = vadd.f32 %v5197_v55, %v5196_v33  ;;  %v4727_v40 = vrot.slane %v4719_v26, %v7986_v45  ;;  %v6180_v29 = vsel %vm4768_vm0, %v5750_v19, 0.0  ;;  %v5210_v31 = vsel %vm4768_vm0, %v4395_v62, 0.0 }
 0x2d7   :  { %v5206_v32 = vrot.slane %v5205_v49, 2  ;;  %v4398_v7 = vpop.f32.mrf.mxu1  ;;  %v5193_v10 = vadd.f32 %v5192_v27, %v5191_v58  ;;  %v6181_v22 = vrot.slane %v6180_v29, 4  ;;  %v4734_v60 = vrot.slane %v4720_v61, %v7986_v45 }
 0x2d8   :  { %v5199_v51 = vrot.slane %v5198_v50, 2  ;;  %v5211_v5 = vrot.slane %v5210_v31, 4  ;;  %v6176_v20 = vrot.slane %v6175_v9, 2  ;;  %v6189_v24 = vadd.f32 %v6188_v36, %v6187_v37 }
 0x2d9   :  { %v6182_v44 = vadd.f32 %v6181_v22, %v6180_v29  ;;  %v5194_v47 = vrot.slane %v5193_v10, 1  ;;  %v5207_v28 = vadd.f32 %v5206_v32, %v5205_v49  ;;  %v4735_v39 = vcombine.low %v4727_v40, %v4734_v60 }
 0x2da   :  { %v5200_v42 = vadd.f32 %v5199_v51, %v5198_v50  ;;  %v5212_v13 = vadd.f32 %v5211_v5, %v5210_v31  ;;  %v6171_v59 = vrot.slane %v6170_v15, 1  ;;  %v5752_v21 = vmul.f32 %v4395_v62, %v4395_v62 }
 0x2db   :  { %v6183_v1 = vrot.slane %v6182_v44, 2  ;;  %4767 = vst [vmem:[%s10519_s2 + $0x78] sm:$0xff] %v4735_v39  ;;  %v6177_v17 = vadd.f32 %v6176_v20, %v6175_v9  ;;  %v6190_v43 = vrot.slane %v6189_v24, 2  ;;  %v5195_v48 = vadd.f32 %v5194_v47, %v5193_v10 }
 0x2dc   :  { %v5201_v25 = vrot.slane %v5200_v42, 1  ;;  %v5213_v45 = vrot.slane %v5212_v13, 2  ;;  %v5208_v53 = vrot.slane %v5207_v28, 1  ;;  %v6194_v16 = vsel %vm4768_vm0, %v5752_v21, 0.0 }
 0x2dd   :  { %v6184_v30 = vadd.f32 %v6183_v1, %v6182_v44  ;;  %v6195_v6 = vrot.slane %v6194_v16, 4  ;;  %v6151_v4 = vadd.f32 %v6150_v41, %v10467_v8  ;;  %v6158_v3 = vadd.f32 %v6157_v63, %v6156_v0 }
 0x2de   :  { %v5202_v2 = vadd.f32 %v5201_v25, %v5200_v42  ;;  %v5214_v23 = vadd.f32 %v5213_v45, %v5212_v13  ;;  %v6172_v62 = vadd.f32 %v6171_v59, %v6170_v15  ;;  %v6178_v58 = vrot.slane %v6177_v17, 1 }
 0x2df   :  { %v6185_v57 = vrot.slane %v6184_v30, 1  ;;  %v6191_v46 = vadd.f32 %v6190_v43, %v6189_v24  ;;  %v6196_v37 = vadd.f32 %v6195_v6, %v6194_v16  ;;  %v5634_v55 = vrot.slane %v5624_v12, %v8048_v18 }
 0x2e0   :  { %v5626_v26 = vcombine.low %v5195_v48, %v5202_v2  ;;  %v5215_v33 = vrot.slane %v5214_v23, 1  ;;  %v5641_v34 = vrot.slane %v5625_v14, %v8048_v18  ;;  %v5209_v52 = vadd.f32 %v5208_v53, %v5207_v28 }
 0x2e1   :  { %v6165_v36 = vadd.f32 %v6164_v35, %v10469_v11  ;;  %v6186_v19 = vadd.f32 %v6185_v57, %v6184_v30  ;;  %v6197_v54 = vrot.slane %v6196_v37, 2  ;;  %v6608_v27 = vcombine.low %v6151_v4, %v6158_v3 }
 0x2e2   :  { %v5216_v49 = vadd.f32 %v5215_v33, %v5214_v23  ;;  %v5648_v8 = vrot.slane %v5626_v26, %v8048_v18  ;;  %v6179_v50 = vadd.f32 %v6178_v58, %v6177_v17  ;;  %v6192_v61 = vrot.slane %v6191_v46, 1 }
 0x2e3   :  { %v6609_v9 = vcombine.low %v6165_v36, %v6172_v62  ;;  %v6198_v56 = vadd.f32 %v6197_v54, %v6196_v37  ;;  %v5656_v32 = vcombine.low %v5634_v55, %v5641_v34  ;;  %v6618_v0 = vrot.slane %v6608_v27, %v8048_v18 }
 0x2e4   :  { %v5627_v41 = vcombine.low %v5209_v52, %v5216_v49  ;;  %v6610_v29 = vcombine.low %v6179_v50, %v6186_v19  ;;  %v6193_v10 = vadd.f32 %v6192_v61, %v6191_v46 }
 0x2e5   :  { %v6199_v31 = vrot.slane %v6198_v56, 1  ;;  %v6625_v11 = vrot.slane %v6609_v9, %v8048_v18  ;;  %v5664_v22 = vrot.slane %v5656_v32, %v8048_v18 }
 0x2e6   :  { %v5655_v40 = vrot.slane %v5627_v41, %v8048_v18  ;;  %v6632_v15 = vrot.slane %v6610_v29, %v8048_v18 }
 0x2e7   :  { %v6200_v51 = vadd.f32 %v6199_v31, %v6198_v56  ;;  %v6640_v20 = vcombine.low %v6618_v0, %v6625_v11 }
 0x2e8   :  { %v5657_v7 = vcombine.low %v5648_v8, %v5655_v40 }
 0x2e9   :  { %v6611_v60 = vcombine.low %v6193_v10, %v6200_v51  ;;  %v6648_v44 = vrot.slane %v6640_v20, %v8048_v18 }
 0x2ea   :  { %v5671_v38 = vrot.slane %v5657_v7, %v8048_v18 }
 0x2eb   :  { %v6639_v24 = vrot.slane %v6611_v60, %v8048_v18 }
 0x2ec   :  { %v5672_v5 = vcombine.low %v5664_v22, %v5671_v38 }
 0x2ed   :  { %v6641_v42 = vcombine.low %v6632_v15, %v6639_v24 }
 0x2ee   :  { %5688 = vst [vmem:[%s10520_s3 + $0x38] sm:$0xff] %v5672_v5 }
 0x2ef   :  { %v6655_v47 = vrot.slane %v6641_v42, %v8048_v18 }
 0x2f1   :  { %v6656_v28 = vcombine.low %v6648_v44, %v6655_v47 }
 0x2f3   :  { %6672 = vst [vmem:[%s10521_s4 + $0x38] sm:$0xff] %v6656_v28 }

// kernel: generator_forward.6
= control target key start
LH: loop header
LB: loop body
LE: loop exit
PB: predicated region body
PF: predicated region fallthrough
CT: control target
= control target key end

     0   :  { %s3516_s15 = smov 0   ;;  %s3518_s16 = smov 0   ;;  %s3920_s0 = inlined_call_operand.vmem [shape: bf16[4,32,2048], index: 0, kind: input, shape index: {}]   ;;  %s3921_s1 = inlined_call_operand.vmem [shape: bf16[4,2048,256], index: 1, kind: input, shape index: {}]   ;;  %s3922_s2 = inlined_call_operand.vmem [shape: f32[4,32,256], index: 2, kind: output, shape index: {0}]   ;;  %s3923_s3 = inlined_call_operand.vmem [shape: f32[4,1,1,256], index: 3, kind: output, shape index: {1}]   ;;  %s3924_s4 = inlined_call_operand.vmem [shape: f32[4,1,1,256], index: 4, kind: output, shape index: {2}]  }
   0x1   :  { %s3520_s17 = smov 0  }
   0x2 LB: > { %s27_s18 = sadd.s32 1, %s3484_s16  ;;  %p2755_p0 = scmp.ge.s32.totalorder %s3488_s17, 1  ;;  %s3488_s17 = sphi %s3520_s17, %s15_s17   ;;  %s3484_s16 = sphi %s3518_s16, %s3926_s16   ;;  %s3480_s15 = sphi %s3516_s15, %s3925_s15  }
   0x3   : > { %p29_p1 = scmp.ge.s32.totalorder %s27_s18, 4  ;;  %p203_p2 = scmp.lt.s32.totalorder %s3488_s17, 5 }
   0x5   : > { %s3928_s18 = smov (%p29_p1, %s27_s18), 0  ;;  %p204_p3 = pnand %p2755_p0, %p203_p2 }
   0x6   : > { %p261_p4 = scmp.lt.s32.totalorder (!%p204_p3), %s3480_s15, 3 }
   0x7   : > { %207 = sbr.rel (%p204_p3) target bundleno = 506 (0x1fa), region = 28 }
   0xc   : > { %s3930_s15 = smov (!%p261_p4, %s3480_s15), 3 }
   0xd   : > { %s3055_s19 = sshll.u32 %s3930_s15, 11  ;;  %s3054_s23 = sshll.u32 %s3930_s15, 8 }
   0xe   : > { %s3540_s22 = scalar_lea.vmem %s3921_s1, %s3055_s19  ;;  %s3590_s26 = scalar_lea.vmem %s3920_s0, %s3054_s23 }
   0xf   : > { %v3082_v0 = vld [vmem:[%s3540_s22 + $0x74] ss:$8 sps:$4 sm:$0xff]   ;;  %v3086_v2 = vld [vmem:[%s3540_s22 + $0x70] ss:$8 sps:$4 sm:$0xff]   ;;  %v3088_v4 = vld [vmem:[%s3540_s22 + $0x64] ss:$8 sps:$4 sm:$0xff]  }
  0x10   : > { %v3084_v1 = vld [vmem:[%s3540_s22 + $0x174] ss:$8 sps:$4 sm:$0xff]   ;;  %2031 = vmatprep.subr.bf16.mxu0 %v3082_v0  ;;  %v3087_v3 = vld [vmem:[%s3540_s22 + $0x170] ss:$8 sps:$4 sm:$0xff]   ;;  %v3090_v5 = vld [vmem:[%s3540_s22 + $0x164] ss:$8 sps:$4 sm:$0xff]  }
  0x11   : > { %2084 = vmatprep.subr.bf16.mxu1 %v3084_v1  ;;  %2032 = vmatpush1.bf16.msra.mxu0 %v3086_v2  ;;  %v3092_v6 = vld [vmem:[%s3540_s22 + $0x60] ss:$8 sps:$4 sm:$0xff]   ;;  %v3094_v8 = vld [vmem:[%s3540_s22 + $0x54] ss:$8 sps:$4 sm:$0xff]   ;;  %v3098_v10 = vld [vmem:[%s3540_s22 + $0x50] ss:$8 sps:$4 sm:$0xff]  }
  0x12   : > { %2085 = vmatpush1.bf16.msra.mxu1 %v3087_v3  ;;  %2033 = vmatprep.subr.bf16.mxu0 %v3088_v4  ;;  %v3093_v7 = vld [vmem:[%s3540_s22 + $0x160] ss:$8 sps:$4 sm:$0xff]   ;;  %v3096_v9 = vld [vmem:[%s3540_s22 + $0x154] ss:$8 sps:$4 sm:$0xff]   ;;  %v3099_v11 = vld [vmem:[%s3540_s22 + $0x150] ss:$8 sps:$4 sm:$0xff]  }
  0x13   : > { %2086 = vmatprep.subr.bf16.mxu1 %v3090_v5  ;;  %v3100_v12 = vld [vmem:[%s3540_s22 + $0x44] ss:$8 sps:$4 sm:$0xff]   ;;  %v3104_v14 = vld [vmem:[%s3540_s22 + $0x40] ss:$8 sps:$4 sm:$0xff]   ;;  %v3106_v16 = vld [vmem:[%s3540_s22 + $0x34] ss:$8 sps:$4 sm:$0xff]  }
  0x14   : > { %v3102_v13 = vld [vmem:[%s3540_s22 + $0x144] ss:$8 sps:$4 sm:$0xff]   ;;  %v3105_v15 = vld [vmem:[%s3540_s22 + $0x140] ss:$8 sps:$4 sm:$0xff]   ;;  %v3108_v17 = vld [vmem:[%s3540_s22 + $0x134] ss:$8 sps:$4 sm:$0xff]  }
  0x15   : > { %2034 = vmatpush1.bf16.msra.mxu0 %v3092_v6  ;;  %v3110_v18 = vld [vmem:[%s3540_s22 + $0x30] ss:$8 sps:$4 sm:$0xff]   ;;  %v3112_v20 = vld [vmem:[%s3540_s22 + $0x24] ss:$8 sps:$4 sm:$0xff]   ;;  %v3116_v22 = vld [vmem:[%s3540_s22 + $0x20] ss:$8 sps:$4 sm:$0xff]  }
  0x16   : > { %2087 = vmatpush1.bf16.msra.mxu1 %v3093_v7  ;;  %2035 = vmatprep.subr.bf16.mxu0 %v3094_v8  ;;  %v3111_v19 = vld [vmem:[%s3540_s22 + $0x130] ss:$8 sps:$4 sm:$0xff]   ;;  %v3114_v21 = vld [vmem:[%s3540_s22 + $0x124] ss:$8 sps:$4 sm:$0xff]   ;;  %v3117_v23 = vld [vmem:[%s3540_s22 + $0x120] ss:$8 sps:$4 sm:$0xff]  }
  0x17   : > { %2088 = vmatprep.subr.bf16.mxu1 %v3096_v9  ;;  %v3118_v24 = vld [vmem:[%s3540_s22 + $0x14] ss:$8 sps:$4 sm:$0xff]   ;;  %v3122_v26 = vld [vmem:[%s3540_s22 + $0x10] ss:$8 sps:$4 sm:$0xff]   ;;  %v3124_v28 = vld [vmem:[%s3540_s22 + $0x4] ss:$8 sps:$4 sm:$0xff]  }
  0x18   : > { %v3120_v25 = vld [vmem:[%s3540_s22 + $0x114] ss:$8 sps:$4 sm:$0xff]   ;;  %v3123_v27 = vld [vmem:[%s3540_s22 + $0x110] ss:$8 sps:$4 sm:$0xff]   ;;  %v3126_v29 = vld [vmem:[%s3540_s22 + $0x104] ss:$8 sps:$4 sm:$0xff]  }
  0x19   : > { %2036 = vmatpush1.bf16.msra.mxu0 %v3098_v10  ;;  %v3128_v30 = vld [vmem:[%s3540_s22] ss:$8 sps:$4 sm:$0xff]   ;;  %v3130_v32 = vld [vmem:[%s3540_s22 + $0xf4] ss:$8 sps:$4 sm:$0xff]   ;;  %v3134_v34 = vld [vmem:[%s3540_s22 + $0xf0] ss:$8 sps:$4 sm:$0xff]  }
  0x1a   : > { %2089 = vmatpush1.bf16.msra.mxu1 %v3099_v11  ;;  %2037 = vmatprep.subr.bf16.mxu0 %v3100_v12  ;;  %v3129_v31 = vld [vmem:[%s3540_s22 + $0x100] ss:$8 sps:$4 sm:$0xff]   ;;  %v3132_v33 = vld [vmem:[%s3540_s22 + $0x1f4] ss:$8 sps:$4 sm:$0xff]   ;;  %v3135_v35 = vld [vmem:[%s3540_s22 + $0x1f0] ss:$8 sps:$4 sm:$0xff]  }
  0x1b   : > { %2090 = vmatprep.subr.bf16.mxu1 %v3102_v13  ;;  %v3136_v36 = vld [vmem:[%s3540_s22 + $0xe4] ss:$8 sps:$4 sm:$0xff]   ;;  %v3140_v38 = vld [vmem:[%s3540_s22 + $0xe0] ss:$8 sps:$4 sm:$0xff]   ;;  %v3142_v40 = vld [vmem:[%s3540_s22 + $0xd4] ss:$8 sps:$4 sm:$0xff]  }
  0x1c   : > { %v3138_v37 = vld [vmem:[%s3540_s22 + $0x1e4] ss:$8 sps:$4 sm:$0xff]   ;;  %v3141_v39 = vld [vmem:[%s3540_s22 + $0x1e0] ss:$8 sps:$4 sm:$0xff]   ;;  %v3144_v41 = vld [vmem:[%s3540_s22 + $0x1d4] ss:$8 sps:$4 sm:$0xff]  }
  0x1d   : > { %2038 = vmatpush1.bf16.msra.mxu0 %v3104_v14  ;;  %v3146_v42 = vld [vmem:[%s3540_s22 + $0xd0] ss:$8 sps:$4 sm:$0xff]   ;;  %v3148_v44 = vld [vmem:[%s3540_s22 + $0xc4] ss:$8 sps:$4 sm:$0xff]   ;;  %v3152_v46 = vld [vmem:[%s3540_s22 + $0xc0] ss:$8 sps:$4 sm:$0xff]  }
  0x1e   : > { %2091 = vmatpush1.bf16.msra.mxu1 %v3105_v15  ;;  %2039 = vmatprep.subr.bf16.mxu0 %v3106_v16  ;;  %v3147_v43 = vld [vmem:[%s3540_s22 + $0x1d0] ss:$8 sps:$4 sm:$0xff]   ;;  %v3150_v45 = vld [vmem:[%s3540_s22 + $0x1c4] ss:$8 sps:$4 sm:$0xff]   ;;  %v3153_v47 = vld [vmem:[%s3540_s22 + $0x1c0] ss:$8 sps:$4 sm:$0xff]  }
  0x1f   : > { %2092 = vmatprep.subr.bf16.mxu1 %v3108_v17  ;;  %v303_v48 = vld [vmem:[%s3590_s26] sm:$0xff]  ;;  %v304_v50 = vld [vmem:[%s3590_s26 + $0x8] sm:$0xff]  ;;  %v3154_v52 = vld [vmem:[%s3540_s22 + $0xb4] ss:$8 sps:$4 sm:$0xff]   ;;  %s3056_s27 = sshll.u32 %s3930_s15, 6  ;;  %s2762_s5 = sshll.u32 %s3930_s15, 1 }
  0x20   : > { %v311_v49 = vld [vmem:[%s3590_s26 + $0x40] sm:$0xff]  ;;  %v312_v51 = vld [vmem:[%s3590_s26 + $0x48] sm:$0xff]  ;;  %v3156_v54 = vld [vmem:[%s3540_s22 + $0x1b4] ss:$8 sps:$4 sm:$0xff]   ;;  %s3892_s30 = scalar_lea.vmem %s3922_s2, %s3056_s27  ;;  %s294_s8 = scalar_lea.vmem %s3923_s3, %s2762_s5 }
  0x21   : > { %2040 = vmatpush1.bf16.msra.mxu0 %v3110_v18  ;;  %v2765_v53 = vcombine.high %v303_v48, %v311_v49  ;;  %v2767_v55 = vcombine.high %v304_v50, %v312_v51  ;;  %v3158_v56 = vld [vmem:[%s3540_s22 + $0xb0] ss:$8 sps:$4 sm:$0xff]   ;;  %v3160_v58 = vld [vmem:[%s3540_s22 + $0xa4] ss:$8 sps:$4 sm:$0xff]   ;;  %v3164_v60 = vld [vmem:[%s3540_s22 + $0xa0] ss:$8 sps:$4 sm:$0xff]   ;;  %v2764_v8 = vcombine.low %v303_v48, %v311_v49  ;;  %v2766_v9 = vcombine.low %v304_v50, %v312_v51  ;;  %s302_s11 = scalar_lea.vmem %s3924_s4, %s2762_s5 }
  0x22   : > { %2093 = vmatpush1.bf16.msra.mxu1 %v3111_v19  ;;  %2041 = vmatprep.subr.bf16.mxu0 %v3112_v20  ;;  %v3159_v57 = vld [vmem:[%s3540_s22 + $0x1b0] ss:$8 sps:$4 sm:$0xff]   ;;  %v3162_v59 = vld [vmem:[%s3540_s22 + $0x1a4] ss:$8 sps:$4 sm:$0xff]   ;;  %v3165_v61 = vld [vmem:[%s3540_s22 + $0x1a0] ss:$8 sps:$4 sm:$0xff]  }
  0x23   : > { %2094 = vmatprep.subr.bf16.mxu1 %v3114_v21  ;;  %2063 = vmatprep.mubr.bf16.mxu0 %v2765_v53  ;;  %v3166_v62 = vld [vmem:[%s3540_s22 + $0x94] ss:$8 sps:$4 sm:$0xff]   ;;  %v3170_v0 = vld [vmem:[%s3540_s22 + $0x90] ss:$8 sps:$4 sm:$0xff]   ;;  %v3172_v2 = vld [vmem:[%s3540_s22 + $0x84] ss:$8 sps:$4 sm:$0xff]  }
  0x24   : > { %2116 = vmatprep.mubr.bf16.mxu1 %v2767_v55  ;;  %v3168_v63 = vld [vmem:[%s3540_s22 + $0x194] ss:$8 sps:$4 sm:$0xff]   ;;  %v3171_v1 = vld [vmem:[%s3540_s22 + $0x190] ss:$8 sps:$4 sm:$0xff]   ;;  %v3174_v3 = vld [vmem:[%s3540_s22 + $0x184] ss:$8 sps:$4 sm:$0xff]  }
  0x25   : > { %2042 = vmatpush1.bf16.msra.mxu0 %v3116_v22  ;;  %v3176_v4 = vld [vmem:[%s3540_s22 + $0x80] ss:$8 sps:$4 sm:$0xff]   ;;  %v3180_v6 = vld [vmem:[%s3540_s22 + $0x274] ss:$8 sps:$4 sm:$0xff]   ;;  %v3178_v10 = vld [vmem:[%s3540_s22 + $0x270] ss:$8 sps:$4 sm:$0xff]  }
  0x26   : > { %2095 = vmatpush1.bf16.msra.mxu1 %v3117_v23  ;;  %2043 = vmatprep.subr.bf16.mxu0 %v3118_v24  ;;  %v3177_v5 = vld [vmem:[%s3540_s22 + $0x180] ss:$8 sps:$4 sm:$0xff]   ;;  %v3183_v7 = vld [vmem:[%s3540_s22 + $0x374] ss:$8 sps:$4 sm:$0xff]   ;;  %v3181_v11 = vld [vmem:[%s3540_s22 + $0x370] ss:$8 sps:$4 sm:$0xff]  }
  0x27   : > { %2096 = vmatprep.subr.bf16.mxu1 %v3120_v25  ;;  %v3186_v12 = vld [vmem:[%s3540_s22 + $0x264] ss:$8 sps:$4 sm:$0xff]   ;;  %v3184_v14 = vld [vmem:[%s3540_s22 + $0x260] ss:$8 sps:$4 sm:$0xff]   ;;  %v3192_v16 = vld [vmem:[%s3540_s22 + $0x254] ss:$8 sps:$4 sm:$0xff]  }
  0x28   : > { %v3189_v13 = vld [vmem:[%s3540_s22 + $0x364] ss:$8 sps:$4 sm:$0xff]   ;;  %v3187_v15 = vld [vmem:[%s3540_s22 + $0x360] ss:$8 sps:$4 sm:$0xff]   ;;  %v3195_v17 = vld [vmem:[%s3540_s22 + $0x354] ss:$8 sps:$4 sm:$0xff]  }
  0x29   : > { %2044 = vmatpush1.bf16.msra.mxu0 %v3122_v26  ;;  %v3190_v18 = vld [vmem:[%s3540_s22 + $0x250] ss:$8 sps:$4 sm:$0xff]   ;;  %v3198_v20 = vld [vmem:[%s3540_s22 + $0x244] ss:$8 sps:$4 sm:$0xff]   ;;  %v3196_v22 = vld [vmem:[%s3540_s22 + $0x240] ss:$8 sps:$4 sm:$0xff]  }
  0x2a   : > { %2097 = vmatpush1.bf16.msra.mxu1 %v3123_v27  ;;  %2045 = vmatprep.subr.bf16.mxu0 %v3124_v28  ;;  %v3193_v19 = vld [vmem:[%s3540_s22 + $0x350] ss:$8 sps:$4 sm:$0xff]   ;;  %v3201_v21 = vld [vmem:[%s3540_s22 + $0x344] ss:$8 sps:$4 sm:$0xff]   ;;  %v3199_v23 = vld [vmem:[%s3540_s22 + $0x340] ss:$8 sps:$4 sm:$0xff]  }
  0x2b   : > { %2098 = vmatprep.subr.bf16.mxu1 %v3126_v29  ;;  %v3204_v24 = vld [vmem:[%s3540_s22 + $0x234] ss:$8 sps:$4 sm:$0xff]   ;;  %v3202_v26 = vld [vmem:[%s3540_s22 + $0x230] ss:$8 sps:$4 sm:$0xff]   ;;  %v319_v28 = vld [vmem:[%s3590_s26 + $0x80] sm:$0xff] }
  0x2c   : > { %v3207_v25 = vld [vmem:[%s3540_s22 + $0x334] ss:$8 sps:$4 sm:$0xff]   ;;  %v3205_v27 = vld [vmem:[%s3540_s22 + $0x330] ss:$8 sps:$4 sm:$0xff]   ;;  %v327_v29 = vld [vmem:[%s3590_s26 + $0xc0] sm:$0xff] }
  0x2d   : > { %2046 = vmatpush1.bf16.msra.mxu0 %v3128_v30  ;;  %v320_v30 = vld [vmem:[%s3590_s26 + $0x88] sm:$0xff]  ;;  %v3657_v48 = vld [vmem:[%s3590_s26 + $0x18] sm:$0xff] }
  0x2e   : > { %2099 = vmatpush1.bf16.msra.mxu1 %v3129_v31  ;;  %2047 = vmatprep.subr.bf16.mxu0 %v3130_v32  ;;  %v328_v31 = vld [vmem:[%s3590_s26 + $0xc8] sm:$0xff]  ;;  %v3662_v50 = vld [vmem:[%s3590_s26 + $0x58] sm:$0xff] }
  0x2f   : > { %2100 = vmatprep.subr.bf16.mxu1 %v3132_v33  ;;  %v3210_v32 = vld [vmem:[%s3540_s22 + $0x224] ss:$8 sps:$4 sm:$0xff]   ;;  %v2781_v33 = vcombine.high %v319_v28, %v327_v29  ;;  %v2771_v51 = vcombine.high %v3657_v48, %v3662_v50  ;;  %v3223_v53 = vld [vmem:[%s3540_s22 + $0x300] ss:$8 sps:$4 sm:$0xff]   ;;  %v3231_v55 = vld [vmem:[%s3540_s22 + $0x3f4] ss:$8 sps:$4 sm:$0xff]  }
  0x31   : > { %2048 = vmatpush2.bf16.msra.mxu0 %v3134_v34  ;;  %v2783_v34 = vcombine.high %v320_v30, %v328_v31 }
  0x32   : > { %2101 = vmatpush2.bf16.msra.mxu1 %v3135_v35  ;;  %2049 = vmatprep.subr.bf16.mxu0 %v3136_v36  ;;  %v2780_v35 = vcombine.low %v319_v28, %v327_v29  ;;  %v3213_v36 = vld [vmem:[%s3540_s22 + $0x324] ss:$8 sps:$4 sm:$0xff]   ;;  %v2770_v29 = vcombine.low %v3657_v48, %v3662_v50 }
  0x33   : > { %2102 = vmatprep.subr.bf16.mxu1 %v3138_v37  ;;  %v2782_v37 = vcombine.low %v320_v30, %v328_v31  ;;  %v322_v30 = vld [vmem:[%s3590_s26 + $0x98] sm:$0xff]  ;;  %v3294_v48 = vld [vmem:[%s3540_s22 + $0x444] ss:$8 sps:$4 sm:$0xff]  }
  0x34   : > { %v330_v31 = vld [vmem:[%s3590_s26 + $0xd8] sm:$0xff] }
  0x35   : > { %2050 = vmatpush2.bf16.msra.mxu0 %v3140_v38  ;;  %v3208_v38 = vld [vmem:[%s3540_s22 + $0x220] ss:$8 sps:$4 sm:$0xff]  }
  0x36   : > { %2103 = vmatpush2.bf16.msra.mxu1 %v3141_v39  ;;  %2051 = vmatprep.subr.bf16.mxu0 %v3142_v40  ;;  %v3211_v39 = vld [vmem:[%s3540_s22 + $0x320] ss:$8 sps:$4 sm:$0xff]   ;;  %v3216_v40 = vld [vmem:[%s3540_s22 + $0x214] ss:$8 sps:$4 sm:$0xff]  }
  0x37   : > { %2104 = vmatprep.subr.bf16.mxu1 %v3144_v41  ;;  %v3219_v41 = vld [vmem:[%s3540_s22 + $0x314] ss:$8 sps:$4 sm:$0xff]  }
  0x39   : > { %2052 = vmatpush2.bf16.msra.mxu0 %v3146_v42  ;;  %v3214_v42 = vld [vmem:[%s3540_s22 + $0x210] ss:$8 sps:$4 sm:$0xff]  }
  0x3a   : > { %2105 = vmatpush2.bf16.msra.mxu1 %v3147_v43  ;;  %2053 = vmatprep.subr.bf16.mxu0 %v3148_v44  ;;  %v3217_v43 = vld [vmem:[%s3540_s22 + $0x310] ss:$8 sps:$4 sm:$0xff]   ;;  %v3222_v44 = vld [vmem:[%s3540_s22 + $0x204] ss:$8 sps:$4 sm:$0xff]  }
  0x3b   : > { %2106 = vmatprep.subr.bf16.mxu1 %v3150_v45  ;;  %v3225_v45 = vld [vmem:[%s3540_s22 + $0x304] ss:$8 sps:$4 sm:$0xff]  }
  0x3d   : > { %2054 = vmatpush2.bf16.msra.mxu0 %v3152_v46  ;;  %v3651_v46 = vld [vmem:[%s3590_s26 + $0x10] sm:$0xff] }
  0x3e   : > { %2107 = vmatpush2.bf16.msra.mxu1 %v3153_v47  ;;  %2055 = vmatprep.subr.bf16.mxu0 %v3154_v52  ;;  %v3654_v47 = vld [vmem:[%s3590_s26 + $0x50] sm:$0xff]  ;;  %v3220_v52 = vld [vmem:[%s3540_s22 + $0x200] ss:$8 sps:$4 sm:$0xff]  }
  0x3f   : > { %2108 = vmatprep.subr.bf16.mxu1 %v3156_v54  ;;  %v2769_v49 = vcombine.high %v3651_v46, %v3654_v47  ;;  %v3228_v54 = vld [vmem:[%s3540_s22 + $0x2f4] ss:$8 sps:$4 sm:$0xff]   ;;  %v2768_v28 = vcombine.low %v3651_v46, %v3654_v47  ;;  %v3727_v46 = vld [vmem:[%s3590_s26 + $0x28] sm:$0xff] }
  0x40   : > { %v3730_v47 = vld [vmem:[%s3590_s26 + $0x68] sm:$0xff] }
  0x41   : > { %2056 = vmatpush2.bf16.msra.mxu0 %v3158_v56  ;;  %v3226_v56 = vld [vmem:[%s3540_s22 + $0x2f0] ss:$8 sps:$4 sm:$0xff]  }
  0x42   : > { %2109 = vmatpush2.bf16.msra.mxu1 %v3159_v57  ;;  %2057 = vmatprep.subr.bf16.mxu0 %v3160_v58  ;;  %v3229_v57 = vld [vmem:[%s3540_s22 + $0x3f0] ss:$8 sps:$4 sm:$0xff]   ;;  %v3234_v58 = vld [vmem:[%s3540_s22 + $0x2e4] ss:$8 sps:$4 sm:$0xff]  }
  0x43   : > { %2110 = vmatprep.subr.bf16.mxu1 %v3162_v59  ;;  %v3237_v59 = vld [vmem:[%s3540_s22 + $0x3e4] ss:$8 sps:$4 sm:$0xff]  }
  0x45   : > { %2058 = vmatpush2.bf16.msra.mxu0 %v3164_v60  ;;  %v3232_v60 = vld [vmem:[%s3540_s22 + $0x2e0] ss:$8 sps:$4 sm:$0xff]  }
  0x46   : > { %2111 = vmatpush2.bf16.msra.mxu1 %v3165_v61  ;;  %2059 = vmatprep.subr.bf16.mxu0 %v3166_v62  ;;  %v3235_v61 = vld [vmem:[%s3540_s22 + $0x3e0] ss:$8 sps:$4 sm:$0xff]   ;;  %v3240_v62 = vld [vmem:[%s3540_s22 + $0x2d4] ss:$8 sps:$4 sm:$0xff]  }
  0x47   : > { %2112 = vmatprep.subr.bf16.mxu1 %v3168_v63  ;;  %v3243_v63 = vld [vmem:[%s3540_s22 + $0x3d4] ss:$8 sps:$4 sm:$0xff]  }
  0x49   : > { %2060 = vmatpush2.bf16.msra.mxu0 %v3170_v0  ;;  %v3238_v0 = vld [vmem:[%s3540_s22 + $0x2d0] ss:$8 sps:$4 sm:$0xff]  }
  0x4a   : > { %2113 = vmatpush2.bf16.msra.mxu1 %v3171_v1  ;;  %2061 = vmatprep.subr.bf16.mxu0 %v3172_v2  ;;  %v3241_v1 = vld [vmem:[%s3540_s22 + $0x3d0] ss:$8 sps:$4 sm:$0xff]   ;;  %v3246_v2 = vld [vmem:[%s3540_s22 + $0x2c4] ss:$8 sps:$4 sm:$0xff]  }
  0x4b   : > { %2114 = vmatprep.subr.bf16.mxu1 %v3174_v3  ;;  %v3249_v3 = vld [vmem:[%s3540_s22 + $0x3c4] ss:$8 sps:$4 sm:$0xff]  }
  0x4d   : > { %2062 = vmatpush2.bf16.msra.mxu0 %v3176_v4  ;;  %v3244_v4 = vld [vmem:[%s3540_s22 + $0x2c0] ss:$8 sps:$4 sm:$0xff]  }
  0x4e   : > { %2115 = vmatpush2.bf16.msra.mxu1 %v3177_v5  ;;  %2137 = vmatprep.subr.bf16.mxu0 %v3180_v6  ;;  %v3247_v5 = vld [vmem:[%s3540_s22 + $0x3c0] ss:$8 sps:$4 sm:$0xff]   ;;  %v3252_v6 = vld [vmem:[%s3540_s22 + $0x2b4] ss:$8 sps:$4 sm:$0xff]  }
  0x4f   : > { %2190 = vmatprep.subr.bf16.mxu1 %v3183_v7  ;;  %v3255_v7 = vld [vmem:[%s3540_s22 + $0x3b4] ss:$8 sps:$4 sm:$0xff]  }
  0x50   : > { %2064 = vmatmul.mubr.bf16.vlgmr.msra.gmra.mxu0 %v2764_v8  ;;  %v3250_v8 = vld [vmem:[%s3540_s22 + $0x2b0] ss:$8 sps:$4 sm:$0xff]  }
  0x51   : > { %2117 = vmatmul.mubr.bf16.vlgmr.msra.gmra.mxu1 %v2766_v9  ;;  %2138 = vmatpush1.bf16.msra.mxu0 %v3178_v10  ;;  %v3253_v9 = vld [vmem:[%s3540_s22 + $0x3b0] ss:$8 sps:$4 sm:$0xff]   ;;  %v3258_v10 = vld [vmem:[%s3540_s22 + $0x2a4] ss:$8 sps:$4 sm:$0xff]  }
  0x52   : > { %2191 = vmatpush1.bf16.msra.mxu1 %v3181_v11  ;;  %2139 = vmatprep.subr.bf16.mxu0 %v3186_v12  ;;  %v3261_v11 = vld [vmem:[%s3540_s22 + $0x3a4] ss:$8 sps:$4 sm:$0xff]   ;;  %v3256_v12 = vld [vmem:[%s3540_s22 + $0x2a0] ss:$8 sps:$4 sm:$0xff]  }
  0x53   : > { %2192 = vmatprep.subr.bf16.mxu1 %v3189_v13  ;;  %2073 = vmatprep.mubr.bf16.mxu0 %v2781_v33  ;;  %v3259_v13 = vld [vmem:[%s3540_s22 + $0x3a0] ss:$8 sps:$4 sm:$0xff]   ;;  %v3285_v33 = vld [vmem:[%s3540_s22 + $0x564] ss:$8 sps:$4 sm:$0xff]  }
  0x54   : > { %2126 = vmatprep.mubr.bf16.mxu1 %v2783_v34 }
  0x55   : > { %2140 = vmatpush1.bf16.msra.mxu0 %v3184_v14  ;;  %v3264_v14 = vld [vmem:[%s3540_s22 + $0x294] ss:$8 sps:$4 sm:$0xff]  }
  0x56   : > { %2193 = vmatpush1.bf16.msra.mxu1 %v3187_v15  ;;  %2141 = vmatprep.subr.bf16.mxu0 %v3192_v16  ;;  %v3267_v15 = vld [vmem:[%s3540_s22 + $0x394] ss:$8 sps:$4 sm:$0xff]   ;;  %v3262_v16 = vld [vmem:[%s3540_s22 + $0x290] ss:$8 sps:$4 sm:$0xff]  }
  0x57   : > { %2194 = vmatprep.subr.bf16.mxu1 %v3195_v17  ;;  %v3265_v17 = vld [vmem:[%s3540_s22 + $0x390] ss:$8 sps:$4 sm:$0xff]  }
  0x58   : > { %2074 = vmatmul.mubr.bf16.gmra.mxu0 %v2780_v35  ;;  %v2787_v35 = vcombine.high %v322_v30, %v330_v31 }
  0x59   : > { %2142 = vmatpush1.bf16.msra.mxu0 %v3190_v18  ;;  %2127 = vmatmul.mubr.bf16.gmra.mxu1 %v2782_v37  ;;  %v3270_v18 = vld [vmem:[%s3540_s22 + $0x284] ss:$8 sps:$4 sm:$0xff]   ;;  %v3283_v37 = vld [vmem:[%s3540_s22 + $0x560] ss:$8 sps:$4 sm:$0xff]  }
  0x5a   : > { %2195 = vmatpush1.bf16.msra.mxu1 %v3193_v19  ;;  %2143 = vmatprep.subr.bf16.mxu0 %v3198_v20  ;;  %v3273_v19 = vld [vmem:[%s3540_s22 + $0x384] ss:$8 sps:$4 sm:$0xff]   ;;  %v3268_v20 = vld [vmem:[%s3540_s22 + $0x280] ss:$8 sps:$4 sm:$0xff]  }
  0x5b   : > { %2196 = vmatprep.subr.bf16.mxu1 %v3201_v21  ;;  %2169 = vmatprep.mubr.bf16.mxu0 %v2769_v49  ;;  %v3271_v21 = vld [vmem:[%s3540_s22 + $0x380] ss:$8 sps:$4 sm:$0xff]   ;;  %v3297_v49 = vld [vmem:[%s3540_s22 + $0x544] ss:$8 sps:$4 sm:$0xff]  }
  0x5c   : > { %2222 = vmatprep.mubr.bf16.mxu1 %v2771_v51  ;;  %v2775_v51 = vcombine.high %v3727_v46, %v3730_v47 }
  0x5d   : > { %2144 = vmatpush1.bf16.msra.mxu0 %v3196_v22  ;;  %v3276_v22 = vld [vmem:[%s3540_s22 + $0x474] ss:$8 sps:$4 sm:$0xff]  }
  0x5e   : > { %2197 = vmatpush1.bf16.msra.mxu1 %v3199_v23  ;;  %2145 = vmatprep.subr.bf16.mxu0 %v3204_v24  ;;  %v3279_v23 = vld [vmem:[%s3540_s22 + $0x574] ss:$8 sps:$4 sm:$0xff]   ;;  %v3274_v24 = vld [vmem:[%s3540_s22 + $0x470] ss:$8 sps:$4 sm:$0xff]  }
  0x5f   : > { %2198 = vmatprep.subr.bf16.mxu1 %v3207_v25  ;;  %v3277_v25 = vld [vmem:[%s3540_s22 + $0x570] ss:$8 sps:$4 sm:$0xff]  }
  0x61   : > { %2146 = vmatpush1.bf16.msra.mxu0 %v3202_v26  ;;  %v321_v26 = vld [vmem:[%s3590_s26 + $0x90] sm:$0xff] }
  0x62   : > { %2199 = vmatpush1.bf16.msra.mxu1 %v3205_v27  ;;  %2147 = vmatprep.subr.bf16.mxu0 %v3210_v32  ;;  %v329_v27 = vld [vmem:[%s3590_s26 + $0xd0] sm:$0xff]  ;;  %v3282_v32 = vld [vmem:[%s3540_s22 + $0x464] ss:$8 sps:$4 sm:$0xff]  }
  0x63   : > { %2200 = vmatprep.subr.bf16.mxu1 %v3213_v36  ;;  %v2785_v34 = vcombine.high %v321_v26, %v329_v27  ;;  %v3280_v36 = vld [vmem:[%s3540_s22 + $0x460] ss:$8 sps:$4 sm:$0xff]  }
  0x65   : > { %2148 = vmatpush1.bf16.msra.mxu0 %v3208_v38  ;;  %v3288_v38 = vld [vmem:[%s3540_s22 + $0x454] ss:$8 sps:$4 sm:$0xff]  }
  0x66   : > { %2201 = vmatpush1.bf16.msra.mxu1 %v3211_v39  ;;  %2149 = vmatprep.subr.bf16.mxu0 %v3216_v40  ;;  %v3291_v39 = vld [vmem:[%s3540_s22 + $0x554] ss:$8 sps:$4 sm:$0xff]   ;;  %v3286_v40 = vld [vmem:[%s3540_s22 + $0x450] ss:$8 sps:$4 sm:$0xff]  }
  0x67   : > { %2202 = vmatprep.subr.bf16.mxu1 %v3219_v41  ;;  %v3289_v41 = vld [vmem:[%s3540_s22 + $0x550] ss:$8 sps:$4 sm:$0xff]  }
  0x69   : > { %2150 = vmatpush1.bf16.msra.mxu0 %v3214_v42  ;;  %v3721_v42 = vld [vmem:[%s3590_s26 + $0x20] sm:$0xff] }
  0x6a   : > { %2203 = vmatpush1.bf16.msra.mxu1 %v3217_v43  ;;  %2151 = vmatprep.subr.bf16.mxu0 %v3222_v44  ;;  %v3724_v43 = vld [vmem:[%s3590_s26 + $0x60] sm:$0xff]  ;;  %v2784_v44 = vcombine.low %v321_v26, %v329_v27 }
  0x6b   : > { %2204 = vmatprep.subr.bf16.mxu1 %v3225_v45  ;;  %v2786_v45 = vcombine.low %v322_v30, %v330_v31  ;;  %v2773_v50 = vcombine.high %v3721_v42, %v3724_v43  ;;  %v3354_v26 = vld [vmem:[%s3540_s22 + $0x4a4] ss:$8 sps:$4 sm:$0xff]   ;;  %v3360_v30 = vld [vmem:[%s3540_s22 + $0x494] ss:$8 sps:$4 sm:$0xff]  }
  0x6c   : > { %v3357_v27 = vld [vmem:[%s3540_s22 + $0x5a4] ss:$8 sps:$4 sm:$0xff]   ;;  %v3363_v31 = vld [vmem:[%s3540_s22 + $0x594] ss:$8 sps:$4 sm:$0xff]  }
  0x6d   : > { %2152 = vmatpush1.bf16.msra.mxu0 %v3220_v52  ;;  %v3292_v52 = vld [vmem:[%s3540_s22 + $0x440] ss:$8 sps:$4 sm:$0xff]  }
  0x6e   : > { %2205 = vmatpush1.bf16.msra.mxu1 %v3223_v53  ;;  %2153 = vmatprep.subr.bf16.mxu0 %v3228_v54  ;;  %v3295_v53 = vld [vmem:[%s3540_s22 + $0x540] ss:$8 sps:$4 sm:$0xff]   ;;  %v3300_v54 = vld [vmem:[%s3540_s22 + $0x434] ss:$8 sps:$4 sm:$0xff]  }
  0x6f   : > { %2206 = vmatprep.subr.bf16.mxu1 %v3231_v55  ;;  %v3303_v55 = vld [vmem:[%s3540_s22 + $0x534] ss:$8 sps:$4 sm:$0xff]  }
  0x71   : > { %2154 = vmatpush2.bf16.msra.mxu0 %v3226_v56  ;;  %v3298_v56 = vld [vmem:[%s3540_s22 + $0x430] ss:$8 sps:$4 sm:$0xff]  }
  0x72   : > { %2207 = vmatpush2.bf16.msra.mxu1 %v3229_v57  ;;  %2155 = vmatprep.subr.bf16.mxu0 %v3234_v58  ;;  %v3301_v57 = vld [vmem:[%s3540_s22 + $0x530] ss:$8 sps:$4 sm:$0xff]   ;;  %v3306_v58 = vld [vmem:[%s3540_s22 + $0x424] ss:$8 sps:$4 sm:$0xff]  }
  0x73   : > { %2208 = vmatprep.subr.bf16.mxu1 %v3237_v59  ;;  %v3309_v59 = vld [vmem:[%s3540_s22 + $0x524] ss:$8 sps:$4 sm:$0xff]  }
  0x75   : > { %2156 = vmatpush2.bf16.msra.mxu0 %v3232_v60  ;;  %v3304_v60 = vld [vmem:[%s3540_s22 + $0x420] ss:$8 sps:$4 sm:$0xff]  }
  0x76   : > { %2209 = vmatpush2.bf16.msra.mxu1 %v3235_v61  ;;  %2157 = vmatprep.subr.bf16.mxu0 %v3240_v62  ;;  %v3307_v61 = vld [vmem:[%s3540_s22 + $0x520] ss:$8 sps:$4 sm:$0xff]   ;;  %v3312_v62 = vld [vmem:[%s3540_s22 + $0x414] ss:$8 sps:$4 sm:$0xff]  }
  0x77   : > { %2210 = vmatprep.subr.bf16.mxu1 %v3243_v63  ;;  %v3315_v63 = vld [vmem:[%s3540_s22 + $0x514] ss:$8 sps:$4 sm:$0xff]  }
  0x79   : > { %2158 = vmatpush2.bf16.msra.mxu0 %v3238_v0  ;;  %v3310_v0 = vld [vmem:[%s3540_s22 + $0x410] ss:$8 sps:$4 sm:$0xff]  }
  0x7a   : > { %2211 = vmatpush2.bf16.msra.mxu1 %v3241_v1  ;;  %2159 = vmatprep.subr.bf16.mxu0 %v3246_v2  ;;  %v3313_v1 = vld [vmem:[%s3540_s22 + $0x510] ss:$8 sps:$4 sm:$0xff]   ;;  %v3318_v2 = vld [vmem:[%s3540_s22 + $0x404] ss:$8 sps:$4 sm:$0xff]  }
  0x7b   : > { %2212 = vmatprep.subr.bf16.mxu1 %v3249_v3  ;;  %v3321_v3 = vld [vmem:[%s3540_s22 + $0x504] ss:$8 sps:$4 sm:$0xff]  }
  0x7d   : > { %2160 = vmatpush2.bf16.msra.mxu0 %v3244_v4  ;;  %v3316_v4 = vld [vmem:[%s3540_s22 + $0x400] ss:$8 sps:$4 sm:$0xff]  }
  0x7e   : > { %2213 = vmatpush2.bf16.msra.mxu1 %v3247_v5  ;;  %2161 = vmatprep.subr.bf16.mxu0 %v3252_v6  ;;  %v3319_v5 = vld [vmem:[%s3540_s22 + $0x500] ss:$8 sps:$4 sm:$0xff]   ;;  %v3324_v6 = vld [vmem:[%s3540_s22 + $0x4f4] ss:$8 sps:$4 sm:$0xff]  }
  0x7f   : > { %2214 = vmatprep.subr.bf16.mxu1 %v3255_v7  ;;  %v3327_v7 = vld [vmem:[%s3540_s22 + $0x5f4] ss:$8 sps:$4 sm:$0xff]  }
  0x81   : > { %2162 = vmatpush2.bf16.msra.mxu0 %v3250_v8  ;;  %v3322_v8 = vld [vmem:[%s3540_s22 + $0x4f0] ss:$8 sps:$4 sm:$0xff]  }
  0x82   : > { %2215 = vmatpush2.bf16.msra.mxu1 %v3253_v9  ;;  %2163 = vmatprep.subr.bf16.mxu0 %v3258_v10  ;;  %v3325_v9 = vld [vmem:[%s3540_s22 + $0x5f0] ss:$8 sps:$4 sm:$0xff]   ;;  %v3330_v10 = vld [vmem:[%s3540_s22 + $0x4e4] ss:$8 sps:$4 sm:$0xff]  }
  0x83   : > { %2216 = vmatprep.subr.bf16.mxu1 %v3261_v11  ;;  %v3333_v11 = vld [vmem:[%s3540_s22 + $0x5e4] ss:$8 sps:$4 sm:$0xff]  }
  0x85   : > { %2164 = vmatpush2.bf16.msra.mxu0 %v3256_v12  ;;  %v3328_v12 = vld [vmem:[%s3540_s22 + $0x4e0] ss:$8 sps:$4 sm:$0xff]  }
  0x86   : > { %2217 = vmatpush2.bf16.msra.mxu1 %v3259_v13  ;;  %2165 = vmatprep.subr.bf16.mxu0 %v3264_v14  ;;  %v3331_v13 = vld [vmem:[%s3540_s22 + $0x5e0] ss:$8 sps:$4 sm:$0xff]   ;;  %v3336_v14 = vld [vmem:[%s3540_s22 + $0x4d4] ss:$8 sps:$4 sm:$0xff]  }
  0x87   : > { %2218 = vmatprep.subr.bf16.mxu1 %v3267_v15  ;;  %v3339_v15 = vld [vmem:[%s3540_s22 + $0x5d4] ss:$8 sps:$4 sm:$0xff]  }
  0x89   : > { %2166 = vmatpush2.bf16.msra.mxu0 %v3262_v16  ;;  %v3334_v16 = vld [vmem:[%s3540_s22 + $0x4d0] ss:$8 sps:$4 sm:$0xff]  }
  0x8a   : > { %2219 = vmatpush2.bf16.msra.mxu1 %v3265_v17  ;;  %2167 = vmatprep.subr.bf16.mxu0 %v3270_v18  ;;  %v3337_v17 = vld [vmem:[%s3540_s22 + $0x5d0] ss:$8 sps:$4 sm:$0xff]   ;;  %v3342_v18 = vld [vmem:[%s3540_s22 + $0x4c4] ss:$8 sps:$4 sm:$0xff]  }
  0x8b   : > { %2220 = vmatprep.subr.bf16.mxu1 %v3273_v19  ;;  %v3345_v19 = vld [vmem:[%s3540_s22 + $0x5c4] ss:$8 sps:$4 sm:$0xff]  }
  0x8d   : > { %2168 = vmatpush2.bf16.msra.mxu0 %v3268_v20  ;;  %v3340_v20 = vld [vmem:[%s3540_s22 + $0x4c0] ss:$8 sps:$4 sm:$0xff]  }
  0x8e   : > { %2221 = vmatpush2.bf16.msra.mxu1 %v3271_v21  ;;  %2243 = vmatprep.subr.bf16.mxu0 %v3276_v22  ;;  %v3343_v21 = vld [vmem:[%s3540_s22 + $0x5c0] ss:$8 sps:$4 sm:$0xff]   ;;  %v3348_v22 = vld [vmem:[%s3540_s22 + $0x4b4] ss:$8 sps:$4 sm:$0xff]  }
  0x8f   : > { %2296 = vmatprep.subr.bf16.mxu1 %v3279_v23  ;;  %v3351_v23 = vld [vmem:[%s3540_s22 + $0x5b4] ss:$8 sps:$4 sm:$0xff]  }
  0x90   : > { %2170 = vmatmul.mubr.bf16.vlgmr.msra.gmra.mxu0 %v2768_v28  ;;  %v3352_v28 = vld [vmem:[%s3540_s22 + $0x4a0] ss:$8 sps:$4 sm:$0xff]  }
  0x91   : > { %2223 = vmatmul.mubr.bf16.vlgmr.msra.gmra.mxu1 %v2770_v29  ;;  %2244 = vmatpush1.bf16.msra.mxu0 %v3274_v24  ;;  %v3346_v24 = vld [vmem:[%s3540_s22 + $0x4b0] ss:$8 sps:$4 sm:$0xff]   ;;  %v3355_v29 = vld [vmem:[%s3540_s22 + $0x5a0] ss:$8 sps:$4 sm:$0xff]  }
  0x92   : > { %2297 = vmatpush1.bf16.msra.mxu1 %v3277_v25  ;;  %2245 = vmatprep.subr.bf16.mxu0 %v3282_v32  ;;  %v3349_v25 = vld [vmem:[%s3540_s22 + $0x5b0] ss:$8 sps:$4 sm:$0xff]  }
  0x93   : > { %2298 = vmatprep.subr.bf16.mxu1 %v3285_v33  ;;  %2179 = vmatprep.mubr.bf16.mxu0 %v2785_v34  ;;  %v3358_v32 = vld [vmem:[%s3540_s22 + $0x490] ss:$8 sps:$4 sm:$0xff]   ;;  %v3366_v34 = vld [vmem:[%s3540_s22 + $0x484] ss:$8 sps:$4 sm:$0xff]  }
  0x94   : > { %2232 = vmatprep.mubr.bf16.mxu1 %v2787_v35  ;;  %v3361_v33 = vld [vmem:[%s3540_s22 + $0x590] ss:$8 sps:$4 sm:$0xff]   ;;  %v3369_v35 = vld [vmem:[%s3540_s22 + $0x584] ss:$8 sps:$4 sm:$0xff]  }
  0x95   : > { %2246 = vmatpush1.bf16.msra.mxu0 %v3280_v36  ;;  %v3364_v36 = vld [vmem:[%s3540_s22 + $0x480] ss:$8 sps:$4 sm:$0xff]  }
  0x96   : > { %2299 = vmatpush1.bf16.msra.mxu1 %v3283_v37  ;;  %2247 = vmatprep.subr.bf16.mxu0 %v3288_v38  ;;  %v3367_v37 = vld [vmem:[%s3540_s22 + $0x580] ss:$8 sps:$4 sm:$0xff]   ;;  %v3372_v38 = vld [vmem:[%s3540_s22 + $0x674] ss:$8 sps:$4 sm:$0xff]  }
  0x97   : > { %2300 = vmatprep.subr.bf16.mxu1 %v3291_v39  ;;  %v3375_v39 = vld [vmem:[%s3540_s22 + $0x774] ss:$8 sps:$4 sm:$0xff]  }
  0x98   : > { %2180 = vmatmul.mubr.bf16.gmra.mxu0 %v2784_v44  ;;  %v2774_v44 = vcombine.low %v3727_v46, %v3730_v47  ;;  %v3376_v46 = vld [vmem:[%s3540_s22 + $0x660] ss:$8 sps:$4 sm:$0xff]  }
  0x99   : > { %2233 = vmatmul.mubr.bf16.gmra.mxu1 %v2786_v45  ;;  %2248 = vmatpush1.bf16.msra.mxu0 %v3286_v40  ;;  %v323_v40 = vld [vmem:[%s3590_s26 + $0xa0] sm:$0xff] }
  0x9a   : > { %2301 = vmatpush1.bf16.msra.mxu1 %v3289_v41  ;;  %2249 = vmatprep.subr.bf16.mxu0 %v3294_v48  ;;  %v2772_v41 = vcombine.low %v3721_v42, %v3724_v43  ;;  %v331_v45 = vld [vmem:[%s3590_s26 + $0xe0] sm:$0xff]  ;;  %v324_v48 = vld [vmem:[%s3590_s26 + $0xa8] sm:$0xff] }
  0x9b   : > { %2302 = vmatprep.subr.bf16.mxu1 %v3297_v49  ;;  %2275 = vmatprep.mubr.bf16.mxu0 %v2773_v50  ;;  %v332_v49 = vld [vmem:[%s3590_s26 + $0xe8] sm:$0xff]  ;;  %v3370_v50 = vld [vmem:[%s3540_s22 + $0x670] ss:$8 sps:$4 sm:$0xff]   ;;  %v2789_v42 = vcombine.high %v323_v40, %v331_v45 }
  0x9c   : > { %2328 = vmatprep.mubr.bf16.mxu1 %v2775_v51  ;;  %v3373_v51 = vld [vmem:[%s3540_s22 + $0x770] ss:$8 sps:$4 sm:$0xff]   ;;  %v2791_v43 = vcombine.high %v324_v48, %v332_v49  ;;  %v3379_v47 = vld [vmem:[%s3540_s22 + $0x760] ss:$8 sps:$4 sm:$0xff]  }
  0x9d   : > { %2250 = vmatpush1.bf16.msra.mxu0 %v3292_v52  ;;  %v3378_v52 = vld [vmem:[%s3540_s22 + $0x664] ss:$8 sps:$4 sm:$0xff]  }
  0x9e   : > { %2303 = vmatpush1.bf16.msra.mxu1 %v3295_v53  ;;  %2251 = vmatprep.subr.bf16.mxu0 %v3300_v54  ;;  %v3381_v53 = vld [vmem:[%s3540_s22 + $0x764] ss:$8 sps:$4 sm:$0xff]   ;;  %v3384_v54 = vld [vmem:[%s3540_s22 + $0x654] ss:$8 sps:$4 sm:$0xff]  }
  0x9f   : > { %2304 = vmatprep.subr.bf16.mxu1 %v3303_v55  ;;  %v3387_v55 = vld [vmem:[%s3540_s22 + $0x754] ss:$8 sps:$4 sm:$0xff]  }
  0xa1   : > { %2252 = vmatpush1.bf16.msra.mxu0 %v3298_v56  ;;  %v3807_v56 = vld [vmem:[%s3590_s26 + $0x30] sm:$0xff] }
  0xa2   : > { %2305 = vmatpush1.bf16.msra.mxu1 %v3301_v57  ;;  %2253 = vmatprep.subr.bf16.mxu0 %v3306_v58  ;;  %v2788_v57 = vcombine.low %v323_v40, %v331_v45  ;;  %v2790_v58 = vcombine.low %v324_v48, %v332_v49  ;;  %v3442_v40 = vld [vmem:[%s3540_s22 + $0x6b0] ss:$8 sps:$4 sm:$0xff]   ;;  %v3453_v45 = vld [vmem:[%s3540_s22 + $0x7a4] ss:$8 sps:$4 sm:$0xff]   ;;  %v3448_v48 = vld [vmem:[%s3540_s22 + $0x6a0] ss:$8 sps:$4 sm:$0xff]  }
  0xa3   : > { %2306 = vmatprep.subr.bf16.mxu1 %v3309_v59  ;;  %v3810_v59 = vld [vmem:[%s3590_s26 + $0x70] sm:$0xff]  ;;  %v3451_v49 = vld [vmem:[%s3540_s22 + $0x7a0] ss:$8 sps:$4 sm:$0xff]  }
  0xa5   : > { %2254 = vmatpush1.bf16.msra.mxu0 %v3304_v60  ;;  %v3813_v60 = vld [vmem:[%s3590_s26 + $0x38] sm:$0xff] }
  0xa6   : > { %2307 = vmatpush1.bf16.msra.mxu1 %v3307_v61  ;;  %2255 = vmatprep.subr.bf16.mxu0 %v3312_v62  ;;  %v3816_v61 = vld [vmem:[%s3590_s26 + $0x78] sm:$0xff] }
  0xa7   : > { %2308 = vmatprep.subr.bf16.mxu1 %v3315_v63  ;;  %v3382_v62 = vld [vmem:[%s3540_s22 + $0x650] ss:$8 sps:$4 sm:$0xff]  }
  0xa8   : > { %v3385_v63 = vld [vmem:[%s3540_s22 + $0x750] ss:$8 sps:$4 sm:$0xff]  }
  0xa9   : > { %2256 = vmatpush1.bf16.msra.mxu0 %v3310_v0  ;;  %v3390_v0 = vld [vmem:[%s3540_s22 + $0x644] ss:$8 sps:$4 sm:$0xff]  }
  0xaa   : > { %2309 = vmatpush1.bf16.msra.mxu1 %v3313_v1  ;;  %2257 = vmatprep.subr.bf16.mxu0 %v3318_v2  ;;  %v3393_v1 = vld [vmem:[%s3540_s22 + $0x744] ss:$8 sps:$4 sm:$0xff]   ;;  %v2777_v2 = vcombine.high %v3807_v56, %v3810_v59 }
  0xab   : > { %2310 = vmatprep.subr.bf16.mxu1 %v3321_v3  ;;  %v2779_v3 = vcombine.high %v3813_v60, %v3816_v61 }
  0xad   : > { %2258 = vmatpush1.bf16.msra.mxu0 %v3316_v4  ;;  %v3388_v4 = vld [vmem:[%s3540_s22 + $0x640] ss:$8 sps:$4 sm:$0xff]  }
  0xae   : > { %2311 = vmatpush1.bf16.msra.mxu1 %v3319_v5  ;;  %2259 = vmatprep.subr.bf16.mxu0 %v3324_v6  ;;  %v3391_v5 = vld [vmem:[%s3540_s22 + $0x740] ss:$8 sps:$4 sm:$0xff]   ;;  %v3396_v6 = vld [vmem:[%s3540_s22 + $0x634] ss:$8 sps:$4 sm:$0xff]  }
  0xaf   : > { %2312 = vmatprep.subr.bf16.mxu1 %v3327_v7  ;;  %v3399_v7 = vld [vmem:[%s3540_s22 + $0x734] ss:$8 sps:$4 sm:$0xff]  }
  0xb1   : > { %2260 = vmatpush2.bf16.msra.mxu0 %v3322_v8  ;;  %v3394_v8 = vld [vmem:[%s3540_s22 + $0x630] ss:$8 sps:$4 sm:$0xff]  }
  0xb2   : > { %2313 = vmatpush2.bf16.msra.mxu1 %v3325_v9  ;;  %2261 = vmatprep.subr.bf16.mxu0 %v3330_v10  ;;  %v3397_v9 = vld [vmem:[%s3540_s22 + $0x730] ss:$8 sps:$4 sm:$0xff]   ;;  %v3402_v10 = vld [vmem:[%s3540_s22 + $0x624] ss:$8 sps:$4 sm:$0xff]  }
  0xb3   : > { %2314 = vmatprep.subr.bf16.mxu1 %v3333_v11  ;;  %v3405_v11 = vld [vmem:[%s3540_s22 + $0x724] ss:$8 sps:$4 sm:$0xff]  }
  0xb5   : > { %2262 = vmatpush2.bf16.msra.mxu0 %v3328_v12  ;;  %v3400_v12 = vld [vmem:[%s3540_s22 + $0x620] ss:$8 sps:$4 sm:$0xff]  }
  0xb6   : > { %2315 = vmatpush2.bf16.msra.mxu1 %v3331_v13  ;;  %2263 = vmatprep.subr.bf16.mxu0 %v3336_v14  ;;  %v3403_v13 = vld [vmem:[%s3540_s22 + $0x720] ss:$8 sps:$4 sm:$0xff]   ;;  %v3408_v14 = vld [vmem:[%s3540_s22 + $0x614] ss:$8 sps:$4 sm:$0xff]  }
  0xb7   : > { %2316 = vmatprep.subr.bf16.mxu1 %v3339_v15  ;;  %v3411_v15 = vld [vmem:[%s3540_s22 + $0x714] ss:$8 sps:$4 sm:$0xff]  }
  0xb9   : > { %2264 = vmatpush2.bf16.msra.mxu0 %v3334_v16  ;;  %v3406_v16 = vld [vmem:[%s3540_s22 + $0x610] ss:$8 sps:$4 sm:$0xff]  }
  0xba   : > { %2317 = vmatpush2.bf16.msra.mxu1 %v3337_v17  ;;  %2265 = vmatprep.subr.bf16.mxu0 %v3342_v18  ;;  %v3409_v17 = vld [vmem:[%s3540_s22 + $0x710] ss:$8 sps:$4 sm:$0xff]   ;;  %v3414_v18 = vld [vmem:[%s3540_s22 + $0x604] ss:$8 sps:$4 sm:$0xff]  }
  0xbb   : > { %2318 = vmatprep.subr.bf16.mxu1 %v3345_v19  ;;  %v3417_v19 = vld [vmem:[%s3540_s22 + $0x704] ss:$8 sps:$4 sm:$0xff]  }
  0xbd   : > { %2266 = vmatpush2.bf16.msra.mxu0 %v3340_v20  ;;  %v3412_v20 = vld [vmem:[%s3540_s22 + $0x600] ss:$8 sps:$4 sm:$0xff]  }
  0xbe   : > { %2319 = vmatpush2.bf16.msra.mxu1 %v3343_v21  ;;  %2267 = vmatprep.subr.bf16.mxu0 %v3348_v22  ;;  %v3415_v21 = vld [vmem:[%s3540_s22 + $0x700] ss:$8 sps:$4 sm:$0xff]   ;;  %v3420_v22 = vld [vmem:[%s3540_s22 + $0x6f4] ss:$8 sps:$4 sm:$0xff]  }
  0xbf   : > { %2320 = vmatprep.subr.bf16.mxu1 %v3351_v23  ;;  %v3423_v23 = vld [vmem:[%s3540_s22 + $0x7f4] ss:$8 sps:$4 sm:$0xff]  }
  0xc1   : > { %2268 = vmatpush2.bf16.msra.mxu0 %v3346_v24  ;;  %v3418_v24 = vld [vmem:[%s3540_s22 + $0x6f0] ss:$8 sps:$4 sm:$0xff]  }
  0xc2   : > { %2321 = vmatpush2.bf16.msra.mxu1 %v3349_v25  ;;  %2269 = vmatprep.subr.bf16.mxu0 %v3354_v26  ;;  %v3421_v25 = vld [vmem:[%s3540_s22 + $0x7f0] ss:$8 sps:$4 sm:$0xff]   ;;  %v3426_v26 = vld [vmem:[%s3540_s22 + $0x6e4] ss:$8 sps:$4 sm:$0xff]  }
  0xc3   : > { %2322 = vmatprep.subr.bf16.mxu1 %v3357_v27  ;;  %v3429_v27 = vld [vmem:[%s3540_s22 + $0x7e4] ss:$8 sps:$4 sm:$0xff]  }
  0xc5   : > { %2270 = vmatpush2.bf16.msra.mxu0 %v3352_v28  ;;  %v3424_v28 = vld [vmem:[%s3540_s22 + $0x6e0] ss:$8 sps:$4 sm:$0xff]  }
  0xc6   : > { %2323 = vmatpush2.bf16.msra.mxu1 %v3355_v29  ;;  %2271 = vmatprep.subr.bf16.mxu0 %v3360_v30  ;;  %v3427_v29 = vld [vmem:[%s3540_s22 + $0x7e0] ss:$8 sps:$4 sm:$0xff]   ;;  %v3432_v30 = vld [vmem:[%s3540_s22 + $0x6d4] ss:$8 sps:$4 sm:$0xff]  }
  0xc7   : > { %2324 = vmatprep.subr.bf16.mxu1 %v3363_v31  ;;  %v3435_v31 = vld [vmem:[%s3540_s22 + $0x7d4] ss:$8 sps:$4 sm:$0xff]  }
  0xc9   : > { %2272 = vmatpush2.bf16.msra.mxu0 %v3358_v32  ;;  %v3430_v32 = vld [vmem:[%s3540_s22 + $0x6d0] ss:$8 sps:$4 sm:$0xff]  }
  0xca   : > { %2325 = vmatpush2.bf16.msra.mxu1 %v3361_v33  ;;  %2273 = vmatprep.subr.bf16.mxu0 %v3366_v34  ;;  %v3433_v33 = vld [vmem:[%s3540_s22 + $0x7d0] ss:$8 sps:$4 sm:$0xff]   ;;  %v3438_v34 = vld [vmem:[%s3540_s22 + $0x6c4] ss:$8 sps:$4 sm:$0xff]  }
  0xcb   : > { %2326 = vmatprep.subr.bf16.mxu1 %v3369_v35  ;;  %v3441_v35 = vld [vmem:[%s3540_s22 + $0x7c4] ss:$8 sps:$4 sm:$0xff]  }
  0xcd   : > { %2274 = vmatpush2.bf16.msra.mxu0 %v3364_v36  ;;  %v3436_v36 = vld [vmem:[%s3540_s22 + $0x6c0] ss:$8 sps:$4 sm:$0xff]  }
  0xce   : > { %2327 = vmatpush2.bf16.msra.mxu1 %v3367_v37  ;;  %2349 = vmatprep.subr.bf16.mxu0 %v3372_v38  ;;  %v3439_v37 = vld [vmem:[%s3540_s22 + $0x7c0] ss:$8 sps:$4 sm:$0xff]   ;;  %v3444_v38 = vld [vmem:[%s3540_s22 + $0x6b4] ss:$8 sps:$4 sm:$0xff]  }
  0xcf   : > { %2402 = vmatprep.subr.bf16.mxu1 %v3375_v39  ;;  %v3447_v39 = vld [vmem:[%s3540_s22 + $0x7b4] ss:$8 sps:$4 sm:$0xff]  }
  0xd0   : > { %2276 = vmatmul.mubr.bf16.vlgmr.msra.gmra.mxu0 %v2772_v41  ;;  %v3445_v41 = vld [vmem:[%s3540_s22 + $0x7b0] ss:$8 sps:$4 sm:$0xff]  }
  0xd1   : > { %2329 = vmatmul.mubr.bf16.vlgmr.msra.gmra.mxu1 %v2774_v44  ;;  %2350 = vmatpush1.bf16.msra.mxu0 %v3370_v50  ;;  %v3450_v44 = vld [vmem:[%s3540_s22 + $0x6a4] ss:$8 sps:$4 sm:$0xff]   ;;  %v3456_v50 = vld [vmem:[%s3540_s22 + $0x694] ss:$8 sps:$4 sm:$0xff]  }
  0xd2   : > { %2403 = vmatpush1.bf16.msra.mxu1 %v3373_v51  ;;  %2351 = vmatprep.subr.bf16.mxu0 %v3378_v52  ;;  %v3459_v51 = vld [vmem:[%s3540_s22 + $0x794] ss:$8 sps:$4 sm:$0xff]   ;;  %v3454_v52 = vld [vmem:[%s3540_s22 + $0x690] ss:$8 sps:$4 sm:$0xff]  }
  0xd3   : > { %2404 = vmatprep.subr.bf16.mxu1 %v3381_v53  ;;  %2285 = vmatprep.mubr.bf16.mxu0 %v2789_v42  ;;  %v3457_v53 = vld [vmem:[%s3540_s22 + $0x790] ss:$8 sps:$4 sm:$0xff]   ;;  %v3462_v42 = vld [vmem:[%s3540_s22 + $0x684] ss:$8 sps:$4 sm:$0xff]  }
  0xd4   : > { %2338 = vmatprep.mubr.bf16.mxu1 %v2791_v43  ;;  %v3465_v43 = vld [vmem:[%s3540_s22 + $0x784] ss:$8 sps:$4 sm:$0xff]  }
  0xd5   : > { %2352 = vmatpush1.bf16.msra.mxu0 %v3376_v46  ;;  %v3460_v46 = vld [vmem:[%s3540_s22 + $0x680] ss:$8 sps:$4 sm:$0xff]  }
  0xd6   : > { %2405 = vmatpush1.bf16.msra.mxu1 %v3379_v47  ;;  %2353 = vmatprep.subr.bf16.mxu0 %v3384_v54  ;;  %v3463_v47 = vld [vmem:[%s3540_s22 + $0x780] ss:$8 sps:$4 sm:$0xff]   ;;  %v325_v54 = vld [vmem:[%s3590_s26 + $0xb0] sm:$0xff] }
  0xd7   : > { %2406 = vmatprep.subr.bf16.mxu1 %v3387_v55  ;;  %v333_v55 = vld [vmem:[%s3590_s26 + $0xf0] sm:$0xff] }
  0xd8   : > { %2286 = vmatmul.mubr.bf16.gmra.mxu0 %v2788_v57  ;;  %v326_v57 = vld [vmem:[%s3590_s26 + $0xb8] sm:$0xff] }
  0xd9   : > { %2339 = vmatmul.mubr.bf16.gmra.mxu1 %v2790_v58  ;;  %2354 = vmatpush1.bf16.msra.mxu0 %v3382_v62  ;;  %v334_v58 = vld [vmem:[%s3590_s26 + $0xf8] sm:$0xff]  ;;  %v2776_v62 = vcombine.low %v3807_v56, %v3810_v59 }
  0xda   : > { %2407 = vmatpush1.bf16.msra.mxu1 %v3385_v63  ;;  %2355 = vmatprep.subr.bf16.mxu0 %v3390_v0  ;;  %v2778_v63 = vcombine.low %v3813_v60, %v3816_v61  ;;  %v2793_v0 = vcombine.high %v325_v54, %v333_v55 }
  0xdb   : > { %2408 = vmatprep.subr.bf16.mxu1 %v3393_v1  ;;  %2381 = vmatprep.mubr.bf16.mxu0 %v2777_v2  ;;  %v2795_v1 = vcombine.high %v326_v57, %v334_v58  ;;  %v2792_v2 = vcombine.low %v325_v54, %v333_v55 }
  0xdc   : > { %2434 = vmatprep.mubr.bf16.mxu1 %v2779_v3  ;;  %v2794_v3 = vcombine.low %v326_v57, %v334_v58 }
  0xdd   : > { %2356 = vmatpush1.bf16.msra.mxu0 %v3388_v4 }
  0xde   : > { %2409 = vmatpush1.bf16.msra.mxu1 %v3391_v5  ;;  %2357 = vmatprep.subr.bf16.mxu0 %v3396_v6 }
  0xdf   : > { %2410 = vmatprep.subr.bf16.mxu1 %v3399_v7 }
  0xe1   : > { %2358 = vmatpush1.bf16.msra.mxu0 %v3394_v8 }
  0xe2   : > { %2411 = vmatpush1.bf16.msra.mxu1 %v3397_v9  ;;  %2359 = vmatprep.subr.bf16.mxu0 %v3402_v10 }
  0xe3   : > { %2412 = vmatprep.subr.bf16.mxu1 %v3405_v11 }
  0xe5   : > { %2360 = vmatpush1.bf16.msra.mxu0 %v3400_v12 }
  0xe6   : > { %2413 = vmatpush1.bf16.msra.mxu1 %v3403_v13  ;;  %2361 = vmatprep.subr.bf16.mxu0 %v3408_v14 }
  0xe7   : > { %2414 = vmatprep.subr.bf16.mxu1 %v3411_v15 }
  0xe9   : > { %2362 = vmatpush1.bf16.msra.mxu0 %v3406_v16 }
  0xea   : > { %2415 = vmatpush1.bf16.msra.mxu1 %v3409_v17  ;;  %2363 = vmatprep.subr.bf16.mxu0 %v3414_v18 }
  0xeb   : > { %2416 = vmatprep.subr.bf16.mxu1 %v3417_v19 }
  0xed   : > { %2364 = vmatpush1.bf16.msra.mxu0 %v3412_v20 }
  0xee   : > { %2417 = vmatpush1.bf16.msra.mxu1 %v3415_v21  ;;  %2365 = vmatprep.subr.bf16.mxu0 %v3420_v22 }
  0xef   : > { %2418 = vmatprep.subr.bf16.mxu1 %v3423_v23 }
  0xf1   : > { %2366 = vmatpush2.bf16.msra.mxu0 %v3418_v24 }
  0xf2   : > { %2419 = vmatpush2.bf16.msra.mxu1 %v3421_v25  ;;  %2367 = vmatprep.subr.bf16.mxu0 %v3426_v26 }
  0xf3   : > { %2420 = vmatprep.subr.bf16.mxu1 %v3429_v27 }
  0xf5   : > { %2368 = vmatpush2.bf16.msra.mxu0 %v3424_v28 }
  0xf6   : > { %2421 = vmatpush2.bf16.msra.mxu1 %v3427_v29  ;;  %2369 = vmatprep.subr.bf16.mxu0 %v3432_v30 }
  0xf7   : > { %2422 = vmatprep.subr.bf16.mxu1 %v3435_v31 }
  0xf9   : > { %2370 = vmatpush2.bf16.msra.mxu0 %v3430_v32 }
  0xfa   : > { %2423 = vmatpush2.bf16.msra.mxu1 %v3433_v33  ;;  %2371 = vmatprep.subr.bf16.mxu0 %v3438_v34 }
  0xfb   : > { %2424 = vmatprep.subr.bf16.mxu1 %v3441_v35 }
  0xfd   : > { %2372 = vmatpush2.bf16.msra.mxu0 %v3436_v36 }
  0xfe   : > { %2425 = vmatpush2.bf16.msra.mxu1 %v3439_v37  ;;  %2373 = vmatprep.subr.bf16.mxu0 %v3444_v38 }
  0xff   : > { %2426 = vmatprep.subr.bf16.mxu1 %v3447_v39 }
 0x101   : > { %2374 = vmatpush2.bf16.msra.mxu0 %v3442_v40 }
 0x102   : > { %2427 = vmatpush2.bf16.msra.mxu1 %v3445_v41  ;;  %2375 = vmatprep.subr.bf16.mxu0 %v3450_v44 }
 0x103   : > { %2428 = vmatprep.subr.bf16.mxu1 %v3453_v45 }
 0x105   : > { %2376 = vmatpush2.bf16.msra.mxu0 %v3448_v48 }
 0x106   : > { %2429 = vmatpush2.bf16.msra.mxu1 %v3451_v49  ;;  %2377 = vmatprep.subr.bf16.mxu0 %v3456_v50 }
 0x107   : > { %2430 = vmatprep.subr.bf16.mxu1 %v3459_v51 }
 0x109   : > { %2378 = vmatpush2.bf16.msra.mxu0 %v3454_v52 }
 0x10a   : > { %2431 = vmatpush2.bf16.msra.mxu1 %v3457_v53  ;;  %2379 = vmatprep.subr.bf16.mxu0 %v3462_v42 }
 0x10b   : > { %2432 = vmatprep.subr.bf16.mxu1 %v3465_v43 }
 0x10d   : > { %2380 = vmatpush2.bf16.msra.mxu0 %v3460_v46 }
 0x10e   : > { %2433 = vmatpush2.bf16.msra.mxu1 %v3463_v47 }
 0x110   : > { %2382 = vmatmul.mubr.bf16.vlgmr.msra.gmra.mxu0 %v2776_v62  ;;  %v2065_v4 = vpop.f32.mrf.mxu0 }
 0x111   : > { %2435 = vmatmul.mubr.bf16.vlgmr.msra.gmra.mxu1 %v2778_v63  ;;  %2391 = vmatprep.mubr.bf16.mxu0 %v2793_v0  ;;  %v2118_v5 = vpop.f32.mrf.mxu1 }
 0x112   : > { %2444 = vmatprep.mubr.bf16.mxu1 %v2795_v1  ;;  %v2067_v6 = vpop.f32.mrf.mxu0  ;;  %v2119_v44 = vadd.f32 %v2118_v5, %v2065_v4 }
 0x113   : > { %v2120_v7 = vpop.f32.mrf.mxu1 }
 0x114   : > { %v2069_v56 = vpop.f32.mrf.mxu0  ;;  %v2121_v45 = vadd.f32 %v2120_v7, %v2067_v6 }
 0x115   : > { %v2122_v59 = vpop.f32.mrf.mxu1 }
 0x116   : > { %v2071_v8 = vpop.f32.mrf.mxu0  ;;  %v2123_v51 = vadd.f32 %v2122_v59, %v2069_v56 }
 0x117   : > { %v2124_v61 = vpop.f32.mrf.mxu1 }
 0x118   : > { %2392 = vmatmul.mubr.bf16.gmra.mxu0 %v2792_v2  ;;  %v2075_v60 = vpop.f32.mrf.mxu0  ;;  %v2125_v53 = vadd.f32 %v2124_v61, %v2071_v8 }
 0x119   : > { %2445 = vmatmul.mubr.bf16.gmra.mxu1 %v2794_v3  ;;  %v2128_v9 = vpop.f32.mrf.mxu1 }
 0x11a   : > { %v2077_v10 = vpop.f32.mrf.mxu0  ;;  %v2129_v46 = vadd.f32 %v2128_v9, %v2075_v60 }
 0x11b   : > { %v2130_v11 = vpop.f32.mrf.mxu1 }
 0x11c   : > { %v2079_v12 = vpop.f32.mrf.mxu0  ;;  %v2131_v1 = vadd.f32 %v2130_v11, %v2077_v10 }
 0x11d   : > { %v2132_v13 = vpop.f32.mrf.mxu1 }
 0x11e   : > { %v2081_v14 = vpop.f32.mrf.mxu0  ;;  %v2133_v4 = vadd.f32 %v2132_v13, %v2079_v12 }
 0x11f   : > { %v2134_v16 = vpop.f32.mrf.mxu1 }
 0x120   : > { %v2135_v56 = vadd.f32 %v2134_v16, %v2081_v14 }
 0x150   : > { %v2171_v15 = vpop.f32.mrf.mxu0 }
 0x151   : > { %v2224_v17 = vpop.f32.mrf.mxu1  ;;  %v2172_v48 = vadd.f32 %v2171_v15, %v2119_v44 }
 0x152   : > { %v2173_v18 = vpop.f32.mrf.mxu0 }
 0x153   : > { %v2226_v19 = vpop.f32.mrf.mxu1  ;;  %v2174_v52 = vadd.f32 %v2173_v18, %v2121_v45  ;;  %v2225_v42 = vadd.f32 %v2224_v17, %v2172_v48 }
 0x154   : > { %v2175_v20 = vpop.f32.mrf.mxu0 }
 0x155   : > { %v2228_v21 = vpop.f32.mrf.mxu1  ;;  %v2176_v43 = vadd.f32 %v2175_v20, %v2123_v51  ;;  %v2227_v55 = vadd.f32 %v2226_v19, %v2174_v52 }
 0x156   : > { %v2177_v22 = vpop.f32.mrf.mxu0 }
 0x157   : > { %v2230_v23 = vpop.f32.mrf.mxu1  ;;  %v2178_v57 = vadd.f32 %v2177_v22, %v2125_v53  ;;  %v2229_v63 = vadd.f32 %v2228_v21, %v2176_v43 }
 0x158   : > { %v2181_v24 = vpop.f32.mrf.mxu0 }
 0x159   : > { %v2234_v25 = vpop.f32.mrf.mxu1  ;;  %v2182_v62 = vadd.f32 %v2181_v24, %v2129_v46  ;;  %v2231_v5 = vadd.f32 %v2230_v23, %v2178_v57 }
 0x15a   : > { %v2183_v26 = vpop.f32.mrf.mxu0 }
 0x15b   : > { %v2236_v27 = vpop.f32.mrf.mxu1  ;;  %v2184_v59 = vadd.f32 %v2183_v26, %v2131_v1  ;;  %v2235_v8 = vadd.f32 %v2234_v25, %v2182_v62 }
 0x15c   : > { %v2185_v28 = vpop.f32.mrf.mxu0 }
 0x15d   : > { %v2238_v29 = vpop.f32.mrf.mxu1  ;;  %v2186_v9 = vadd.f32 %v2185_v28, %v2133_v4  ;;  %v2237_v20 = vadd.f32 %v2236_v27, %v2184_v59 }
 0x15e   : > { %v2187_v30 = vpop.f32.mrf.mxu0 }
 0x15f   : > { %v3884_v31 = vpop.f32.mrf.mxu1  ;;  %v2188_v19 = vadd.f32 %v2187_v30, %v2135_v56  ;;  %v2239_v23 = vadd.f32 %v2238_v29, %v2186_v9 }
 0x161   : > { %v2241_v28 = vadd.f32 %v3884_v31, %v2188_v19 }
 0x190   : > { %v2277_v32 = vpop.f32.mrf.mxu0 }
 0x191   : > { %v2330_v33 = vpop.f32.mrf.mxu1  ;;  %v2278_v58 = vadd.f32 %v2277_v32, %v2225_v42 }
 0x192   : > { %v2279_v34 = vpop.f32.mrf.mxu0 }
 0x193   : > { %v2332_v35 = vpop.f32.mrf.mxu1  ;;  %v2280_v0 = vadd.f32 %v2279_v34, %v2227_v55  ;;  %v2331_v6 = vadd.f32 %v2330_v33, %v2278_v58 }
 0x194   : > { %v2281_v36 = vpop.f32.mrf.mxu0 }
 0x195   : > { %v2334_v37 = vpop.f32.mrf.mxu1  ;;  %v2282_v7 = vadd.f32 %v2281_v36, %v2229_v63  ;;  %v2333_v15 = vadd.f32 %v2332_v35, %v2280_v0 }
 0x196   : > { %v2283_v38 = vpop.f32.mrf.mxu0 }
 0x197   : > { %v2336_v39 = vpop.f32.mrf.mxu1  ;;  %v2284_v17 = vadd.f32 %v2283_v38, %v2231_v5  ;;  %v2335_v12 = vadd.f32 %v2334_v37, %v2282_v7 }
 0x198   : > { %v2287_v40 = vpop.f32.mrf.mxu0 }
 0x199   : > { %v2340_v41 = vpop.f32.mrf.mxu1  ;;  %v2288_v13 = vadd.f32 %v2287_v40, %v2235_v8  ;;  %v2337_v24 = vadd.f32 %v2336_v39, %v2284_v17 }
 0x19a   : > { %v2289_v49 = vpop.f32.mrf.mxu0 }
 0x19b   : > { %v3886_v50 = vpop.f32.mrf.mxu1  ;;  %v2290_v30 = vadd.f32 %v2289_v49, %v2237_v20  ;;  %v2341_v34 = vadd.f32 %v2340_v41, %v2288_v13 }
 0x19c   : > { %v2291_v47 = vpop.f32.mrf.mxu0 }
 0x19d   : > { %v2344_v54 = vpop.f32.mrf.mxu1  ;;  %v2292_v35 = vadd.f32 %v2291_v47, %v2239_v23  ;;  %v2343_v44 = vadd.f32 %v3886_v50, %v2290_v30 }
 0x19e   : > { %v2293_v2 = vpop.f32.mrf.mxu0 }
 0x19f   : > { %v2346_v3 = vpop.f32.mrf.mxu1  ;;  %v2294_v40 = vadd.f32 %v2293_v2, %v2241_v28  ;;  %v2345_v49 = vadd.f32 %v2344_v54, %v2292_v35 }
 0x1a1   : > { %v2347_v46 = vadd.f32 %v2346_v3, %v2294_v40 }
 0x1d0   : > { %v2383_v60 = vpop.f32.mrf.mxu0 }
 0x1d1   : > { %v2436_v61 = vpop.f32.mrf.mxu1  ;;  %v2384_v18 = vadd.f32 %v2383_v60, %v2331_v6 }
 0x1d2   : > { %v2385_v10 = vpop.f32.mrf.mxu0 }
 0x1d3   : > { %v2438_v11 = vpop.f32.mrf.mxu1  ;;  %v2437_v14 = vadd.f32 %v2436_v61, %v2384_v18  ;;  %v2386_v16 = vadd.f32 %v2385_v10, %v2333_v15 }
 0x1d4   : > { %v2387_v21 = vpop.f32.mrf.mxu0 }
 0x1d5   : > { %v2440_v22 = vpop.f32.mrf.mxu1  ;;  %2455 = vst [vmem:[%s3892_s30] sm:$0xff] %v2437_v14  ;;  %v2439_v25 = vadd.f32 %v2438_v11, %v2386_v16  ;;  %v2388_v26 = vadd.f32 %v2387_v21, %v2335_v12  ;;  %v2504_v51 = vmul.f32 %v2437_v14, %v2437_v14  ;;  %v3490_v12 = vmov 1966171168  }
 0x1d6   : > { %v2389_v32 = vpop.f32.mrf.mxu0  ;;  %v2485_v13 = vunpack.c.l.s4 %v3490_v12 }
 0x1d7   : > { %v2442_v33 = vpop.f32.mrf.mxu1  ;;  %2456 = vst [vmem:[%s3892_s30 + $0x8] sm:$0xff] %v2439_v25  ;;  %v2441_v36 = vadd.f32 %v2440_v22, %v2388_v26  ;;  %v2390_v37 = vadd.f32 %v2389_v32, %v2337_v24  ;;  %v2505_v58 = vmul.f32 %v2439_v25, %v2439_v25 }
 0x1d8   : > { %v2393_v27 = vpop.f32.mrf.mxu0  ;;  %v2486_v28 = vunpack.c.0.s8 %v2485_v13 }
 0x1d9   : > { %v2446_v38 = vpop.f32.mrf.mxu1  ;;  %2457 = vst [vmem:[%s3892_s30 + $0x10] sm:$0xff] %v2441_v36  ;;  %v2443_v29 = vadd.f32 %v2442_v33, %v2390_v37  ;;  %v2394_v39 = vadd.f32 %v2393_v27, %v2341_v34  ;;  %v2506_v45 = vmul.f32 %v2441_v36, %v2441_v36  ;;  %v2463_v47 = vadd.f32 %v2441_v36, %v2437_v14 }
 0x1da   : > { %v2395_v31 = vpop.f32.mrf.mxu0  ;;  %v2487_v14 = vlaneseq }
 0x1db   : > { %v2448_v48 = vpop.f32.mrf.mxu1  ;;  %2458 = vst [vmem:[%s3892_s30 + $0x18] sm:$0xff] %v2443_v29  ;;  %v2447_v41 = vadd.f32 %v2446_v38, %v2394_v39  ;;  %v2507_v52 = vmul.f32 %v2443_v29, %v2443_v29  ;;  %v2396_v53 = vadd.f32 %v2395_v31, %v2343_v44  ;;  %v2512_v50 = vadd.f32 %v2506_v45, %v2504_v51 }
 0x1dc   : > { %v2397_v42 = vpop.f32.mrf.mxu0  ;;  %v2472_v0 = vadd.f32 %v2443_v29, %v2439_v25  ;;  %v2488_v30 = vshrl.u32 %v2487_v14, 7  ;;  %vm2501_vm0 = vcmp.lt.s32.totalorder %v2487_v14, 256 }
 0x1dd   : > { %v2450_v43 = vpop.f32.mrf.mxu1  ;;  %2459 = vst [vmem:[%s3892_s30 + $0x20] sm:$0xff] %v2447_v41  ;;  %v2508_v55 = vmul.f32 %v2447_v41, %v2447_v41  ;;  %v2398_v57 = vadd.f32 %v2397_v42, %v2345_v49  ;;  %v2449_v62 = vadd.f32 %v2448_v48, %v2396_v53  ;;  %v2464_v54 = vadd.f32 %v2463_v47, %v2447_v41 }
 0x1de   : > { %v2399_v63 = vpop.f32.mrf.mxu0  ;;  %v2521_v4 = vadd.f32 %v2507_v52, %v2505_v58  ;;  %v2489_v29 = vsub.s32 %v2486_v28, %v2488_v30 }
 0x1df   : > { %v2451_v1 = vadd.f32 %v2450_v43, %v2398_v57  ;;  %v2400_v2 = vadd.f32 %v2399_v63, %v2347_v46  ;;  %v2513_v5 = vadd.f32 %v2512_v50, %v2508_v55  ;;  %2460 = vst [vmem:[%s3892_s30 + $0x28] sm:$0xff] %v2449_v62  ;;  %v2509_v6 = vmul.f32 %v2449_v62, %v2449_v62  ;;  %v2452_v7 = vpop.f32.mrf.mxu1 }
 0x1e0   : > { %v2473_v3 = vadd.f32 %v2472_v0, %v2449_v62 }
 0x1e1   : > { %2461 = vst [vmem:[%s3892_s30 + $0x30] sm:$0xff] %v2451_v1  ;;  %v2465_v56 = vadd.f32 %v2464_v54, %v2451_v1  ;;  %v2510_v59 = vmul.f32 %v2451_v1, %v2451_v1  ;;  %v2453_v8 = vadd.f32 %v2452_v7, %v2400_v2  ;;  %v2522_v60 = vadd.f32 %v2521_v4, %v2509_v6 }
 0x1e3   : > { %v2466_v61 = vrot.slane %v2465_v56, 4  ;;  %v2514_v9 = vadd.f32 %v2513_v5, %v2510_v59  ;;  %2462 = vst [vmem:[%s3892_s30 + $0x38] sm:$0xff] %v2453_v8  ;;  %v2474_v15 = vadd.f32 %v2473_v3, %v2453_v8  ;;  %v2511_v17 = vmul.f32 %v2453_v8, %v2453_v8 }
 0x1e5   : > { %v2467_v18 = vadd.f32 %v2466_v61, %v2465_v56  ;;  %v2515_v19 = vrot.slane %v2514_v9, 4  ;;  %v2475_v10 = vrot.slane %v2474_v15, 4  ;;  %v2523_v11 = vadd.f32 %v2522_v60, %v2511_v17 }
 0x1e7   : > { %v2468_v16 = vrot.slane %v2467_v18, 2  ;;  %v2516_v20 = vadd.f32 %v2515_v19, %v2514_v9  ;;  %v2476_v21 = vadd.f32 %v2475_v10, %v2474_v15  ;;  %v2524_v22 = vrot.slane %v2523_v11, 4 }
 0x1e9   : > { %v2469_v23 = vadd.f32 %v2468_v16, %v2467_v18  ;;  %v2517_v24 = vrot.slane %v2516_v20, 2  ;;  %v2477_v25 = vrot.slane %v2476_v21, 2  ;;  %v2525_v26 = vadd.f32 %v2524_v22, %v2523_v11 }
 0x1eb   : > { %v2470_v32 = vrot.slane %v2469_v23, 1  ;;  %v2518_v33 = vadd.f32 %v2517_v24, %v2516_v20  ;;  %v2478_v34 = vadd.f32 %v2477_v25, %v2476_v21  ;;  %v2526_v35 = vrot.slane %v2525_v26, 2 }
 0x1ed   : > { %v2519_v36 = vrot.slane %v2518_v33, 1  ;;  %v2479_v37 = vrot.slane %v2478_v34, 1  ;;  %v2527_v27 = vadd.f32 %v2526_v35, %v2525_v26  ;;  %v2471_v38 = vadd.f32 %v2470_v32, %v2469_v23 }
 0x1ef   : > { %v2480_v40 = vadd.f32 %v2479_v37, %v2478_v34  ;;  %v2528_v39 = vrot.slane %v2527_v27, 1  ;;  %v2520_v44 = vadd.f32 %v2519_v36, %v2518_v33 }
 0x1f1   : > { %v2483_v45 = vcombine.low %v2471_v38, %v2480_v40  ;;  %v2529_v31 = vadd.f32 %v2528_v39, %v2527_v27 }
 0x1f3   : > { %v2490_v48 = vrot.slane %v2483_v45, %v2489_v29  ;;  %v2532_v49 = vcombine.low %v2520_v44, %v2529_v31 }
 0x1f5   : > { %v2497_v41 = vrot.slane %v2490_v48, %v2489_v29  ;;  %v2539_v51 = vrot.slane %v2532_v49, %v2489_v29 }
 0x1f7   : > { %2503 = vst.msk [vmem:[%s294_s8] sm:$0x3] %vm2501_vm0, %v2497_v41  ;;  %v2546_v52 = vrot.slane %v2539_v51, %v2489_v29 }
 0x1f9   : > { %2548 = vst.msk [vmem:[%s302_s11] sm:$0x3] %vm2501_vm0, %v2546_v52 }
 0x1fa PF: > { %s15_s17 = sadd.s32 1, %s3488_s17   ;;  %s3925_s15 = smov %s3484_s16 }
 0x1fb   : > { %p12_p5 = scmp.ge.s32.totalorder %s15_s17, 6   ;;  %s3926_s16 = smov %s3928_s18 }
 0x1fd   :  { %14 = sbr.rel (!%p12_p5) target bundleno = 2 (0x2), region = 85 }

// kernel: generator_forward.7
= control target key start
LH: loop header
LB: loop body
LE: loop exit
PB: predicated region body
PF: predicated region fallthrough
CT: control target
= control target key end

     0   :  { %s2363_s15 = smov 0   ;;  %s2365_s16 = smov 0   ;;  %s2751_s0 = inlined_call_operand.vmem [shape: bf16[4,128,1024], index: 0, kind: input, shape index: {}]   ;;  %s2752_s1 = inlined_call_operand.vmem [shape: bf16[4,1024,128], index: 1, kind: input, shape index: {}]   ;;  %s2753_s2 = inlined_call_operand.vmem [shape: f32[4,128,128], index: 2, kind: output, shape index: {0}]   ;;  %s2754_s3 = inlined_call_operand.vmem [shape: f32[4,1,1,128], index: 3, kind: output, shape index: {1}]   ;;  %s2755_s4 = inlined_call_operand.vmem [shape: f32[4,1,1,128], index: 4, kind: output, shape index: {2}]  }
   0x1   :  { %s2367_s17 = smov 0  }
   0x2 LB: > { %s27_s18 = sadd.s32 1, %s2332_s16  ;;  %p1830_p0 = scmp.ge.s32.totalorder %s2336_s17, 1  ;;  %s2336_s17 = sphi %s2367_s17, %s15_s17   ;;  %s2332_s16 = sphi %s2365_s16, %s2781_s16   ;;  %s2328_s15 = sphi %s2363_s15, %s2780_s15  }
   0x3   : > { %p29_p1 = scmp.ge.s32.totalorder %s27_s18, 4  ;;  %p203_p2 = scmp.lt.s32.totalorder %s2336_s17, 5 }
   0x5   : > { %s2783_s18 = smov (%p29_p1, %s27_s18), 0  ;;  %p204_p3 = pnand %p1830_p0, %p203_p2 }
   0x7   : > { %207 = sbr.rel (%p204_p3) target bundleno = 393 (0x189), region = 28 }
   0xc   : > { %p256_p4 = scmp.lt.s32.totalorder %s2328_s15, 3 }
   0xe   : > { %s2785_s15 = smov (!%p256_p4, %s2328_s15), 3 }
   0xf   : > { %s1967_s19 = sshll.u32 %s2785_s15, 9  ;;  %s1969_s26 = sshll.u32 %s2785_s15, 7 }
  0x10   : > { %s2389_s22 = scalar_lea.vmem %s2752_s1, %s1967_s19  ;;  %s2426_s25 = scalar_lea.vmem %s2751_s0, %s1967_s19 }
  0x11   : > { %v2250_v0 = vld [vmem:[%s2389_s22 + $0x78] sm:$0xff]   ;;  %v2254_v4 = vld [vmem:[%s2389_s22 + $0x70] sm:$0xff]   ;;  %v2258_v8 = vld [vmem:[%s2389_s22 + $0x68] sm:$0xff]   ;;  %s2664_s29 = scalar_lea.vmem %s2753_s2, %s1969_s26  ;;  %s286_s6 = scalar_lea.vmem %s2754_s3, %s2785_s15 }
  0x12   : > { %v2251_v1 = vld [vmem:[%s2389_s22 + $0xf8] sm:$0xff]   ;;  %1970 = vmatprep.subr.bf16.mxu0 %v2250_v0  ;;  %v2255_v5 = vld [vmem:[%s2389_s22 + $0xf0] sm:$0xff]   ;;  %v2259_v9 = vld [vmem:[%s2389_s22 + $0xe8] sm:$0xff]   ;;  %s292_s9 = scalar_lea.vmem %s2755_s4, %s2785_s15 }
  0x13   : > { %v2252_v2 = vld [vmem:[%s2389_s22 + $0x38] sm:$0xff]   ;;  %2034 = vmatprep.subr.bf16.mxu1 %v2251_v1  ;;  %v2256_v6 = vld [vmem:[%s2389_s22 + $0x30] sm:$0xff]   ;;  %v2260_v10 = vld [vmem:[%s2389_s22 + $0x28] sm:$0xff]  }
  0x14   : > { %v2253_v3 = vld [vmem:[%s2389_s22 + $0xb8] sm:$0xff]   ;;  %1971 = vmatpush3.bf16.msra.mxu0 %v2252_v2  ;;  %v2257_v7 = vld [vmem:[%s2389_s22 + $0xb0] sm:$0xff]   ;;  %v2261_v11 = vld [vmem:[%s2389_s22 + $0xa8] sm:$0xff]  }
  0x15   : > { %2035 = vmatpush3.bf16.msra.mxu1 %v2253_v3  ;;  %1972 = vmatprep.subr.bf16.mxu0 %v2254_v4  ;;  %v2262_v12 = vld [vmem:[%s2389_s22 + $0x60] sm:$0xff]   ;;  %v2266_v16 = vld [vmem:[%s2389_s22 + $0x58] sm:$0xff]   ;;  %v2270_v20 = vld [vmem:[%s2389_s22 + $0x50] sm:$0xff]  }
  0x16   : > { %2036 = vmatprep.subr.bf16.mxu1 %v2255_v5  ;;  %v2263_v13 = vld [vmem:[%s2389_s22 + $0xe0] sm:$0xff]   ;;  %v2267_v17 = vld [vmem:[%s2389_s22 + $0xd8] sm:$0xff]   ;;  %v2271_v21 = vld [vmem:[%s2389_s22 + $0xd0] sm:$0xff]  }
  0x17   : > { %v2264_v14 = vld [vmem:[%s2389_s22 + $0x20] sm:$0xff]   ;;  %v2268_v18 = vld [vmem:[%s2389_s22 + $0x18] sm:$0xff]   ;;  %v2272_v22 = vld [vmem:[%s2389_s22 + $0x10] sm:$0xff]  }
  0x18   : > { %1973 = vmatpush3.bf16.msra.mxu0 %v2256_v6  ;;  %v2265_v15 = vld [vmem:[%s2389_s22 + $0xa0] sm:$0xff]   ;;  %v2269_v19 = vld [vmem:[%s2389_s22 + $0x98] sm:$0xff]   ;;  %v2273_v23 = vld [vmem:[%s2389_s22 + $0x90] sm:$0xff]  }
  0x19   : > { %2037 = vmatpush3.bf16.msra.mxu1 %v2257_v7  ;;  %1974 = vmatprep.subr.bf16.mxu0 %v2258_v8  ;;  %v2274_v24 = vld [vmem:[%s2389_s22 + $0x48] sm:$0xff]   ;;  %v2278_v28 = vld [vmem:[%s2389_s22 + $0x40] sm:$0xff]   ;;  %v2282_v40 = vld [vmem:[%s2389_s22 + $0x178] sm:$0xff]  }
  0x1a   : > { %2038 = vmatprep.subr.bf16.mxu1 %v2259_v9  ;;  %v2275_v25 = vld [vmem:[%s2389_s22 + $0xc8] sm:$0xff]   ;;  %v2279_v29 = vld [vmem:[%s2389_s22 + $0xc0] sm:$0xff]   ;;  %v2283_v41 = vld [vmem:[%s2389_s22 + $0x138] sm:$0xff]  }
  0x1b   : > { %v2276_v26 = vld [vmem:[%s2389_s22 + $0x8] sm:$0xff]   ;;  %v2280_v30 = vld [vmem:[%s2389_s22] sm:$0xff]   ;;  %v2284_v42 = vld [vmem:[%s2389_s22 + $0x1f8] sm:$0xff]  }
  0x1c   : > { %1975 = vmatpush3.bf16.msra.mxu0 %v2260_v10  ;;  %v2277_v27 = vld [vmem:[%s2389_s22 + $0x88] sm:$0xff]   ;;  %v2281_v31 = vld [vmem:[%s2389_s22 + $0x80] sm:$0xff]   ;;  %v2285_v43 = vld [vmem:[%s2389_s22 + $0x1b8] sm:$0xff]  }
  0x1d   : > { %2039 = vmatpush3.bf16.msra.mxu1 %v2261_v11  ;;  %1976 = vmatprep.subr.bf16.mxu0 %v2262_v12  ;;  %v294_v32 = vld [vmem:[%s2426_s25] sm:$0xff]  ;;  %v295_v34 = vld [vmem:[%s2426_s25 + $0x8] sm:$0xff]  ;;  %v2286_v50 = vld [vmem:[%s2389_s22 + $0x170] sm:$0xff]  }
  0x1e   : > { %2040 = vmatprep.subr.bf16.mxu1 %v2263_v13  ;;  %v298_v33 = vld [vmem:[%s2426_s25 + $0x20] sm:$0xff]  ;;  %v299_v37 = vld [vmem:[%s2426_s25 + $0x28] sm:$0xff]  ;;  %v2287_v52 = vld [vmem:[%s2389_s22 + $0x130] sm:$0xff]  }
  0x1f   : > { %v1837_v35 = vcombine.low %v294_v32, %v298_v33  ;;  %v1838_v36 = vcombine.high %v294_v32, %v298_v33  ;;  %v1839_v38 = vcombine.low %v295_v34, %v299_v37  ;;  %v1840_v39 = vcombine.high %v295_v34, %v299_v37  ;;  %v302_v44 = vld [vmem:[%s2426_s25 + $0x40] sm:$0xff]  ;;  %v303_v47 = vld [vmem:[%s2426_s25 + $0x48] sm:$0xff]  ;;  %v2288_v54 = vld [vmem:[%s2389_s22 + $0x1f0] sm:$0xff]  }
  0x20   : > { %1977 = vmatpush3.bf16.msra.mxu0 %v2264_v14  ;;  %v306_v45 = vld [vmem:[%s2426_s25 + $0x60] sm:$0xff]  ;;  %v307_v48 = vld [vmem:[%s2426_s25 + $0x68] sm:$0xff]  ;;  %v2289_v55 = vld [vmem:[%s2389_s22 + $0x1b0] sm:$0xff]  }
  0x21   : > { %2041 = vmatpush3.bf16.msra.mxu1 %v2265_v15  ;;  %1978 = vmatprep.subr.bf16.mxu0 %v2266_v16  ;;  %v1846_v46 = vcombine.high %v302_v44, %v306_v45  ;;  %v1848_v49 = vcombine.high %v303_v47, %v307_v48  ;;  %v1845_v51 = vcombine.low %v302_v44, %v306_v45  ;;  %v310_v56 = vld [vmem:[%s2426_s25 + $0x80] sm:$0xff]  ;;  %v311_v58 = vld [vmem:[%s2426_s25 + $0x88] sm:$0xff]  ;;  %v2304_v32 = vld [vmem:[%s2389_s22 + $0x1d0] sm:$0xff]  }
  0x22   : > { %2042 = vmatprep.subr.bf16.mxu1 %v2267_v17  ;;  %1222 = vmatprep.mubr.bf16.mxu0 %v1838_v36  ;;  %v1847_v53 = vcombine.low %v303_v47, %v307_v48  ;;  %v314_v57 = vld [vmem:[%s2426_s25 + $0xa0] sm:$0xff]  ;;  %v315_v59 = vld [vmem:[%s2426_s25 + $0xa8] sm:$0xff]  ;;  %v2305_v33 = vld [vmem:[%s2389_s22 + $0x190] sm:$0xff]  }
  0x23   : > { %1319 = vmatprep.mubr.bf16.mxu1 %v1840_v39  ;;  %v1854_v60 = vcombine.high %v310_v56, %v314_v57  ;;  %v1856_v61 = vcombine.high %v311_v58, %v315_v59  ;;  %v2290_v62 = vld [vmem:[%s2389_s22 + $0x168] sm:$0xff]   ;;  %v1853_v2 = vcombine.low %v310_v56, %v314_v57  ;;  %v318_v3 = vld [vmem:[%s2426_s25 + $0xc0] sm:$0xff]  ;;  %v1855_v6 = vcombine.low %v311_v58, %v315_v59 }
  0x24   : > { %1979 = vmatpush3.bf16.msra.mxu0 %v2268_v18  ;;  %v2291_v63 = vld [vmem:[%s2389_s22 + $0x128] sm:$0xff]   ;;  %v322_v4 = vld [vmem:[%s2426_s25 + $0xe0] sm:$0xff]  ;;  %v2298_v18 = vld [vmem:[%s2389_s22 + $0x158] sm:$0xff]  }
  0x25   : > { %2043 = vmatpush3.bf16.msra.mxu1 %v2269_v19  ;;  %1980 = vmatprep.subr.bf16.mxu0 %v2270_v20  ;;  %v2292_v0 = vld [vmem:[%s2389_s22 + $0x1e8] sm:$0xff]   ;;  %v1862_v7 = vcombine.high %v318_v3, %v322_v4  ;;  %v2294_v10 = vld [vmem:[%s2389_s22 + $0x160] sm:$0xff]   ;;  %v1861_v19 = vcombine.low %v318_v3, %v322_v4  ;;  %v2299_v20 = vld [vmem:[%s2389_s22 + $0x118] sm:$0xff]  }
  0x26   : > { %2044 = vmatprep.subr.bf16.mxu1 %v2271_v21  ;;  %v2293_v1 = vld [vmem:[%s2389_s22 + $0x1a8] sm:$0xff]   ;;  %v2295_v11 = vld [vmem:[%s2389_s22 + $0x120] sm:$0xff]  }
  0x27   : > { %v319_v5 = vld [vmem:[%s2426_s25 + $0xc8] sm:$0xff]  ;;  %v2296_v12 = vld [vmem:[%s2389_s22 + $0x1e0] sm:$0xff]  }
  0x28   : > { %1981 = vmatpush3.bf16.msra.mxu0 %v2272_v22  ;;  %v323_v8 = vld [vmem:[%s2426_s25 + $0xe8] sm:$0xff]  ;;  %v2297_v13 = vld [vmem:[%s2389_s22 + $0x1a0] sm:$0xff]  }
  0x29   : > { %2045 = vmatpush3.bf16.msra.mxu1 %v2273_v23  ;;  %1982 = vmatprep.subr.bf16.mxu0 %v2274_v24  ;;  %v1864_v9 = vcombine.high %v319_v5, %v323_v8  ;;  %v326_v14 = vld [vmem:[%s2426_s25 + $0x100] sm:$0xff]  ;;  %v327_v16 = vld [vmem:[%s2426_s25 + $0x108] sm:$0xff]  ;;  %v1863_v21 = vcombine.low %v319_v5, %v323_v8  ;;  %v2300_v23 = vld [vmem:[%s2389_s22 + $0x1d8] sm:$0xff]  }
  0x2a   : > { %2046 = vmatprep.subr.bf16.mxu1 %v2275_v25  ;;  %v330_v15 = vld [vmem:[%s2426_s25 + $0x120] sm:$0xff]  ;;  %v331_v17 = vld [vmem:[%s2426_s25 + $0x128] sm:$0xff]  ;;  %v2301_v25 = vld [vmem:[%s2389_s22 + $0x198] sm:$0xff]  }
  0x2b   : > { %v1870_v22 = vcombine.high %v326_v14, %v330_v15  ;;  %v1872_v24 = vcombine.high %v327_v16, %v331_v17  ;;  %v1869_v34 = vcombine.low %v326_v14, %v330_v15  ;;  %v2307_v39 = vld [vmem:[%s2389_s22 + $0x108] sm:$0xff]   ;;  %v2311_v48 = vld [vmem:[%s2389_s22 + $0x100] sm:$0xff]   ;;  %v305_v8 = vld [vmem:[%s2426_s25 + $0x58] sm:$0xff] }
  0x2c   : > { %1983 = vmatpush3.bf16.msra.mxu0 %v2276_v26  ;;  %v334_v26 = vld [vmem:[%s2426_s25 + $0x140] sm:$0xff]  ;;  %v343_v44 = vld [vmem:[%s2426_s25 + $0x188] sm:$0xff]  ;;  %v312_v14 = vld [vmem:[%s2426_s25 + $0x90] sm:$0xff] }
  0x2d   : > { %2047 = vmatpush3.bf16.msra.mxu1 %v2277_v27  ;;  %1984 = vmatprep.subr.bf16.mxu0 %v2278_v28  ;;  %v338_v27 = vld [vmem:[%s2426_s25 + $0x160] sm:$0xff]  ;;  %v2302_v28 = vld [vmem:[%s2389_s22 + $0x150] sm:$0xff]   ;;  %v347_v45 = vld [vmem:[%s2426_s25 + $0x1a8] sm:$0xff] }
  0x2e   : > { %2048 = vmatprep.subr.bf16.mxu1 %v2279_v29  ;;  %v335_v29 = vld [vmem:[%s2426_s25 + $0x148] sm:$0xff]  ;;  %v1878_v36 = vcombine.high %v334_v26, %v338_v27  ;;  %v1877_v47 = vcombine.low %v334_v26, %v338_v27  ;;  %v1887_v59 = vcombine.low %v343_v44, %v347_v45  ;;  %v316_v15 = vld [vmem:[%s2426_s25 + $0xb0] sm:$0xff] }
  0x2f   : > { %v351_v56 = vld [vmem:[%s2426_s25 + $0x1c8] sm:$0xff]  ;;  %v1857_v26 = vcombine.low %v312_v14, %v316_v15 }
  0x30   : > { %1985 = vmatpush3.bf16.msra.mxu0 %v2280_v30  ;;  %v339_v30 = vld [vmem:[%s2426_s25 + $0x168] sm:$0xff] }
  0x31   : > { %2049 = vmatpush3.bf16.msra.mxu1 %v2281_v31  ;;  %2098 = vmatprep.subr.bf16.mxu0 %v2282_v40  ;;  %v2303_v31 = vld [vmem:[%s2389_s22 + $0x110] sm:$0xff]   ;;  %v1880_v37 = vcombine.high %v335_v29, %v339_v30  ;;  %v2308_v40 = vld [vmem:[%s2389_s22 + $0x1c8] sm:$0xff]  }
  0x32   : > { %2162 = vmatprep.subr.bf16.mxu1 %v2284_v42  ;;  %v346_v42 = vld [vmem:[%s2426_s25 + $0x1a0] sm:$0xff]  ;;  %v355_v57 = vld [vmem:[%s2426_s25 + $0x1e8] sm:$0xff] }
  0x33   : > { %1223 = vmatmul.mubr.bf16.vlgmr.msra.gmra.mxu0 %v1837_v35  ;;  %v1871_v35 = vcombine.low %v327_v16, %v331_v17  ;;  %v1895_v3 = vcombine.low %v351_v56, %v355_v57  ;;  %v313_v16 = vld [vmem:[%s2426_s25 + $0x98] sm:$0xff] }
  0x34   : > { %1320 = vmatmul.mubr.bf16.vlgmr.msra.gmra.mxu1 %v1839_v38  ;;  %2099 = vmatpush3.bf16.msra.mxu0 %v2283_v41  ;;  %v2306_v38 = vld [vmem:[%s2389_s22 + $0x148] sm:$0xff]   ;;  %v342_v41 = vld [vmem:[%s2426_s25 + $0x180] sm:$0xff]  ;;  %v317_v17 = vld [vmem:[%s2426_s25 + $0xb8] sm:$0xff] }
  0x35   : > { %2163 = vmatpush3.bf16.msra.mxu1 %v2285_v43  ;;  %1230 = vmatprep.mubr.bf16.mxu0 %v1846_v46  ;;  %v2309_v43 = vld [vmem:[%s2389_s22 + $0x188] sm:$0xff]   ;;  %v2310_v46 = vld [vmem:[%s2389_s22 + $0x140] sm:$0xff]   ;;  %v1885_v58 = vcombine.low %v342_v41, %v346_v42  ;;  %v1859_v27 = vcombine.low %v313_v16, %v317_v17 }
  0x36   : > { %1327 = vmatprep.mubr.bf16.mxu1 %v1848_v49  ;;  %2100 = vmatprep.subr.bf16.mxu0 %v2286_v50  ;;  %v1879_v49 = vcombine.low %v335_v29, %v339_v30  ;;  %v1886_v50 = vcombine.high %v342_v41, %v346_v42  ;;  %v328_v30 = vld [vmem:[%s2426_s25 + $0x110] sm:$0xff]  ;;  %v341_v41 = vld [vmem:[%s2426_s25 + $0x178] sm:$0xff] }
  0x37   : > { %2164 = vmatprep.subr.bf16.mxu1 %v2288_v54  ;;  %v350_v54 = vld [vmem:[%s2426_s25 + $0x1c0] sm:$0xff] }
  0x38   : > { %2101 = vmatpush3.bf16.msra.mxu0 %v2287_v52  ;;  %v1888_v52 = vcombine.high %v343_v44, %v347_v45 }
  0x39   : > { %2165 = vmatpush3.bf16.msra.mxu1 %v2289_v55  ;;  %2102 = vmatprep.subr.bf16.mxu0 %v2290_v62  ;;  %v354_v55 = vld [vmem:[%s2426_s25 + $0x1e0] sm:$0xff]  ;;  %v296_v62 = vld [vmem:[%s2426_s25 + $0x10] sm:$0xff] }
  0x3a   : > { %2166 = vmatprep.subr.bf16.mxu1 %v2292_v0  ;;  %v297_v0 = vld [vmem:[%s2426_s25 + $0x18] sm:$0xff] }
  0x3b   : > { %1231 = vmatmul.mubr.bf16.gmra.mxu0 %v1845_v51  ;;  %v2312_v51 = vld [vmem:[%s2389_s22 + $0x1c0] sm:$0xff]  }
  0x3c   : > { %1328 = vmatmul.mubr.bf16.gmra.mxu1 %v1847_v53  ;;  %1238 = vmatprep.mubr.bf16.mxu0 %v1854_v60  ;;  %v2313_v53 = vld [vmem:[%s2389_s22 + $0x180] sm:$0xff]   ;;  %v1894_v60 = vcombine.high %v350_v54, %v354_v55 }
  0x3d   : > { %1335 = vmatprep.mubr.bf16.mxu1 %v1856_v61  ;;  %2103 = vmatpush3.bf16.msra.mxu0 %v2291_v63  ;;  %v1896_v61 = vcombine.high %v351_v56, %v355_v57  ;;  %v300_v63 = vld [vmem:[%s2426_s25 + $0x30] sm:$0xff]  ;;  %v353_v56 = vld [vmem:[%s2426_s25 + $0x1d8] sm:$0xff] }
  0x3e   : > { %2167 = vmatpush3.bf16.msra.mxu1 %v2293_v1  ;;  %2104 = vmatprep.subr.bf16.mxu0 %v2294_v10  ;;  %v301_v1 = vld [vmem:[%s2426_s25 + $0x38] sm:$0xff]  ;;  %v1842_v4 = vcombine.high %v296_v62, %v300_v63  ;;  %v1841_v10 = vcombine.low %v296_v62, %v300_v63 }
  0x3f   : > { %2168 = vmatprep.subr.bf16.mxu1 %v2296_v12  ;;  %v1844_v5 = vcombine.high %v297_v0, %v301_v1  ;;  %v357_v57 = vld [vmem:[%s2426_s25 + $0x1f8] sm:$0xff] }
  0x40   : > { %v1899_v63 = vcombine.low %v353_v56, %v357_v57 }
  0x41   : > { %2105 = vmatpush3.bf16.msra.mxu0 %v2295_v11  ;;  %v1843_v11 = vcombine.low %v297_v0, %v301_v1 }
  0x42   : > { %2169 = vmatpush3.bf16.msra.mxu1 %v2297_v13  ;;  %2106 = vmatprep.subr.bf16.mxu0 %v2298_v18 }
  0x43   : > { %1239 = vmatmul.mubr.bf16.gmra.mxu0 %v1853_v2  ;;  %2170 = vmatprep.subr.bf16.mxu1 %v2300_v23  ;;  %v1893_v2 = vcombine.low %v350_v54, %v354_v55  ;;  %v324_v23 = vld [vmem:[%s2426_s25 + $0xf0] sm:$0xff] }
  0x44   : > { %1336 = vmatmul.mubr.bf16.gmra.mxu1 %v1855_v6  ;;  %1246 = vmatprep.mubr.bf16.mxu0 %v1862_v7  ;;  %v304_v6 = vld [vmem:[%s2426_s25 + $0x50] sm:$0xff] }
  0x45   : > { %1343 = vmatprep.mubr.bf16.mxu1 %v1864_v9  ;;  %2107 = vmatpush3.bf16.msra.mxu0 %v2299_v20  ;;  %v308_v7 = vld [vmem:[%s2426_s25 + $0x70] sm:$0xff]  ;;  %v309_v9 = vld [vmem:[%s2426_s25 + $0x78] sm:$0xff]  ;;  %v1858_v20 = vcombine.high %v312_v14, %v316_v15 }
  0x46   : > { %2171 = vmatpush3.bf16.msra.mxu1 %v2301_v25  ;;  %2108 = vmatprep.subr.bf16.mxu0 %v2302_v28  ;;  %v1850_v12 = vcombine.high %v304_v6, %v308_v7  ;;  %v1852_v13 = vcombine.high %v305_v8, %v309_v9  ;;  %v1849_v18 = vcombine.low %v304_v6, %v308_v7  ;;  %v325_v25 = vld [vmem:[%s2426_s25 + $0xf8] sm:$0xff]  ;;  %v352_v54 = vld [vmem:[%s2426_s25 + $0x1d0] sm:$0xff] }
  0x47   : > { %2172 = vmatprep.subr.bf16.mxu1 %v2304_v32  ;;  %v329_v32 = vld [vmem:[%s2426_s25 + $0x118] sm:$0xff]  ;;  %v356_v55 = vld [vmem:[%s2426_s25 + $0x1f0] sm:$0xff] }
  0x48   : > { %v1897_v62 = vcombine.low %v352_v54, %v356_v55 }
  0x49   : > { %2109 = vmatpush3.bf16.msra.mxu0 %v2303_v31  ;;  %v332_v31 = vld [vmem:[%s2426_s25 + $0x130] sm:$0xff] }
  0x4a   : > { %2173 = vmatpush3.bf16.msra.mxu1 %v2305_v33  ;;  %2110 = vmatprep.subr.bf16.mxu0 %v2306_v38  ;;  %v333_v33 = vld [vmem:[%s2426_s25 + $0x138] sm:$0xff]  ;;  %v336_v38 = vld [vmem:[%s2426_s25 + $0x150] sm:$0xff]  ;;  %v1873_v42 = vcombine.low %v328_v30, %v332_v31 }
  0x4b   : > { %1247 = vmatmul.mubr.bf16.gmra.mxu0 %v1861_v19  ;;  %2174 = vmatprep.subr.bf16.mxu1 %v2308_v40  ;;  %v1851_v19 = vcombine.low %v305_v8, %v309_v9  ;;  %v337_v40 = vld [vmem:[%s2426_s25 + $0x158] sm:$0xff] }
  0x4c   : > { %1344 = vmatmul.mubr.bf16.gmra.mxu1 %v1863_v21  ;;  %1254 = vmatprep.mubr.bf16.mxu0 %v1870_v22  ;;  %v1860_v21 = vcombine.high %v313_v16, %v317_v17  ;;  %v320_v22 = vld [vmem:[%s2426_s25 + $0xd0] sm:$0xff]  ;;  %v1884_v45 = vcombine.high %v337_v40, %v341_v41 }
  0x4d   : > { %1351 = vmatprep.mubr.bf16.mxu1 %v1872_v24  ;;  %2111 = vmatpush3.bf16.msra.mxu0 %v2307_v39  ;;  %v321_v24 = vld [vmem:[%s2426_s25 + $0xd8] sm:$0xff]  ;;  %v1866_v28 = vcombine.high %v320_v22, %v324_v23  ;;  %v340_v39 = vld [vmem:[%s2426_s25 + $0x170] sm:$0xff] }
  0x4e   : > { %2175 = vmatpush3.bf16.msra.mxu1 %v2309_v43  ;;  %2112 = vmatprep.subr.bf16.mxu0 %v2310_v46  ;;  %v1868_v29 = vcombine.high %v321_v24, %v325_v25  ;;  %v1875_v43 = vcombine.low %v329_v32, %v333_v33  ;;  %v1882_v44 = vcombine.high %v336_v38, %v340_v39  ;;  %v344_v46 = vld [vmem:[%s2426_s25 + $0x190] sm:$0xff] }
  0x4f   : > { %2176 = vmatprep.subr.bf16.mxu1 %v2312_v51  ;;  %v1883_v51 = vcombine.low %v337_v40, %v341_v41 }
  0x51   : > { %2113 = vmatpush3.bf16.msra.mxu0 %v2311_v48  ;;  %v345_v48 = vld [vmem:[%s2426_s25 + $0x198] sm:$0xff] }
  0x52   : > { %2177 = vmatpush3.bf16.msra.mxu1 %v2313_v53 }
  0x53   : > { %1255 = vmatmul.mubr.bf16.gmra.mxu0 %v1869_v34  ;;  %v1865_v34 = vcombine.low %v320_v22, %v324_v23 }
  0x54   : > { %1352 = vmatmul.mubr.bf16.gmra.mxu1 %v1871_v35  ;;  %1262 = vmatprep.mubr.bf16.mxu0 %v1878_v36  ;;  %v1867_v35 = vcombine.low %v321_v24, %v325_v25  ;;  %v1874_v36 = vcombine.high %v328_v30, %v332_v31 }
  0x55   : > { %1359 = vmatprep.mubr.bf16.mxu1 %v1880_v37  ;;  %v1876_v37 = vcombine.high %v329_v32, %v333_v33 }
  0x5b   : > { %1263 = vmatmul.mubr.bf16.gmra.mxu0 %v1877_v47  ;;  %v348_v47 = vld [vmem:[%s2426_s25 + $0x1b0] sm:$0xff] }
  0x5c   : > { %1360 = vmatmul.mubr.bf16.gmra.mxu1 %v1879_v49  ;;  %1270 = vmatprep.mubr.bf16.mxu0 %v1886_v50  ;;  %v349_v49 = vld [vmem:[%s2426_s25 + $0x1b8] sm:$0xff]  ;;  %v1881_v50 = vcombine.low %v336_v38, %v340_v39 }
  0x5d   : > { %1367 = vmatprep.mubr.bf16.mxu1 %v1888_v52  ;;  %v1890_v52 = vcombine.high %v344_v46, %v348_v47  ;;  %v1892_v53 = vcombine.high %v345_v48, %v349_v49 }
  0x63   : > { %1271 = vmatmul.mubr.bf16.gmra.mxu0 %v1885_v58  ;;  %v1889_v58 = vcombine.low %v344_v46, %v348_v47 }
  0x64   : > { %1368 = vmatmul.mubr.bf16.gmra.mxu1 %v1887_v59  ;;  %1278 = vmatprep.mubr.bf16.mxu0 %v1894_v60  ;;  %v1891_v59 = vcombine.low %v345_v48, %v349_v49  ;;  %v1898_v60 = vcombine.high %v352_v54, %v356_v55 }
  0x65   : > { %1375 = vmatprep.mubr.bf16.mxu1 %v1896_v61  ;;  %v1900_v61 = vcombine.high %v353_v56, %v357_v57 }
  0x6b   : > { %1279 = vmatmul.mubr.bf16.gmra.mxu0 %v1893_v2 }
  0x6c   : > { %1376 = vmatmul.mubr.bf16.gmra.mxu1 %v1895_v3  ;;  %1416 = vmatprep.mubr.bf16.mxu0 %v1842_v4 }
  0x6d   : > { %1513 = vmatprep.mubr.bf16.mxu1 %v1844_v5 }
  0x73   : > { %1417 = vmatmul.mubr.bf16.vlgmr.msra.gmra.mxu0 %v1841_v10 }
  0x74   : > { %1514 = vmatmul.mubr.bf16.vlgmr.msra.gmra.mxu1 %v1843_v11  ;;  %1424 = vmatprep.mubr.bf16.mxu0 %v1850_v12 }
  0x75   : > { %1521 = vmatprep.mubr.bf16.mxu1 %v1852_v13 }
  0x7b   : > { %1425 = vmatmul.mubr.bf16.gmra.mxu0 %v1849_v18 }
  0x7c   : > { %1522 = vmatmul.mubr.bf16.gmra.mxu1 %v1851_v19  ;;  %1432 = vmatprep.mubr.bf16.mxu0 %v1858_v20 }
  0x7d   : > { %1529 = vmatprep.mubr.bf16.mxu1 %v1860_v21 }
  0x83   : > { %1433 = vmatmul.mubr.bf16.gmra.mxu0 %v1857_v26 }
  0x84   : > { %1530 = vmatmul.mubr.bf16.gmra.mxu1 %v1859_v27  ;;  %1440 = vmatprep.mubr.bf16.mxu0 %v1866_v28 }
  0x85   : > { %1537 = vmatprep.mubr.bf16.mxu1 %v1868_v29 }
  0x8b   : > { %1441 = vmatmul.mubr.bf16.gmra.mxu0 %v1865_v34 }
  0x8c   : > { %1538 = vmatmul.mubr.bf16.gmra.mxu1 %v1867_v35  ;;  %1448 = vmatprep.mubr.bf16.mxu0 %v1874_v36 }
  0x8d   : > { %1545 = vmatprep.mubr.bf16.mxu1 %v1876_v37 }
  0x93   : > { %1449 = vmatmul.mubr.bf16.gmra.mxu0 %v1873_v42 }
  0x94   : > { %1546 = vmatmul.mubr.bf16.gmra.mxu1 %v1875_v43  ;;  %1456 = vmatprep.mubr.bf16.mxu0 %v1882_v44 }
  0x95   : > { %1553 = vmatprep.mubr.bf16.mxu1 %v1884_v45 }
  0x9b   : > { %1457 = vmatmul.mubr.bf16.gmra.mxu0 %v1881_v50 }
  0x9c   : > { %1554 = vmatmul.mubr.bf16.gmra.mxu1 %v1883_v51  ;;  %1464 = vmatprep.mubr.bf16.mxu0 %v1890_v52 }
  0x9d   : > { %1561 = vmatprep.mubr.bf16.mxu1 %v1892_v53 }
  0xa3   : > { %1465 = vmatmul.mubr.bf16.gmra.mxu0 %v1889_v58 }
  0xa4   : > { %1562 = vmatmul.mubr.bf16.gmra.mxu1 %v1891_v59  ;;  %1472 = vmatprep.mubr.bf16.mxu0 %v1898_v60 }
  0xa5   : > { %1569 = vmatprep.mubr.bf16.mxu1 %v1900_v61 }
  0xab   : > { %1473 = vmatmul.mubr.bf16.gmra.mxu0 %v1897_v62 }
  0xac   : > { %1570 = vmatmul.mubr.bf16.gmra.mxu1 %v1899_v63 }
  0xf3   : > { %v2526_v0 = vpop.f32.mrf.mxu0 }
  0xf4   : > { %v2528_v1 = vpop.f32.mrf.mxu1 }
  0xf5   : > { %v1987_v2 = vpop.f32.mrf.mxu0 }
  0xf6   : > { %v2051_v3 = vpop.f32.mrf.mxu1  ;;  %v1988_v63 = vadd.f32 %v1987_v2, %v2526_v0 }
  0xf7   : > { %v2530_v4 = vpop.f32.mrf.mxu0 }
  0xf8   : > { %v2532_v5 = vpop.f32.mrf.mxu1 }
  0xf9   : > { %v2534_v6 = vpop.f32.mrf.mxu0 }
  0xfa   : > { %v2536_v7 = vpop.f32.mrf.mxu1 }
  0xfb   : > { %v2538_v8 = vpop.f32.mrf.mxu0 }
  0xfc   : > { %v2540_v9 = vpop.f32.mrf.mxu1 }
  0xfd   : > { %v2542_v10 = vpop.f32.mrf.mxu0 }
  0xfe   : > { %v2544_v11 = vpop.f32.mrf.mxu1 }
  0xff   : > { %v2546_v12 = vpop.f32.mrf.mxu0 }
 0x100   : > { %v2548_v13 = vpop.f32.mrf.mxu1 }
 0x101   : > { %v2550_v14 = vpop.f32.mrf.mxu0 }
 0x102   : > { %v2552_v15 = vpop.f32.mrf.mxu1 }
 0x103   : > { %v2554_v16 = vpop.f32.mrf.mxu0 }
 0x104   : > { %v2556_v17 = vpop.f32.mrf.mxu1 }
 0x105   : > { %v2558_v18 = vpop.f32.mrf.mxu0 }
 0x106   : > { %v2560_v19 = vpop.f32.mrf.mxu1 }
 0x107   : > { %v2562_v20 = vpop.f32.mrf.mxu0 }
 0x108   : > { %v2564_v21 = vpop.f32.mrf.mxu1 }
 0x109   : > { %v2566_v22 = vpop.f32.mrf.mxu0 }
 0x10a   : > { %v2568_v23 = vpop.f32.mrf.mxu1 }
 0x10b   : > { %v2570_v24 = vpop.f32.mrf.mxu0 }
 0x10c   : > { %v2572_v25 = vpop.f32.mrf.mxu1 }
 0x10d   : > { %v2574_v26 = vpop.f32.mrf.mxu0 }
 0x10e   : > { %v2576_v27 = vpop.f32.mrf.mxu1 }
 0x10f   : > { %v2578_v28 = vpop.f32.mrf.mxu0 }
 0x110   : > { %v2580_v29 = vpop.f32.mrf.mxu1 }
 0x111   : > { %v2582_v30 = vpop.f32.mrf.mxu0 }
 0x112   : > { %v2584_v31 = vpop.f32.mrf.mxu1 }
 0x113   : > { %v2586_v32 = vpop.f32.mrf.mxu0 }
 0x114   : > { %v2588_v33 = vpop.f32.mrf.mxu1 }
 0x115   : > { %v2590_v34 = vpop.f32.mrf.mxu0 }
 0x116   : > { %v2592_v35 = vpop.f32.mrf.mxu1 }
 0x117   : > { %v2594_v36 = vpop.f32.mrf.mxu0 }
 0x118   : > { %v2596_v37 = vpop.f32.mrf.mxu1 }
 0x119   : > { %v2598_v38 = vpop.f32.mrf.mxu0 }
 0x11a   : > { %v2600_v39 = vpop.f32.mrf.mxu1 }
 0x11b   : > { %v2602_v40 = vpop.f32.mrf.mxu0 }
 0x11c   : > { %v2604_v41 = vpop.f32.mrf.mxu1 }
 0x11d   : > { %v2606_v42 = vpop.f32.mrf.mxu0 }
 0x11e   : > { %v2608_v43 = vpop.f32.mrf.mxu1 }
 0x11f   : > { %v2610_v44 = vpop.f32.mrf.mxu0 }
 0x120   : > { %v2612_v45 = vpop.f32.mrf.mxu1 }
 0x121   : > { %v2614_v46 = vpop.f32.mrf.mxu0 }
 0x122   : > { %v2616_v47 = vpop.f32.mrf.mxu1 }
 0x123   : > { %v2618_v48 = vpop.f32.mrf.mxu0 }
 0x124   : > { %v2620_v49 = vpop.f32.mrf.mxu1 }
 0x125   : > { %v2622_v50 = vpop.f32.mrf.mxu0 }
 0x126   : > { %v2624_v51 = vpop.f32.mrf.mxu1 }
 0x127   : > { %2756 = vst [vmem:[#allocation2_spill] sm:$0xff] %v2624_v51  ;;  %v2626_v52 = vpop.f32.mrf.mxu0 }
 0x128   : > { %2757 = vst [vmem:[#allocation3_spill] sm:$0xff] %v2626_v52  ;;  %v2628_v53 = vpop.f32.mrf.mxu1 }
 0x129   : > { %2758 = vst [vmem:[#allocation4_spill] sm:$0xff] %v2628_v53  ;;  %v2630_v54 = vpop.f32.mrf.mxu0  ;;  %v2052_v53 = vadd.f32 %v2051_v3, %v2528_v1  ;;  %v1994_v1 = vadd.f32 %v2542_v10, %v2538_v8  ;;  %v2058_v3 = vadd.f32 %v2544_v11, %v2540_v9  ;;  %v1997_v9 = vadd.f32 %v2550_v14, %v2546_v12 }
 0x12a   : > { %2759 = vst [vmem:[#allocation5_spill] sm:$0xff] %v2630_v54  ;;  %v2632_v55 = vpop.f32.mrf.mxu1  ;;  %v2061_v11 = vadd.f32 %v2552_v15, %v2548_v13  ;;  %v2064_v12 = vadd.f32 %v2560_v19, %v2556_v17  ;;  %v2067_v17 = vadd.f32 %v2568_v23, %v2564_v21 }
 0x12b   : > { %2760 = vst [vmem:[#allocation6_spill] sm:$0xff] %v2632_v55  ;;  %v2634_v56 = vpop.f32.mrf.mxu0  ;;  %v1322_v52 = vadd.f32 %v2052_v53, %v1988_v63  ;;  %v1330_v10 = vadd.f32 %v2058_v3, %v1994_v1  ;;  %v2000_v1 = vadd.f32 %v2558_v18, %v2554_v16  ;;  %v2003_v16 = vadd.f32 %v2566_v22, %v2562_v20 }
 0x12c   : > { %2761 = vst [vmem:[#allocation7_spill] sm:$0xff] %v2634_v56  ;;  %v2636_v57 = vpop.f32.mrf.mxu1  ;;  %v1333_v13 = vadd.f32 %v2061_v11, %v1997_v9  ;;  %v2070_v20 = vadd.f32 %v2576_v27, %v2572_v25  ;;  %v2073_v25 = vadd.f32 %v2584_v31, %v2580_v29 }
 0x12d   : > { %2762 = vst [vmem:[#allocation8_spill] sm:$0xff] %v2636_v57  ;;  %v2638_v58 = vpop.f32.mrf.mxu0  ;;  %v1341_v21 = vadd.f32 %v2067_v17, %v2003_v16 }
 0x12e   : > { %2763 = vst [vmem:[#allocation9_spill] sm:$0xff] %v2638_v58  ;;  %v2640_v59 = vpop.f32.mrf.mxu1  ;;  %v1991_v58 = vadd.f32 %v2534_v6, %v2530_v4 }
 0x12f   : > { %2764 = vst [vmem:[#allocation10_spill] sm:$0xff] %v2640_v59  ;;  %v2642_v60 = vpop.f32.mrf.mxu0 }
 0x130   : > { %2765 = vst [vmem:[#allocation11_spill] sm:$0xff] %v2642_v60  ;;  %v2644_v61 = vpop.f32.mrf.mxu1  ;;  %v2055_v60 = vadd.f32 %v2536_v7, %v2532_v5 }
 0x131   : > { %2766 = vst [vmem:[#allocation12_spill] sm:$0xff] %v2644_v61  ;;  %v2646_v62 = vpop.f32.mrf.mxu0 }
 0x132   : > { %2767 = vst [vmem:[#allocation13_spill] sm:$0xff] %v2646_v62  ;;  %v2650_v55 = vpop.f32.mrf.mxu1  ;;  %v1325_v5 = vadd.f32 %v2055_v60, %v1991_v58 }
 0x133   : > { %v2114_v56 = vpop.f32.mrf.mxu0 }
 0x134   : > { %v2178_v54 = vpop.f32.mrf.mxu1 }
 0x135   : > { %v2115_v57 = vpop.f32.mrf.mxu0 }
 0x136   : > { %v2116_v59 = vadd.f32 %v2115_v57, %v2114_v56  ;;  %v2179_v61 = vpop.f32.mrf.mxu1 }
 0x137   : > { %v2117_v62 = vpop.f32.mrf.mxu0  ;;  %v2180_v0 = vadd.f32 %v2179_v61, %v2178_v54 }
 0x138   : > { %v1419_v51 = vadd.f32 %v2116_v59, %v1322_v52  ;;  %v2181_v2 = vpop.f32.mrf.mxu1 }
 0x139   : > { %v2118_v4 = vpop.f32.mrf.mxu0 }
 0x13a   : > { %v1516_v6 = vadd.f32 %v2180_v0, %v1419_v51  ;;  %v2119_v7 = vadd.f32 %v2118_v4, %v2117_v62  ;;  %v2182_v52 = vpop.f32.mrf.mxu1 }
 0x13b   : > { %v2120_v53 = vpop.f32.mrf.mxu0  ;;  %v2183_v56 = vadd.f32 %v2182_v52, %v2181_v2 }
 0x13c   : > { %1578 = vst [vmem:[%s2664_s29] sm:$0xff] %v1516_v6  ;;  %v1422_v54 = vadd.f32 %v2119_v7, %v1325_v5  ;;  %v2184_v8 = vpop.f32.mrf.mxu1  ;;  %v1616_v51 = vmul.f32 %v1516_v6, %v1516_v6 }
 0x13d   : > { %v2121_v57 = vpop.f32.mrf.mxu0 }
 0x13e   : > { %v1519_v59 = vadd.f32 %v2183_v56, %v1422_v54  ;;  %v2122_v61 = vadd.f32 %v2121_v57, %v2120_v53  ;;  %v2185_v58 = vpop.f32.mrf.mxu1 }
 0x13f   : > { %v2123_v60 = vpop.f32.mrf.mxu0  ;;  %v2186_v2 = vadd.f32 %v2185_v58, %v2184_v8 }
 0x140   : > { %1579 = vst [vmem:[%s2664_s29 + $0x8] sm:$0xff] %v1519_v59  ;;  %v1594_v62 = vadd.f32 %v1519_v59, %v1516_v6  ;;  %v1617_v63 = vmul.f32 %v1519_v59, %v1519_v59  ;;  %v1427_v0 = vadd.f32 %v2122_v61, %v1330_v10  ;;  %v2187_v4 = vpop.f32.mrf.mxu1  ;;  %v1338_v10 = vadd.f32 %v2064_v12, %v2000_v1 }
 0x141   : > { %v2124_v14 = vpop.f32.mrf.mxu0 }
 0x142   : > { %v1632_v15 = vadd.f32 %v1617_v63, %v1616_v51  ;;  %v1524_v3 = vadd.f32 %v2186_v2, %v1427_v0  ;;  %v2125_v5 = vadd.f32 %v2124_v14, %v2123_v60  ;;  %v2188_v7 = vpop.f32.mrf.mxu1  ;;  %v2006_v63 = vadd.f32 %v2574_v26, %v2570_v24 }
 0x143   : > { %v2126_v52 = vpop.f32.mrf.mxu0  ;;  %v2189_v56 = vadd.f32 %v2188_v7, %v2187_v4  ;;  %v2009_v24 = vadd.f32 %v2582_v30, %v2578_v28  ;;  %v2076_v28 = vadd.f32 %v2592_v35, %v2588_v33  ;;  %v2079_v33 = vadd.f32 %v2600_v39, %v2596_v37 }
 0x144   : > { %1580 = vst [vmem:[%s2664_s29 + $0x10] sm:$0xff] %v1524_v3  ;;  %v1595_v6 = vadd.f32 %v1594_v62, %v1524_v3  ;;  %v1618_v53 = vmul.f32 %v1524_v3, %v1524_v3  ;;  %v1430_v54 = vadd.f32 %v2125_v5, %v1333_v13  ;;  %v2190_v8 = vpop.f32.mrf.mxu1  ;;  %v1346_v5 = vadd.f32 %v2070_v20, %v2006_v63 }
 0x145   : > { %v2127_v18 = vpop.f32.mrf.mxu0  ;;  %v1349_v29 = vadd.f32 %v2073_v25, %v2009_v24 }
 0x146   : > { %v1633_v19 = vadd.f32 %v1632_v15, %v1618_v53  ;;  %v1527_v57 = vadd.f32 %v2189_v56, %v1430_v54  ;;  %v2128_v9 = vadd.f32 %v2127_v18, %v2126_v52  ;;  %v2191_v11 = vpop.f32.mrf.mxu1  ;;  %v2012_v18 = vadd.f32 %v2590_v34, %v2586_v32 }
 0x147   : > { %v2129_v59 = vpop.f32.mrf.mxu0  ;;  %v2192_v60 = vadd.f32 %v2191_v11, %v2190_v8  ;;  %v2015_v32 = vadd.f32 %v2598_v38, %v2594_v36  ;;  %v2082_v36 = vadd.f32 %v2608_v43, %v2604_v41  ;;  %v2085_v41 = vadd.f32 %v2616_v47, %v2612_v45 }
 0x148   : > { %1581 = vst [vmem:[%s2664_s29 + $0x18] sm:$0xff] %v1527_v57  ;;  %v1596_v61 = vadd.f32 %v1595_v6, %v1527_v57  ;;  %v1619_v58 = vmul.f32 %v1527_v57, %v1527_v57  ;;  %v1435_v51 = vadd.f32 %v2128_v9, %v1338_v10  ;;  %v2193_v62 = vpop.f32.mrf.mxu1 }
 0x149   : > { %v2130_v22 = vpop.f32.mrf.mxu0  ;;  %v1357_v37 = vadd.f32 %v2079_v33, %v2015_v32 }
 0x14a   : > { %v1634_v23 = vadd.f32 %v1633_v19, %v1619_v58  ;;  %v1532_v0 = vadd.f32 %v2192_v60, %v1435_v51  ;;  %v2131_v2 = vadd.f32 %v2130_v22, %v2129_v59  ;;  %v2194_v4 = vpop.f32.mrf.mxu1  ;;  %v1354_v60 = vadd.f32 %v2076_v28, %v2012_v18 }
 0x14b   : > { %v2132_v1 = vpop.f32.mrf.mxu0  ;;  %v2195_v15 = vadd.f32 %v2194_v4, %v2193_v62  ;;  %v2024_v18 = vadd.f32 %v2622_v50, %v2618_v48  ;;  %v2770_v48 = vld [vmem:[#allocation5_spill] sm:$0xff] }
 0x14c   : > { %1582 = vst [vmem:[%s2664_s29 + $0x20] sm:$0xff] %v1532_v0  ;;  %v1597_v12 = vadd.f32 %v1596_v61, %v1532_v0  ;;  %v1620_v14 = vmul.f32 %v1532_v0, %v1532_v0  ;;  %v1438_v13 = vadd.f32 %v2131_v2, %v1341_v21  ;;  %v2196_v3 = vpop.f32.mrf.mxu1 }
 0x14d   : > { %v2133_v26 = vpop.f32.mrf.mxu0 }
 0x14e   : > { %v1635_v27 = vadd.f32 %v1634_v23, %v1620_v14  ;;  %v1535_v7 = vadd.f32 %v2195_v15, %v1438_v13  ;;  %v2134_v52 = vadd.f32 %v2133_v26, %v2132_v1  ;;  %v2197_v6 = vpop.f32.mrf.mxu1  ;;  %v2018_v1 = vadd.f32 %v2606_v42, %v2602_v40 }
 0x14f   : > { %v2135_v53 = vpop.f32.mrf.mxu0  ;;  %v2198_v10 = vadd.f32 %v2197_v6, %v2196_v3  ;;  %v2021_v40 = vadd.f32 %v2614_v46, %v2610_v44  ;;  %v2768_v44 = vld [vmem:[#allocation2_spill] sm:$0xff] }
 0x150   : > { %1583 = vst [vmem:[%s2664_s29 + $0x28] sm:$0xff] %v1535_v7  ;;  %v1598_v54 = vadd.f32 %v1597_v12, %v1535_v7  ;;  %v1621_v56 = vmul.f32 %v1535_v7, %v1535_v7  ;;  %v1443_v8 = vadd.f32 %v2134_v52, %v1346_v5  ;;  %v2199_v16 = vpop.f32.mrf.mxu1  ;;  %v2088_v46 = vadd.f32 %v2768_v44, %v2620_v49  ;;  %v2771_v49 = vld [vmem:[#allocation4_spill] sm:$0xff] }
 0x151   : > { %v2136_v30 = vpop.f32.mrf.mxu0  ;;  %v1365_v45 = vadd.f32 %v2085_v41, %v2021_v40  ;;  %v2777_v41 = vld [vmem:[#allocation11_spill] sm:$0xff] }
 0x152   : > { %v1636_v31 = vadd.f32 %v1635_v27, %v1621_v56  ;;  %v1540_v17 = vadd.f32 %v2198_v10, %v1443_v8  ;;  %v2137_v19 = vadd.f32 %v2136_v30, %v2135_v53  ;;  %v2200_v57 = vpop.f32.mrf.mxu1  ;;  %v1362_v27 = vadd.f32 %v2082_v36, %v2018_v1  ;;  %v2775_v36 = vld [vmem:[#allocation8_spill] sm:$0xff] }
 0x153   : > { %v2138_v9 = vpop.f32.mrf.mxu0  ;;  %v2201_v58 = vadd.f32 %v2200_v57, %v2199_v16 }
 0x154   : > { %1584 = vst [vmem:[%s2664_s29 + $0x30] sm:$0xff] %v1540_v17  ;;  %v1599_v11 = vadd.f32 %v1598_v54, %v1540_v17  ;;  %v1622_v59 = vmul.f32 %v1540_v17, %v1540_v17  ;;  %v1446_v61 = vadd.f32 %v2137_v19, %v1349_v29  ;;  %v2202_v51 = vpop.f32.mrf.mxu1 }
 0x155   : > { %v2139_v34 = vpop.f32.mrf.mxu0 }
 0x156   : > { %v1637_v35 = vadd.f32 %v1636_v31, %v1622_v59  ;;  %v1543_v62 = vadd.f32 %v2201_v58, %v1446_v61  ;;  %v2140_v63 = vadd.f32 %v2139_v34, %v2138_v9  ;;  %v2203_v20 = vpop.f32.mrf.mxu1  ;;  %v1370_v61 = vadd.f32 %v2088_v46, %v2024_v18  ;;  %v2769_v58 = vld [vmem:[#allocation3_spill] sm:$0xff] }
 0x157   : > { %v2141_v22 = vpop.f32.mrf.mxu0  ;;  %v2204_v2 = vadd.f32 %v2203_v20, %v2202_v51  ;;  %v2027_v50 = vadd.f32 %v2770_v48, %v2769_v58 }
 0x158   : > { %1585 = vst [vmem:[%s2664_s29 + $0x38] sm:$0xff] %v1543_v62  ;;  %v1600_v21 = vadd.f32 %v1599_v11, %v1543_v62  ;;  %v1623_v23 = vmul.f32 %v1543_v62, %v1543_v62  ;;  %v1451_v0 = vadd.f32 %v2140_v63, %v1354_v60  ;;  %v2205_v4 = vpop.f32.mrf.mxu1  ;;  %v2772_v60 = vld [vmem:[#allocation6_spill] sm:$0xff] }
 0x159   : > { %v2142_v38 = vpop.f32.mrf.mxu0  ;;  %v2091_v32 = vadd.f32 %v2772_v60, %v2771_v49 }
 0x15a   : > { %v1638_v39 = vadd.f32 %v1637_v35, %v1623_v23  ;;  %v1548_v12 = vadd.f32 %v2204_v2, %v1451_v0  ;;  %v2143_v14 = vadd.f32 %v2142_v38, %v2141_v22  ;;  %v2206_v13 = vpop.f32.mrf.mxu1  ;;  %v2773_v2 = vld [vmem:[#allocation7_spill] sm:$0xff]  ;;  %v2776_v38 = vld [vmem:[#allocation10_spill] sm:$0xff] }
 0x15b   : > { %v2144_v15 = vpop.f32.mrf.mxu0  ;;  %v2207_v26 = vadd.f32 %v2206_v13, %v2205_v4  ;;  %v2774_v4 = vld [vmem:[#allocation9_spill] sm:$0xff] }
 0x15c   : > { %1586 = vst [vmem:[%s2664_s29 + $0x40] sm:$0xff] %v1548_v12  ;;  %v1601_v3 = vadd.f32 %v1600_v21, %v1548_v12  ;;  %v1624_v5 = vmul.f32 %v1548_v12, %v1548_v12  ;;  %v1454_v24 = vadd.f32 %v2143_v14, %v1357_v37  ;;  %v2208_v25 = vpop.f32.mrf.mxu1  ;;  %v2030_v1 = vadd.f32 %v2774_v4, %v2773_v2 }
 0x15d   : > { %v2145_v42 = vpop.f32.mrf.mxu0  ;;  %v2094_v37 = vadd.f32 %v2776_v38, %v2775_v36  ;;  %v1373_v12 = vadd.f32 %v2091_v32, %v2027_v50 }
 0x15e   : > { %v1639_v43 = vadd.f32 %v1638_v39, %v1624_v5  ;;  %v1551_v7 = vadd.f32 %v2207_v26, %v1454_v24  ;;  %v2146_v52 = vadd.f32 %v2145_v42, %v2144_v15  ;;  %v2209_v6 = vpop.f32.mrf.mxu1 }
 0x15f   : > { %v2147_v53 = vpop.f32.mrf.mxu0  ;;  %v2210_v10 = vadd.f32 %v2209_v6, %v2208_v25  ;;  %v1378_v42 = vadd.f32 %v2094_v37, %v2030_v1  ;;  %v2779_v6 = vld [vmem:[#allocation12_spill] sm:$0xff] }
 0x160   : > { %1587 = vst [vmem:[%s2664_s29 + $0x48] sm:$0xff] %v1551_v7  ;;  %v1602_v54 = vadd.f32 %v1601_v3, %v1551_v7  ;;  %v1625_v56 = vmul.f32 %v1551_v7, %v1551_v7  ;;  %v1459_v8 = vadd.f32 %v2146_v52, %v1362_v27  ;;  %v2211_v16 = vpop.f32.mrf.mxu1 }
 0x161   : > { %v2148_v28 = vpop.f32.mrf.mxu0 }
 0x162   : > { %v1640_v47 = vadd.f32 %v1639_v43, %v1625_v56  ;;  %v1556_v30 = vadd.f32 %v2210_v10, %v1459_v8  ;;  %v2149_v29 = vadd.f32 %v2148_v28, %v2147_v53  ;;  %v2212_v31 = vpop.f32.mrf.mxu1  ;;  %v2778_v43 = vld [vmem:[#allocation13_spill] sm:$0xff]  ;;  %v2097_v53 = vadd.f32 %v2650_v55, %v2779_v6 }
 0x163   : > { %v2150_v17 = vpop.f32.mrf.mxu0  ;;  %v2213_v11 = vadd.f32 %v2212_v31, %v2211_v16  ;;  %v2033_v7 = vadd.f32 %v2778_v43, %v2777_v41 }
 0x164   : > { %1588 = vst [vmem:[%s2664_s29 + $0x50] sm:$0xff] %v1556_v30  ;;  %v1603_v19 = vadd.f32 %v1602_v54, %v1556_v30  ;;  %v1626_v57 = vmul.f32 %v1556_v30, %v1556_v30  ;;  %v1462_v9 = vadd.f32 %v2149_v29, %v1365_v45  ;;  %v2214_v59 = vpop.f32.mrf.mxu1 }
 0x165   : > { %v2151_v51 = vpop.f32.mrf.mxu0  ;;  %v1381_v30 = vadd.f32 %v2097_v53, %v2033_v7 }
 0x166   : > { %v1641_v34 = vadd.f32 %v1640_v47, %v1626_v57  ;;  %v1559_v33 = vadd.f32 %v2213_v11, %v1462_v9  ;;  %v2152_v35 = vadd.f32 %v2151_v51, %v2150_v17  ;;  %v2215_v62 = vpop.f32.mrf.mxu1 }
 0x167   : > { %v2153_v63 = vpop.f32.mrf.mxu0  ;;  %v2216_v23 = vadd.f32 %v2215_v62, %v2214_v59 }
 0x168   : > { %1589 = vst [vmem:[%s2664_s29 + $0x58] sm:$0xff] %v1559_v33  ;;  %v1604_v20 = vadd.f32 %v1603_v19, %v1559_v33  ;;  %v1627_v22 = vmul.f32 %v1559_v33, %v1559_v33  ;;  %v1467_v21 = vadd.f32 %v2152_v35, %v1370_v61  ;;  %v2217_v0 = vpop.f32.mrf.mxu1 }
 0x169   : > { %v2154_v39 = vpop.f32.mrf.mxu0 }
 0x16a   : > { %v1642_v14 = vadd.f32 %v1641_v34, %v1627_v22  ;;  %v1564_v13 = vadd.f32 %v2216_v23, %v1467_v21  ;;  %v2155_v15 = vadd.f32 %v2154_v39, %v2153_v63  ;;  %v2218_v3 = vpop.f32.mrf.mxu1 }
 0x16b   : > { %v2156_v5 = vpop.f32.mrf.mxu0  ;;  %v2219_v27 = vadd.f32 %v2218_v3, %v2217_v0 }
 0x16c   : > { %1590 = vst [vmem:[%s2664_s29 + $0x60] sm:$0xff] %v1564_v13  ;;  %v1605_v24 = vadd.f32 %v1604_v20, %v1564_v13  ;;  %v1628_v26 = vmul.f32 %v1564_v13, %v1564_v13  ;;  %v1470_v25 = vadd.f32 %v2155_v15, %v1373_v12  ;;  %v2220_v40 = vpop.f32.mrf.mxu1 }
 0x16d   : > { %v2157_v52 = vpop.f32.mrf.mxu0 }
 0x16e   : > { %v1643_v54 = vadd.f32 %v1642_v14, %v1628_v26  ;;  %v1567_v56 = vadd.f32 %v2219_v27, %v1470_v25  ;;  %v2158_v8 = vadd.f32 %v2157_v52, %v2156_v5  ;;  %v2221_v10 = vpop.f32.mrf.mxu1 }
 0x16f   : > { %v2159_v16 = vpop.f32.mrf.mxu0  ;;  %v2222_v28 = vadd.f32 %v2221_v10, %v2220_v40 }
 0x170   : > { %1591 = vst [vmem:[%s2664_s29 + $0x68] sm:$0xff] %v1567_v56  ;;  %v1606_v18 = vadd.f32 %v1605_v24, %v1567_v56  ;;  %v1629_v44 = vmul.f32 %v1567_v56, %v1567_v56  ;;  %v1475_v46 = vadd.f32 %v2158_v8, %v1378_v42  ;;  %v2223_v45 = vpop.f32.mrf.mxu1 }
 0x171   : > { %v2160_v47 = vpop.f32.mrf.mxu0 }
 0x172   : > { %v1644_v29 = vadd.f32 %v1643_v54, %v1629_v44  ;;  %v1572_v31 = vadd.f32 %v2222_v28, %v1475_v46  ;;  %v2161_v17 = vadd.f32 %v2160_v47, %v2159_v16  ;;  %v2224_v19 = vpop.f32.mrf.mxu1 }
 0x173   : > { %v2225_v11 = vadd.f32 %v2224_v19, %v2223_v45 }
 0x174   : > { %1592 = vst [vmem:[%s2664_s29 + $0x70] sm:$0xff] %v1572_v31  ;;  %v1607_v55 = vadd.f32 %v1606_v18, %v1572_v31  ;;  %v1630_v57 = vmul.f32 %v1572_v31, %v1572_v31  ;;  %v1478_v9 = vadd.f32 %v2161_v17, %v1381_v30 }
 0x176   : > { %v1645_v59 = vadd.f32 %v1644_v29, %v1630_v57  ;;  %v1575_v61 = vadd.f32 %v2225_v11, %v1478_v9 }
 0x178   : > { %1593 = vst [vmem:[%s2664_s29 + $0x78] sm:$0xff] %v1575_v61  ;;  %v1608_v58 = vadd.f32 %v1607_v55, %v1575_v61  ;;  %v1631_v48 = vmul.f32 %v1575_v61, %v1575_v61 }
 0x17a   : > { %v1609_v50 = vrot.slane %v1608_v58, 4  ;;  %v1646_v51 = vadd.f32 %v1645_v59, %v1631_v48 }
 0x17c   : > { %v1610_v49 = vadd.f32 %v1609_v50, %v1608_v58  ;;  %v1647_v60 = vrot.slane %v1646_v51, 4 }
 0x17e   : > { %v1611_v32 = vrot.slane %v1610_v49, 2  ;;  %v1648_v34 = vadd.f32 %v1647_v60, %v1646_v51 }
 0x180   : > { %v1612_v33 = vadd.f32 %v1611_v32, %v1610_v49  ;;  %v1649_v35 = vrot.slane %v1648_v34, 2 }
 0x182   : > { %v1613_v62 = vrot.slane %v1612_v33, 1  ;;  %v1650_v63 = vadd.f32 %v1649_v35, %v1648_v34 }
 0x184   : > { %v1614_v20 = vadd.f32 %v1613_v62, %v1612_v33  ;;  %v1651_v22 = vrot.slane %v1650_v63, 1 }
 0x186   : > { %1615 = vst [vmem:[%s286_s6] sm:$0x1] %v1614_v20  ;;  %v1652_v21 = vadd.f32 %v1651_v22, %v1650_v63 }
 0x188   : > { %1653 = vst [vmem:[%s292_s9] sm:$0x1] %v1652_v21 }
 0x189 PF: > { %s15_s17 = sadd.s32 1, %s2336_s17   ;;  %s2780_s15 = smov %s2332_s16 }
 0x18a   : > { %p12_p5 = scmp.ge.s32.totalorder %s15_s17, 6   ;;  %s2781_s16 = smov %s2783_s18 }
 0x18c   :  { %14 = sbr.rel (!%p12_p5) target bundleno = 2 (0x2), region = 85 }

// kernel: generator_forward.8
= control target key start
LH: loop header
LB: loop body
LE: loop exit
PB: predicated region body
PF: predicated region fallthrough
CT: control target
= control target key end

     0   :  { %s2811_s15 = smov 0   ;;  %s2813_s16 = smov 0   ;;  %s3260_s0 = inlined_call_operand.vmem [shape: bf16[4,512,512], index: 0, kind: input, shape index: {}]   ;;  %s3261_s1 = inlined_call_operand.vmem [shape: bf16[4,512,128], index: 1, kind: input, shape index: {}]   ;;  %s3262_s2 = inlined_call_operand.vmem [shape: f32[4,512,128], index: 2, kind: output, shape index: {0}]   ;;  %s3263_s3 = inlined_call_operand.vmem [shape: f32[4,1,1,128], index: 3, kind: output, shape index: {1}]   ;;  %s3264_s4 = inlined_call_operand.vmem [shape: f32[4,1,1,128], index: 4, kind: output, shape index: {2}]  }
   0x1   :  { %s2815_s17 = smov 0  }
   0x2 LB: > { %s27_s18 = sadd.s32 1, %s2779_s16  ;;  %p2340_p0 = scmp.ge.s32.totalorder %s2783_s17, 1  ;;  %s2783_s17 = sphi %s2815_s17, %s15_s17   ;;  %s2779_s16 = sphi %s2813_s16, %s3266_s16   ;;  %s2775_s15 = sphi %s2811_s15, %s3265_s15  }
   0x3   : > { %p29_p1 = scmp.ge.s32.totalorder %s27_s18, 4  ;;  %p203_p2 = scmp.lt.s32.totalorder %s2783_s17, 5 }
   0x5   : > { %s3268_s18 = smov (%p29_p1, %s27_s18), 0  ;;  %p204_p3 = pnand %p2340_p0, %p203_p2 }
   0x6   : > { %p256_p4 = scmp.lt.s32.totalorder (!%p204_p3), %s2775_s15, 3 }
   0x7   : > { %207 = sbr.rel (%p204_p3) target bundleno = 544 (0x220), region = 28 }
   0xc   : > { %v2785_v0 = vmov 0   ;;  %s3270_s15 = smov (!%p256_p4, %s2775_s15), 3 }
   0xd   : > { %1318 = vmatprep.subr.bf16.mxu0 %v2785_v0  ;;  %1607 = vmatprep.subr.bf16.mxu1 %v2785_v0  ;;  %s2510_s19 = sshll.u32 %s3270_s15, 8  ;;  %s2509_s23 = sshll.u32 %s3270_s15, 10 }
   0xe   : > { %s2837_s22 = scalar_lea.vmem %s3261_s1, %s2510_s19  ;;  %s2874_s26 = scalar_lea.vmem %s3260_s0, %s2509_s23 }
   0xf   : > { %v2537_v1 = vld [vmem:[%s2837_s22 + $0x38] sm:$0xff]   ;;  %v2539_v3 = vld [vmem:[%s2837_s22 + $0x30] sm:$0xff]   ;;  %v2541_v5 = vld [vmem:[%s2837_s22 + $0x28] sm:$0xff]   ;;  %s2511_s27 = sshll.u32 %s3270_s15, 9  ;;  %s286_s7 = scalar_lea.vmem %s3263_s3, %s3270_s15 }
  0x10   : > { %v2538_v2 = vld [vmem:[%s2837_s22 + $0xb8] sm:$0xff]   ;;  %1319 = vmatpush1.bf16.msra.mxu0 %v2537_v1  ;;  %v2540_v4 = vld [vmem:[%s2837_s22 + $0xb0] sm:$0xff]   ;;  %v2542_v6 = vld [vmem:[%s2837_s22 + $0xa8] sm:$0xff]   ;;  %s3013_s30 = scalar_lea.vmem %s3262_s2, %s2511_s27  ;;  %s292_s10 = scalar_lea.vmem %s3264_s4, %s3270_s15 }
  0x11   : > { %1608 = vmatpush1.bf16.msra.mxu1 %v2538_v2  ;;  %1320 = vmatprep.subr.bf16.mxu0 %v2785_v0  ;;  %v2543_v7 = vld [vmem:[%s2837_s22 + $0x20] sm:$0xff]   ;;  %v2545_v9 = vld [vmem:[%s2837_s22 + $0x18] sm:$0xff]   ;;  %v2547_v11 = vld [vmem:[%s2837_s22 + $0x10] sm:$0xff]  }
  0x12   : > { %1609 = vmatprep.subr.bf16.mxu1 %v2785_v0  ;;  %v2544_v8 = vld [vmem:[%s2837_s22 + $0xa0] sm:$0xff]   ;;  %v2546_v10 = vld [vmem:[%s2837_s22 + $0x98] sm:$0xff]   ;;  %v2548_v12 = vld [vmem:[%s2837_s22 + $0x90] sm:$0xff]  }
  0x13   : > { %v2549_v13 = vld [vmem:[%s2837_s22 + $0x8] sm:$0xff]   ;;  %v2551_v15 = vld [vmem:[%s2837_s22] sm:$0xff]   ;;  %v2553_v17 = vld [vmem:[%s2837_s22 + $0x78] sm:$0xff]  }
  0x14   : > { %1321 = vmatpush1.bf16.msra.mxu0 %v2539_v3  ;;  %v2550_v14 = vld [vmem:[%s2837_s22 + $0x88] sm:$0xff]   ;;  %v2552_v16 = vld [vmem:[%s2837_s22 + $0x80] sm:$0xff]   ;;  %v2554_v18 = vld [vmem:[%s2837_s22 + $0xf8] sm:$0xff]  }
  0x15   : > { %1610 = vmatpush1.bf16.msra.mxu1 %v2540_v4  ;;  %1322 = vmatprep.subr.bf16.mxu0 %v2785_v0  ;;  %v2571_v19 = vld [vmem:[%s2874_s26 + $0x4] ss:$16 sps:$4 sm:$0xff]   ;;  %v2574_v21 = vld [vmem:[%s2874_s26 + $0xc] ss:$16 sps:$4 sm:$0xff]   ;;  %v2569_v35 = vld [vmem:[%s2874_s26] ss:$16 sps:$4 sm:$0xff]  }
  0x16   : > { %1611 = vmatprep.subr.bf16.mxu1 %v2785_v0  ;;  %v2555_v20 = vld [vmem:[%s2837_s22 + $0x70] sm:$0xff]   ;;  %1350 = vmatprep.mubr.bf16.mxu0 %v2571_v19  ;;  %v2557_v23 = vld [vmem:[%s2837_s22 + $0x68] sm:$0xff]   ;;  %v2559_v25 = vld [vmem:[%s2837_s22 + $0x60] sm:$0xff]  }
  0x17   : > { %v2556_v22 = vld [vmem:[%s2837_s22 + $0xf0] sm:$0xff]   ;;  %1639 = vmatprep.mubr.bf16.mxu1 %v2574_v21  ;;  %v2558_v24 = vld [vmem:[%s2837_s22 + $0xe8] sm:$0xff]   ;;  %v2560_v26 = vld [vmem:[%s2837_s22 + $0xe0] sm:$0xff]  }
  0x18   : > { %1323 = vmatpush1.bf16.msra.mxu0 %v2541_v5  ;;  %v2561_v27 = vld [vmem:[%s2837_s22 + $0x58] sm:$0xff]   ;;  %v2563_v29 = vld [vmem:[%s2837_s22 + $0x50] sm:$0xff]   ;;  %v2565_v31 = vld [vmem:[%s2837_s22 + $0x48] sm:$0xff]  }
  0x19   : > { %1612 = vmatpush1.bf16.msra.mxu1 %v2542_v6  ;;  %1324 = vmatprep.subr.bf16.mxu0 %v2785_v0  ;;  %v2562_v28 = vld [vmem:[%s2837_s22 + $0xd8] sm:$0xff]   ;;  %v2564_v30 = vld [vmem:[%s2837_s22 + $0xd0] sm:$0xff]   ;;  %v2566_v32 = vld [vmem:[%s2837_s22 + $0xc8] sm:$0xff]  }
  0x1a   : > { %1613 = vmatprep.subr.bf16.mxu1 %v2785_v0  ;;  %v2567_v33 = vld [vmem:[%s2837_s22 + $0x40] sm:$0xff]   ;;  %v2572_v36 = vld [vmem:[%s2874_s26 + $0x8] ss:$16 sps:$4 sm:$0xff]   ;;  %v2577_v38 = vld [vmem:[%s2874_s26 + $0x2c] ss:$16 sps:$4 sm:$0xff]  }
  0x1b   : > { %v2568_v34 = vld [vmem:[%s2837_s22 + $0xc0] sm:$0xff]   ;;  %v2580_v40 = vld [vmem:[%s2874_s26 + $0x28] ss:$16 sps:$4 sm:$0xff]   ;;  %v2583_v42 = vld [vmem:[%s2874_s26 + $0x4c] ss:$16 sps:$4 sm:$0xff]  }
  0x1c   : > { %1325 = vmatpush1.bf16.msra.mxu0 %v2543_v7  ;;  %v2575_v37 = vld [vmem:[%s2874_s26 + $0x24] ss:$16 sps:$4 sm:$0xff]   ;;  %v2579_v39 = vld [vmem:[%s2874_s26 + $0x20] ss:$16 sps:$4 sm:$0xff]   ;;  %v2586_v44 = vld [vmem:[%s2874_s26 + $0x48] ss:$16 sps:$4 sm:$0xff]  }
  0x1d   : > { %1614 = vmatpush1.bf16.msra.mxu1 %v2544_v8  ;;  %1326 = vmatprep.subr.bf16.mxu0 %v2785_v0  ;;  %v2581_v41 = vld [vmem:[%s2874_s26 + $0x44] ss:$16 sps:$4 sm:$0xff]   ;;  %v2585_v43 = vld [vmem:[%s2874_s26 + $0x40] ss:$16 sps:$4 sm:$0xff]   ;;  %v2589_v46 = vld [vmem:[%s2874_s26 + $0x6c] ss:$16 sps:$4 sm:$0xff]  }
  0x1e   : > { %1615 = vmatprep.subr.bf16.mxu1 %v2785_v0  ;;  %v2587_v45 = vld [vmem:[%s2874_s26 + $0x64] ss:$16 sps:$4 sm:$0xff]   ;;  %v2591_v47 = vld [vmem:[%s2874_s26 + $0x60] ss:$16 sps:$4 sm:$0xff]   ;;  %v2592_v48 = vld [vmem:[%s2874_s26 + $0x68] ss:$16 sps:$4 sm:$0xff]  }
  0x1f   : > { %v2593_v49 = vld [vmem:[%s2874_s26 + $0x84] ss:$16 sps:$4 sm:$0xff]   ;;  %v2595_v50 = vld [vmem:[%s2874_s26 + $0x8c] ss:$16 sps:$4 sm:$0xff]   ;;  %v2597_v51 = vld [vmem:[%s2874_s26 + $0x80] ss:$16 sps:$4 sm:$0xff]  }
  0x20   : > { %1327 = vmatpush1.bf16.msra.mxu0 %v2545_v9  ;;  %v2598_v52 = vld [vmem:[%s2874_s26 + $0x88] ss:$16 sps:$4 sm:$0xff]   ;;  %v2599_v53 = vld [vmem:[%s2874_s26 + $0xa4] ss:$16 sps:$4 sm:$0xff]   ;;  %v2601_v54 = vld [vmem:[%s2874_s26 + $0xac] ss:$16 sps:$4 sm:$0xff]  }
  0x21   : > { %1616 = vmatpush1.bf16.msra.mxu1 %v2546_v10  ;;  %1328 = vmatprep.subr.bf16.mxu0 %v2785_v0  ;;  %v2603_v55 = vld [vmem:[%s2874_s26 + $0xa0] ss:$16 sps:$4 sm:$0xff]   ;;  %v2604_v56 = vld [vmem:[%s2874_s26 + $0xa8] ss:$16 sps:$4 sm:$0xff]   ;;  %v2605_v57 = vld [vmem:[%s2874_s26 + $0xc4] ss:$16 sps:$4 sm:$0xff]  }
  0x22   : > { %1617 = vmatprep.subr.bf16.mxu1 %v2785_v0  ;;  %v2607_v58 = vld [vmem:[%s2874_s26 + $0xcc] ss:$16 sps:$4 sm:$0xff]   ;;  %v2609_v59 = vld [vmem:[%s2874_s26 + $0xc0] ss:$16 sps:$4 sm:$0xff]   ;;  %v2610_v60 = vld [vmem:[%s2874_s26 + $0xc8] ss:$16 sps:$4 sm:$0xff]  }
  0x23   : > { %v2611_v61 = vld [vmem:[%s2874_s26 + $0xe4] ss:$16 sps:$4 sm:$0xff]   ;;  %v2613_v62 = vld [vmem:[%s2874_s26 + $0xec] ss:$16 sps:$4 sm:$0xff]   ;;  %v2615_v63 = vld [vmem:[%s2874_s26 + $0xe0] ss:$16 sps:$4 sm:$0xff]  }
  0x24   : > { %1329 = vmatpush1.bf16.msra.mxu0 %v2547_v11  ;;  %v2617_v1 = vld [vmem:[%s2874_s26 + $0x104] ss:$16 sps:$4 sm:$0xff]   ;;  %v2619_v2 = vld [vmem:[%s2874_s26 + $0x10c] ss:$16 sps:$4 sm:$0xff]   ;;  %v2621_v3 = vld [vmem:[%s2874_s26 + $0x100] ss:$16 sps:$4 sm:$0xff]  }
  0x25   : > { %1618 = vmatpush1.bf16.msra.mxu1 %v2548_v12  ;;  %1330 = vmatprep.subr.bf16.mxu0 %v2785_v0  ;;  %v2622_v4 = vld [vmem:[%s2874_s26 + $0x108] ss:$16 sps:$4 sm:$0xff]   ;;  %v2623_v5 = vld [vmem:[%s2874_s26 + $0x124] ss:$16 sps:$4 sm:$0xff]   ;;  %v2625_v6 = vld [vmem:[%s2874_s26 + $0x12c] ss:$16 sps:$4 sm:$0xff]  }
  0x26   : > { %1619 = vmatprep.subr.bf16.mxu1 %v2785_v0  ;;  %v2627_v7 = vld [vmem:[%s2874_s26 + $0x120] ss:$16 sps:$4 sm:$0xff]   ;;  %v2628_v8 = vld [vmem:[%s2874_s26 + $0x128] ss:$16 sps:$4 sm:$0xff]   ;;  %v2629_v9 = vld [vmem:[%s2874_s26 + $0x144] ss:$16 sps:$4 sm:$0xff]  }
  0x27   : > { %v2631_v10 = vld [vmem:[%s2874_s26 + $0x14c] ss:$16 sps:$4 sm:$0xff]   ;;  %v2633_v11 = vld [vmem:[%s2874_s26 + $0x140] ss:$16 sps:$4 sm:$0xff]   ;;  %v2634_v12 = vld [vmem:[%s2874_s26 + $0x148] ss:$16 sps:$4 sm:$0xff]  }
  0x28   : > { %1331 = vmatpush1.bf16.msra.mxu0 %v2549_v13  ;;  %v2635_v13 = vld [vmem:[%s2874_s26 + $0x164] ss:$16 sps:$4 sm:$0xff]   ;;  %v2645_v19 = vld [vmem:[%s2874_s26 + $0x180] ss:$16 sps:$4 sm:$0xff]  }
  0x29   : > { %1620 = vmatpush1.bf16.msra.mxu1 %v2550_v14  ;;  %1332 = vmatprep.subr.bf16.mxu0 %v2785_v0  ;;  %v2637_v14 = vld [vmem:[%s2874_s26 + $0x16c] ss:$16 sps:$4 sm:$0xff]   ;;  %v2647_v21 = vld [vmem:[%s2874_s26 + $0x1a4] ss:$16 sps:$4 sm:$0xff]  }
  0x2a   : > { %1621 = vmatprep.subr.bf16.mxu1 %v2785_v0 }
  0x2c   : > { %1333 = vmatpush1.bf16.msra.mxu0 %v2551_v15  ;;  %v2639_v15 = vld [vmem:[%s2874_s26 + $0x160] ss:$16 sps:$4 sm:$0xff]  }
  0x2d   : > { %1622 = vmatpush1.bf16.msra.mxu1 %v2552_v16  ;;  %1334 = vmatprep.subr.bf16.mxu0 %v2785_v0  ;;  %v2640_v16 = vld [vmem:[%s2874_s26 + $0x168] ss:$16 sps:$4 sm:$0xff]  }
  0x2e   : > { %1623 = vmatprep.subr.bf16.mxu1 %v2785_v0 }
  0x30   : > { %1335 = vmatpush2.bf16.msra.mxu0 %v2553_v17  ;;  %v2641_v17 = vld [vmem:[%s2874_s26 + $0x184] ss:$16 sps:$4 sm:$0xff]  }
  0x31   : > { %1624 = vmatpush2.bf16.msra.mxu1 %v2554_v18  ;;  %1336 = vmatprep.subr.bf16.mxu0 %v2785_v0  ;;  %v2643_v18 = vld [vmem:[%s2874_s26 + $0x18c] ss:$16 sps:$4 sm:$0xff]  }
  0x32   : > { %1625 = vmatprep.subr.bf16.mxu1 %v2785_v0 }
  0x34   : > { %1337 = vmatpush2.bf16.msra.mxu0 %v2555_v20  ;;  %v2646_v20 = vld [vmem:[%s2874_s26 + $0x188] ss:$16 sps:$4 sm:$0xff]  }
  0x35   : > { %1626 = vmatpush2.bf16.msra.mxu1 %v2556_v22  ;;  %1338 = vmatprep.subr.bf16.mxu0 %v2785_v0  ;;  %v2649_v22 = vld [vmem:[%s2874_s26 + $0x1ac] ss:$16 sps:$4 sm:$0xff]  }
  0x36   : > { %1627 = vmatprep.subr.bf16.mxu1 %v2785_v0 }
  0x38   : > { %1339 = vmatpush2.bf16.msra.mxu0 %v2557_v23  ;;  %v2651_v23 = vld [vmem:[%s2874_s26 + $0x1a0] ss:$16 sps:$4 sm:$0xff]  }
  0x39   : > { %1628 = vmatpush2.bf16.msra.mxu1 %v2558_v24  ;;  %1340 = vmatprep.subr.bf16.mxu0 %v2785_v0  ;;  %v2652_v24 = vld [vmem:[%s2874_s26 + $0x1a8] ss:$16 sps:$4 sm:$0xff]  }
  0x3a   : > { %1629 = vmatprep.subr.bf16.mxu1 %v2785_v0 }
  0x3c   : > { %1341 = vmatpush2.bf16.msra.mxu0 %v2559_v25  ;;  %v2653_v25 = vld [vmem:[%s2874_s26 + $0x1c4] ss:$16 sps:$4 sm:$0xff]  }
  0x3d   : > { %1630 = vmatpush2.bf16.msra.mxu1 %v2560_v26  ;;  %1342 = vmatprep.subr.bf16.mxu0 %v2785_v0  ;;  %v2655_v26 = vld [vmem:[%s2874_s26 + $0x1cc] ss:$16 sps:$4 sm:$0xff]  }
  0x3e   : > { %1631 = vmatprep.subr.bf16.mxu1 %v2785_v0 }
  0x40   : > { %1343 = vmatpush2.bf16.msra.mxu0 %v2561_v27  ;;  %v2657_v27 = vld [vmem:[%s2874_s26 + $0x1c0] ss:$16 sps:$4 sm:$0xff]  }
  0x41   : > { %1632 = vmatpush2.bf16.msra.mxu1 %v2562_v28  ;;  %1344 = vmatprep.subr.bf16.mxu0 %v2785_v0  ;;  %v2658_v28 = vld [vmem:[%s2874_s26 + $0x1c8] ss:$16 sps:$4 sm:$0xff]  }
  0x42   : > { %1633 = vmatprep.subr.bf16.mxu1 %v2785_v0 }
  0x44   : > { %1345 = vmatpush2.bf16.msra.mxu0 %v2563_v29  ;;  %v2659_v29 = vld [vmem:[%s2874_s26 + $0x1e4] ss:$16 sps:$4 sm:$0xff]  }
  0x45   : > { %1634 = vmatpush2.bf16.msra.mxu1 %v2564_v30  ;;  %1346 = vmatprep.subr.bf16.mxu0 %v2785_v0  ;;  %v2661_v30 = vld [vmem:[%s2874_s26 + $0x1ec] ss:$16 sps:$4 sm:$0xff]  }
  0x46   : > { %1635 = vmatprep.subr.bf16.mxu1 %v2785_v0 }
  0x48   : > { %1347 = vmatpush2.bf16.msra.mxu0 %v2565_v31  ;;  %v2663_v31 = vld [vmem:[%s2874_s26 + $0x1e0] ss:$16 sps:$4 sm:$0xff]  }
  0x49   : > { %1636 = vmatpush2.bf16.msra.mxu1 %v2566_v32  ;;  %1348 = vmatprep.subr.bf16.mxu0 %v2785_v0  ;;  %v2664_v32 = vld [vmem:[%s2874_s26 + $0x1e8] ss:$16 sps:$4 sm:$0xff]  }
  0x4a   : > { %1637 = vmatprep.subr.bf16.mxu1 %v2785_v0  ;;  %v2616_v0 = vld [vmem:[%s2874_s26 + $0xe8] ss:$16 sps:$4 sm:$0xff]  }
  0x4c   : > { %1349 = vmatpush2.bf16.msra.mxu0 %v2567_v33  ;;  %v2665_v33 = vld [vmem:[%s2874_s26 + $0x204] ss:$16 sps:$4 sm:$0xff]  }
  0x4d   : > { %1638 = vmatpush2.bf16.msra.mxu1 %v2568_v34  ;;  %v2667_v34 = vld [vmem:[%s2874_s26 + $0x20c] ss:$16 sps:$4 sm:$0xff]  }
  0x4f   : > { %1351 = vmatmul.mubr.bf16.vlgmr.msra.gmra.mxu0 %v2569_v35  ;;  %v2669_v35 = vld [vmem:[%s2874_s26 + $0x200] ss:$16 sps:$4 sm:$0xff]  }
  0x50   : > { %1640 = vmatmul.mubr.bf16.vlgmr.msra.gmra.mxu1 %v2572_v36  ;;  %1358 = vmatprep.mubr.bf16.mxu0 %v2575_v37  ;;  %v2670_v36 = vld [vmem:[%s2874_s26 + $0x208] ss:$16 sps:$4 sm:$0xff]   ;;  %v2671_v37 = vld [vmem:[%s2874_s26 + $0x224] ss:$16 sps:$4 sm:$0xff]  }
  0x51   : > { %1647 = vmatprep.mubr.bf16.mxu1 %v2577_v38  ;;  %v2673_v38 = vld [vmem:[%s2874_s26 + $0x22c] ss:$16 sps:$4 sm:$0xff]  }
  0x57   : > { %1359 = vmatmul.mubr.bf16.gmra.mxu0 %v2579_v39  ;;  %v2675_v39 = vld [vmem:[%s2874_s26 + $0x220] ss:$16 sps:$4 sm:$0xff]  }
  0x58   : > { %1648 = vmatmul.mubr.bf16.gmra.mxu1 %v2580_v40  ;;  %1366 = vmatprep.mubr.bf16.mxu0 %v2581_v41  ;;  %v2676_v40 = vld [vmem:[%s2874_s26 + $0x228] ss:$16 sps:$4 sm:$0xff]   ;;  %v2677_v41 = vld [vmem:[%s2874_s26 + $0x244] ss:$16 sps:$4 sm:$0xff]  }
  0x59   : > { %1655 = vmatprep.mubr.bf16.mxu1 %v2583_v42  ;;  %v2679_v42 = vld [vmem:[%s2874_s26 + $0x24c] ss:$16 sps:$4 sm:$0xff]  }
  0x5f   : > { %1367 = vmatmul.mubr.bf16.gmra.mxu0 %v2585_v43  ;;  %v2681_v43 = vld [vmem:[%s2874_s26 + $0x240] ss:$16 sps:$4 sm:$0xff]  }
  0x60   : > { %1656 = vmatmul.mubr.bf16.gmra.mxu1 %v2586_v44  ;;  %1374 = vmatprep.mubr.bf16.mxu0 %v2587_v45  ;;  %v2682_v44 = vld [vmem:[%s2874_s26 + $0x248] ss:$16 sps:$4 sm:$0xff]   ;;  %v2683_v45 = vld [vmem:[%s2874_s26 + $0x264] ss:$16 sps:$4 sm:$0xff]  }
  0x61   : > { %1663 = vmatprep.mubr.bf16.mxu1 %v2589_v46  ;;  %v2685_v46 = vld [vmem:[%s2874_s26 + $0x26c] ss:$16 sps:$4 sm:$0xff]  }
  0x67   : > { %1375 = vmatmul.mubr.bf16.gmra.mxu0 %v2591_v47  ;;  %v2687_v47 = vld [vmem:[%s2874_s26 + $0x260] ss:$16 sps:$4 sm:$0xff]  }
  0x68   : > { %1664 = vmatmul.mubr.bf16.gmra.mxu1 %v2592_v48  ;;  %1382 = vmatprep.mubr.bf16.mxu0 %v2593_v49  ;;  %v2688_v48 = vld [vmem:[%s2874_s26 + $0x268] ss:$16 sps:$4 sm:$0xff]   ;;  %v2689_v49 = vld [vmem:[%s2874_s26 + $0x284] ss:$16 sps:$4 sm:$0xff]  }
  0x69   : > { %1671 = vmatprep.mubr.bf16.mxu1 %v2595_v50  ;;  %v2691_v50 = vld [vmem:[%s2874_s26 + $0x28c] ss:$16 sps:$4 sm:$0xff]  }
  0x6f   : > { %1383 = vmatmul.mubr.bf16.gmra.mxu0 %v2597_v51  ;;  %v2693_v51 = vld [vmem:[%s2874_s26 + $0x280] ss:$16 sps:$4 sm:$0xff]  }
  0x70   : > { %1672 = vmatmul.mubr.bf16.gmra.mxu1 %v2598_v52  ;;  %1390 = vmatprep.mubr.bf16.mxu0 %v2599_v53  ;;  %v2694_v52 = vld [vmem:[%s2874_s26 + $0x288] ss:$16 sps:$4 sm:$0xff]   ;;  %v2695_v53 = vld [vmem:[%s2874_s26 + $0x2a4] ss:$16 sps:$4 sm:$0xff]  }
  0x71   : > { %1679 = vmatprep.mubr.bf16.mxu1 %v2601_v54  ;;  %v2697_v54 = vld [vmem:[%s2874_s26 + $0x2ac] ss:$16 sps:$4 sm:$0xff]  }
  0x77   : > { %1391 = vmatmul.mubr.bf16.gmra.mxu0 %v2603_v55  ;;  %v2699_v55 = vld [vmem:[%s2874_s26 + $0x2a0] ss:$16 sps:$4 sm:$0xff]  }
  0x78   : > { %1680 = vmatmul.mubr.bf16.gmra.mxu1 %v2604_v56  ;;  %1398 = vmatprep.mubr.bf16.mxu0 %v2605_v57  ;;  %v2700_v56 = vld [vmem:[%s2874_s26 + $0x2a8] ss:$16 sps:$4 sm:$0xff]   ;;  %v2701_v57 = vld [vmem:[%s2874_s26 + $0x2c4] ss:$16 sps:$4 sm:$0xff]  }
  0x79   : > { %1687 = vmatprep.mubr.bf16.mxu1 %v2607_v58  ;;  %v2703_v58 = vld [vmem:[%s2874_s26 + $0x2cc] ss:$16 sps:$4 sm:$0xff]  }
  0x7f   : > { %1399 = vmatmul.mubr.bf16.gmra.mxu0 %v2609_v59  ;;  %v2705_v59 = vld [vmem:[%s2874_s26 + $0x2c0] ss:$16 sps:$4 sm:$0xff]  }
  0x80   : > { %1688 = vmatmul.mubr.bf16.gmra.mxu1 %v2610_v60  ;;  %1406 = vmatprep.mubr.bf16.mxu0 %v2611_v61  ;;  %v2706_v60 = vld [vmem:[%s2874_s26 + $0x2c8] ss:$16 sps:$4 sm:$0xff]   ;;  %v2707_v61 = vld [vmem:[%s2874_s26 + $0x2e4] ss:$16 sps:$4 sm:$0xff]  }
  0x81   : > { %1695 = vmatprep.mubr.bf16.mxu1 %v2613_v62  ;;  %v2709_v62 = vld [vmem:[%s2874_s26 + $0x2ec] ss:$16 sps:$4 sm:$0xff]  }
  0x87   : > { %1407 = vmatmul.mubr.bf16.gmra.mxu0 %v2615_v63  ;;  %v2711_v63 = vld [vmem:[%s2874_s26 + $0x2e0] ss:$16 sps:$4 sm:$0xff]  }
  0x88   : > { %1696 = vmatmul.mubr.bf16.gmra.mxu1 %v2616_v0  ;;  %1414 = vmatprep.mubr.bf16.mxu0 %v2617_v1  ;;  %v2712_v0 = vld [vmem:[%s2874_s26 + $0x2e8] ss:$16 sps:$4 sm:$0xff]   ;;  %v2713_v1 = vld [vmem:[%s2874_s26 + $0x304] ss:$16 sps:$4 sm:$0xff]  }
  0x89   : > { %1703 = vmatprep.mubr.bf16.mxu1 %v2619_v2  ;;  %v2715_v2 = vld [vmem:[%s2874_s26 + $0x30c] ss:$16 sps:$4 sm:$0xff]  }
  0x8f   : > { %1415 = vmatmul.mubr.bf16.gmra.mxu0 %v2621_v3  ;;  %v2717_v3 = vld [vmem:[%s2874_s26 + $0x300] ss:$16 sps:$4 sm:$0xff]  }
  0x90   : > { %1704 = vmatmul.mubr.bf16.gmra.mxu1 %v2622_v4  ;;  %1422 = vmatprep.mubr.bf16.mxu0 %v2623_v5  ;;  %v2718_v4 = vld [vmem:[%s2874_s26 + $0x308] ss:$16 sps:$4 sm:$0xff]   ;;  %v2719_v5 = vld [vmem:[%s2874_s26 + $0x324] ss:$16 sps:$4 sm:$0xff]  }
  0x91   : > { %1711 = vmatprep.mubr.bf16.mxu1 %v2625_v6  ;;  %v2721_v6 = vld [vmem:[%s2874_s26 + $0x32c] ss:$16 sps:$4 sm:$0xff]  }
  0x97   : > { %1423 = vmatmul.mubr.bf16.gmra.mxu0 %v2627_v7 }
  0x98   : > { %1712 = vmatmul.mubr.bf16.gmra.mxu1 %v2628_v8  ;;  %1430 = vmatprep.mubr.bf16.mxu0 %v2629_v9 }
  0x99   : > { %1719 = vmatprep.mubr.bf16.mxu1 %v2631_v10 }
  0x9f   : > { %1431 = vmatmul.mubr.bf16.gmra.mxu0 %v2633_v11 }
  0xa0   : > { %1720 = vmatmul.mubr.bf16.gmra.mxu1 %v2634_v12  ;;  %1438 = vmatprep.mubr.bf16.mxu0 %v2635_v13  ;;  %v2723_v13 = vld [vmem:[%s2874_s26 + $0x320] ss:$16 sps:$4 sm:$0xff]  }
  0xa1   : > { %1727 = vmatprep.mubr.bf16.mxu1 %v2637_v14 }
  0xa7   : > { %1439 = vmatmul.mubr.bf16.gmra.mxu0 %v2639_v15  ;;  %v2724_v15 = vld [vmem:[%s2874_s26 + $0x328] ss:$16 sps:$4 sm:$0xff]  }
  0xa8   : > { %1728 = vmatmul.mubr.bf16.gmra.mxu1 %v2640_v16  ;;  %1446 = vmatprep.mubr.bf16.mxu0 %v2641_v17  ;;  %v2725_v16 = vld [vmem:[%s2874_s26 + $0x344] ss:$16 sps:$4 sm:$0xff]  }
  0xa9   : > { %1735 = vmatprep.mubr.bf16.mxu1 %v2643_v18 }
  0xaf   : > { %1447 = vmatmul.mubr.bf16.gmra.mxu0 %v2645_v19  ;;  %v2727_v19 = vld [vmem:[%s2874_s26 + $0x34c] ss:$16 sps:$4 sm:$0xff]  }
  0xb0   : > { %1736 = vmatmul.mubr.bf16.gmra.mxu1 %v2646_v20  ;;  %1454 = vmatprep.mubr.bf16.mxu0 %v2647_v21 }
  0xb1   : > { %1743 = vmatprep.mubr.bf16.mxu1 %v2649_v22 }
  0xb7   : > { %1455 = vmatmul.mubr.bf16.gmra.mxu0 %v2651_v23 }
  0xb8   : > { %1744 = vmatmul.mubr.bf16.gmra.mxu1 %v2652_v24  ;;  %1462 = vmatprep.mubr.bf16.mxu0 %v2653_v25 }
  0xb9   : > { %1751 = vmatprep.mubr.bf16.mxu1 %v2655_v26 }
  0xbf   : > { %1463 = vmatmul.mubr.bf16.gmra.mxu0 %v2657_v27 }
  0xc0   : > { %1752 = vmatmul.mubr.bf16.gmra.mxu1 %v2658_v28  ;;  %1470 = vmatprep.mubr.bf16.mxu0 %v2659_v29 }
  0xc1   : > { %1759 = vmatprep.mubr.bf16.mxu1 %v2661_v30 }
  0xc7   : > { %1471 = vmatmul.mubr.bf16.gmra.mxu0 %v2663_v31 }
  0xc8   : > { %1760 = vmatmul.mubr.bf16.gmra.mxu1 %v2664_v32  ;;  %1478 = vmatprep.mubr.bf16.mxu0 %v2665_v33  ;;  %v2729_v33 = vld [vmem:[%s2874_s26 + $0x340] ss:$16 sps:$4 sm:$0xff]  }
  0xc9   : > { %1767 = vmatprep.mubr.bf16.mxu1 %v2667_v34 }
  0xcf   : > { %1479 = vmatmul.mubr.bf16.gmra.mxu0 %v2669_v35  ;;  %v2730_v35 = vld [vmem:[%s2874_s26 + $0x348] ss:$16 sps:$4 sm:$0xff]  }
  0xd0   : > { %1768 = vmatmul.mubr.bf16.gmra.mxu1 %v2670_v36  ;;  %1486 = vmatprep.mubr.bf16.mxu0 %v2671_v37  ;;  %v2731_v36 = vld [vmem:[%s2874_s26 + $0x364] ss:$16 sps:$4 sm:$0xff]  }
  0xd1   : > { %1775 = vmatprep.mubr.bf16.mxu1 %v2673_v38 }
  0xd7   : > { %1487 = vmatmul.mubr.bf16.gmra.mxu0 %v2675_v39 }
  0xd8   : > { %1776 = vmatmul.mubr.bf16.gmra.mxu1 %v2676_v40  ;;  %1494 = vmatprep.mubr.bf16.mxu0 %v2677_v41  ;;  %v2733_v40 = vld [vmem:[%s2874_s26 + $0x36c] ss:$16 sps:$4 sm:$0xff]  }
  0xd9   : > { %1783 = vmatprep.mubr.bf16.mxu1 %v2679_v42 }
  0xdf   : > { %1495 = vmatmul.mubr.bf16.gmra.mxu0 %v2681_v43 }
  0xe0   : > { %1784 = vmatmul.mubr.bf16.gmra.mxu1 %v2682_v44  ;;  %1502 = vmatprep.mubr.bf16.mxu0 %v2683_v45 }
  0xe1   : > { %1791 = vmatprep.mubr.bf16.mxu1 %v2685_v46 }
  0xe7   : > { %1503 = vmatmul.mubr.bf16.gmra.mxu0 %v2687_v47 }
  0xe8   : > { %1792 = vmatmul.mubr.bf16.gmra.mxu1 %v2688_v48  ;;  %1510 = vmatprep.mubr.bf16.mxu0 %v2689_v49 }
  0xe9   : > { %1799 = vmatprep.mubr.bf16.mxu1 %v2691_v50 }
  0xef   : > { %1511 = vmatmul.mubr.bf16.gmra.mxu0 %v2693_v51 }
  0xf0   : > { %1800 = vmatmul.mubr.bf16.gmra.mxu1 %v2694_v52  ;;  %1518 = vmatprep.mubr.bf16.mxu0 %v2695_v53  ;;  %v2735_v53 = vld [vmem:[%s2874_s26 + $0x360] ss:$16 sps:$4 sm:$0xff]  }
  0xf1   : > { %1807 = vmatprep.mubr.bf16.mxu1 %v2697_v54 }
  0xf7   : > { %1519 = vmatmul.mubr.bf16.gmra.mxu0 %v2699_v55  ;;  %v2736_v55 = vld [vmem:[%s2874_s26 + $0x368] ss:$16 sps:$4 sm:$0xff]  }
  0xf8   : > { %1808 = vmatmul.mubr.bf16.gmra.mxu1 %v2700_v56  ;;  %1526 = vmatprep.mubr.bf16.mxu0 %v2701_v57  ;;  %v2739_v56 = vld [vmem:[%s2874_s26 + $0x384] ss:$16 sps:$4 sm:$0xff]  }
  0xf9   : > { %1815 = vmatprep.mubr.bf16.mxu1 %v2703_v58 }
  0xff   : > { %1527 = vmatmul.mubr.bf16.gmra.mxu0 %v2705_v59 }
 0x100   : > { %1816 = vmatmul.mubr.bf16.gmra.mxu1 %v2706_v60  ;;  %1534 = vmatprep.mubr.bf16.mxu0 %v2707_v61  ;;  %v2742_v60 = vld [vmem:[%s2874_s26 + $0x38c] ss:$16 sps:$4 sm:$0xff]  }
 0x101   : > { %1823 = vmatprep.mubr.bf16.mxu1 %v2709_v62 }
 0x107   : > { %1535 = vmatmul.mubr.bf16.gmra.mxu0 %v2711_v63 }
 0x108   : > { %1824 = vmatmul.mubr.bf16.gmra.mxu1 %v2712_v0  ;;  %1542 = vmatprep.mubr.bf16.mxu0 %v2713_v1 }
 0x109   : > { %1831 = vmatprep.mubr.bf16.mxu1 %v2715_v2 }
 0x10f   : > { %v1352_v7 = vpop.f32.mrf.mxu0  ;;  %1543 = vmatmul.mubr.bf16.gmra.mxu0 %v2717_v3 }
 0x110   : > { %v1641_v8 = vpop.f32.mrf.mxu1  ;;  %1832 = vmatmul.mubr.bf16.gmra.mxu1 %v2718_v4  ;;  %1550 = vmatprep.mubr.bf16.mxu0 %v2719_v5 }
 0x111   : > { %v1642_v9 = vadd.f32 %v1641_v8, %v1352_v7  ;;  %v1354_v10 = vpop.f32.mrf.mxu0  ;;  %1839 = vmatprep.mubr.bf16.mxu1 %v2721_v6 }
 0x112   : > { %v1643_v11 = vpop.f32.mrf.mxu1 }
 0x113   : > { %1896 = vst [vmem:[%s3013_s30] sm:$0xff] %v1642_v9  ;;  %v1355_v12 = vpop.f32.mrf.mxu0  ;;  %v2030_v21 = vmul.f32 %v1642_v9, %v1642_v9  ;;  %v2740_v11 = vld [vmem:[%s2874_s26 + $0x388] ss:$16 sps:$4 sm:$0xff]  }
 0x114   : > { %v1644_v14 = vpop.f32.mrf.mxu1 }
 0x115   : > { %v1645_v17 = vadd.f32 %v1644_v14, %v1355_v12  ;;  %v1357_v18 = vpop.f32.mrf.mxu0  ;;  %v2745_v12 = vld [vmem:[%s2874_s26 + $0x3a4] ss:$16 sps:$4 sm:$0xff]  }
 0x116   : > { %v1646_v20 = vpop.f32.mrf.mxu1 }
 0x117   : > { %1897 = vst [vmem:[%s3013_s30 + $0x8] sm:$0xff] %v1645_v17  ;;  %v1960_v22 = vadd.f32 %v1645_v17, %v1642_v9  ;;  %v2031_v23 = vmul.f32 %v1645_v17, %v1645_v17  ;;  %v1360_v24 = vpop.f32.mrf.mxu0  ;;  %1551 = vmatmul.mubr.bf16.gmra.mxu0 %v2723_v13  ;;  %v2737_v9 = vld [vmem:[%s2874_s26 + $0x380] ss:$16 sps:$4 sm:$0xff]  }
 0x118   : > { %v1649_v25 = vpop.f32.mrf.mxu1  ;;  %1840 = vmatmul.mubr.bf16.gmra.mxu1 %v2724_v15  ;;  %1558 = vmatprep.mubr.bf16.mxu0 %v2725_v16  ;;  %v2748_v16 = vld [vmem:[%s2874_s26 + $0x3ac] ss:$16 sps:$4 sm:$0xff]  }
 0x119   : > { %v2094_v26 = vadd.f32 %v2031_v23, %v2030_v21  ;;  %v1650_v27 = vadd.f32 %v1649_v25, %v1360_v24  ;;  %v1362_v28 = vpop.f32.mrf.mxu0  ;;  %1847 = vmatprep.mubr.bf16.mxu1 %v2727_v19 }
 0x11a   : > { %v1651_v29 = vpop.f32.mrf.mxu1 }
 0x11b   : > { %1898 = vst [vmem:[%s3013_s30 + $0x10] sm:$0xff] %v1650_v27  ;;  %v1961_v30 = vadd.f32 %v1960_v22, %v1650_v27  ;;  %v2032_v31 = vmul.f32 %v1650_v27, %v1650_v27  ;;  %v1363_v32 = vpop.f32.mrf.mxu0  ;;  %v2743_v29 = vld [vmem:[%s2874_s26 + $0x3a0] ss:$16 sps:$4 sm:$0xff]  }
 0x11c   : > { %v1652_v34 = vpop.f32.mrf.mxu1 }
 0x11d   : > { %v2095_v37 = vadd.f32 %v2094_v26, %v2032_v31  ;;  %v1653_v38 = vadd.f32 %v1652_v34, %v1363_v32  ;;  %v1365_v39 = vpop.f32.mrf.mxu0  ;;  %v2746_v31 = vld [vmem:[%s2874_s26 + $0x3a8] ss:$16 sps:$4 sm:$0xff]   ;;  %v2751_v32 = vld [vmem:[%s2874_s26 + $0x3c4] ss:$16 sps:$4 sm:$0xff]  }
 0x11e   : > { %v1654_v41 = vpop.f32.mrf.mxu1 }
 0x11f   : > { %1899 = vst [vmem:[%s3013_s30 + $0x18] sm:$0xff] %v1653_v38  ;;  %v1962_v42 = vadd.f32 %v1961_v30, %v1653_v38  ;;  %v2033_v43 = vmul.f32 %v1653_v38, %v1653_v38  ;;  %v1368_v44 = vpop.f32.mrf.mxu0  ;;  %1559 = vmatmul.mubr.bf16.gmra.mxu0 %v2729_v33 }
 0x120   : > { %v1657_v45 = vpop.f32.mrf.mxu1  ;;  %1848 = vmatmul.mubr.bf16.gmra.mxu1 %v2730_v35  ;;  %1566 = vmatprep.mubr.bf16.mxu0 %v2731_v36  ;;  %v2754_v36 = vld [vmem:[%s2874_s26 + $0x3cc] ss:$16 sps:$4 sm:$0xff]  }
 0x121   : > { %v2096_v46 = vadd.f32 %v2095_v37, %v2033_v43  ;;  %v1658_v47 = vadd.f32 %v1657_v45, %v1368_v44  ;;  %v1370_v48 = vpop.f32.mrf.mxu0  ;;  %1855 = vmatprep.mubr.bf16.mxu1 %v2733_v40 }
 0x122   : > { %v1659_v49 = vpop.f32.mrf.mxu1 }
 0x123   : > { %1900 = vst [vmem:[%s3013_s30 + $0x20] sm:$0xff] %v1658_v47  ;;  %v1963_v50 = vadd.f32 %v1962_v42, %v1658_v47  ;;  %v2034_v51 = vmul.f32 %v1658_v47, %v1658_v47  ;;  %v1371_v52 = vpop.f32.mrf.mxu0  ;;  %v2749_v49 = vld [vmem:[%s2874_s26 + $0x3c0] ss:$16 sps:$4 sm:$0xff]  }
 0x124   : > { %v1660_v54 = vpop.f32.mrf.mxu1 }
 0x125   : > { %v2097_v57 = vadd.f32 %v2096_v46, %v2034_v51  ;;  %v1661_v58 = vadd.f32 %v1660_v54, %v1371_v52  ;;  %v1373_v59 = vpop.f32.mrf.mxu0  ;;  %v2752_v51 = vld [vmem:[%s2874_s26 + $0x3c8] ss:$16 sps:$4 sm:$0xff]   ;;  %v2757_v52 = vld [vmem:[%s2874_s26 + $0x3e4] ss:$16 sps:$4 sm:$0xff]  }
 0x126   : > { %v1662_v61 = vpop.f32.mrf.mxu1 }
 0x127   : > { %1901 = vst [vmem:[%s3013_s30 + $0x28] sm:$0xff] %v1661_v58  ;;  %v1964_v62 = vadd.f32 %v1963_v50, %v1661_v58  ;;  %v2035_v63 = vmul.f32 %v1661_v58, %v1661_v58  ;;  %v1376_v0 = vpop.f32.mrf.mxu0  ;;  %1567 = vmatmul.mubr.bf16.gmra.mxu0 %v2735_v53 }
 0x128   : > { %v1665_v1 = vpop.f32.mrf.mxu1  ;;  %1856 = vmatmul.mubr.bf16.gmra.mxu1 %v2736_v55  ;;  %1574 = vmatprep.mubr.bf16.mxu0 %v2739_v56  ;;  %v2760_v56 = vld [vmem:[%s2874_s26 + $0x3ec] ss:$16 sps:$4 sm:$0xff]  }
 0x129   : > { %v2098_v2 = vadd.f32 %v2097_v57, %v2035_v63  ;;  %v1666_v3 = vadd.f32 %v1665_v1, %v1376_v0  ;;  %v1378_v4 = vpop.f32.mrf.mxu0  ;;  %1863 = vmatprep.mubr.bf16.mxu1 %v2742_v60 }
 0x12a   : > { %v1667_v5 = vpop.f32.mrf.mxu1 }
 0x12b   : > { %1902 = vst [vmem:[%s3013_s30 + $0x30] sm:$0xff] %v1666_v3  ;;  %v1965_v6 = vadd.f32 %v1964_v62, %v1666_v3  ;;  %v2036_v7 = vmul.f32 %v1666_v3, %v1666_v3  ;;  %v1379_v8 = vpop.f32.mrf.mxu0  ;;  %v2755_v5 = vld [vmem:[%s2874_s26 + $0x3e0] ss:$16 sps:$4 sm:$0xff]  }
 0x12c   : > { %v1668_v10 = vpop.f32.mrf.mxu1 }
 0x12d   : > { %v2099_v13 = vadd.f32 %v2098_v2, %v2036_v7  ;;  %v1669_v14 = vadd.f32 %v1668_v10, %v1379_v8  ;;  %v1381_v15 = vpop.f32.mrf.mxu0  ;;  %v2758_v7 = vld [vmem:[%s2874_s26 + $0x3e8] ss:$16 sps:$4 sm:$0xff]  }
 0x12e   : > { %v1670_v17 = vpop.f32.mrf.mxu1 }
 0x12f   : > { %1903 = vst [vmem:[%s3013_s30 + $0x38] sm:$0xff] %v1669_v14  ;;  %v1966_v18 = vadd.f32 %v1965_v6, %v1669_v14  ;;  %v2037_v19 = vmul.f32 %v1669_v14, %v1669_v14  ;;  %v1384_v20 = vpop.f32.mrf.mxu0  ;;  %1575 = vmatmul.mubr.bf16.gmra.mxu0 %v2737_v9 }
 0x130   : > { %v1673_v21 = vpop.f32.mrf.mxu1  ;;  %1864 = vmatmul.mubr.bf16.gmra.mxu1 %v2740_v11  ;;  %1582 = vmatprep.mubr.bf16.mxu0 %v2745_v12 }
 0x131   : > { %v2100_v22 = vadd.f32 %v2099_v13, %v2037_v19  ;;  %v1674_v23 = vadd.f32 %v1673_v21, %v1384_v20  ;;  %v1386_v24 = vpop.f32.mrf.mxu0  ;;  %1871 = vmatprep.mubr.bf16.mxu1 %v2748_v16 }
 0x132   : > { %v1675_v25 = vpop.f32.mrf.mxu1 }
 0x133   : > { %1904 = vst [vmem:[%s3013_s30 + $0x40] sm:$0xff] %v1674_v23  ;;  %v1967_v26 = vadd.f32 %v1966_v18, %v1674_v23  ;;  %v2038_v27 = vmul.f32 %v1674_v23, %v1674_v23  ;;  %v1387_v28 = vpop.f32.mrf.mxu0 }
 0x134   : > { %v1676_v30 = vpop.f32.mrf.mxu1 }
 0x135   : > { %v2101_v33 = vadd.f32 %v2100_v22, %v2038_v27  ;;  %v1677_v34 = vadd.f32 %v1676_v30, %v1387_v28  ;;  %v1389_v35 = vpop.f32.mrf.mxu0 }
 0x136   : > { %v1678_v37 = vpop.f32.mrf.mxu1 }
 0x137   : > { %1905 = vst [vmem:[%s3013_s30 + $0x48] sm:$0xff] %v1677_v34  ;;  %v1968_v38 = vadd.f32 %v1967_v26, %v1677_v34  ;;  %v2039_v39 = vmul.f32 %v1677_v34, %v1677_v34  ;;  %v1392_v40 = vpop.f32.mrf.mxu0  ;;  %1583 = vmatmul.mubr.bf16.gmra.mxu0 %v2743_v29 }
 0x138   : > { %v1681_v41 = vpop.f32.mrf.mxu1  ;;  %1872 = vmatmul.mubr.bf16.gmra.mxu1 %v2746_v31  ;;  %1590 = vmatprep.mubr.bf16.mxu0 %v2751_v32 }
 0x139   : > { %v2102_v42 = vadd.f32 %v2101_v33, %v2039_v39  ;;  %v1682_v43 = vadd.f32 %v1681_v41, %v1392_v40  ;;  %v1394_v44 = vpop.f32.mrf.mxu0  ;;  %1879 = vmatprep.mubr.bf16.mxu1 %v2754_v36 }
 0x13a   : > { %v1683_v45 = vpop.f32.mrf.mxu1 }
 0x13b   : > { %1906 = vst [vmem:[%s3013_s30 + $0x50] sm:$0xff] %v1682_v43  ;;  %v1969_v46 = vadd.f32 %v1968_v38, %v1682_v43  ;;  %v2040_v47 = vmul.f32 %v1682_v43, %v1682_v43  ;;  %v1395_v48 = vpop.f32.mrf.mxu0 }
 0x13c   : > { %v1684_v50 = vpop.f32.mrf.mxu1 }
 0x13d   : > { %v2103_v53 = vadd.f32 %v2102_v42, %v2040_v47  ;;  %v1685_v54 = vadd.f32 %v1684_v50, %v1395_v48  ;;  %v1397_v55 = vpop.f32.mrf.mxu0 }
 0x13e   : > { %v1686_v57 = vpop.f32.mrf.mxu1 }
 0x13f   : > { %1907 = vst [vmem:[%s3013_s30 + $0x58] sm:$0xff] %v1685_v54  ;;  %v1970_v58 = vadd.f32 %v1969_v46, %v1685_v54  ;;  %v2041_v59 = vmul.f32 %v1685_v54, %v1685_v54  ;;  %v1400_v60 = vpop.f32.mrf.mxu0  ;;  %1591 = vmatmul.mubr.bf16.gmra.mxu0 %v2749_v49 }
 0x140   : > { %v1689_v61 = vpop.f32.mrf.mxu1  ;;  %1880 = vmatmul.mubr.bf16.gmra.mxu1 %v2752_v51  ;;  %1598 = vmatprep.mubr.bf16.mxu0 %v2757_v52 }
 0x141   : > { %v2104_v62 = vadd.f32 %v2103_v53, %v2041_v59  ;;  %v1690_v63 = vadd.f32 %v1689_v61, %v1400_v60  ;;  %v1402_v0 = vpop.f32.mrf.mxu0  ;;  %1887 = vmatprep.mubr.bf16.mxu1 %v2760_v56 }
 0x142   : > { %v1691_v1 = vpop.f32.mrf.mxu1 }
 0x143   : > { %1908 = vst [vmem:[%s3013_s30 + $0x60] sm:$0xff] %v1690_v63  ;;  %v1971_v2 = vadd.f32 %v1970_v58, %v1690_v63  ;;  %v2042_v3 = vmul.f32 %v1690_v63, %v1690_v63  ;;  %v1403_v4 = vpop.f32.mrf.mxu0 }
 0x144   : > { %v1692_v6 = vpop.f32.mrf.mxu1 }
 0x145   : > { %v2105_v8 = vadd.f32 %v2104_v62, %v2042_v3  ;;  %v1693_v9 = vadd.f32 %v1692_v6, %v1403_v4  ;;  %v1405_v10 = vpop.f32.mrf.mxu0 }
 0x146   : > { %v1694_v11 = vpop.f32.mrf.mxu1 }
 0x147   : > { %1909 = vst [vmem:[%s3013_s30 + $0x68] sm:$0xff] %v1693_v9  ;;  %v1972_v12 = vadd.f32 %v1971_v2, %v1693_v9  ;;  %v2043_v13 = vmul.f32 %v1693_v9, %v1693_v9  ;;  %v1408_v14 = vpop.f32.mrf.mxu0  ;;  %1599 = vmatmul.mubr.bf16.gmra.mxu0 %v2755_v5 }
 0x148   : > { %v1697_v15 = vpop.f32.mrf.mxu1  ;;  %1888 = vmatmul.mubr.bf16.gmra.mxu1 %v2758_v7 }
 0x149   : > { %v2106_v16 = vadd.f32 %v2105_v8, %v2043_v13  ;;  %v1698_v17 = vadd.f32 %v1697_v15, %v1408_v14  ;;  %v1410_v18 = vpop.f32.mrf.mxu0 }
 0x14a   : > { %v1699_v19 = vpop.f32.mrf.mxu1 }
 0x14b   : > { %1910 = vst [vmem:[%s3013_s30 + $0x70] sm:$0xff] %v1698_v17  ;;  %v1973_v20 = vadd.f32 %v1972_v12, %v1698_v17  ;;  %v2044_v21 = vmul.f32 %v1698_v17, %v1698_v17  ;;  %v1411_v22 = vpop.f32.mrf.mxu0 }
 0x14c   : > { %v1700_v23 = vpop.f32.mrf.mxu1 }
 0x14d   : > { %v2107_v24 = vadd.f32 %v2106_v16, %v2044_v21  ;;  %v1701_v25 = vadd.f32 %v1700_v23, %v1411_v22  ;;  %v1413_v26 = vpop.f32.mrf.mxu0 }
 0x14e   : > { %v1702_v27 = vpop.f32.mrf.mxu1 }
 0x14f   : > { %1911 = vst [vmem:[%s3013_s30 + $0x78] sm:$0xff] %v1701_v25  ;;  %v1974_v28 = vadd.f32 %v1973_v20, %v1701_v25  ;;  %v2045_v29 = vmul.f32 %v1701_v25, %v1701_v25  ;;  %v1416_v30 = vpop.f32.mrf.mxu0 }
 0x150   : > { %v1705_v31 = vpop.f32.mrf.mxu1 }
 0x151   : > { %v2108_v32 = vadd.f32 %v2107_v24, %v2045_v29  ;;  %v1706_v33 = vadd.f32 %v1705_v31, %v1416_v30  ;;  %v1418_v34 = vpop.f32.mrf.mxu0 }
 0x152   : > { %v1707_v35 = vpop.f32.mrf.mxu1 }
 0x153   : > { %1912 = vst [vmem:[%s3013_s30 + $0x80] sm:$0xff] %v1706_v33  ;;  %v1975_v36 = vadd.f32 %v1974_v28, %v1706_v33  ;;  %v2046_v37 = vmul.f32 %v1706_v33, %v1706_v33  ;;  %v1419_v38 = vpop.f32.mrf.mxu0 }
 0x154   : > { %v1708_v39 = vpop.f32.mrf.mxu1 }
 0x155   : > { %v2109_v40 = vadd.f32 %v2108_v32, %v2046_v37  ;;  %v1709_v41 = vadd.f32 %v1708_v39, %v1419_v38  ;;  %v1421_v42 = vpop.f32.mrf.mxu0 }
 0x156   : > { %v1710_v43 = vpop.f32.mrf.mxu1 }
 0x157   : > { %1913 = vst [vmem:[%s3013_s30 + $0x88] sm:$0xff] %v1709_v41  ;;  %v1976_v44 = vadd.f32 %v1975_v36, %v1709_v41  ;;  %v2047_v45 = vmul.f32 %v1709_v41, %v1709_v41  ;;  %v1424_v46 = vpop.f32.mrf.mxu0 }
 0x158   : > { %v1713_v47 = vpop.f32.mrf.mxu1 }
 0x159   : > { %v2110_v48 = vadd.f32 %v2109_v40, %v2047_v45  ;;  %v1714_v49 = vadd.f32 %v1713_v47, %v1424_v46  ;;  %v1426_v50 = vpop.f32.mrf.mxu0 }
 0x15a   : > { %v1715_v51 = vpop.f32.mrf.mxu1 }
 0x15b   : > { %1914 = vst [vmem:[%s3013_s30 + $0x90] sm:$0xff] %v1714_v49  ;;  %v1977_v52 = vadd.f32 %v1976_v44, %v1714_v49  ;;  %v2048_v53 = vmul.f32 %v1714_v49, %v1714_v49  ;;  %v1427_v54 = vpop.f32.mrf.mxu0 }
 0x15c   : > { %v1716_v55 = vpop.f32.mrf.mxu1 }
 0x15d   : > { %v2111_v56 = vadd.f32 %v2110_v48, %v2048_v53  ;;  %v1717_v57 = vadd.f32 %v1716_v55, %v1427_v54  ;;  %v1429_v58 = vpop.f32.mrf.mxu0 }
 0x15e   : > { %v1718_v59 = vpop.f32.mrf.mxu1 }
 0x15f   : > { %1915 = vst [vmem:[%s3013_s30 + $0x98] sm:$0xff] %v1717_v57  ;;  %v1978_v60 = vadd.f32 %v1977_v52, %v1717_v57  ;;  %v2049_v61 = vmul.f32 %v1717_v57, %v1717_v57  ;;  %v1432_v62 = vpop.f32.mrf.mxu0 }
 0x160   : > { %v1721_v63 = vpop.f32.mrf.mxu1 }
 0x161   : > { %v2112_v0 = vadd.f32 %v2111_v56, %v2049_v61  ;;  %v1722_v1 = vadd.f32 %v1721_v63, %v1432_v62  ;;  %v1434_v2 = vpop.f32.mrf.mxu0 }
 0x162   : > { %v1723_v3 = vpop.f32.mrf.mxu1 }
 0x163   : > { %1916 = vst [vmem:[%s3013_s30 + $0xa0] sm:$0xff] %v1722_v1  ;;  %v1979_v4 = vadd.f32 %v1978_v60, %v1722_v1  ;;  %v2050_v5 = vmul.f32 %v1722_v1, %v1722_v1  ;;  %v1435_v6 = vpop.f32.mrf.mxu0 }
 0x164   : > { %v1724_v7 = vpop.f32.mrf.mxu1 }
 0x165   : > { %v2113_v8 = vadd.f32 %v2112_v0, %v2050_v5  ;;  %v1725_v9 = vadd.f32 %v1724_v7, %v1435_v6  ;;  %v1437_v10 = vpop.f32.mrf.mxu0 }
 0x166   : > { %v1726_v11 = vpop.f32.mrf.mxu1 }
 0x167   : > { %1917 = vst [vmem:[%s3013_s30 + $0xa8] sm:$0xff] %v1725_v9  ;;  %v1980_v12 = vadd.f32 %v1979_v4, %v1725_v9  ;;  %v2051_v13 = vmul.f32 %v1725_v9, %v1725_v9  ;;  %v1440_v14 = vpop.f32.mrf.mxu0 }
 0x168   : > { %v1729_v15 = vpop.f32.mrf.mxu1 }
 0x169   : > { %v2114_v16 = vadd.f32 %v2113_v8, %v2051_v13  ;;  %v1730_v17 = vadd.f32 %v1729_v15, %v1440_v14  ;;  %v1442_v18 = vpop.f32.mrf.mxu0 }
 0x16a   : > { %v1731_v19 = vpop.f32.mrf.mxu1 }
 0x16b   : > { %1918 = vst [vmem:[%s3013_s30 + $0xb0] sm:$0xff] %v1730_v17  ;;  %v1981_v20 = vadd.f32 %v1980_v12, %v1730_v17  ;;  %v2052_v21 = vmul.f32 %v1730_v17, %v1730_v17  ;;  %v1443_v22 = vpop.f32.mrf.mxu0 }
 0x16c   : > { %v1732_v23 = vpop.f32.mrf.mxu1 }
 0x16d   : > { %v2115_v24 = vadd.f32 %v2114_v16, %v2052_v21  ;;  %v1733_v25 = vadd.f32 %v1732_v23, %v1443_v22  ;;  %v1445_v26 = vpop.f32.mrf.mxu0 }
 0x16e   : > { %v1734_v27 = vpop.f32.mrf.mxu1 }
 0x16f   : > { %1919 = vst [vmem:[%s3013_s30 + $0xb8] sm:$0xff] %v1733_v25  ;;  %v1982_v28 = vadd.f32 %v1981_v20, %v1733_v25  ;;  %v2053_v29 = vmul.f32 %v1733_v25, %v1733_v25  ;;  %v1448_v30 = vpop.f32.mrf.mxu0 }
 0x170   : > { %v1737_v31 = vpop.f32.mrf.mxu1 }
 0x171   : > { %v2116_v32 = vadd.f32 %v2115_v24, %v2053_v29  ;;  %v1738_v33 = vadd.f32 %v1737_v31, %v1448_v30  ;;  %v1450_v34 = vpop.f32.mrf.mxu0 }
 0x172   : > { %v1739_v35 = vpop.f32.mrf.mxu1 }
 0x173   : > { %1920 = vst [vmem:[%s3013_s30 + $0xc0] sm:$0xff] %v1738_v33  ;;  %v1983_v36 = vadd.f32 %v1982_v28, %v1738_v33  ;;  %v2054_v37 = vmul.f32 %v1738_v33, %v1738_v33  ;;  %v1451_v38 = vpop.f32.mrf.mxu0 }
 0x174   : > { %v1740_v39 = vpop.f32.mrf.mxu1 }
 0x175   : > { %v2117_v40 = vadd.f32 %v2116_v32, %v2054_v37  ;;  %v1741_v41 = vadd.f32 %v1740_v39, %v1451_v38  ;;  %v1453_v42 = vpop.f32.mrf.mxu0 }
 0x176   : > { %v1742_v43 = vpop.f32.mrf.mxu1 }
 0x177   : > { %1921 = vst [vmem:[%s3013_s30 + $0xc8] sm:$0xff] %v1741_v41  ;;  %v1984_v44 = vadd.f32 %v1983_v36, %v1741_v41  ;;  %v2055_v45 = vmul.f32 %v1741_v41, %v1741_v41  ;;  %v1456_v46 = vpop.f32.mrf.mxu0 }
 0x178   : > { %v1745_v47 = vpop.f32.mrf.mxu1 }
 0x179   : > { %v2118_v48 = vadd.f32 %v2117_v40, %v2055_v45  ;;  %v1746_v49 = vadd.f32 %v1745_v47, %v1456_v46  ;;  %v1458_v50 = vpop.f32.mrf.mxu0 }
 0x17a   : > { %v1747_v51 = vpop.f32.mrf.mxu1 }
 0x17b   : > { %1922 = vst [vmem:[%s3013_s30 + $0xd0] sm:$0xff] %v1746_v49  ;;  %v1985_v52 = vadd.f32 %v1984_v44, %v1746_v49  ;;  %v2056_v53 = vmul.f32 %v1746_v49, %v1746_v49  ;;  %v1459_v54 = vpop.f32.mrf.mxu0 }
 0x17c   : > { %v1748_v55 = vpop.f32.mrf.mxu1 }
 0x17d   : > { %v2119_v56 = vadd.f32 %v2118_v48, %v2056_v53  ;;  %v1749_v57 = vadd.f32 %v1748_v55, %v1459_v54  ;;  %v1461_v58 = vpop.f32.mrf.mxu0 }
 0x17e   : > { %v1750_v59 = vpop.f32.mrf.mxu1 }
 0x17f   : > { %1923 = vst [vmem:[%s3013_s30 + $0xd8] sm:$0xff] %v1749_v57  ;;  %v1986_v60 = vadd.f32 %v1985_v52, %v1749_v57  ;;  %v2057_v61 = vmul.f32 %v1749_v57, %v1749_v57  ;;  %v1464_v62 = vpop.f32.mrf.mxu0 }
 0x180   : > { %v1753_v63 = vpop.f32.mrf.mxu1 }
 0x181   : > { %v2120_v0 = vadd.f32 %v2119_v56, %v2057_v61  ;;  %v1754_v1 = vadd.f32 %v1753_v63, %v1464_v62  ;;  %v1466_v2 = vpop.f32.mrf.mxu0 }
 0x182   : > { %v1755_v3 = vpop.f32.mrf.mxu1 }
 0x183   : > { %1924 = vst [vmem:[%s3013_s30 + $0xe0] sm:$0xff] %v1754_v1  ;;  %v1987_v4 = vadd.f32 %v1986_v60, %v1754_v1  ;;  %v2058_v5 = vmul.f32 %v1754_v1, %v1754_v1  ;;  %v1467_v6 = vpop.f32.mrf.mxu0 }
 0x184   : > { %v1756_v7 = vpop.f32.mrf.mxu1 }
 0x185   : > { %v2121_v8 = vadd.f32 %v2120_v0, %v2058_v5  ;;  %v1757_v9 = vadd.f32 %v1756_v7, %v1467_v6  ;;  %v1469_v10 = vpop.f32.mrf.mxu0 }
 0x186   : > { %v1758_v11 = vpop.f32.mrf.mxu1 }
 0x187   : > { %1925 = vst [vmem:[%s3013_s30 + $0xe8] sm:$0xff] %v1757_v9  ;;  %v1988_v12 = vadd.f32 %v1987_v4, %v1757_v9  ;;  %v2059_v13 = vmul.f32 %v1757_v9, %v1757_v9  ;;  %v1472_v14 = vpop.f32.mrf.mxu0 }
 0x188   : > { %v1761_v15 = vpop.f32.mrf.mxu1 }
 0x189   : > { %v2122_v16 = vadd.f32 %v2121_v8, %v2059_v13  ;;  %v1762_v17 = vadd.f32 %v1761_v15, %v1472_v14  ;;  %v1474_v18 = vpop.f32.mrf.mxu0 }
 0x18a   : > { %v1763_v19 = vpop.f32.mrf.mxu1 }
 0x18b   : > { %1926 = vst [vmem:[%s3013_s30 + $0xf0] sm:$0xff] %v1762_v17  ;;  %v1989_v20 = vadd.f32 %v1988_v12, %v1762_v17  ;;  %v2060_v21 = vmul.f32 %v1762_v17, %v1762_v17  ;;  %v1475_v22 = vpop.f32.mrf.mxu0 }
 0x18c   : > { %v1764_v23 = vpop.f32.mrf.mxu1 }
 0x18d   : > { %v2123_v24 = vadd.f32 %v2122_v16, %v2060_v21  ;;  %v1765_v25 = vadd.f32 %v1764_v23, %v1475_v22  ;;  %v1477_v26 = vpop.f32.mrf.mxu0 }
 0x18e   : > { %v1766_v27 = vpop.f32.mrf.mxu1 }
 0x18f   : > { %1927 = vst [vmem:[%s3013_s30 + $0xf8] sm:$0xff] %v1765_v25  ;;  %v3073_v28 = vadd.f32 %v1989_v20, %v1765_v25  ;;  %v2061_v29 = vmul.f32 %v1765_v25, %v1765_v25  ;;  %v1480_v30 = vpop.f32.mrf.mxu0 }
 0x190   : > { %v1769_v31 = vpop.f32.mrf.mxu1 }
 0x191   : > { %v3075_v32 = vadd.f32 %v2123_v24, %v2061_v29  ;;  %v3077_v33 = vadd.f32 %v1769_v31, %v1480_v30  ;;  %v1482_v34 = vpop.f32.mrf.mxu0 }
 0x192   : > { %v1771_v35 = vpop.f32.mrf.mxu1 }
 0x193   : > { %1928 = vst [vmem:[%s3013_s30 + $0x100] sm:$0xff] %v3077_v33  ;;  %v1483_v36 = vpop.f32.mrf.mxu0 }
 0x194   : > { %v1772_v37 = vpop.f32.mrf.mxu1 }
 0x195   : > { %v3081_v38 = vadd.f32 %v1772_v37, %v1483_v36  ;;  %v1485_v39 = vpop.f32.mrf.mxu0 }
 0x196   : > { %v1774_v40 = vpop.f32.mrf.mxu1 }
 0x197   : > { %1929 = vst [vmem:[%s3013_s30 + $0x108] sm:$0xff] %v3081_v38  ;;  %v1488_v41 = vpop.f32.mrf.mxu0 }
 0x198   : > { %v1777_v42 = vpop.f32.mrf.mxu1 }
 0x199   : > { %v3085_v43 = vadd.f32 %v1777_v42, %v1488_v41  ;;  %v1490_v44 = vpop.f32.mrf.mxu0 }
 0x19a   : > { %v1779_v45 = vpop.f32.mrf.mxu1 }
 0x19b   : > { %1930 = vst [vmem:[%s3013_s30 + $0x110] sm:$0xff] %v3085_v43  ;;  %v1491_v46 = vpop.f32.mrf.mxu0 }
 0x19c   : > { %v1780_v47 = vpop.f32.mrf.mxu1 }
 0x19d   : > { %v3089_v48 = vadd.f32 %v1780_v47, %v1491_v46  ;;  %v1493_v49 = vpop.f32.mrf.mxu0 }
 0x19e   : > { %v1782_v50 = vpop.f32.mrf.mxu1 }
 0x19f   : > { %1931 = vst [vmem:[%s3013_s30 + $0x118] sm:$0xff] %v3089_v48  ;;  %v1496_v51 = vpop.f32.mrf.mxu0 }
 0x1a0   : > { %v1785_v52 = vpop.f32.mrf.mxu1 }
 0x1a1   : > { %v3093_v53 = vadd.f32 %v1785_v52, %v1496_v51  ;;  %v1498_v54 = vpop.f32.mrf.mxu0 }
 0x1a2   : > { %v1787_v55 = vpop.f32.mrf.mxu1  ;;  %v2062_v54 = vmul.f32 %v3077_v33, %v3077_v33 }
 0x1a3   : > { %1932 = vst [vmem:[%s3013_s30 + $0x120] sm:$0xff] %v3093_v53  ;;  %v1499_v56 = vpop.f32.mrf.mxu0 }
 0x1a4   : > { %v1788_v57 = vpop.f32.mrf.mxu1 }
 0x1a5   : > { %v3097_v58 = vadd.f32 %v1788_v57, %v1499_v56  ;;  %v1501_v59 = vpop.f32.mrf.mxu0  ;;  %v1991_v57 = vadd.f32 %v3073_v28, %v3077_v33 }
 0x1a6   : > { %v1790_v60 = vpop.f32.mrf.mxu1  ;;  %v2063_v59 = vmul.f32 %v3081_v38, %v3081_v38 }
 0x1a7   : > { %1933 = vst [vmem:[%s3013_s30 + $0x128] sm:$0xff] %v3097_v58  ;;  %v1504_v61 = vpop.f32.mrf.mxu0 }
 0x1a8   : > { %v1793_v62 = vpop.f32.mrf.mxu1 }
 0x1a9   : > { %v3101_v63 = vadd.f32 %v1793_v62, %v1504_v61  ;;  %v1506_v0 = vpop.f32.mrf.mxu0 }
 0x1aa   : > { %v1795_v1 = vpop.f32.mrf.mxu1  ;;  %v2125_v0 = vadd.f32 %v3075_v32, %v2062_v54 }
 0x1ab   : > { %1934 = vst [vmem:[%s3013_s30 + $0x130] sm:$0xff] %v3101_v63  ;;  %v1507_v2 = vpop.f32.mrf.mxu0  ;;  %v1992_v1 = vadd.f32 %v1991_v57, %v3081_v38 }
 0x1ac   : > { %v1796_v3 = vpop.f32.mrf.mxu1  ;;  %v2126_v28 = vadd.f32 %v2125_v0, %v2063_v59 }
 0x1ad   : > { %v3105_v4 = vadd.f32 %v1796_v3, %v1507_v2  ;;  %v1509_v5 = vpop.f32.mrf.mxu0  ;;  %v2064_v2 = vmul.f32 %v3085_v43, %v3085_v43  ;;  %v1993_v33 = vadd.f32 %v1992_v1, %v3085_v43 }
 0x1ae   : > { %v1798_v6 = vpop.f32.mrf.mxu1 }
 0x1af   : > { %1935 = vst [vmem:[%s3013_s30 + $0x138] sm:$0xff] %v3105_v4  ;;  %v1512_v7 = vpop.f32.mrf.mxu0  ;;  %v2065_v6 = vmul.f32 %v3089_v48, %v3089_v48  ;;  %v2127_v32 = vadd.f32 %v2126_v28, %v2064_v2  ;;  %v1994_v38 = vadd.f32 %v1993_v33, %v3089_v48 }
 0x1b0   : > { %v1801_v8 = vpop.f32.mrf.mxu1 }
 0x1b1   : > { %v3109_v9 = vadd.f32 %v1801_v8, %v1512_v7  ;;  %v1514_v10 = vpop.f32.mrf.mxu0  ;;  %v1995_v43 = vadd.f32 %v1994_v38, %v3093_v53 }
 0x1b2   : > { %v1803_v11 = vpop.f32.mrf.mxu1 }
 0x1b3   : > { %1936 = vst [vmem:[%s3013_s30 + $0x140] sm:$0xff] %v3109_v9  ;;  %v1515_v12 = vpop.f32.mrf.mxu0  ;;  %v2066_v11 = vmul.f32 %v3093_v53, %v3093_v53  ;;  %v1996_v48 = vadd.f32 %v1995_v43, %v3097_v58 }
 0x1b4   : > { %v1804_v13 = vpop.f32.mrf.mxu1 }
 0x1b5   : > { %v3113_v14 = vadd.f32 %v1804_v13, %v1515_v12  ;;  %v1517_v15 = vpop.f32.mrf.mxu0  ;;  %v1997_v53 = vadd.f32 %v1996_v48, %v3101_v63 }
 0x1b6   : > { %v1806_v16 = vpop.f32.mrf.mxu1  ;;  %v2128_v15 = vadd.f32 %v2127_v32, %v2065_v6 }
 0x1b7   : > { %1937 = vst [vmem:[%s3013_s30 + $0x148] sm:$0xff] %v3113_v14  ;;  %v1520_v17 = vpop.f32.mrf.mxu0  ;;  %v2067_v16 = vmul.f32 %v3097_v58, %v3097_v58  ;;  %v1998_v58 = vadd.f32 %v1997_v53, %v3105_v4 }
 0x1b8   : > { %v1809_v18 = vpop.f32.mrf.mxu1 }
 0x1b9   : > { %v3117_v19 = vadd.f32 %v1809_v18, %v1520_v17  ;;  %v1522_v20 = vpop.f32.mrf.mxu0 }
 0x1ba   : > { %v1811_v21 = vpop.f32.mrf.mxu1 }
 0x1bb   : > { %1938 = vst [vmem:[%s3013_s30 + $0x150] sm:$0xff] %v3117_v19  ;;  %v1523_v22 = vpop.f32.mrf.mxu0  ;;  %v2129_v21 = vadd.f32 %v2128_v15, %v2066_v11 }
 0x1bc   : > { %v1812_v23 = vpop.f32.mrf.mxu1 }
 0x1bd   : > { %v3121_v24 = vadd.f32 %v1812_v23, %v1523_v22  ;;  %v1525_v25 = vpop.f32.mrf.mxu0  ;;  %v2068_v22 = vmul.f32 %v3101_v63, %v3101_v63  ;;  %v1999_v63 = vadd.f32 %v1998_v58, %v3109_v9 }
 0x1be   : > { %v1814_v26 = vpop.f32.mrf.mxu1 }
 0x1bf   : > { %1939 = vst [vmem:[%s3013_s30 + $0x158] sm:$0xff] %v3121_v24  ;;  %v1528_v27 = vpop.f32.mrf.mxu0  ;;  %v2130_v26 = vadd.f32 %v2129_v21, %v2067_v16 }
 0x1c0   : > { %v1817_v29 = vpop.f32.mrf.mxu1 }
 0x1c1   : > { %v3125_v30 = vadd.f32 %v1817_v29, %v1528_v27  ;;  %v1530_v31 = vpop.f32.mrf.mxu0  ;;  %v2069_v27 = vmul.f32 %v3105_v4, %v3105_v4  ;;  %v2000_v4 = vadd.f32 %v1999_v63, %v3113_v14 }
 0x1c2   : > { %v1819_v34 = vpop.f32.mrf.mxu1 }
 0x1c3   : > { %1940 = vst [vmem:[%s3013_s30 + $0x160] sm:$0xff] %v3125_v30  ;;  %v1531_v35 = vpop.f32.mrf.mxu0  ;;  %v2074_v0 = vmul.f32 %v3125_v30, %v3125_v30 }
 0x1c4   : > { %v1820_v36 = vpop.f32.mrf.mxu1 }
 0x1c5   : > { %v3129_v37 = vadd.f32 %v1820_v36, %v1531_v35  ;;  %v1533_v39 = vpop.f32.mrf.mxu0  ;;  %v2131_v35 = vadd.f32 %v2130_v26, %v2068_v22  ;;  %v2070_v36 = vmul.f32 %v3109_v9, %v3109_v9  ;;  %v2001_v9 = vadd.f32 %v2000_v4, %v3117_v19 }
 0x1c6   : > { %v1822_v40 = vpop.f32.mrf.mxu1 }
 0x1c7   : > { %1941 = vst [vmem:[%s3013_s30 + $0x168] sm:$0xff] %v3129_v37  ;;  %v1536_v41 = vpop.f32.mrf.mxu0 }
 0x1c8   : > { %v1825_v42 = vpop.f32.mrf.mxu1 }
 0x1c9   : > { %v3133_v44 = vadd.f32 %v1825_v42, %v1536_v41  ;;  %v1538_v45 = vpop.f32.mrf.mxu0  ;;  %v2132_v41 = vadd.f32 %v2131_v35, %v2069_v27  ;;  %v2071_v42 = vmul.f32 %v3113_v14, %v3113_v14  ;;  %v2002_v14 = vadd.f32 %v2001_v9, %v3121_v24 }
 0x1ca   : > { %v1827_v46 = vpop.f32.mrf.mxu1 }
 0x1cb   : > { %1942 = vst [vmem:[%s3013_s30 + $0x170] sm:$0xff] %v3133_v44  ;;  %v1539_v47 = vpop.f32.mrf.mxu0 }
 0x1cc   : > { %v1828_v49 = vpop.f32.mrf.mxu1 }
 0x1cd   : > { %v3137_v50 = vadd.f32 %v1828_v49, %v1539_v47  ;;  %v1541_v51 = vpop.f32.mrf.mxu0  ;;  %v2133_v49 = vadd.f32 %v2132_v41, %v2070_v36 }
 0x1ce   : > { %v1830_v52 = vpop.f32.mrf.mxu1  ;;  %v2072_v51 = vmul.f32 %v3117_v19, %v3117_v19  ;;  %v2003_v19 = vadd.f32 %v2002_v14, %v3125_v30 }
 0x1cf   : > { %1943 = vst [vmem:[%s3013_s30 + $0x178] sm:$0xff] %v3137_v50  ;;  %v1544_v55 = vpop.f32.mrf.mxu0  ;;  %v2077_v30 = vmul.f32 %v3137_v50, %v3137_v50 }
 0x1d0   : > { %v1833_v56 = vpop.f32.mrf.mxu1 }
 0x1d1   : > { %v3147_v60 = vadd.f32 %v1833_v56, %v1544_v55  ;;  %v1546_v61 = vpop.f32.mrf.mxu0  ;;  %v2134_v55 = vadd.f32 %v2133_v49, %v2071_v42  ;;  %v2073_v56 = vmul.f32 %v3121_v24, %v3121_v24  ;;  %v2004_v24 = vadd.f32 %v2003_v19, %v3129_v37 }
 0x1d2   : > { %v1835_v62 = vpop.f32.mrf.mxu1 }
 0x1d3   : > { %1944 = vst [vmem:[%s3013_s30 + $0x180] sm:$0xff] %v3147_v60  ;;  %v1547_v3 = vpop.f32.mrf.mxu0  ;;  %v2135_v62 = vadd.f32 %v2134_v55, %v2072_v51 }
 0x1d4   : > { %v1836_v5 = vpop.f32.mrf.mxu1 }
 0x1d5   : > { %v3158_v7 = vadd.f32 %v1836_v5, %v1547_v3  ;;  %v1549_v8 = vpop.f32.mrf.mxu0  ;;  %v2136_v3 = vadd.f32 %v2135_v62, %v2073_v56  ;;  %v2075_v5 = vmul.f32 %v3129_v37, %v3129_v37  ;;  %v2078_v37 = vmul.f32 %v3147_v60, %v3147_v60 }
 0x1d6   : > { %v1838_v10 = vpop.f32.mrf.mxu1 }
 0x1d7   : > { %1945 = vst [vmem:[%s3013_s30 + $0x188] sm:$0xff] %v3158_v7  ;;  %v1552_v12 = vpop.f32.mrf.mxu0  ;;  %v2137_v8 = vadd.f32 %v2136_v3, %v2074_v0  ;;  %v2076_v10 = vmul.f32 %v3133_v44, %v3133_v44 }
 0x1d8   : > { %v1841_v13 = vpop.f32.mrf.mxu1 }
 0x1d9   : > { %v3168_v17 = vadd.f32 %v1841_v13, %v1552_v12  ;;  %v1554_v18 = vpop.f32.mrf.mxu0  ;;  %v2138_v11 = vadd.f32 %v2137_v8, %v2075_v5  ;;  %v2005_v12 = vadd.f32 %v2004_v24, %v3133_v44  ;;  %v2079_v44 = vmul.f32 %v3158_v7, %v3158_v7 }
 0x1da   : > { %v1843_v20 = vpop.f32.mrf.mxu1 }
 0x1db   : > { %1946 = vst [vmem:[%s3013_s30 + $0x190] sm:$0xff] %v3168_v17  ;;  %v1555_v23 = vpop.f32.mrf.mxu0  ;;  %v2139_v16 = vadd.f32 %v2138_v11, %v2076_v10  ;;  %v2006_v18 = vadd.f32 %v2005_v12, %v3137_v50  ;;  %v2080_v50 = vmul.f32 %v3168_v17, %v3168_v17 }
 0x1dc   : > { %v1844_v25 = vpop.f32.mrf.mxu1 }
 0x1dd   : > { %v3178_v29 = vadd.f32 %v1844_v25, %v1555_v23  ;;  %v1557_v31 = vpop.f32.mrf.mxu0  ;;  %v2140_v48 = vadd.f32 %v2139_v16, %v2077_v30  ;;  %v2007_v22 = vadd.f32 %v2006_v18, %v3147_v60 }
 0x1de   : > { %v1846_v34 = vpop.f32.mrf.mxu1 }
 0x1df   : > { %1947 = vst [vmem:[%s3013_s30 + $0x198] sm:$0xff] %v3178_v29  ;;  %v1560_v39 = vpop.f32.mrf.mxu0  ;;  %v2141_v53 = vadd.f32 %v2140_v48, %v2078_v37  ;;  %v2008_v27 = vadd.f32 %v2007_v22, %v3158_v7  ;;  %v2081_v60 = vmul.f32 %v3178_v29, %v3178_v29 }
 0x1e0   : > { %v1849_v40 = vpop.f32.mrf.mxu1 }
 0x1e1   : > { %v3188_v45 = vadd.f32 %v1849_v40, %v1560_v39  ;;  %v1562_v46 = vpop.f32.mrf.mxu0  ;;  %v2142_v35 = vadd.f32 %v2141_v53, %v2079_v44  ;;  %v2009_v58 = vadd.f32 %v2008_v27, %v3168_v17 }
 0x1e2   : > { %v1851_v47 = vpop.f32.mrf.mxu1 }
 0x1e3   : > { %1948 = vst [vmem:[%s3013_s30 + $0x1a0] sm:$0xff] %v3188_v45  ;;  %v1563_v52 = vpop.f32.mrf.mxu0  ;;  %v2143_v41 = vadd.f32 %v2142_v35, %v2080_v50  ;;  %v2010_v63 = vadd.f32 %v2009_v58, %v3178_v29  ;;  %v2082_v7 = vmul.f32 %v3188_v45, %v3188_v45 }
 0x1e4   : > { %v1852_v54 = vpop.f32.mrf.mxu1 }
 0x1e5   : > { %v3198_v57 = vadd.f32 %v1852_v54, %v1563_v52  ;;  %v1565_v59 = vpop.f32.mrf.mxu0  ;;  %v2144_v47 = vadd.f32 %v2143_v41, %v2081_v60  ;;  %v2011_v49 = vadd.f32 %v2010_v63, %v3188_v45 }
 0x1e6   : > { %v1854_v61 = vpop.f32.mrf.mxu1 }
 0x1e7   : > { %1949 = vst [vmem:[%s3013_s30 + $0x1a8] sm:$0xff] %v3198_v57  ;;  %v1568_v1 = vpop.f32.mrf.mxu0  ;;  %v2083_v17 = vmul.f32 %v3198_v57, %v3198_v57  ;;  %v2145_v54 = vadd.f32 %v2144_v47, %v2082_v7  ;;  %v2012_v55 = vadd.f32 %v2011_v49, %v3198_v57 }
 0x1e8   : > { %v1857_v2 = vpop.f32.mrf.mxu1 }
 0x1e9   : > { %v1858_v28 = vadd.f32 %v1857_v2, %v1568_v1  ;;  %v1570_v33 = vpop.f32.mrf.mxu0  ;;  %v2146_v59 = vadd.f32 %v2145_v54, %v2083_v17 }
 0x1ea   : > { %v1859_v6 = vpop.f32.mrf.mxu1 }
 0x1eb   : > { %1950 = vst [vmem:[%s3013_s30 + $0x1b0] sm:$0xff] %v1858_v28  ;;  %v1571_v32 = vpop.f32.mrf.mxu0  ;;  %v2084_v29 = vmul.f32 %v1858_v28, %v1858_v28  ;;  %v2013_v61 = vadd.f32 %v2012_v55, %v1858_v28 }
 0x1ec   : > { %v1860_v38 = vpop.f32.mrf.mxu1 }
 0x1ed   : > { %v1861_v13 = vadd.f32 %v1860_v38, %v1571_v32  ;;  %v1573_v15 = vpop.f32.mrf.mxu0  ;;  %v2147_v1 = vadd.f32 %v2146_v59, %v2084_v29 }
 0x1ee   : > { %v1862_v43 = vpop.f32.mrf.mxu1 }
 0x1ef   : > { %1951 = vst [vmem:[%s3013_s30 + $0x1b8] sm:$0xff] %v1861_v13  ;;  %v1576_v20 = vpop.f32.mrf.mxu0  ;;  %v2085_v62 = vmul.f32 %v1861_v13, %v1861_v13  ;;  %v2014_v2 = vadd.f32 %v2013_v61, %v1861_v13 }
 0x1f0   : > { %v1865_v21 = vpop.f32.mrf.mxu1 }
 0x1f1   : > { %v1866_v23 = vadd.f32 %v1865_v21, %v1576_v20  ;;  %v1578_v25 = vpop.f32.mrf.mxu0  ;;  %v2148_v33 = vadd.f32 %v2147_v1, %v2085_v62 }
 0x1f2   : > { %v1867_v26 = vpop.f32.mrf.mxu1 }
 0x1f3   : > { %1952 = vst [vmem:[%s3013_s30 + $0x1c0] sm:$0xff] %v1866_v23  ;;  %v1579_v31 = vpop.f32.mrf.mxu0  ;;  %v2086_v3 = vmul.f32 %v1866_v23, %v1866_v23  ;;  %v2015_v6 = vadd.f32 %v2014_v2, %v1866_v23 }
 0x1f4   : > { %v1868_v34 = vpop.f32.mrf.mxu1 }
 0x1f5   : > { %v1869_v36 = vadd.f32 %v1868_v34, %v1579_v31  ;;  %v1581_v39 = vpop.f32.mrf.mxu0  ;;  %v2149_v32 = vadd.f32 %v2148_v33, %v2086_v3 }
 0x1f6   : > { %v1870_v40 = vpop.f32.mrf.mxu1 }
 0x1f7   : > { %1953 = vst [vmem:[%s3013_s30 + $0x1c8] sm:$0xff] %v1869_v36  ;;  %v1584_v42 = vpop.f32.mrf.mxu0  ;;  %v2087_v57 = vmul.f32 %v1869_v36, %v1869_v36  ;;  %v2016_v28 = vadd.f32 %v2015_v6, %v1869_v36 }
 0x1f8   : > { %v1873_v46 = vpop.f32.mrf.mxu1 }
 0x1f9   : > { %v1874_v4 = vadd.f32 %v1873_v46, %v1584_v42  ;;  %v1586_v51 = vpop.f32.mrf.mxu0  ;;  %v2150_v30 = vadd.f32 %v2149_v32, %v2087_v57 }
 0x1fa   : > { %v1875_v52 = vpop.f32.mrf.mxu1 }
 0x1fb   : > { %1954 = vst [vmem:[%s3013_s30 + $0x1d0] sm:$0xff] %v1874_v4  ;;  %v1587_v9 = vpop.f32.mrf.mxu0  ;;  %v2088_v38 = vmul.f32 %v1874_v4, %v1874_v4  ;;  %v2017_v15 = vadd.f32 %v2016_v28, %v1874_v4 }
 0x1fc   : > { %v1876_v56 = vpop.f32.mrf.mxu1 }
 0x1fd   : > { %v1877_v14 = vadd.f32 %v1876_v56, %v1587_v9  ;;  %v1589_v0 = vpop.f32.mrf.mxu0  ;;  %v2151_v37 = vadd.f32 %v2150_v30, %v2088_v38 }
 0x1fe   : > { %v1878_v45 = vpop.f32.mrf.mxu1 }
 0x1ff   : > { %1955 = vst [vmem:[%s3013_s30 + $0x1d8] sm:$0xff] %v1877_v14  ;;  %v1592_v19 = vpop.f32.mrf.mxu0  ;;  %v2089_v13 = vmul.f32 %v1877_v14, %v1877_v14  ;;  %v2018_v20 = vadd.f32 %v2017_v15, %v1877_v14 }
 0x200   : > { %v1881_v5 = vpop.f32.mrf.mxu1 }
 0x201   : > { %v1882_v8 = vadd.f32 %v1881_v5, %v1592_v19  ;;  %v1594_v24 = vpop.f32.mrf.mxu0  ;;  %v2152_v44 = vadd.f32 %v2151_v37, %v2089_v13 }
 0x202   : > { %v1883_v10 = vpop.f32.mrf.mxu1 }
 0x203   : > { %1956 = vst [vmem:[%s3013_s30 + $0x1e0] sm:$0xff] %v1882_v8  ;;  %v1595_v11 = vpop.f32.mrf.mxu0  ;;  %v2090_v21 = vmul.f32 %v1882_v8, %v1882_v8  ;;  %v2019_v23 = vadd.f32 %v2018_v20, %v1882_v8 }
 0x204   : > { %v1884_v12 = vpop.f32.mrf.mxu1 }
 0x205   : > { %v1885_v43 = vadd.f32 %v1884_v12, %v1595_v11  ;;  %v1597_v16 = vpop.f32.mrf.mxu0  ;;  %v2153_v50 = vadd.f32 %v2152_v44, %v2090_v21 }
 0x206   : > { %v1886_v18 = vpop.f32.mrf.mxu1 }
 0x207   : > { %1957 = vst [vmem:[%s3013_s30 + $0x1e8] sm:$0xff] %v1885_v43  ;;  %v1600_v48 = vpop.f32.mrf.mxu0  ;;  %v2091_v25 = vmul.f32 %v1885_v43, %v1885_v43  ;;  %v2020_v31 = vadd.f32 %v2019_v23, %v1885_v43 }
 0x208   : > { %v1889_v22 = vpop.f32.mrf.mxu1 }
 0x209   : > { %v1890_v26 = vadd.f32 %v1889_v22, %v1600_v48  ;;  %v1602_v53 = vpop.f32.mrf.mxu0  ;;  %v2154_v60 = vadd.f32 %v2153_v50, %v2091_v25 }
 0x20a   : > { %v1891_v27 = vpop.f32.mrf.mxu1 }
 0x20b   : > { %1958 = vst [vmem:[%s3013_s30 + $0x1f0] sm:$0xff] %v1890_v26  ;;  %v2092_v34 = vmul.f32 %v1890_v26, %v1890_v26  ;;  %v1603_v35 = vpop.f32.mrf.mxu0  ;;  %v2021_v36 = vadd.f32 %v2020_v31, %v1890_v26 }
 0x20c   : > { %v1892_v58 = vpop.f32.mrf.mxu1 }
 0x20d   : > { %v1893_v39 = vadd.f32 %v1892_v58, %v1603_v35  ;;  %v1605_v40 = vpop.f32.mrf.mxu0  ;;  %v2155_v63 = vadd.f32 %v2154_v60, %v2092_v34 }
 0x20e   : > { %v1894_v41 = vpop.f32.mrf.mxu1 }
 0x20f   : > { %1959 = vst [vmem:[%s3013_s30 + $0x1f8] sm:$0xff] %v1893_v39  ;;  %v2022_v7 = vadd.f32 %v2021_v36, %v1893_v39  ;;  %v2093_v42 = vmul.f32 %v1893_v39, %v1893_v39 }
 0x211   : > { %v2023_v46 = vrot.slane %v2022_v7, 4  ;;  %v2156_v47 = vadd.f32 %v2155_v63, %v2093_v42 }
 0x213   : > { %v2024_v49 = vadd.f32 %v2023_v46, %v2022_v7  ;;  %v2157_v17 = vrot.slane %v2156_v47, 4 }
 0x215   : > { %v2025_v4 = vrot.slane %v2024_v49, 2  ;;  %v2158_v51 = vadd.f32 %v2157_v17, %v2156_v47 }
 0x217   : > { %v2026_v52 = vadd.f32 %v2025_v4, %v2024_v49  ;;  %v2159_v54 = vrot.slane %v2158_v51, 2 }
 0x219   : > { %v2027_v55 = vrot.slane %v2026_v52, 1  ;;  %v2160_v29 = vadd.f32 %v2159_v54, %v2158_v51 }
 0x21b   : > { %v2028_v9 = vadd.f32 %v2027_v55, %v2026_v52  ;;  %v2161_v56 = vrot.slane %v2160_v29, 1 }
 0x21d   : > { %2029 = vst [vmem:[%s286_s7] sm:$0x1] %v2028_v9  ;;  %v2162_v59 = vadd.f32 %v2161_v56, %v2160_v29 }
 0x21f   : > { %2163 = vst [vmem:[%s292_s10] sm:$0x1] %v2162_v59 }
 0x220 PF: > { %s15_s17 = sadd.s32 1, %s2783_s17   ;;  %s3265_s15 = smov %s2779_s16 }
 0x221   : > { %p12_p5 = scmp.ge.s32.totalorder %s15_s17, 6   ;;  %s3266_s16 = smov %s3268_s18 }
 0x223   :  { %14 = sbr.rel (!%p12_p5) target bundleno = 2 (0x2), region = 85 }

// kernel: generator_forward.9
= control target key start
LH: loop header
LB: loop body
LE: loop exit
PB: predicated region body
PF: predicated region fallthrough
CT: control target
= control target key end

     0   :  { %s2763_s9 = smov 0   ;;  %s2765_s10 = smov 0   ;;  %s3136_s0 = inlined_call_operand.vmem [shape: bf16[4,2048,256], index: 0, kind: input, shape index: {}]   ;;  %s3137_s1 = inlined_call_operand.vmem [shape: bf16[4,256,128], index: 1, kind: input, shape index: {}]   ;;  %s3138_s2 = inlined_call_operand.vmem [shape: f32[4,2048,128], index: 2, kind: output, shape index: {}]  }
   0x1   :  { %s2767_s11 = smov 0   ;;  %s2769_s12 = smov 0  }
   0x2   :  { %s2771_s13 = smov 0  }
   0x3 LB: > { %s21_s14 = sadd.s32 1, %s2737_s11  ;;  %s24_s15 = sadd.s32 1, %s2741_s12  ;;  %s2745_s13 = sphi %s2771_s13, %s12_s13   ;;  %s2741_s12 = sphi %s2769_s12, %s3142_s12   ;;  %s2737_s11 = sphi %s2767_s11, %s3141_s11   ;;  %s2733_s10 = sphi %s2765_s10, %s3140_s10   ;;  %s2729_s9 = sphi %s2763_s9, %s3139_s9  }
   0x4   : > { %p22_p0 = scmp.ge.s32.totalorder %s21_s14, 2  ;;  %p2013_p1 = scmp.ge.s32.totalorder %s2745_s13, 1 }
   0x5   : > { %p144_p2 = scmp.lt.s32.totalorder %s2745_s13, 9 }
   0x6   : > { %s3144_s14 = smov (%p22_p0, %s21_s14), 0  ;;  %s3146_s15 = smov (!%p22_p0, %s24_s15), %s2741_s12 }
   0x7   : > { %p145_p3 = pnand %p2013_p1, %p144_p2  ;;  %p26_p4 = scmp.ge.s32.totalorder %s3146_s15, 4 }
   0x8   : > { %p181_p5 = scmp.lt.s32.totalorder (!%p145_p3), %s2733_s10, 3  ;;  %s2014_s16 = sshll.u32 (!%p145_p3), %s2729_s9, 7 }
   0x9   : > { %s3148_s15 = smov (%p26_p4, %s3146_s15), 0  ;;  %148 = sbr.rel (%p145_p3) target bundleno = 542 (0x21e), region = 28 }
   0xa   : > { %p183_p6 = scmp.lt.s32.totalorder (!%p145_p3), %s2014_s16, 255 }
   0xe   : > { %v2747_v0 = vmov 0   ;;  %s3150_s10 = smov (!%p181_p5, %s2733_s10), 3  ;;  %s3152_s16 = smov (!%p183_p6, %s2014_s16), 255 }
   0xf   : > { %1103 = vmatprep.subr.bf16.mxu0 %v2747_v0  ;;  %2170 = vmatprep.subr.bf16.mxu1 %v2747_v0  ;;  %s2169_s17 = sshll.u32 %s3150_s10, 7  ;;  %s2015_s21 = sshll.u32 %s3152_s16, 1 }
  0x10   : > { %s2801_s20 = scalar_lea.vmem %s3137_s1, %s2169_s17  ;;  %s2016_s22 = sshll.u32 %s3150_s10, 9 }
  0x11   : > { %v2243_v1 = vld [vmem:[%s2801_s20 + $0x38] sm:$0xff]   ;;  %v2244_v2 = vld [vmem:[%s2801_s20 + $0x30] sm:$0xff]   ;;  %v2245_v3 = vld [vmem:[%s2801_s20 + $0x28] sm:$0xff]   ;;  %s187_s23 = sadd.s32 %s2016_s22, %s2015_s21  ;;  %s2021_s28 = sshll.u32 %s3150_s10, 8 }
  0x12   : > { %1104 = vmatpush1.bf16.msra.mxu0 %v2243_v1  ;;  %2186 = vmatpush1.bf16.msra.mxu1 %v2243_v1  ;;  %v2246_v4 = vld [vmem:[%s2801_s20 + $0x20] sm:$0xff]   ;;  %s2017_s24 = sshll.u32 %s187_s23, 2  ;;  %v2247_v5 = vld [vmem:[%s2801_s20 + $0x18] sm:$0xff]   ;;  %v2248_v7 = vld [vmem:[%s2801_s20 + $0x10] sm:$0xff]   ;;  %s202_s29 = sadd.s32 %s2021_s28, %s3152_s16 }
  0x13   : > { %1105 = vmatprep.subr.bf16.mxu0 %v2747_v0  ;;  %2171 = vmatprep.subr.bf16.mxu1 %v2747_v0  ;;  %s2821_s27 = scalar_lea.vmem %s3136_s0, %s2017_s24  ;;  %v2249_v9 = vld [vmem:[%s2801_s20 + $0x8] sm:$0xff]   ;;  %v2250_v10 = vld [vmem:[%s2801_s20] sm:$0xff]   ;;  %v2251_v11 = vld [vmem:[%s2801_s20 + $0x78] sm:$0xff]   ;;  %s2022_s30 = sshll.u32 %s202_s29, 3 }
  0x14   : > { %v2261_v6 = vld [vmem:[%s2821_s27 + $0x4] ss:$8 sps:$4 sm:$0xff]   ;;  %v2252_v12 = vld [vmem:[%s2801_s20 + $0x70] sm:$0xff]   ;;  %v2255_v15 = vld [vmem:[%s2801_s20 + $0x58] sm:$0xff]   ;;  %s2969_s5 = scalar_lea.vmem %s3138_s2, %s2022_s30 }
  0x15   : > { %v2264_v8 = vld [vmem:[%s2821_s27 + $0x204] ss:$8 sps:$4 sm:$0xff]   ;;  %1135 = vmatprep.mubr.bf16.mxu0 %v2261_v6  ;;  %v2256_v16 = vld [vmem:[%s2801_s20 + $0x50] sm:$0xff]   ;;  %v2259_v19 = vld [vmem:[%s2821_s27] ss:$8 sps:$4 sm:$0xff]  }
  0x16   : > { %1106 = vmatpush1.bf16.msra.mxu0 %v2244_v2  ;;  %2187 = vmatpush1.bf16.msra.mxu1 %v2244_v2  ;;  %v2253_v13 = vld [vmem:[%s2801_s20 + $0x68] sm:$0xff]   ;;  %v2254_v14 = vld [vmem:[%s2801_s20 + $0x60] sm:$0xff]   ;;  %v2265_v21 = vld [vmem:[%s2821_s27 + $0x14] ss:$8 sps:$4 sm:$0xff]  }
  0x17   : > { %1107 = vmatprep.subr.bf16.mxu0 %v2747_v0  ;;  %2172 = vmatprep.subr.bf16.mxu1 %v2747_v0  ;;  %v2257_v17 = vld [vmem:[%s2801_s20 + $0x48] sm:$0xff]   ;;  %v2258_v18 = vld [vmem:[%s2801_s20 + $0x40] sm:$0xff]   ;;  %v2267_v22 = vld [vmem:[%s2821_s27 + $0x214] ss:$8 sps:$4 sm:$0xff]  }
  0x18   : > { %1391 = vmatprep.mubr.bf16.mxu1 %v2264_v8  ;;  %v2262_v20 = vld [vmem:[%s2821_s27 + $0x200] ss:$8 sps:$4 sm:$0xff]   ;;  %v2269_v23 = vld [vmem:[%s2821_s27 + $0x10] ss:$8 sps:$4 sm:$0xff]   ;;  %v2271_v25 = vld [vmem:[%s2821_s27 + $0x24] ss:$8 sps:$4 sm:$0xff]  }
  0x19   : > { %v2270_v24 = vld [vmem:[%s2821_s27 + $0x210] ss:$8 sps:$4 sm:$0xff]   ;;  %v2273_v26 = vld [vmem:[%s2821_s27 + $0x224] ss:$8 sps:$4 sm:$0xff]   ;;  %v2275_v27 = vld [vmem:[%s2821_s27 + $0x20] ss:$8 sps:$4 sm:$0xff]  }
  0x1a   : > { %1108 = vmatpush1.bf16.msra.mxu0 %v2245_v3  ;;  %2188 = vmatpush1.bf16.msra.mxu1 %v2245_v3  ;;  %v2276_v28 = vld [vmem:[%s2821_s27 + $0x220] ss:$8 sps:$4 sm:$0xff]   ;;  %v2277_v29 = vld [vmem:[%s2821_s27 + $0x34] ss:$8 sps:$4 sm:$0xff]   ;;  %v2281_v31 = vld [vmem:[%s2821_s27 + $0x30] ss:$8 sps:$4 sm:$0xff]  }
  0x1b   : > { %1109 = vmatprep.subr.bf16.mxu0 %v2747_v0  ;;  %2173 = vmatprep.subr.bf16.mxu1 %v2747_v0  ;;  %v2279_v30 = vld [vmem:[%s2821_s27 + $0x234] ss:$8 sps:$4 sm:$0xff]   ;;  %v2282_v32 = vld [vmem:[%s2821_s27 + $0x230] ss:$8 sps:$4 sm:$0xff]   ;;  %v2283_v33 = vld [vmem:[%s2821_s27 + $0x44] ss:$8 sps:$4 sm:$0xff]  }
  0x1c   : > { %v2285_v34 = vld [vmem:[%s2821_s27 + $0x244] ss:$8 sps:$4 sm:$0xff]   ;;  %v2287_v35 = vld [vmem:[%s2821_s27 + $0x40] ss:$8 sps:$4 sm:$0xff]   ;;  %v2289_v37 = vld [vmem:[%s2821_s27 + $0x54] ss:$8 sps:$4 sm:$0xff]  }
  0x1d   : > { %v2288_v36 = vld [vmem:[%s2821_s27 + $0x240] ss:$8 sps:$4 sm:$0xff]   ;;  %v2291_v38 = vld [vmem:[%s2821_s27 + $0x254] ss:$8 sps:$4 sm:$0xff]   ;;  %v2293_v39 = vld [vmem:[%s2821_s27 + $0x50] ss:$8 sps:$4 sm:$0xff]  }
  0x1e   : > { %1110 = vmatpush1.bf16.msra.mxu0 %v2246_v4  ;;  %2189 = vmatpush1.bf16.msra.mxu1 %v2246_v4  ;;  %v2294_v40 = vld [vmem:[%s2821_s27 + $0x250] ss:$8 sps:$4 sm:$0xff]   ;;  %v2295_v41 = vld [vmem:[%s2821_s27 + $0x64] ss:$8 sps:$4 sm:$0xff]   ;;  %v2299_v43 = vld [vmem:[%s2821_s27 + $0x60] ss:$8 sps:$4 sm:$0xff]  }
  0x1f   : > { %1111 = vmatprep.subr.bf16.mxu0 %v2747_v0  ;;  %2174 = vmatprep.subr.bf16.mxu1 %v2747_v0  ;;  %v2297_v42 = vld [vmem:[%s2821_s27 + $0x264] ss:$8 sps:$4 sm:$0xff]   ;;  %v2300_v44 = vld [vmem:[%s2821_s27 + $0x260] ss:$8 sps:$4 sm:$0xff]   ;;  %v2301_v45 = vld [vmem:[%s2821_s27 + $0x74] ss:$8 sps:$4 sm:$0xff]  }
  0x20   : > { %v2303_v46 = vld [vmem:[%s2821_s27 + $0x274] ss:$8 sps:$4 sm:$0xff]   ;;  %v2305_v47 = vld [vmem:[%s2821_s27 + $0x70] ss:$8 sps:$4 sm:$0xff]   ;;  %v2307_v49 = vld [vmem:[%s2821_s27 + $0x84] ss:$8 sps:$4 sm:$0xff]  }
  0x21   : > { %v2306_v48 = vld [vmem:[%s2821_s27 + $0x270] ss:$8 sps:$4 sm:$0xff]   ;;  %v2309_v50 = vld [vmem:[%s2821_s27 + $0x284] ss:$8 sps:$4 sm:$0xff]   ;;  %v2311_v51 = vld [vmem:[%s2821_s27 + $0x80] ss:$8 sps:$4 sm:$0xff]  }
  0x22   : > { %1112 = vmatpush1.bf16.msra.mxu0 %v2247_v5  ;;  %2190 = vmatpush1.bf16.msra.mxu1 %v2247_v5  ;;  %v2312_v52 = vld [vmem:[%s2821_s27 + $0x280] ss:$8 sps:$4 sm:$0xff]   ;;  %v2313_v53 = vld [vmem:[%s2821_s27 + $0x94] ss:$8 sps:$4 sm:$0xff]   ;;  %v2317_v55 = vld [vmem:[%s2821_s27 + $0x90] ss:$8 sps:$4 sm:$0xff]  }
  0x23   : > { %1113 = vmatprep.subr.bf16.mxu0 %v2747_v0  ;;  %2175 = vmatprep.subr.bf16.mxu1 %v2747_v0  ;;  %v2315_v54 = vld [vmem:[%s2821_s27 + $0x294] ss:$8 sps:$4 sm:$0xff]   ;;  %v2318_v56 = vld [vmem:[%s2821_s27 + $0x290] ss:$8 sps:$4 sm:$0xff]   ;;  %v2319_v57 = vld [vmem:[%s2821_s27 + $0xa4] ss:$8 sps:$4 sm:$0xff]  }
  0x24   : > { %v2321_v58 = vld [vmem:[%s2821_s27 + $0x2a4] ss:$8 sps:$4 sm:$0xff]   ;;  %v2323_v59 = vld [vmem:[%s2821_s27 + $0xa0] ss:$8 sps:$4 sm:$0xff]   ;;  %v2325_v61 = vld [vmem:[%s2821_s27 + $0xb4] ss:$8 sps:$4 sm:$0xff]  }
  0x25   : > { %v2324_v60 = vld [vmem:[%s2821_s27 + $0x2a0] ss:$8 sps:$4 sm:$0xff]   ;;  %v2327_v62 = vld [vmem:[%s2821_s27 + $0x2b4] ss:$8 sps:$4 sm:$0xff]   ;;  %v2329_v63 = vld [vmem:[%s2821_s27 + $0xb0] ss:$8 sps:$4 sm:$0xff]  }
  0x26   : > { %1114 = vmatpush1.bf16.msra.mxu0 %v2248_v7  ;;  %2191 = vmatpush1.bf16.msra.mxu1 %v2248_v7  ;;  %v2331_v1 = vld [vmem:[%s2821_s27 + $0xc4] ss:$8 sps:$4 sm:$0xff]   ;;  %v2335_v3 = vld [vmem:[%s2821_s27 + $0xc0] ss:$8 sps:$4 sm:$0xff]   ;;  %v2337_v5 = vld [vmem:[%s2821_s27 + $0xd4] ss:$8 sps:$4 sm:$0xff]  }
  0x27   : > { %1115 = vmatprep.subr.bf16.mxu0 %v2747_v0  ;;  %2176 = vmatprep.subr.bf16.mxu1 %v2747_v0  ;;  %v2333_v2 = vld [vmem:[%s2821_s27 + $0x2c4] ss:$8 sps:$4 sm:$0xff]   ;;  %v2336_v4 = vld [vmem:[%s2821_s27 + $0x2c0] ss:$8 sps:$4 sm:$0xff]   ;;  %v2339_v6 = vld [vmem:[%s2821_s27 + $0x2d4] ss:$8 sps:$4 sm:$0xff]  }
  0x28   : > { %v2341_v7 = vld [vmem:[%s2821_s27 + $0xd0] ss:$8 sps:$4 sm:$0xff]  }
  0x29   : > { %v2342_v8 = vld [vmem:[%s2821_s27 + $0x2d0] ss:$8 sps:$4 sm:$0xff]  }
  0x2a   : > { %1116 = vmatpush1.bf16.msra.mxu0 %v2249_v9  ;;  %2192 = vmatpush1.bf16.msra.mxu1 %v2249_v9  ;;  %v2343_v9 = vld [vmem:[%s2821_s27 + $0xe4] ss:$8 sps:$4 sm:$0xff]  }
  0x2b   : > { %1117 = vmatprep.subr.bf16.mxu0 %v2747_v0  ;;  %2177 = vmatprep.subr.bf16.mxu1 %v2747_v0 }
  0x2e   : > { %1118 = vmatpush1.bf16.msra.mxu0 %v2250_v10  ;;  %2193 = vmatpush1.bf16.msra.mxu1 %v2250_v10  ;;  %v2345_v10 = vld [vmem:[%s2821_s27 + $0x2e4] ss:$8 sps:$4 sm:$0xff]  }
  0x2f   : > { %1119 = vmatprep.subr.bf16.mxu0 %v2747_v0  ;;  %2178 = vmatprep.subr.bf16.mxu1 %v2747_v0 }
  0x32   : > { %1120 = vmatpush2.bf16.msra.mxu0 %v2251_v11  ;;  %2194 = vmatpush2.bf16.msra.mxu1 %v2251_v11  ;;  %v2347_v11 = vld [vmem:[%s2821_s27 + $0xe0] ss:$8 sps:$4 sm:$0xff]  }
  0x33   : > { %1121 = vmatprep.subr.bf16.mxu0 %v2747_v0  ;;  %2179 = vmatprep.subr.bf16.mxu1 %v2747_v0 }
  0x36   : > { %1122 = vmatpush2.bf16.msra.mxu0 %v2252_v12  ;;  %2195 = vmatpush2.bf16.msra.mxu1 %v2252_v12  ;;  %v2348_v12 = vld [vmem:[%s2821_s27 + $0x2e0] ss:$8 sps:$4 sm:$0xff]  }
  0x37   : > { %1123 = vmatprep.subr.bf16.mxu0 %v2747_v0  ;;  %2180 = vmatprep.subr.bf16.mxu1 %v2747_v0 }
  0x3a   : > { %1124 = vmatpush2.bf16.msra.mxu0 %v2253_v13  ;;  %2196 = vmatpush2.bf16.msra.mxu1 %v2253_v13  ;;  %v2349_v13 = vld [vmem:[%s2821_s27 + $0xf4] ss:$8 sps:$4 sm:$0xff]  }
  0x3b   : > { %1125 = vmatprep.subr.bf16.mxu0 %v2747_v0  ;;  %2181 = vmatprep.subr.bf16.mxu1 %v2747_v0 }
  0x3e   : > { %1126 = vmatpush2.bf16.msra.mxu0 %v2254_v14  ;;  %2197 = vmatpush2.bf16.msra.mxu1 %v2254_v14  ;;  %v2351_v14 = vld [vmem:[%s2821_s27 + $0x2f4] ss:$8 sps:$4 sm:$0xff]  }
  0x3f   : > { %1127 = vmatprep.subr.bf16.mxu0 %v2747_v0  ;;  %2182 = vmatprep.subr.bf16.mxu1 %v2747_v0 }
  0x42   : > { %1128 = vmatpush2.bf16.msra.mxu0 %v2255_v15  ;;  %2198 = vmatpush2.bf16.msra.mxu1 %v2255_v15  ;;  %v2353_v15 = vld [vmem:[%s2821_s27 + $0xf0] ss:$8 sps:$4 sm:$0xff]  }
  0x43   : > { %1129 = vmatprep.subr.bf16.mxu0 %v2747_v0  ;;  %2183 = vmatprep.subr.bf16.mxu1 %v2747_v0 }
  0x46   : > { %1130 = vmatpush2.bf16.msra.mxu0 %v2256_v16  ;;  %2199 = vmatpush2.bf16.msra.mxu1 %v2256_v16  ;;  %v2354_v16 = vld [vmem:[%s2821_s27 + $0x2f0] ss:$8 sps:$4 sm:$0xff]  }
  0x47   : > { %1131 = vmatprep.subr.bf16.mxu0 %v2747_v0  ;;  %2184 = vmatprep.subr.bf16.mxu1 %v2747_v0 }
  0x4a   : > { %1132 = vmatpush2.bf16.msra.mxu0 %v2257_v17  ;;  %2200 = vmatpush2.bf16.msra.mxu1 %v2257_v17  ;;  %v2355_v17 = vld [vmem:[%s2821_s27 + $0x104] ss:$8 sps:$4 sm:$0xff]  }
  0x4b   : > { %1133 = vmatprep.subr.bf16.mxu0 %v2747_v0  ;;  %2185 = vmatprep.subr.bf16.mxu1 %v2747_v0  ;;  %v2330_v0 = vld [vmem:[%s2821_s27 + $0x2b0] ss:$8 sps:$4 sm:$0xff]  }
  0x4e   : > { %1134 = vmatpush2.bf16.msra.mxu0 %v2258_v18  ;;  %2201 = vmatpush2.bf16.msra.mxu1 %v2258_v18  ;;  %v2357_v18 = vld [vmem:[%s2821_s27 + $0x304] ss:$8 sps:$4 sm:$0xff]  }
  0x51   : > { %1136 = vmatmul.mubr.bf16.vlgmr.msra.gmra.mxu0 %v2259_v19  ;;  %1392 = vmatmul.mubr.bf16.vlgmr.msra.gmra.mxu1 %v2262_v20  ;;  %v2359_v19 = vld [vmem:[%s2821_s27 + $0x100] ss:$8 sps:$4 sm:$0xff]  }
  0x52   : > { %1143 = vmatprep.mubr.bf16.mxu0 %v2265_v21  ;;  %1399 = vmatprep.mubr.bf16.mxu1 %v2267_v22  ;;  %v2360_v20 = vld [vmem:[%s2821_s27 + $0x300] ss:$8 sps:$4 sm:$0xff]   ;;  %v2361_v21 = vld [vmem:[%s2821_s27 + $0x114] ss:$8 sps:$4 sm:$0xff]  }
  0x53   : > { %v2363_v22 = vld [vmem:[%s2821_s27 + $0x314] ss:$8 sps:$4 sm:$0xff]  }
  0x59   : > { %1144 = vmatmul.mubr.bf16.gmra.mxu0 %v2269_v23  ;;  %1400 = vmatmul.mubr.bf16.gmra.mxu1 %v2270_v24  ;;  %v2365_v23 = vld [vmem:[%s2821_s27 + $0x110] ss:$8 sps:$4 sm:$0xff]  }
  0x5a   : > { %1151 = vmatprep.mubr.bf16.mxu0 %v2271_v25  ;;  %1407 = vmatprep.mubr.bf16.mxu1 %v2273_v26  ;;  %v2366_v24 = vld [vmem:[%s2821_s27 + $0x310] ss:$8 sps:$4 sm:$0xff]   ;;  %v2367_v25 = vld [vmem:[%s2821_s27 + $0x124] ss:$8 sps:$4 sm:$0xff]  }
  0x5b   : > { %v2369_v26 = vld [vmem:[%s2821_s27 + $0x324] ss:$8 sps:$4 sm:$0xff]  }
  0x61   : > { %1152 = vmatmul.mubr.bf16.gmra.mxu0 %v2275_v27  ;;  %1408 = vmatmul.mubr.bf16.gmra.mxu1 %v2276_v28  ;;  %v2371_v27 = vld [vmem:[%s2821_s27 + $0x120] ss:$8 sps:$4 sm:$0xff]  }
  0x62   : > { %1159 = vmatprep.mubr.bf16.mxu0 %v2277_v29  ;;  %1415 = vmatprep.mubr.bf16.mxu1 %v2279_v30  ;;  %v2372_v28 = vld [vmem:[%s2821_s27 + $0x320] ss:$8 sps:$4 sm:$0xff]   ;;  %v2373_v29 = vld [vmem:[%s2821_s27 + $0x134] ss:$8 sps:$4 sm:$0xff]  }
  0x63   : > { %v2375_v30 = vld [vmem:[%s2821_s27 + $0x334] ss:$8 sps:$4 sm:$0xff]  }
  0x69   : > { %1160 = vmatmul.mubr.bf16.gmra.mxu0 %v2281_v31  ;;  %1416 = vmatmul.mubr.bf16.gmra.mxu1 %v2282_v32  ;;  %v2377_v31 = vld [vmem:[%s2821_s27 + $0x130] ss:$8 sps:$4 sm:$0xff]  }
  0x6a   : > { %1167 = vmatprep.mubr.bf16.mxu0 %v2283_v33  ;;  %1423 = vmatprep.mubr.bf16.mxu1 %v2285_v34  ;;  %v2378_v32 = vld [vmem:[%s2821_s27 + $0x330] ss:$8 sps:$4 sm:$0xff]   ;;  %v2379_v33 = vld [vmem:[%s2821_s27 + $0x144] ss:$8 sps:$4 sm:$0xff]  }
  0x6b   : > { %v2381_v34 = vld [vmem:[%s2821_s27 + $0x344] ss:$8 sps:$4 sm:$0xff]  }
  0x71   : > { %1168 = vmatmul.mubr.bf16.gmra.mxu0 %v2287_v35  ;;  %1424 = vmatmul.mubr.bf16.gmra.mxu1 %v2288_v36  ;;  %v2383_v35 = vld [vmem:[%s2821_s27 + $0x140] ss:$8 sps:$4 sm:$0xff]  }
  0x72   : > { %1175 = vmatprep.mubr.bf16.mxu0 %v2289_v37  ;;  %1431 = vmatprep.mubr.bf16.mxu1 %v2291_v38  ;;  %v2384_v36 = vld [vmem:[%s2821_s27 + $0x340] ss:$8 sps:$4 sm:$0xff]   ;;  %v2385_v37 = vld [vmem:[%s2821_s27 + $0x154] ss:$8 sps:$4 sm:$0xff]  }
  0x73   : > { %v2387_v38 = vld [vmem:[%s2821_s27 + $0x354] ss:$8 sps:$4 sm:$0xff]  }
  0x79   : > { %1176 = vmatmul.mubr.bf16.gmra.mxu0 %v2293_v39  ;;  %1432 = vmatmul.mubr.bf16.gmra.mxu1 %v2294_v40  ;;  %v2389_v39 = vld [vmem:[%s2821_s27 + $0x150] ss:$8 sps:$4 sm:$0xff]  }
  0x7a   : > { %1183 = vmatprep.mubr.bf16.mxu0 %v2295_v41  ;;  %1439 = vmatprep.mubr.bf16.mxu1 %v2297_v42  ;;  %v2390_v40 = vld [vmem:[%s2821_s27 + $0x350] ss:$8 sps:$4 sm:$0xff]   ;;  %v2391_v41 = vld [vmem:[%s2821_s27 + $0x164] ss:$8 sps:$4 sm:$0xff]  }
  0x7b   : > { %v2393_v42 = vld [vmem:[%s2821_s27 + $0x364] ss:$8 sps:$4 sm:$0xff]  }
  0x81   : > { %1184 = vmatmul.mubr.bf16.gmra.mxu0 %v2299_v43  ;;  %1440 = vmatmul.mubr.bf16.gmra.mxu1 %v2300_v44  ;;  %v2395_v43 = vld [vmem:[%s2821_s27 + $0x160] ss:$8 sps:$4 sm:$0xff]  }
  0x82   : > { %1191 = vmatprep.mubr.bf16.mxu0 %v2301_v45  ;;  %1447 = vmatprep.mubr.bf16.mxu1 %v2303_v46  ;;  %v2396_v44 = vld [vmem:[%s2821_s27 + $0x360] ss:$8 sps:$4 sm:$0xff]   ;;  %v2397_v45 = vld [vmem:[%s2821_s27 + $0x174] ss:$8 sps:$4 sm:$0xff]  }
  0x83   : > { %v2399_v46 = vld [vmem:[%s2821_s27 + $0x374] ss:$8 sps:$4 sm:$0xff]  }
  0x89   : > { %1192 = vmatmul.mubr.bf16.gmra.mxu0 %v2305_v47  ;;  %1448 = vmatmul.mubr.bf16.gmra.mxu1 %v2306_v48  ;;  %v2401_v47 = vld [vmem:[%s2821_s27 + $0x170] ss:$8 sps:$4 sm:$0xff]  }
  0x8a   : > { %1199 = vmatprep.mubr.bf16.mxu0 %v2307_v49  ;;  %1455 = vmatprep.mubr.bf16.mxu1 %v2309_v50  ;;  %v2402_v48 = vld [vmem:[%s2821_s27 + $0x370] ss:$8 sps:$4 sm:$0xff]   ;;  %v2403_v49 = vld [vmem:[%s2821_s27 + $0x184] ss:$8 sps:$4 sm:$0xff]  }
  0x8b   : > { %v2405_v50 = vld [vmem:[%s2821_s27 + $0x384] ss:$8 sps:$4 sm:$0xff]  }
  0x91   : > { %1200 = vmatmul.mubr.bf16.gmra.mxu0 %v2311_v51  ;;  %1456 = vmatmul.mubr.bf16.gmra.mxu1 %v2312_v52  ;;  %v2407_v51 = vld [vmem:[%s2821_s27 + $0x180] ss:$8 sps:$4 sm:$0xff]  }
  0x92   : > { %1207 = vmatprep.mubr.bf16.mxu0 %v2313_v53  ;;  %1463 = vmatprep.mubr.bf16.mxu1 %v2315_v54  ;;  %v2408_v52 = vld [vmem:[%s2821_s27 + $0x380] ss:$8 sps:$4 sm:$0xff]   ;;  %v2409_v53 = vld [vmem:[%s2821_s27 + $0x194] ss:$8 sps:$4 sm:$0xff]  }
  0x93   : > { %v2411_v54 = vld [vmem:[%s2821_s27 + $0x394] ss:$8 sps:$4 sm:$0xff]  }
  0x99   : > { %1208 = vmatmul.mubr.bf16.gmra.mxu0 %v2317_v55  ;;  %1464 = vmatmul.mubr.bf16.gmra.mxu1 %v2318_v56 }
  0x9a   : > { %1215 = vmatprep.mubr.bf16.mxu0 %v2319_v57  ;;  %1471 = vmatprep.mubr.bf16.mxu1 %v2321_v58 }
  0xa1   : > { %1216 = vmatmul.mubr.bf16.gmra.mxu0 %v2323_v59  ;;  %1472 = vmatmul.mubr.bf16.gmra.mxu1 %v2324_v60 }
  0xa2   : > { %1223 = vmatprep.mubr.bf16.mxu0 %v2325_v61  ;;  %1479 = vmatprep.mubr.bf16.mxu1 %v2327_v62  ;;  %v2413_v61 = vld [vmem:[%s2821_s27 + $0x190] ss:$8 sps:$4 sm:$0xff]  }
  0xa3   : > { %v2414_v62 = vld [vmem:[%s2821_s27 + $0x390] ss:$8 sps:$4 sm:$0xff]  }
  0xa9   : > { %1224 = vmatmul.mubr.bf16.gmra.mxu0 %v2329_v63  ;;  %1480 = vmatmul.mubr.bf16.gmra.mxu1 %v2330_v0  ;;  %v2415_v63 = vld [vmem:[%s2821_s27 + $0x1a4] ss:$8 sps:$4 sm:$0xff]  }
  0xaa   : > { %1231 = vmatprep.mubr.bf16.mxu0 %v2331_v1  ;;  %1487 = vmatprep.mubr.bf16.mxu1 %v2333_v2  ;;  %v2417_v0 = vld [vmem:[%s2821_s27 + $0x3a4] ss:$8 sps:$4 sm:$0xff]  }
  0xb1   : > { %1232 = vmatmul.mubr.bf16.gmra.mxu0 %v2335_v3  ;;  %1488 = vmatmul.mubr.bf16.gmra.mxu1 %v2336_v4 }
  0xb2   : > { %1239 = vmatprep.mubr.bf16.mxu0 %v2337_v5  ;;  %1495 = vmatprep.mubr.bf16.mxu1 %v2339_v6 }
  0xb9   : > { %1240 = vmatmul.mubr.bf16.gmra.mxu0 %v2341_v7  ;;  %1496 = vmatmul.mubr.bf16.gmra.mxu1 %v2342_v8 }
  0xba   : > { %1247 = vmatprep.mubr.bf16.mxu0 %v2343_v9  ;;  %1503 = vmatprep.mubr.bf16.mxu1 %v2345_v10  ;;  %v2419_v9 = vld [vmem:[%s2821_s27 + $0x1a0] ss:$8 sps:$4 sm:$0xff]  }
  0xbb   : > { %v2420_v10 = vld [vmem:[%s2821_s27 + $0x3a0] ss:$8 sps:$4 sm:$0xff]  }
  0xc1   : > { %1248 = vmatmul.mubr.bf16.gmra.mxu0 %v2347_v11  ;;  %1504 = vmatmul.mubr.bf16.gmra.mxu1 %v2348_v12  ;;  %v2421_v11 = vld [vmem:[%s2821_s27 + $0x1b4] ss:$8 sps:$4 sm:$0xff]  }
  0xc2   : > { %1255 = vmatprep.mubr.bf16.mxu0 %v2349_v13  ;;  %1511 = vmatprep.mubr.bf16.mxu1 %v2351_v14  ;;  %v2423_v12 = vld [vmem:[%s2821_s27 + $0x3b4] ss:$8 sps:$4 sm:$0xff]  }
  0xc9   : > { %1256 = vmatmul.mubr.bf16.gmra.mxu0 %v2353_v15  ;;  %1512 = vmatmul.mubr.bf16.gmra.mxu1 %v2354_v16 }
  0xca   : > { %1263 = vmatprep.mubr.bf16.mxu0 %v2355_v17  ;;  %1519 = vmatprep.mubr.bf16.mxu1 %v2357_v18 }
  0xd1   : > { %1264 = vmatmul.mubr.bf16.gmra.mxu0 %v2359_v19  ;;  %1520 = vmatmul.mubr.bf16.gmra.mxu1 %v2360_v20 }
  0xd2   : > { %1271 = vmatprep.mubr.bf16.mxu0 %v2361_v21  ;;  %1527 = vmatprep.mubr.bf16.mxu1 %v2363_v22 }
  0xd9   : > { %1272 = vmatmul.mubr.bf16.gmra.mxu0 %v2365_v23  ;;  %1528 = vmatmul.mubr.bf16.gmra.mxu1 %v2366_v24 }
  0xda   : > { %1279 = vmatprep.mubr.bf16.mxu0 %v2367_v25  ;;  %1535 = vmatprep.mubr.bf16.mxu1 %v2369_v26  ;;  %v2425_v25 = vld [vmem:[%s2821_s27 + $0x1b0] ss:$8 sps:$4 sm:$0xff]  }
  0xdb   : > { %v2426_v26 = vld [vmem:[%s2821_s27 + $0x3b0] ss:$8 sps:$4 sm:$0xff]  }
  0xe1   : > { %1280 = vmatmul.mubr.bf16.gmra.mxu0 %v2371_v27  ;;  %1536 = vmatmul.mubr.bf16.gmra.mxu1 %v2372_v28  ;;  %v2429_v27 = vld [vmem:[%s2821_s27 + $0x1c4] ss:$8 sps:$4 sm:$0xff]  }
  0xe2   : > { %1287 = vmatprep.mubr.bf16.mxu0 %v2373_v29  ;;  %1543 = vmatprep.mubr.bf16.mxu1 %v2375_v30  ;;  %v2432_v28 = vld [vmem:[%s2821_s27 + $0x3c4] ss:$8 sps:$4 sm:$0xff]  }
  0xe9   : > { %1288 = vmatmul.mubr.bf16.gmra.mxu0 %v2377_v31  ;;  %1544 = vmatmul.mubr.bf16.gmra.mxu1 %v2378_v32 }
  0xea   : > { %1295 = vmatprep.mubr.bf16.mxu0 %v2379_v33  ;;  %1551 = vmatprep.mubr.bf16.mxu1 %v2381_v34 }
  0xf1   : > { %1296 = vmatmul.mubr.bf16.gmra.mxu0 %v2383_v35  ;;  %1552 = vmatmul.mubr.bf16.gmra.mxu1 %v2384_v36 }
  0xf2   : > { %1303 = vmatprep.mubr.bf16.mxu0 %v2385_v37  ;;  %1559 = vmatprep.mubr.bf16.mxu1 %v2387_v38 }
  0xf9   : > { %1304 = vmatmul.mubr.bf16.gmra.mxu0 %v2389_v39  ;;  %1560 = vmatmul.mubr.bf16.gmra.mxu1 %v2390_v40 }
  0xfa   : > { %1311 = vmatprep.mubr.bf16.mxu0 %v2391_v41  ;;  %1567 = vmatprep.mubr.bf16.mxu1 %v2393_v42  ;;  %v2427_v41 = vld [vmem:[%s2821_s27 + $0x1c0] ss:$8 sps:$4 sm:$0xff]  }
  0xfb   : > { %v2430_v42 = vld [vmem:[%s2821_s27 + $0x3c0] ss:$8 sps:$4 sm:$0xff]  }
 0x101   : > { %1312 = vmatmul.mubr.bf16.gmra.mxu0 %v2395_v43  ;;  %1568 = vmatmul.mubr.bf16.gmra.mxu1 %v2396_v44  ;;  %v2435_v43 = vld [vmem:[%s2821_s27 + $0x1d4] ss:$8 sps:$4 sm:$0xff]  }
 0x102   : > { %1319 = vmatprep.mubr.bf16.mxu0 %v2397_v45  ;;  %1575 = vmatprep.mubr.bf16.mxu1 %v2399_v46  ;;  %v2438_v44 = vld [vmem:[%s2821_s27 + $0x3d4] ss:$8 sps:$4 sm:$0xff]  }
 0x109   : > { %1320 = vmatmul.mubr.bf16.gmra.mxu0 %v2401_v47  ;;  %1576 = vmatmul.mubr.bf16.gmra.mxu1 %v2402_v48 }
 0x10a   : > { %1327 = vmatprep.mubr.bf16.mxu0 %v2403_v49  ;;  %1583 = vmatprep.mubr.bf16.mxu1 %v2405_v50 }
 0x111   : > { %v1137_v55 = vpop.f32.mrf.mxu0  ;;  %1328 = vmatmul.mubr.bf16.gmra.mxu0 %v2407_v51  ;;  %v1393_v56 = vpop.f32.mrf.mxu1  ;;  %1584 = vmatmul.mubr.bf16.gmra.mxu1 %v2408_v52 }
 0x112   : > { %2451 = vtanh.f32 %v1137_v55  ;;  %1335 = vmatprep.mubr.bf16.mxu0 %v2409_v53  ;;  %1591 = vmatprep.mubr.bf16.mxu1 %v2411_v54 }
 0x113   : > { %2453 = vtanh.f32 %v1393_v56  ;;  %v1139_v57 = vpop.f32.mrf.mxu0  ;;  %v1395_v58 = vpop.f32.mrf.mxu1 }
 0x114   : > { %v2433_v57 = vld [vmem:[%s2821_s27 + $0x1d0] ss:$8 sps:$4 sm:$0xff]  }
 0x115   : > { %v1140_v59 = vpop.f32.mrf.mxu0  ;;  %v1396_v60 = vpop.f32.mrf.mxu1  ;;  %v2436_v58 = vld [vmem:[%s2821_s27 + $0x3d0] ss:$8 sps:$4 sm:$0xff]  }
 0x116   : > { %2455 = vtanh.f32 %v1140_v59  ;;  %v2441_v59 = vld [vmem:[%s2821_s27 + $0x1e4] ss:$8 sps:$4 sm:$0xff]  }
 0x117   : > { %2457 = vtanh.f32 %v1396_v60  ;;  %v1142_v1 = vpop.f32.mrf.mxu0  ;;  %v1398_v2 = vpop.f32.mrf.mxu1  ;;  %v2444_v60 = vld [vmem:[%s2821_s27 + $0x3e4] ss:$8 sps:$4 sm:$0xff]  }
 0x119   : > { %v1145_v3 = vpop.f32.mrf.mxu0  ;;  %1336 = vmatmul.mubr.bf16.gmra.mxu0 %v2413_v61  ;;  %v1401_v4 = vpop.f32.mrf.mxu1  ;;  %1592 = vmatmul.mubr.bf16.gmra.mxu1 %v2414_v62 }
 0x11a   : > { %2459 = vtanh.f32 %v1145_v3  ;;  %1343 = vmatprep.mubr.bf16.mxu0 %v2415_v63  ;;  %1599 = vmatprep.mubr.bf16.mxu1 %v2417_v0 }
 0x11b   : > { %2461 = vtanh.f32 %v1401_v4  ;;  %v1147_v5 = vpop.f32.mrf.mxu0  ;;  %v1403_v6 = vpop.f32.mrf.mxu1 }
 0x11d   : > { %v1148_v7 = vpop.f32.mrf.mxu0  ;;  %v1404_v8 = vpop.f32.mrf.mxu1 }
 0x11e   : > { %2463 = vtanh.f32 %v1148_v7 }
 0x11f   : > { %v2452_v13 = vpop.eup %2451  ;;  %2465 = vtanh.f32 %v1404_v8  ;;  %v1150_v14 = vpop.f32.mrf.mxu0 }
 0x120   : > { %v1406_v15 = vpop.f32.mrf.mxu1  ;;  %v2454_v16 = vpop.eup %2453  ;;  %1776 = vst [vmem:[%s2969_s5] sm:$0xff] %v2452_v13 }
 0x121   : > { %1840 = vst [vmem:[%s2969_s5 + $0x200] sm:$0xff] %v2454_v16  ;;  %v1153_v17 = vpop.f32.mrf.mxu0  ;;  %1344 = vmatmul.mubr.bf16.gmra.mxu0 %v2419_v9  ;;  %1600 = vmatmul.mubr.bf16.gmra.mxu1 %v2420_v10  ;;  %v2439_v9 = vld [vmem:[%s2821_s27 + $0x1e0] ss:$8 sps:$4 sm:$0xff]  }
 0x122   : > { %v1409_v18 = vpop.f32.mrf.mxu1  ;;  %2467 = vtanh.f32 %v1153_v17  ;;  %1351 = vmatprep.mubr.bf16.mxu0 %v2421_v11  ;;  %1607 = vmatprep.mubr.bf16.mxu1 %v2423_v12  ;;  %v2442_v10 = vld [vmem:[%s2821_s27 + $0x3e0] ss:$8 sps:$4 sm:$0xff]   ;;  %v2447_v11 = vld [vmem:[%s2821_s27 + $0x1f4] ss:$8 sps:$4 sm:$0xff]  }
 0x123   : > { %v2456_v19 = vpop.eup %2455  ;;  %2469 = vtanh.f32 %v1409_v18  ;;  %v1155_v20 = vpop.f32.mrf.mxu0  ;;  %v2450_v12 = vld [vmem:[%s2821_s27 + $0x3f4] ss:$8 sps:$4 sm:$0xff]  }
 0x124   : > { %v1411_v21 = vpop.f32.mrf.mxu1  ;;  %v2458_v22 = vpop.eup %2457  ;;  %1777 = vst [vmem:[%s2969_s5 + $0x8] sm:$0xff] %v2456_v19 }
 0x125   : > { %1841 = vst [vmem:[%s2969_s5 + $0x208] sm:$0xff] %v2458_v22  ;;  %v1156_v23 = vpop.f32.mrf.mxu0 }
 0x126   : > { %v1412_v24 = vpop.f32.mrf.mxu1  ;;  %2471 = vtanh.f32 %v1156_v23 }
 0x127   : > { %v2460_v29 = vpop.eup %2459  ;;  %2473 = vtanh.f32 %v1412_v24  ;;  %v1158_v30 = vpop.f32.mrf.mxu0 }
 0x128   : > { %v1414_v31 = vpop.f32.mrf.mxu1  ;;  %v2462_v32 = vpop.eup %2461  ;;  %1778 = vst [vmem:[%s2969_s5 + $0x10] sm:$0xff] %v2460_v29 }
 0x129   : > { %1842 = vst [vmem:[%s2969_s5 + $0x210] sm:$0xff] %v2462_v32  ;;  %v1161_v33 = vpop.f32.mrf.mxu0  ;;  %1352 = vmatmul.mubr.bf16.gmra.mxu0 %v2425_v25  ;;  %1608 = vmatmul.mubr.bf16.gmra.mxu1 %v2426_v26  ;;  %v2445_v25 = vld [vmem:[%s2821_s27 + $0x1f0] ss:$8 sps:$4 sm:$0xff]  }
 0x12a   : > { %v1417_v34 = vpop.f32.mrf.mxu1  ;;  %2475 = vtanh.f32 %v1161_v33  ;;  %1359 = vmatprep.mubr.bf16.mxu0 %v2429_v27  ;;  %1615 = vmatprep.mubr.bf16.mxu1 %v2432_v28  ;;  %v2448_v26 = vld [vmem:[%s2821_s27 + $0x3f0] ss:$8 sps:$4 sm:$0xff]  }
 0x12b   : > { %v2464_v35 = vpop.eup %2463  ;;  %2477 = vtanh.f32 %v1417_v34  ;;  %v1163_v36 = vpop.f32.mrf.mxu0 }
 0x12c   : > { %v1419_v37 = vpop.f32.mrf.mxu1  ;;  %v2466_v38 = vpop.eup %2465  ;;  %1779 = vst [vmem:[%s2969_s5 + $0x18] sm:$0xff] %v2464_v35 }
 0x12d   : > { %1843 = vst [vmem:[%s2969_s5 + $0x218] sm:$0xff] %v2466_v38  ;;  %v1164_v39 = vpop.f32.mrf.mxu0 }
 0x12e   : > { %v1420_v40 = vpop.f32.mrf.mxu1  ;;  %2479 = vtanh.f32 %v1164_v39 }
 0x12f   : > { %v2468_v45 = vpop.eup %2467  ;;  %2481 = vtanh.f32 %v1420_v40  ;;  %v1166_v46 = vpop.f32.mrf.mxu0 }
 0x130   : > { %v1422_v47 = vpop.f32.mrf.mxu1  ;;  %v2470_v48 = vpop.eup %2469  ;;  %1780 = vst [vmem:[%s2969_s5 + $0x20] sm:$0xff] %v2468_v45 }
 0x131   : > { %1844 = vst [vmem:[%s2969_s5 + $0x220] sm:$0xff] %v2470_v48  ;;  %v1169_v49 = vpop.f32.mrf.mxu0  ;;  %1360 = vmatmul.mubr.bf16.gmra.mxu0 %v2427_v41  ;;  %1616 = vmatmul.mubr.bf16.gmra.mxu1 %v2430_v42 }
 0x132   : > { %v1425_v50 = vpop.f32.mrf.mxu1  ;;  %2483 = vtanh.f32 %v1169_v49  ;;  %1367 = vmatprep.mubr.bf16.mxu0 %v2435_v43  ;;  %1623 = vmatprep.mubr.bf16.mxu1 %v2438_v44 }
 0x133   : > { %v2472_v51 = vpop.eup %2471  ;;  %2485 = vtanh.f32 %v1425_v50  ;;  %v1171_v52 = vpop.f32.mrf.mxu0 }
 0x134   : > { %v1427_v53 = vpop.f32.mrf.mxu1  ;;  %v2474_v54 = vpop.eup %2473  ;;  %1781 = vst [vmem:[%s2969_s5 + $0x28] sm:$0xff] %v2472_v51 }
 0x135   : > { %1845 = vst [vmem:[%s2969_s5 + $0x228] sm:$0xff] %v2474_v54  ;;  %v1172_v55 = vpop.f32.mrf.mxu0 }
 0x136   : > { %v1428_v56 = vpop.f32.mrf.mxu1  ;;  %2487 = vtanh.f32 %v1172_v55 }
 0x137   : > { %v2476_v61 = vpop.eup %2475  ;;  %2489 = vtanh.f32 %v1428_v56  ;;  %v1174_v62 = vpop.f32.mrf.mxu0 }
 0x138   : > { %v1430_v63 = vpop.f32.mrf.mxu1  ;;  %v2478_v0 = vpop.eup %2477  ;;  %1782 = vst [vmem:[%s2969_s5 + $0x30] sm:$0xff] %v2476_v61 }
 0x139   : > { %1846 = vst [vmem:[%s2969_s5 + $0x230] sm:$0xff] %v2478_v0  ;;  %v1177_v1 = vpop.f32.mrf.mxu0  ;;  %1368 = vmatmul.mubr.bf16.gmra.mxu0 %v2433_v57  ;;  %1624 = vmatmul.mubr.bf16.gmra.mxu1 %v2436_v58 }
 0x13a   : > { %v1433_v2 = vpop.f32.mrf.mxu1  ;;  %2491 = vtanh.f32 %v1177_v1  ;;  %1375 = vmatprep.mubr.bf16.mxu0 %v2441_v59  ;;  %1631 = vmatprep.mubr.bf16.mxu1 %v2444_v60 }
 0x13b   : > { %v2480_v3 = vpop.eup %2479  ;;  %2493 = vtanh.f32 %v1433_v2  ;;  %v1179_v4 = vpop.f32.mrf.mxu0 }
 0x13c   : > { %v1435_v5 = vpop.f32.mrf.mxu1  ;;  %v2482_v6 = vpop.eup %2481  ;;  %1783 = vst [vmem:[%s2969_s5 + $0x38] sm:$0xff] %v2480_v3 }
 0x13d   : > { %1847 = vst [vmem:[%s2969_s5 + $0x238] sm:$0xff] %v2482_v6  ;;  %v1180_v7 = vpop.f32.mrf.mxu0 }
 0x13e   : > { %v1436_v8 = vpop.f32.mrf.mxu1  ;;  %2495 = vtanh.f32 %v1180_v7 }
 0x13f   : > { %v2484_v13 = vpop.eup %2483  ;;  %2497 = vtanh.f32 %v1436_v8  ;;  %v1182_v14 = vpop.f32.mrf.mxu0 }
 0x140   : > { %v1438_v15 = vpop.f32.mrf.mxu1  ;;  %v2486_v16 = vpop.eup %2485  ;;  %1784 = vst [vmem:[%s2969_s5 + $0x40] sm:$0xff] %v2484_v13 }
 0x141   : > { %1848 = vst [vmem:[%s2969_s5 + $0x240] sm:$0xff] %v2486_v16  ;;  %v1185_v17 = vpop.f32.mrf.mxu0  ;;  %1376 = vmatmul.mubr.bf16.gmra.mxu0 %v2439_v9  ;;  %1632 = vmatmul.mubr.bf16.gmra.mxu1 %v2442_v10 }
 0x142   : > { %v1441_v18 = vpop.f32.mrf.mxu1  ;;  %2499 = vtanh.f32 %v1185_v17  ;;  %1383 = vmatprep.mubr.bf16.mxu0 %v2447_v11  ;;  %1639 = vmatprep.mubr.bf16.mxu1 %v2450_v12 }
 0x143   : > { %v2488_v19 = vpop.eup %2487  ;;  %2501 = vtanh.f32 %v1441_v18  ;;  %v1187_v20 = vpop.f32.mrf.mxu0 }
 0x144   : > { %v1443_v21 = vpop.f32.mrf.mxu1  ;;  %v2490_v22 = vpop.eup %2489  ;;  %1785 = vst [vmem:[%s2969_s5 + $0x48] sm:$0xff] %v2488_v19 }
 0x145   : > { %1849 = vst [vmem:[%s2969_s5 + $0x248] sm:$0xff] %v2490_v22  ;;  %v1188_v23 = vpop.f32.mrf.mxu0 }
 0x146   : > { %v1444_v24 = vpop.f32.mrf.mxu1  ;;  %2503 = vtanh.f32 %v1188_v23 }
 0x147   : > { %v2492_v27 = vpop.eup %2491  ;;  %2505 = vtanh.f32 %v1444_v24  ;;  %v1190_v28 = vpop.f32.mrf.mxu0 }
 0x148   : > { %v1446_v29 = vpop.f32.mrf.mxu1  ;;  %v2494_v30 = vpop.eup %2493  ;;  %1786 = vst [vmem:[%s2969_s5 + $0x50] sm:$0xff] %v2492_v27 }
 0x149   : > { %1850 = vst [vmem:[%s2969_s5 + $0x250] sm:$0xff] %v2494_v30  ;;  %v1193_v31 = vpop.f32.mrf.mxu0  ;;  %1384 = vmatmul.mubr.bf16.gmra.mxu0 %v2445_v25  ;;  %1640 = vmatmul.mubr.bf16.gmra.mxu1 %v2448_v26 }
 0x14a   : > { %v1449_v32 = vpop.f32.mrf.mxu1  ;;  %2507 = vtanh.f32 %v1193_v31 }
 0x14b   : > { %v2496_v33 = vpop.eup %2495  ;;  %2509 = vtanh.f32 %v1449_v32  ;;  %v1195_v34 = vpop.f32.mrf.mxu0 }
 0x14c   : > { %v1451_v35 = vpop.f32.mrf.mxu1  ;;  %v2498_v36 = vpop.eup %2497  ;;  %1787 = vst [vmem:[%s2969_s5 + $0x58] sm:$0xff] %v2496_v33 }
 0x14d   : > { %1851 = vst [vmem:[%s2969_s5 + $0x258] sm:$0xff] %v2498_v36  ;;  %v1196_v37 = vpop.f32.mrf.mxu0 }
 0x14e   : > { %v1452_v38 = vpop.f32.mrf.mxu1  ;;  %2511 = vtanh.f32 %v1196_v37 }
 0x14f   : > { %v2500_v39 = vpop.eup %2499  ;;  %2513 = vtanh.f32 %v1452_v38  ;;  %v1198_v40 = vpop.f32.mrf.mxu0 }
 0x150   : > { %v1454_v41 = vpop.f32.mrf.mxu1  ;;  %v2502_v42 = vpop.eup %2501  ;;  %1788 = vst [vmem:[%s2969_s5 + $0x60] sm:$0xff] %v2500_v39 }
 0x151   : > { %1852 = vst [vmem:[%s2969_s5 + $0x260] sm:$0xff] %v2502_v42  ;;  %v1201_v43 = vpop.f32.mrf.mxu0 }
 0x152   : > { %v1457_v44 = vpop.f32.mrf.mxu1  ;;  %2515 = vtanh.f32 %v1201_v43 }
 0x153   : > { %v2504_v45 = vpop.eup %2503  ;;  %2517 = vtanh.f32 %v1457_v44  ;;  %v1203_v46 = vpop.f32.mrf.mxu0 }
 0x154   : > { %v1459_v47 = vpop.f32.mrf.mxu1  ;;  %v2506_v48 = vpop.eup %2505  ;;  %1789 = vst [vmem:[%s2969_s5 + $0x68] sm:$0xff] %v2504_v45 }
 0x155   : > { %1853 = vst [vmem:[%s2969_s5 + $0x268] sm:$0xff] %v2506_v48  ;;  %v1204_v49 = vpop.f32.mrf.mxu0 }
 0x156   : > { %v1460_v50 = vpop.f32.mrf.mxu1  ;;  %2519 = vtanh.f32 %v1204_v49 }
 0x157   : > { %v2508_v51 = vpop.eup %2507  ;;  %2521 = vtanh.f32 %v1460_v50  ;;  %v1206_v52 = vpop.f32.mrf.mxu0 }
 0x158   : > { %v1462_v53 = vpop.f32.mrf.mxu1  ;;  %v2510_v54 = vpop.eup %2509  ;;  %1790 = vst [vmem:[%s2969_s5 + $0x70] sm:$0xff] %v2508_v51 }
 0x159   : > { %1854 = vst [vmem:[%s2969_s5 + $0x270] sm:$0xff] %v2510_v54  ;;  %v1209_v55 = vpop.f32.mrf.mxu0 }
 0x15a   : > { %v1465_v56 = vpop.f32.mrf.mxu1  ;;  %2523 = vtanh.f32 %v1209_v55 }
 0x15b   : > { %v2512_v57 = vpop.eup %2511  ;;  %2525 = vtanh.f32 %v1465_v56  ;;  %v1211_v58 = vpop.f32.mrf.mxu0 }
 0x15c   : > { %v1467_v59 = vpop.f32.mrf.mxu1  ;;  %v2514_v60 = vpop.eup %2513  ;;  %1791 = vst [vmem:[%s2969_s5 + $0x78] sm:$0xff] %v2512_v57 }
 0x15d   : > { %1855 = vst [vmem:[%s2969_s5 + $0x278] sm:$0xff] %v2514_v60  ;;  %v1212_v61 = vpop.f32.mrf.mxu0 }
 0x15e   : > { %v1468_v62 = vpop.f32.mrf.mxu1  ;;  %2527 = vtanh.f32 %v1212_v61 }
 0x15f   : > { %v2516_v63 = vpop.eup %2515  ;;  %2529 = vtanh.f32 %v1468_v62  ;;  %v1214_v0 = vpop.f32.mrf.mxu0 }
 0x160   : > { %v1470_v1 = vpop.f32.mrf.mxu1  ;;  %v2518_v2 = vpop.eup %2517  ;;  %1792 = vst [vmem:[%s2969_s5 + $0x80] sm:$0xff] %v2516_v63 }
 0x161   : > { %1856 = vst [vmem:[%s2969_s5 + $0x280] sm:$0xff] %v2518_v2  ;;  %v1217_v3 = vpop.f32.mrf.mxu0 }
 0x162   : > { %v1473_v4 = vpop.f32.mrf.mxu1  ;;  %2531 = vtanh.f32 %v1217_v3 }
 0x163   : > { %v2520_v5 = vpop.eup %2519  ;;  %2533 = vtanh.f32 %v1473_v4  ;;  %v1219_v6 = vpop.f32.mrf.mxu0 }
 0x164   : > { %v1475_v7 = vpop.f32.mrf.mxu1  ;;  %v2522_v8 = vpop.eup %2521  ;;  %1793 = vst [vmem:[%s2969_s5 + $0x88] sm:$0xff] %v2520_v5 }
 0x165   : > { %1857 = vst [vmem:[%s2969_s5 + $0x288] sm:$0xff] %v2522_v8  ;;  %v1220_v9 = vpop.f32.mrf.mxu0 }
 0x166   : > { %v1476_v10 = vpop.f32.mrf.mxu1  ;;  %2535 = vtanh.f32 %v1220_v9 }
 0x167   : > { %v2524_v11 = vpop.eup %2523  ;;  %2537 = vtanh.f32 %v1476_v10  ;;  %v1222_v12 = vpop.f32.mrf.mxu0 }
 0x168   : > { %v1478_v13 = vpop.f32.mrf.mxu1  ;;  %v2526_v14 = vpop.eup %2525  ;;  %1794 = vst [vmem:[%s2969_s5 + $0x90] sm:$0xff] %v2524_v11 }
 0x169   : > { %1858 = vst [vmem:[%s2969_s5 + $0x290] sm:$0xff] %v2526_v14  ;;  %v1225_v15 = vpop.f32.mrf.mxu0 }
 0x16a   : > { %v1481_v16 = vpop.f32.mrf.mxu1  ;;  %2539 = vtanh.f32 %v1225_v15 }
 0x16b   : > { %v2528_v17 = vpop.eup %2527  ;;  %2541 = vtanh.f32 %v1481_v16  ;;  %v1227_v18 = vpop.f32.mrf.mxu0 }
 0x16c   : > { %v1483_v19 = vpop.f32.mrf.mxu1  ;;  %v2530_v20 = vpop.eup %2529  ;;  %1795 = vst [vmem:[%s2969_s5 + $0x98] sm:$0xff] %v2528_v17 }
 0x16d   : > { %1859 = vst [vmem:[%s2969_s5 + $0x298] sm:$0xff] %v2530_v20  ;;  %v1228_v21 = vpop.f32.mrf.mxu0 }
 0x16e   : > { %v1484_v22 = vpop.f32.mrf.mxu1  ;;  %2543 = vtanh.f32 %v1228_v21 }
 0x16f   : > { %v2532_v23 = vpop.eup %2531  ;;  %2545 = vtanh.f32 %v1484_v22  ;;  %v1230_v24 = vpop.f32.mrf.mxu0 }
 0x170   : > { %v1486_v25 = vpop.f32.mrf.mxu1  ;;  %v2534_v26 = vpop.eup %2533  ;;  %1796 = vst [vmem:[%s2969_s5 + $0xa0] sm:$0xff] %v2532_v23 }
 0x171   : > { %1860 = vst [vmem:[%s2969_s5 + $0x2a0] sm:$0xff] %v2534_v26  ;;  %v1233_v27 = vpop.f32.mrf.mxu0 }
 0x172   : > { %v1489_v28 = vpop.f32.mrf.mxu1  ;;  %2547 = vtanh.f32 %v1233_v27 }
 0x173   : > { %v2536_v29 = vpop.eup %2535  ;;  %2549 = vtanh.f32 %v1489_v28  ;;  %v1235_v30 = vpop.f32.mrf.mxu0 }
 0x174   : > { %v1491_v31 = vpop.f32.mrf.mxu1  ;;  %v2538_v32 = vpop.eup %2537  ;;  %1797 = vst [vmem:[%s2969_s5 + $0xa8] sm:$0xff] %v2536_v29 }
 0x175   : > { %1861 = vst [vmem:[%s2969_s5 + $0x2a8] sm:$0xff] %v2538_v32  ;;  %v1236_v33 = vpop.f32.mrf.mxu0 }
 0x176   : > { %v1492_v34 = vpop.f32.mrf.mxu1  ;;  %2551 = vtanh.f32 %v1236_v33 }
 0x177   : > { %v2540_v35 = vpop.eup %2539  ;;  %2553 = vtanh.f32 %v1492_v34  ;;  %v1238_v36 = vpop.f32.mrf.mxu0 }
 0x178   : > { %v1494_v37 = vpop.f32.mrf.mxu1  ;;  %v2542_v38 = vpop.eup %2541  ;;  %1798 = vst [vmem:[%s2969_s5 + $0xb0] sm:$0xff] %v2540_v35 }
 0x179   : > { %1862 = vst [vmem:[%s2969_s5 + $0x2b0] sm:$0xff] %v2542_v38  ;;  %v1241_v39 = vpop.f32.mrf.mxu0 }
 0x17a   : > { %v1497_v40 = vpop.f32.mrf.mxu1  ;;  %2555 = vtanh.f32 %v1241_v39 }
 0x17b   : > { %v2544_v41 = vpop.eup %2543  ;;  %2557 = vtanh.f32 %v1497_v40  ;;  %v1243_v42 = vpop.f32.mrf.mxu0 }
 0x17c   : > { %v1499_v43 = vpop.f32.mrf.mxu1  ;;  %v2546_v44 = vpop.eup %2545  ;;  %1799 = vst [vmem:[%s2969_s5 + $0xb8] sm:$0xff] %v2544_v41 }
 0x17d   : > { %1863 = vst [vmem:[%s2969_s5 + $0x2b8] sm:$0xff] %v2546_v44  ;;  %v1244_v45 = vpop.f32.mrf.mxu0 }
 0x17e   : > { %v1500_v46 = vpop.f32.mrf.mxu1  ;;  %2559 = vtanh.f32 %v1244_v45 }
 0x17f   : > { %v2548_v47 = vpop.eup %2547  ;;  %2561 = vtanh.f32 %v1500_v46  ;;  %v1246_v48 = vpop.f32.mrf.mxu0 }
 0x180   : > { %v1502_v49 = vpop.f32.mrf.mxu1  ;;  %v2550_v50 = vpop.eup %2549  ;;  %1800 = vst [vmem:[%s2969_s5 + $0xc0] sm:$0xff] %v2548_v47 }
 0x181   : > { %1864 = vst [vmem:[%s2969_s5 + $0x2c0] sm:$0xff] %v2550_v50  ;;  %v1249_v51 = vpop.f32.mrf.mxu0 }
 0x182   : > { %v1505_v52 = vpop.f32.mrf.mxu1  ;;  %2563 = vtanh.f32 %v1249_v51 }
 0x183   : > { %v2552_v53 = vpop.eup %2551  ;;  %2565 = vtanh.f32 %v1505_v52  ;;  %v1251_v54 = vpop.f32.mrf.mxu0 }
 0x184   : > { %v1507_v55 = vpop.f32.mrf.mxu1  ;;  %v2554_v56 = vpop.eup %2553  ;;  %1801 = vst [vmem:[%s2969_s5 + $0xc8] sm:$0xff] %v2552_v53 }
 0x185   : > { %1865 = vst [vmem:[%s2969_s5 + $0x2c8] sm:$0xff] %v2554_v56  ;;  %v1252_v57 = vpop.f32.mrf.mxu0 }
 0x186   : > { %v1508_v58 = vpop.f32.mrf.mxu1  ;;  %2567 = vtanh.f32 %v1252_v57 }
 0x187   : > { %v2556_v59 = vpop.eup %2555  ;;  %2569 = vtanh.f32 %v1508_v58  ;;  %v1254_v60 = vpop.f32.mrf.mxu0 }
 0x188   : > { %v1510_v61 = vpop.f32.mrf.mxu1  ;;  %v2558_v62 = vpop.eup %2557  ;;  %1802 = vst [vmem:[%s2969_s5 + $0xd0] sm:$0xff] %v2556_v59 }
 0x189   : > { %1866 = vst [vmem:[%s2969_s5 + $0x2d0] sm:$0xff] %v2558_v62  ;;  %v1257_v63 = vpop.f32.mrf.mxu0 }
 0x18a   : > { %v1513_v0 = vpop.f32.mrf.mxu1  ;;  %2571 = vtanh.f32 %v1257_v63 }
 0x18b   : > { %v2560_v1 = vpop.eup %2559  ;;  %2573 = vtanh.f32 %v1513_v0  ;;  %v1259_v2 = vpop.f32.mrf.mxu0 }
 0x18c   : > { %v1515_v3 = vpop.f32.mrf.mxu1  ;;  %v2562_v4 = vpop.eup %2561  ;;  %1803 = vst [vmem:[%s2969_s5 + $0xd8] sm:$0xff] %v2560_v1 }
 0x18d   : > { %1867 = vst [vmem:[%s2969_s5 + $0x2d8] sm:$0xff] %v2562_v4  ;;  %v1260_v5 = vpop.f32.mrf.mxu0 }
 0x18e   : > { %v1516_v6 = vpop.f32.mrf.mxu1  ;;  %2575 = vtanh.f32 %v1260_v5 }
 0x18f   : > { %v2564_v7 = vpop.eup %2563  ;;  %2577 = vtanh.f32 %v1516_v6  ;;  %v1262_v8 = vpop.f32.mrf.mxu0 }
 0x190   : > { %v1518_v9 = vpop.f32.mrf.mxu1  ;;  %v2566_v10 = vpop.eup %2565  ;;  %1804 = vst [vmem:[%s2969_s5 + $0xe0] sm:$0xff] %v2564_v7 }
 0x191   : > { %1868 = vst [vmem:[%s2969_s5 + $0x2e0] sm:$0xff] %v2566_v10  ;;  %v1265_v11 = vpop.f32.mrf.mxu0 }
 0x192   : > { %v1521_v12 = vpop.f32.mrf.mxu1  ;;  %2579 = vtanh.f32 %v1265_v11 }
 0x193   : > { %v2568_v13 = vpop.eup %2567  ;;  %2581 = vtanh.f32 %v1521_v12  ;;  %v1267_v14 = vpop.f32.mrf.mxu0 }
 0x194   : > { %v1523_v15 = vpop.f32.mrf.mxu1  ;;  %v2570_v16 = vpop.eup %2569  ;;  %1805 = vst [vmem:[%s2969_s5 + $0xe8] sm:$0xff] %v2568_v13 }
 0x195   : > { %1869 = vst [vmem:[%s2969_s5 + $0x2e8] sm:$0xff] %v2570_v16  ;;  %v1268_v17 = vpop.f32.mrf.mxu0 }
 0x196   : > { %v1524_v18 = vpop.f32.mrf.mxu1  ;;  %2583 = vtanh.f32 %v1268_v17 }
 0x197   : > { %v2572_v19 = vpop.eup %2571  ;;  %2585 = vtanh.f32 %v1524_v18  ;;  %v1270_v20 = vpop.f32.mrf.mxu0 }
 0x198   : > { %v1526_v21 = vpop.f32.mrf.mxu1  ;;  %v2574_v22 = vpop.eup %2573  ;;  %1806 = vst [vmem:[%s2969_s5 + $0xf0] sm:$0xff] %v2572_v19 }
 0x199   : > { %1870 = vst [vmem:[%s2969_s5 + $0x2f0] sm:$0xff] %v2574_v22  ;;  %v1273_v23 = vpop.f32.mrf.mxu0 }
 0x19a   : > { %v1529_v24 = vpop.f32.mrf.mxu1  ;;  %2587 = vtanh.f32 %v1273_v23 }
 0x19b   : > { %v2576_v25 = vpop.eup %2575  ;;  %2589 = vtanh.f32 %v1529_v24  ;;  %v1275_v26 = vpop.f32.mrf.mxu0 }
 0x19c   : > { %v1531_v27 = vpop.f32.mrf.mxu1  ;;  %v2578_v28 = vpop.eup %2577  ;;  %1807 = vst [vmem:[%s2969_s5 + $0xf8] sm:$0xff] %v2576_v25 }
 0x19d   : > { %1871 = vst [vmem:[%s2969_s5 + $0x2f8] sm:$0xff] %v2578_v28  ;;  %v1276_v29 = vpop.f32.mrf.mxu0 }
 0x19e   : > { %v1532_v30 = vpop.f32.mrf.mxu1  ;;  %2591 = vtanh.f32 %v1276_v29 }
 0x19f   : > { %v2580_v31 = vpop.eup %2579  ;;  %2593 = vtanh.f32 %v1532_v30  ;;  %v1278_v32 = vpop.f32.mrf.mxu0 }
 0x1a0   : > { %v1534_v33 = vpop.f32.mrf.mxu1  ;;  %v2582_v34 = vpop.eup %2581  ;;  %1808 = vst [vmem:[%s2969_s5 + $0x100] sm:$0xff] %v2580_v31 }
 0x1a1   : > { %1872 = vst [vmem:[%s2969_s5 + $0x300] sm:$0xff] %v2582_v34  ;;  %v1281_v35 = vpop.f32.mrf.mxu0 }
 0x1a2   : > { %v1537_v36 = vpop.f32.mrf.mxu1  ;;  %2595 = vtanh.f32 %v1281_v35 }
 0x1a3   : > { %v2584_v37 = vpop.eup %2583  ;;  %2597 = vtanh.f32 %v1537_v36  ;;  %v1283_v38 = vpop.f32.mrf.mxu0 }
 0x1a4   : > { %v1539_v39 = vpop.f32.mrf.mxu1  ;;  %v2586_v40 = vpop.eup %2585  ;;  %1809 = vst [vmem:[%s2969_s5 + $0x108] sm:$0xff] %v2584_v37 }
 0x1a5   : > { %1873 = vst [vmem:[%s2969_s5 + $0x308] sm:$0xff] %v2586_v40  ;;  %v1284_v41 = vpop.f32.mrf.mxu0 }
 0x1a6   : > { %v1540_v42 = vpop.f32.mrf.mxu1  ;;  %2599 = vtanh.f32 %v1284_v41 }
 0x1a7   : > { %v2588_v43 = vpop.eup %2587  ;;  %2601 = vtanh.f32 %v1540_v42  ;;  %v1286_v44 = vpop.f32.mrf.mxu0 }
 0x1a8   : > { %v1542_v45 = vpop.f32.mrf.mxu1  ;;  %v2590_v46 = vpop.eup %2589  ;;  %1810 = vst [vmem:[%s2969_s5 + $0x110] sm:$0xff] %v2588_v43 }
 0x1a9   : > { %1874 = vst [vmem:[%s2969_s5 + $0x310] sm:$0xff] %v2590_v46  ;;  %v1289_v47 = vpop.f32.mrf.mxu0 }
 0x1aa   : > { %v1545_v48 = vpop.f32.mrf.mxu1  ;;  %2603 = vtanh.f32 %v1289_v47 }
 0x1ab   : > { %v2592_v49 = vpop.eup %2591  ;;  %2605 = vtanh.f32 %v1545_v48  ;;  %v1291_v50 = vpop.f32.mrf.mxu0 }
 0x1ac   : > { %v1547_v51 = vpop.f32.mrf.mxu1  ;;  %v2594_v52 = vpop.eup %2593  ;;  %1811 = vst [vmem:[%s2969_s5 + $0x118] sm:$0xff] %v2592_v49 }
 0x1ad   : > { %1875 = vst [vmem:[%s2969_s5 + $0x318] sm:$0xff] %v2594_v52  ;;  %v1292_v53 = vpop.f32.mrf.mxu0 }
 0x1ae   : > { %v1548_v54 = vpop.f32.mrf.mxu1  ;;  %2607 = vtanh.f32 %v1292_v53 }
 0x1af   : > { %v2596_v55 = vpop.eup %2595  ;;  %2609 = vtanh.f32 %v1548_v54  ;;  %v1294_v56 = vpop.f32.mrf.mxu0 }
 0x1b0   : > { %v1550_v57 = vpop.f32.mrf.mxu1  ;;  %v2598_v58 = vpop.eup %2597  ;;  %1812 = vst [vmem:[%s2969_s5 + $0x120] sm:$0xff] %v2596_v55 }
 0x1b1   : > { %1876 = vst [vmem:[%s2969_s5 + $0x320] sm:$0xff] %v2598_v58  ;;  %v1297_v59 = vpop.f32.mrf.mxu0 }
 0x1b2   : > { %v1553_v60 = vpop.f32.mrf.mxu1  ;;  %2611 = vtanh.f32 %v1297_v59 }
 0x1b3   : > { %v2600_v61 = vpop.eup %2599  ;;  %2613 = vtanh.f32 %v1553_v60  ;;  %v1299_v62 = vpop.f32.mrf.mxu0 }
 0x1b4   : > { %v1555_v63 = vpop.f32.mrf.mxu1  ;;  %v2602_v0 = vpop.eup %2601  ;;  %1813 = vst [vmem:[%s2969_s5 + $0x128] sm:$0xff] %v2600_v61 }
 0x1b5   : > { %1877 = vst [vmem:[%s2969_s5 + $0x328] sm:$0xff] %v2602_v0  ;;  %v1300_v1 = vpop.f32.mrf.mxu0 }
 0x1b6   : > { %v1556_v2 = vpop.f32.mrf.mxu1  ;;  %2615 = vtanh.f32 %v1300_v1 }
 0x1b7   : > { %v2604_v3 = vpop.eup %2603  ;;  %2617 = vtanh.f32 %v1556_v2  ;;  %v1302_v4 = vpop.f32.mrf.mxu0 }
 0x1b8   : > { %v1558_v5 = vpop.f32.mrf.mxu1  ;;  %v2606_v6 = vpop.eup %2605  ;;  %1814 = vst [vmem:[%s2969_s5 + $0x130] sm:$0xff] %v2604_v3 }
 0x1b9   : > { %1878 = vst [vmem:[%s2969_s5 + $0x330] sm:$0xff] %v2606_v6  ;;  %v1305_v7 = vpop.f32.mrf.mxu0 }
 0x1ba   : > { %v1561_v8 = vpop.f32.mrf.mxu1  ;;  %2619 = vtanh.f32 %v1305_v7 }
 0x1bb   : > { %v2608_v9 = vpop.eup %2607  ;;  %2621 = vtanh.f32 %v1561_v8  ;;  %v1307_v10 = vpop.f32.mrf.mxu0 }
 0x1bc   : > { %v1563_v11 = vpop.f32.mrf.mxu1  ;;  %v2610_v12 = vpop.eup %2609  ;;  %1815 = vst [vmem:[%s2969_s5 + $0x138] sm:$0xff] %v2608_v9 }
 0x1bd   : > { %1879 = vst [vmem:[%s2969_s5 + $0x338] sm:$0xff] %v2610_v12  ;;  %v1308_v13 = vpop.f32.mrf.mxu0 }
 0x1be   : > { %v1564_v14 = vpop.f32.mrf.mxu1  ;;  %2623 = vtanh.f32 %v1308_v13 }
 0x1bf   : > { %v2612_v15 = vpop.eup %2611  ;;  %2625 = vtanh.f32 %v1564_v14  ;;  %v1310_v16 = vpop.f32.mrf.mxu0 }
 0x1c0   : > { %v1566_v17 = vpop.f32.mrf.mxu1  ;;  %v2614_v18 = vpop.eup %2613  ;;  %1816 = vst [vmem:[%s2969_s5 + $0x140] sm:$0xff] %v2612_v15 }
 0x1c1   : > { %1880 = vst [vmem:[%s2969_s5 + $0x340] sm:$0xff] %v2614_v18  ;;  %v1313_v19 = vpop.f32.mrf.mxu0 }
 0x1c2   : > { %v1569_v20 = vpop.f32.mrf.mxu1  ;;  %2627 = vtanh.f32 %v1313_v19 }
 0x1c3   : > { %v2616_v21 = vpop.eup %2615  ;;  %2629 = vtanh.f32 %v1569_v20  ;;  %v1315_v22 = vpop.f32.mrf.mxu0 }
 0x1c4   : > { %v1571_v23 = vpop.f32.mrf.mxu1  ;;  %v2618_v24 = vpop.eup %2617  ;;  %1817 = vst [vmem:[%s2969_s5 + $0x148] sm:$0xff] %v2616_v21 }
 0x1c5   : > { %1881 = vst [vmem:[%s2969_s5 + $0x348] sm:$0xff] %v2618_v24  ;;  %v1316_v25 = vpop.f32.mrf.mxu0 }
 0x1c6   : > { %v1572_v26 = vpop.f32.mrf.mxu1  ;;  %2631 = vtanh.f32 %v1316_v25 }
 0x1c7   : > { %v2620_v27 = vpop.eup %2619  ;;  %2633 = vtanh.f32 %v1572_v26  ;;  %v1318_v28 = vpop.f32.mrf.mxu0 }
 0x1c8   : > { %v1574_v29 = vpop.f32.mrf.mxu1  ;;  %v2622_v30 = vpop.eup %2621  ;;  %1818 = vst [vmem:[%s2969_s5 + $0x150] sm:$0xff] %v2620_v27 }
 0x1c9   : > { %1882 = vst [vmem:[%s2969_s5 + $0x350] sm:$0xff] %v2622_v30  ;;  %v1321_v31 = vpop.f32.mrf.mxu0 }
 0x1ca   : > { %v1577_v32 = vpop.f32.mrf.mxu1  ;;  %2635 = vtanh.f32 %v1321_v31 }
 0x1cb   : > { %v2624_v33 = vpop.eup %2623  ;;  %2637 = vtanh.f32 %v1577_v32  ;;  %v1323_v34 = vpop.f32.mrf.mxu0 }
 0x1cc   : > { %v1579_v35 = vpop.f32.mrf.mxu1  ;;  %v2626_v36 = vpop.eup %2625  ;;  %1819 = vst [vmem:[%s2969_s5 + $0x158] sm:$0xff] %v2624_v33 }
 0x1cd   : > { %1883 = vst [vmem:[%s2969_s5 + $0x358] sm:$0xff] %v2626_v36  ;;  %v1324_v37 = vpop.f32.mrf.mxu0 }
 0x1ce   : > { %v1580_v38 = vpop.f32.mrf.mxu1  ;;  %2639 = vtanh.f32 %v1324_v37 }
 0x1cf   : > { %v2628_v39 = vpop.eup %2627  ;;  %2641 = vtanh.f32 %v1580_v38  ;;  %v1326_v40 = vpop.f32.mrf.mxu0 }
 0x1d0   : > { %v1582_v41 = vpop.f32.mrf.mxu1  ;;  %v2630_v42 = vpop.eup %2629  ;;  %1820 = vst [vmem:[%s2969_s5 + $0x160] sm:$0xff] %v2628_v39 }
 0x1d1   : > { %1884 = vst [vmem:[%s2969_s5 + $0x360] sm:$0xff] %v2630_v42  ;;  %v1329_v43 = vpop.f32.mrf.mxu0 }
 0x1d2   : > { %v1585_v44 = vpop.f32.mrf.mxu1  ;;  %2643 = vtanh.f32 %v1329_v43 }
 0x1d3   : > { %v2632_v45 = vpop.eup %2631  ;;  %2645 = vtanh.f32 %v1585_v44  ;;  %v1331_v46 = vpop.f32.mrf.mxu0 }
 0x1d4   : > { %v1587_v47 = vpop.f32.mrf.mxu1  ;;  %v2634_v48 = vpop.eup %2633  ;;  %1821 = vst [vmem:[%s2969_s5 + $0x168] sm:$0xff] %v2632_v45 }
 0x1d5   : > { %1885 = vst [vmem:[%s2969_s5 + $0x368] sm:$0xff] %v2634_v48  ;;  %v1332_v49 = vpop.f32.mrf.mxu0 }
 0x1d6   : > { %v1588_v50 = vpop.f32.mrf.mxu1  ;;  %2647 = vtanh.f32 %v1332_v49 }
 0x1d7   : > { %v2636_v51 = vpop.eup %2635  ;;  %2649 = vtanh.f32 %v1588_v50  ;;  %v1334_v52 = vpop.f32.mrf.mxu0 }
 0x1d8   : > { %v1590_v53 = vpop.f32.mrf.mxu1  ;;  %v2638_v54 = vpop.eup %2637  ;;  %1822 = vst [vmem:[%s2969_s5 + $0x170] sm:$0xff] %v2636_v51 }
 0x1d9   : > { %1886 = vst [vmem:[%s2969_s5 + $0x370] sm:$0xff] %v2638_v54  ;;  %v1337_v55 = vpop.f32.mrf.mxu0 }
 0x1da   : > { %v1593_v56 = vpop.f32.mrf.mxu1  ;;  %2651 = vtanh.f32 %v1337_v55 }
 0x1db   : > { %v2640_v57 = vpop.eup %2639  ;;  %2653 = vtanh.f32 %v1593_v56  ;;  %v1339_v58 = vpop.f32.mrf.mxu0 }
 0x1dc   : > { %v1595_v59 = vpop.f32.mrf.mxu1  ;;  %v2642_v60 = vpop.eup %2641  ;;  %1823 = vst [vmem:[%s2969_s5 + $0x178] sm:$0xff] %v2640_v57 }
 0x1dd   : > { %1887 = vst [vmem:[%s2969_s5 + $0x378] sm:$0xff] %v2642_v60  ;;  %v1340_v61 = vpop.f32.mrf.mxu0 }
 0x1de   : > { %v1596_v62 = vpop.f32.mrf.mxu1  ;;  %2655 = vtanh.f32 %v1340_v61 }
 0x1df   : > { %v2644_v63 = vpop.eup %2643  ;;  %2657 = vtanh.f32 %v1596_v62  ;;  %v1342_v0 = vpop.f32.mrf.mxu0 }
 0x1e0   : > { %v1598_v1 = vpop.f32.mrf.mxu1  ;;  %v2646_v2 = vpop.eup %2645  ;;  %1824 = vst [vmem:[%s2969_s5 + $0x180] sm:$0xff] %v2644_v63 }
 0x1e1   : > { %1888 = vst [vmem:[%s2969_s5 + $0x380] sm:$0xff] %v2646_v2  ;;  %v1345_v3 = vpop.f32.mrf.mxu0 }
 0x1e2   : > { %v1601_v4 = vpop.f32.mrf.mxu1  ;;  %2659 = vtanh.f32 %v1345_v3 }
 0x1e3   : > { %v2648_v5 = vpop.eup %2647  ;;  %2661 = vtanh.f32 %v1601_v4  ;;  %v1347_v6 = vpop.f32.mrf.mxu0 }
 0x1e4   : > { %v1603_v7 = vpop.f32.mrf.mxu1  ;;  %v2650_v8 = vpop.eup %2649  ;;  %1825 = vst [vmem:[%s2969_s5 + $0x188] sm:$0xff] %v2648_v5 }
 0x1e5   : > { %1889 = vst [vmem:[%s2969_s5 + $0x388] sm:$0xff] %v2650_v8  ;;  %v1348_v9 = vpop.f32.mrf.mxu0 }
 0x1e6   : > { %v1604_v10 = vpop.f32.mrf.mxu1  ;;  %2663 = vtanh.f32 %v1348_v9 }
 0x1e7   : > { %v2652_v11 = vpop.eup %2651  ;;  %2665 = vtanh.f32 %v1604_v10  ;;  %v1350_v12 = vpop.f32.mrf.mxu0 }
 0x1e8   : > { %v1606_v13 = vpop.f32.mrf.mxu1  ;;  %v2654_v14 = vpop.eup %2653  ;;  %1826 = vst [vmem:[%s2969_s5 + $0x190] sm:$0xff] %v2652_v11 }
 0x1e9   : > { %1890 = vst [vmem:[%s2969_s5 + $0x390] sm:$0xff] %v2654_v14  ;;  %v1353_v15 = vpop.f32.mrf.mxu0 }
 0x1ea   : > { %v1609_v16 = vpop.f32.mrf.mxu1  ;;  %2667 = vtanh.f32 %v1353_v15 }
 0x1eb   : > { %v2656_v17 = vpop.eup %2655  ;;  %2669 = vtanh.f32 %v1609_v16  ;;  %v1355_v18 = vpop.f32.mrf.mxu0 }
 0x1ec   : > { %v1611_v19 = vpop.f32.mrf.mxu1  ;;  %v2658_v20 = vpop.eup %2657  ;;  %1827 = vst [vmem:[%s2969_s5 + $0x198] sm:$0xff] %v2656_v17 }
 0x1ed   : > { %1891 = vst [vmem:[%s2969_s5 + $0x398] sm:$0xff] %v2658_v20  ;;  %v1356_v21 = vpop.f32.mrf.mxu0 }
 0x1ee   : > { %v1612_v22 = vpop.f32.mrf.mxu1  ;;  %2671 = vtanh.f32 %v1356_v21 }
 0x1ef   : > { %v2660_v23 = vpop.eup %2659  ;;  %2673 = vtanh.f32 %v1612_v22  ;;  %v1358_v24 = vpop.f32.mrf.mxu0 }
 0x1f0   : > { %v1614_v25 = vpop.f32.mrf.mxu1  ;;  %v2662_v26 = vpop.eup %2661  ;;  %1828 = vst [vmem:[%s2969_s5 + $0x1a0] sm:$0xff] %v2660_v23 }
 0x1f1   : > { %1892 = vst [vmem:[%s2969_s5 + $0x3a0] sm:$0xff] %v2662_v26  ;;  %v1361_v27 = vpop.f32.mrf.mxu0 }
 0x1f2   : > { %v1617_v28 = vpop.f32.mrf.mxu1  ;;  %2675 = vtanh.f32 %v1361_v27 }
 0x1f3   : > { %v2664_v29 = vpop.eup %2663  ;;  %2677 = vtanh.f32 %v1617_v28  ;;  %v1363_v30 = vpop.f32.mrf.mxu0 }
 0x1f4   : > { %v1619_v31 = vpop.f32.mrf.mxu1  ;;  %v2666_v32 = vpop.eup %2665  ;;  %1829 = vst [vmem:[%s2969_s5 + $0x1a8] sm:$0xff] %v2664_v29 }
 0x1f5   : > { %1893 = vst [vmem:[%s2969_s5 + $0x3a8] sm:$0xff] %v2666_v32  ;;  %v1364_v33 = vpop.f32.mrf.mxu0 }
 0x1f6   : > { %v1620_v34 = vpop.f32.mrf.mxu1  ;;  %2679 = vtanh.f32 %v1364_v33 }
 0x1f7   : > { %v2668_v35 = vpop.eup %2667  ;;  %2681 = vtanh.f32 %v1620_v34  ;;  %v1366_v36 = vpop.f32.mrf.mxu0 }
 0x1f8   : > { %v1622_v37 = vpop.f32.mrf.mxu1  ;;  %v2670_v38 = vpop.eup %2669  ;;  %1830 = vst [vmem:[%s2969_s5 + $0x1b0] sm:$0xff] %v2668_v35 }
 0x1f9   : > { %1894 = vst [vmem:[%s2969_s5 + $0x3b0] sm:$0xff] %v2670_v38  ;;  %v1369_v39 = vpop.f32.mrf.mxu0 }
 0x1fa   : > { %v1625_v40 = vpop.f32.mrf.mxu1  ;;  %2683 = vtanh.f32 %v1369_v39 }
 0x1fb   : > { %v2672_v41 = vpop.eup %2671  ;;  %2685 = vtanh.f32 %v1625_v40  ;;  %v1371_v42 = vpop.f32.mrf.mxu0 }
 0x1fc   : > { %v1627_v43 = vpop.f32.mrf.mxu1  ;;  %v2674_v44 = vpop.eup %2673  ;;  %1831 = vst [vmem:[%s2969_s5 + $0x1b8] sm:$0xff] %v2672_v41 }
 0x1fd   : > { %1895 = vst [vmem:[%s2969_s5 + $0x3b8] sm:$0xff] %v2674_v44  ;;  %v1372_v45 = vpop.f32.mrf.mxu0 }
 0x1fe   : > { %v1628_v46 = vpop.f32.mrf.mxu1  ;;  %2687 = vtanh.f32 %v1372_v45 }
 0x1ff   : > { %v2676_v47 = vpop.eup %2675  ;;  %2689 = vtanh.f32 %v1628_v46  ;;  %v1374_v48 = vpop.f32.mrf.mxu0 }
 0x200   : > { %v1630_v49 = vpop.f32.mrf.mxu1  ;;  %v2678_v50 = vpop.eup %2677  ;;  %1832 = vst [vmem:[%s2969_s5 + $0x1c0] sm:$0xff] %v2676_v47 }
 0x201   : > { %1896 = vst [vmem:[%s2969_s5 + $0x3c0] sm:$0xff] %v2678_v50  ;;  %v1377_v51 = vpop.f32.mrf.mxu0 }
 0x202   : > { %v1633_v52 = vpop.f32.mrf.mxu1  ;;  %2691 = vtanh.f32 %v1377_v51 }
 0x203   : > { %v2680_v53 = vpop.eup %2679  ;;  %2693 = vtanh.f32 %v1633_v52  ;;  %v1379_v54 = vpop.f32.mrf.mxu0 }
 0x204   : > { %v1635_v55 = vpop.f32.mrf.mxu1  ;;  %v2682_v56 = vpop.eup %2681  ;;  %1833 = vst [vmem:[%s2969_s5 + $0x1c8] sm:$0xff] %v2680_v53 }
 0x205   : > { %1897 = vst [vmem:[%s2969_s5 + $0x3c8] sm:$0xff] %v2682_v56  ;;  %v1380_v57 = vpop.f32.mrf.mxu0 }
 0x206   : > { %v1636_v58 = vpop.f32.mrf.mxu1  ;;  %2695 = vtanh.f32 %v1380_v57 }
 0x207   : > { %v2684_v59 = vpop.eup %2683  ;;  %2697 = vtanh.f32 %v1636_v58  ;;  %v1382_v60 = vpop.f32.mrf.mxu0 }
 0x208   : > { %v1638_v61 = vpop.f32.mrf.mxu1  ;;  %v2686_v62 = vpop.eup %2685  ;;  %1834 = vst [vmem:[%s2969_s5 + $0x1d0] sm:$0xff] %v2684_v59 }
 0x209   : > { %1898 = vst [vmem:[%s2969_s5 + $0x3d0] sm:$0xff] %v2686_v62  ;;  %v1385_v63 = vpop.f32.mrf.mxu0 }
 0x20a   : > { %v1641_v0 = vpop.f32.mrf.mxu1  ;;  %2699 = vtanh.f32 %v1385_v63 }
 0x20b   : > { %v2688_v1 = vpop.eup %2687  ;;  %2701 = vtanh.f32 %v1641_v0  ;;  %v1387_v2 = vpop.f32.mrf.mxu0 }
 0x20c   : > { %v1643_v3 = vpop.f32.mrf.mxu1  ;;  %v2690_v4 = vpop.eup %2689  ;;  %1835 = vst [vmem:[%s2969_s5 + $0x1d8] sm:$0xff] %v2688_v1 }
 0x20d   : > { %1899 = vst [vmem:[%s2969_s5 + $0x3d8] sm:$0xff] %v2690_v4  ;;  %v1388_v5 = vpop.f32.mrf.mxu0 }
 0x20e   : > { %v1644_v6 = vpop.f32.mrf.mxu1  ;;  %2703 = vtanh.f32 %v1388_v5 }
 0x20f   : > { %v2692_v7 = vpop.eup %2691  ;;  %2705 = vtanh.f32 %v1644_v6  ;;  %v1390_v8 = vpop.f32.mrf.mxu0 }
 0x210   : > { %v1646_v9 = vpop.f32.mrf.mxu1  ;;  %v2694_v10 = vpop.eup %2693  ;;  %1836 = vst [vmem:[%s2969_s5 + $0x1e0] sm:$0xff] %v2692_v7 }
 0x211   : > { %1900 = vst [vmem:[%s2969_s5 + $0x3e0] sm:$0xff] %v2694_v10 }
 0x213   : > { %v2696_v11 = vpop.eup %2695 }
 0x214   : > { %v2698_v12 = vpop.eup %2697  ;;  %1837 = vst [vmem:[%s2969_s5 + $0x1e8] sm:$0xff] %v2696_v11 }
 0x215   : > { %1901 = vst [vmem:[%s2969_s5 + $0x3e8] sm:$0xff] %v2698_v12 }
 0x217   : > { %v2700_v13 = vpop.eup %2699 }
 0x218   : > { %v2702_v14 = vpop.eup %2701  ;;  %1838 = vst [vmem:[%s2969_s5 + $0x1f0] sm:$0xff] %v2700_v13 }
 0x219   : > { %1902 = vst [vmem:[%s2969_s5 + $0x3f0] sm:$0xff] %v2702_v14 }
 0x21b   : > { %v2704_v15 = vpop.eup %2703 }
 0x21c   : > { %v2706_v16 = vpop.eup %2705  ;;  %1839 = vst [vmem:[%s2969_s5 + $0x1f8] sm:$0xff] %v2704_v15 }
 0x21d   : > { %1903 = vst [vmem:[%s2969_s5 + $0x3f8] sm:$0xff] %v2706_v16 }
 0x21e PF: > { %s12_s13 = sadd.s32 1, %s2745_s13   ;;  %s3139_s9 = smov %s2737_s11 }
 0x21f   : > { %p9_p7 = scmp.ge.s32.totalorder %s12_s13, 10   ;;  %s3140_s10 = smov %s2741_s12 }
 0x220   : > { %s3141_s11 = smov %s3144_s14  ;;  %s3142_s12 = smov %s3148_s15 }
 0x221   :  { %11 = sbr.rel (!%p9_p7) target bundleno = 3 (0x3), region = 61 }

</bundles_post_ra>
